<compile_context>
chip_gen: v6e
topology: v6e:2x2x1
jax: 0.10.0
libtpu: 0.0.40
codegen_flags: <defaults>
</compile_context>

<pallas_src>
import functools

import jax
import jax.numpy as jnp
from jax import lax
from jax.experimental import pallas as pl
from jax.experimental.pallas import tpu as pltpu

BN_EPS = 1e-5
VMEM_LIMIT_BYTES = 32 * 1024 * 1024
# Set to jnp.bfloat16 on v6e/v7x to hit the fast MXU path (accumulation stays f32 via
# preferred_element_type); f32 default keeps exact parity with the PyTorch reference.
MATMUL_DTYPE = jnp.float32


def _compiler_params(semantics):
    return pltpu.CompilerParams(dimension_semantics=semantics,
                                vmem_limit_bytes=VMEM_LIMIT_BYTES)


def _full_vmem(arr):
    nd = arr.ndim
    return pl.BlockSpec(arr.shape, lambda *_: (0,) * nd)


def _flatten_expert_w(w):
    # (E, KH, KW, Cin, Cout) -> (KH*KW*Cin, E*Cout) matching the im2col patch order.
    E, KH, KW, Cin, Cout = w.shape
    return jnp.transpose(w, (1, 2, 3, 0, 4)).reshape(KH * KW * Cin, E * Cout)


# ----------------------------------------------------------------------------
# Kernel 1: MoE conv stage (grid over batch, "arbitrary" = BN-stat reduction)
# ----------------------------------------------------------------------------
def _moe_conv_stage_kernel(*refs, H, W, Cin, Cout, E, KH, KW, with_ds, mm_dtype):
    if with_ds:
        (xp_ref, w_ref, b_ref, rw_ref, wds_ref,
         y_ref, stat_ref, ds_ref, dstat_ref) = refs
    else:
        xp_ref, w_ref, b_ref, rw_ref, y_ref, stat_ref = refs

    n = pl.program_id(0)
    HW = H * W

    # im2col patches built once (hoisted out of the expert loop): (HW, KH*KW*Cin)
    cols = []
    for kh in range(KH):
        for kw in range(KW):
            cols.append(xp_ref[:, kh:kh + H, kw:kw + W, :].reshape(HW, Cin))
    patches = jnp.concatenate(cols, axis=1)

    # ONE MXU matmul over all experts: (HW, KH*KW*Cin) x (KH*KW*Cin, E*Cout)
    conv = jnp.dot(patches.astype(mm_dtype), w_ref[...].astype(mm_dtype),
                   preferred_element_type=jnp.float32)

    # Expert-weighted sum with router weights (SMEM scalars); bias folded through
    # the same contraction and added once (not per expert over the full tensor).
    acc = jnp.zeros((HW, Cout), jnp.float32)
    bias = jnp.zeros((1, Cout), jnp.float32)
    for e in range(E):
        scale = rw_ref[n, e]
        acc = acc + scale * conv[:, e * Cout:(e + 1) * Cout]
        bias = bias + scale * b_ref[e:e + 1, :]
    acc = acc + bias
    y_ref[...] = acc

    # One-pass BN statistics: rows = [sum; sum-of-squares], accumulated over the grid.
    stat_local = jnp.concatenate(
        [jnp.sum(acc, axis=0, keepdims=True),
         jnp.sum(acc * acc, axis=0, keepdims=True)], axis=0)

    @pl.when(n == 0)
    def _init():
        stat_ref[...] = jnp.zeros_like(stat_ref)

    stat_ref[...] += stat_local

    if with_ds:
        # 1x1 downsample conv reuses the centre im2col column (= unpadded x tile).
        xc = cols[(KH // 2) * KW + (KW // 2)]
        ds = jnp.dot(xc.astype(mm_dtype), wds_ref[...].astype(mm_dtype),
                     preferred_element_type=jnp.float32)
        ds_ref[...] = ds
        dstat_local = jnp.concatenate(
            [jnp.sum(ds, axis=0, keepdims=True),
             jnp.sum(ds * ds, axis=0, keepdims=True)], axis=0)

        @pl.when(n == 0)
        def _init_ds():
            dstat_ref[...] = jnp.zeros_like(dstat_ref)

        dstat_ref[...] += dstat_local


def moe_conv_stage(xp, w_flat, b, rw, wds, *, H, W, Cout, n_experts):
    N = xp.shape[0]
    Cin = xp.shape[-1]
    KH = KW = 3
    HW = H * W
    with_ds = wds is not None

    kernel = functools.partial(
        _moe_conv_stage_kernel, H=H, W=W, Cin=Cin, Cout=Cout, E=n_experts,
        KH=KH, KW=KW, with_ds=with_ds, mm_dtype=MATMUL_DTYPE)

    in_specs = [
        pl.BlockSpec((1, H + 2, W + 2, Cin), lambda nn: (nn, 0, 0, 0)),
        _full_vmem(w_flat),
        _full_vmem(b),
        pl.BlockSpec(memory_space=pltpu.MemorySpace.SMEM),  # router weights -> scalars
    ]
    args = [xp, w_flat, b, rw]
    out_shape = [jax.ShapeDtypeStruct((N * HW, Cout), jnp.float32),
                 jax.ShapeDtypeStruct((2, Cout), jnp.float32)]
    out_specs = [pl.BlockSpec((HW, Cout), lambda nn: (nn, 0)),
                 pl.BlockSpec((2, Cout), lambda nn: (0, 0))]
    flops = 2 * N * HW * (KH * KW * Cin) * (n_experts * Cout) + 4 * N * HW * Cout
    bytes_accessed = 4 * (xp.size + w_flat.size + b.size + rw.size
                          + N * HW * Cout + 2 * Cout)
    if with_ds:
        in_specs.append(_full_vmem(wds))
        args.append(wds)
        out_shape += [jax.ShapeDtypeStruct((N * HW, Cout), jnp.float32),
                      jax.ShapeDtypeStruct((2, Cout), jnp.float32)]
        out_specs += [pl.BlockSpec((HW, Cout), lambda nn: (nn, 0)),
                      pl.BlockSpec((2, Cout), lambda nn: (0, 0))]
        flops += 2 * N * HW * Cin * Cout
        bytes_accessed += 4 * (wds.size + N * HW * Cout + 2 * Cout)

    return pl.pallas_call(
        kernel,
        grid=(N,),
        in_specs=in_specs,
        out_specs=tuple(out_specs),
        out_shape=tuple(out_shape),
        compiler_params=_compiler_params(("arbitrary",)),  # stats = grid reduction
        cost_estimate=pl.CostEstimate(flops=int(flops), transcendentals=0,
                                      bytes_accessed=int(bytes_accessed)),
    )(*args)


# ----------------------------------------------------------------------------
# Kernel 2: BN finalize (+ReLU), and the fused BN2 + residual/downsample-BN + ReLU
# ----------------------------------------------------------------------------
def _bn_scale_shift(stat, gamma, beta, count):
    mean = stat[0:1, :] * (1.0 / count)
    var = jnp.maximum(stat[1:2, :] * (1.0 / count) - mean * mean, 0.0)
    scale = gamma * lax.rsqrt(var + BN_EPS)
    shift = beta - mean * scale
    return scale, shift


def _bn_act_kernel(y_ref, s_ref, g_ref, b_ref, o_ref, *, count, relu):
    scale, shift = _bn_scale_shift(s_ref[...], g_ref[...], b_ref[...], count)
    y = y_ref[...] * scale + shift
    if relu:
        y = jnp.maximum(y, 0.0)
    o_ref[...] = y


def bn_act(y_pre, stats, gamma, beta, *, count, relu, tile_rows):
    total, Cout = y_pre.shape
    n_tiles = total // tile_rows
    kernel = functools.partial(_bn_act_kernel, count=count, relu=relu)
    return pl.pallas_call(
        kernel,
        grid=(n_tiles,),
        in_specs=[pl.BlockSpec((tile_rows, Cout), lambda i: (i, 0)),
                  _full_vmem(stats), _full_vmem(gamma), _full_vmem(beta)],
        out_specs=pl.BlockSpec((tile_rows, Cout), lambda i: (i, 0)),
        out_shape=jax.ShapeDtypeStruct((total, Cout), jnp.float32),
        compiler_params=_compiler_params(("parallel",)),
        cost_estimate=pl.CostEstimate(flops=int(3 * total * Cout),
                                      transcendentals=int(Cout),
                                      bytes_accessed=int(8 * total * Cout)),
    )(y_pre, stats, gamma, beta)


def _bn_add_act_kernel(*refs, count, with_ds_bn):
    if with_ds_bn:
        y_ref, s_ref, g_ref, b_ref, r_ref, rs_ref, rg_ref, rb_ref, o_ref = refs
    else:
        y_ref, s_ref, g_ref, b_ref, r_ref, o_ref = refs
    scale, shift = _bn_scale_shift(s_ref[...], g_ref[...], b_ref[...], count)
    out = y_ref[...] * scale + shift
    if with_ds_bn:
        rscale, rshift = _bn_scale_shift(rs_ref[...], rg_ref[...], rb_ref[...], count)
        out = out + (r_ref[...] * rscale + rshift)
    else:
        out = out + r_ref[...]
    o_ref[...] = jnp.maximum(out, 0.0)


def bn_add_act(y_pre, stats, gamma, beta, residual, res_stats, res_gamma, res_beta,
               *, count, tile_rows):
    total, Cout = y_pre.shape
    n_tiles = total // tile_rows
    with_ds_bn = res_stats is not None
    kernel = functools.partial(_bn_add_act_kernel, count=count, with_ds_bn=with_ds_bn)
    in_specs = [pl.BlockSpec((tile_rows, Cout), lambda i: (i, 0)),
                _full_vmem(stats), _full_vmem(gamma), _full_vmem(beta),
                pl.BlockSpec((tile_rows, residual.shape[1]), lambda i: (i, 0))]
    args = [y_pre, stats, gamma, beta, residual]
    if with_ds_bn:
        in_specs += [_full_vmem(res_stats), _full_vmem(res_gamma), _full_vmem(res_beta)]
        args += [res_stats, res_gamma, res_beta]
    return pl.pallas_call(
        kernel,
        grid=(n_tiles,),
        in_specs=in_specs,
        out_specs=pl.BlockSpec((tile_rows, Cout), lambda i: (i, 0)),
        out_shape=jax.ShapeDtypeStruct((total, Cout), jnp.float32),
        compiler_params=_compiler_params(("parallel",)),
        cost_estimate=pl.CostEstimate(flops=int(6 * total * Cout),
                                      transcendentals=int(2 * Cout),
                                      bytes_accessed=int(12 * total * Cout)),
    )(*args)


# ----------------------------------------------------------------------------
# Tiny glue (plain XLA): router MLP, alpha_k balancing, mutual-information loss
# ----------------------------------------------------------------------------
def mutual_info_loss(scores, sa, n_experts):
    bsz = scores.shape[0]
    onehot = (sa[:, None] == jnp.arange(n_experts, dtype=sa.dtype)[None, :])
    onehot = onehot.astype(jnp.float32)
    joint = jnp.dot(onehot.T, scores) / bsz
    p_c = jnp.sum(joint, axis=1, keepdims=True)
    p_e = jnp.sum(joint, axis=0, keepdims=True)
    eps = 1e-10
    mi = jnp.sum(joint * jnp.log((joint + eps) / (p_c * p_e + eps)))
    return -mi


def _route(feat_mean, sa, p, n_experts):
    # router_train: Linear -> ReLU -> Linear -> Softmax; (N, C+1) x (C+1, 128) is far
    # too small for a Pallas kernel to pay off -> plain XLA.
    router_in = jnp.concatenate([feat_mean, sa[:, None]], axis=1)
    h = jnp.maximum(router_in @ p['router_w1'] + p['router_b1'], 0.0)
    scores = jax.nn.softmax(h @ p['router_w2'] + p['router_b2'], axis=1)
    counts = jnp.sum(
        (sa[:, None] == jnp.arange(n_experts, dtype=sa.dtype)[None, :]).astype(jnp.float32),
        axis=0)
    alpha = 1.0 / (counts + 1e-6)                               # alpha_k
    balanced = scores * alpha[None, :]
    rweights = balanced / (jnp.sum(balanced, axis=1, keepdims=True) + 1e-6)
    mi = mutual_info_loss(rweights, sa, n_experts)
    return rweights, mi


# ----------------------------------------------------------------------------
# Full block forward (NCHW in / NCHW out; kernels compute on flat NHWC views)
# ----------------------------------------------------------------------------
def moe_residual_block_forward(x_nchw, sa, params, *, n_experts=2):
    x = jnp.transpose(x_nchw, (0, 2, 3, 1)).astype(jnp.float32)   # NHWC
    N, H, W, Cin = x.shape
    Cout = params['conv1']['w'].shape[-1]
    HW = H * W
    count = float(N * HW)
    with_ds = (Cin != Cout)   # stride == 1 here

    # --- MoEConv1 (+ fused 1x1 downsample conv) + BN1 stats -> BN1 + ReLU ---
    rw1, mi1 = _route(jnp.mean(x, axis=(1, 2)), sa, params['conv1'], n_experts)
    w1_flat = _flatten_expert_w(params['conv1']['w'])
    xp = jnp.pad(x, ((0, 0), (1, 1), (1, 1), (0, 0)))
    if with_ds:
        y1_pre, s1, ds_pre, sds = moe_conv_stage(
            xp, w1_flat, params['conv1']['b'], rw1, params['ds']['w'],
            H=H, W=W, Cout=Cout, n_experts=n_experts)
    else:
        y1_pre, s1 = moe_conv_stage(
            xp, w1_flat, params['conv1']['b'], rw1, None,
            H=H, W=W, Cout=Cout, n_experts=n_experts)
        ds_pre = sds = None
    h1 = bn_act(y1_pre, s1, params['bn1']['gamma'], params['bn1']['beta'],
                count=count, relu=True, tile_rows=HW)

    # --- MoEConv2 + BN2 stats ---
    h1_img = h1.reshape(N, H, W, Cout)
    rw2, mi2 = _route(jnp.mean(h1_img, axis=(1, 2)), sa, params['conv2'], n_experts)
    w2_flat = _flatten_expert_w(params['conv2']['w'])
    hp = jnp.pad(h1_img, ((0, 0), (1, 1), (1, 1), (0, 0)))
    y2_pre, s2 = moe_conv_stage(hp, w2_flat, params['conv2']['b'], rw2, None,
                                H=H, W=W, Cout=Cout, n_experts=n_experts)

    # --- fused: BN2 + (downsample BN | identity) residual add + ReLU ---
    if with_ds:
        out = bn_add_act(y2_pre, s2, params['bn2']['gamma'], params['bn2']['beta'],
                         ds_pre, sds, params['ds']['gamma'], params['ds']['beta'],
                         count=count, tile_rows=HW)
    else:
        out = bn_add_act(y2_pre, s2, params['bn2']['gamma'], params['bn2']['beta'],
                         x.reshape(N * HW, Cin), None, None, None,
                         count=count, tile_rows=HW)

    out_nchw = jnp.transpose(out.reshape(N, H, W, Cout), (0, 3, 1, 2))
    return out_nchw, mi1 + mi2, [rw1, rw2]


# ----------------------------------------------------------------------------
# Deterministic synthetic parameters (not a checkpoint load)
# ----------------------------------------------------------------------------
def init_params(key, cin, cout, n_experts=2, hidden=128):
    def nrm(k, shape, scale=0.1):
        return jax.random.normal(k, shape, jnp.float32) * scale

    def moe_conv_params(k, c_in, c_out):
        k0, k1, k2, k3 = jax.random.split(k, 4)
        return {
            'w': nrm(k0, (n_experts, 3, 3, c_in, c_out)),       # per-expert HWIO
            'b': nrm(k1, (n_experts, c_out)),
            'router_w1': nrm(k2, (c_in + 1, hidden)),
            'router_b1': jnp.zeros((1, hidden), jnp.float32),
            'router_w2': nrm(k3, (hidden, n_experts)),
            'router_b2': jnp.zeros((1, n_experts), jnp.float32),
        }

    ks = jax.random.split(key, 3)
    bn = lambda c: {'gamma': jnp.ones((1, c), jnp.float32),
                    'beta': jnp.zeros((1, c), jnp.float32)}
    return {
        'conv1': moe_conv_params(ks[0], cin, cout),
        'bn1': bn(cout),
        'conv2': moe_conv_params(ks[1], cout, cout),
        'bn2': bn(cout),
        'ds': {'w': nrm(ks[2], (cin, cout)), **bn(cout)},
    }


if __name__ == "__main__":
    key = jax.random.PRNGKey(0)
    kx, kp = jax.random.split(key, 2)

    N, Cin, Cout, H, W = 2, 4, 8, 16, 16
    x = jax.random.normal(kx, (N, Cin, H, W), jnp.float32)        # NCHW like PyTorch
    sensitive_attribute = jnp.array([0.0, 1.0], jnp.float32)      # one sample per group
    params = init_params(kp, Cin, Cout, n_experts=2)

    fwd = jax.jit(functools.partial(moe_residual_block_forward, n_experts=2))
    out, mi_loss, router_scores = fwd(x, sensitive_attribute, params)
    jax.block_until_ready((out, mi_loss, router_scores))

    assert out.shape == (N, Cout, H, W)
    assert router_scores[0].shape == (N, 2) and router_scores[1].shape == (N, 2)
    print("KERNEL_OK")
</pallas_src>

<mosaic_0001>
module attributes {stable_mosaic.version = 11 : i64} {
  func.func @_bn_act_kernel(%arg0: i32, %arg1: memref<256x8xf32, #tpu.memory_space<vmem>>, %arg2: memref<2x8xf32, #tpu.memory_space<vmem>>, %arg3: memref<1x8xf32, #tpu.memory_space<vmem>>, %arg4: memref<1x8xf32, #tpu.memory_space<vmem>>, %arg5: memref<256x8xf32, #tpu.memory_space<vmem>>) attributes {dimension_semantics = [#tpu.dimension_semantics<parallel>], iteration_bounds = array<i64: 2>, scalar_prefetch = 0 : i64, scratch_operands = 0 : i64, tpu.core_type = #tpu.core_type<tc>, window_params = [{transform_indices = @transform_0, window_bounds = array<i64: 256, 8>}, {pipeline_mode = #tpu.pipeline_mode<synchronous>, transform_indices = @transform_1, window_bounds = array<i64: 2, 8>}, {pipeline_mode = #tpu.pipeline_mode<synchronous>, transform_indices = @transform_2, window_bounds = array<i64: 1, 8>}, {pipeline_mode = #tpu.pipeline_mode<synchronous>, transform_indices = @transform_3, window_bounds = array<i64: 1, 8>}, {transform_indices = @transform_4, window_bounds = array<i64: 256, 8>}]} {
    %c0 = arith.constant 0 : index
    %c0_0 = arith.constant 0 : index
    %0 = vector.load %arg2[%c0, %c0_0] : memref<2x8xf32, #tpu.memory_space<vmem>>, vector<2x8xf32>
    %c0_1 = arith.constant 0 : index
    %c0_2 = arith.constant 0 : index
    %1 = vector.load %arg3[%c0_1, %c0_2] : memref<1x8xf32, #tpu.memory_space<vmem>>, vector<1x8xf32>
    %c0_3 = arith.constant 0 : index
    %c0_4 = arith.constant 0 : index
    %2 = vector.load %arg4[%c0_3, %c0_4] : memref<1x8xf32, #tpu.memory_space<vmem>>, vector<1x8xf32>
    %3 = vector.extract_strided_slice %0 {offsets = [0, 0], sizes = [1, 8], strides = [1, 1]} : vector<2x8xf32> to vector<1x8xf32>
    %cst = arith.constant 0.001953125 : f32
    %4 = vector.broadcast %cst : f32 to vector<1x8xf32>
    %5 = arith.mulf %3, %4 : vector<1x8xf32>
    %6 = vector.extract_strided_slice %0 {offsets = [1, 0], sizes = [1, 8], strides = [1, 1]} : vector<2x8xf32> to vector<1x8xf32>
    %cst_5 = arith.constant 0.001953125 : f32
    %7 = vector.broadcast %cst_5 : f32 to vector<1x8xf32>
    %8 = arith.mulf %6, %7 : vector<1x8xf32>
    %9 = arith.mulf %5, %5 : vector<1x8xf32>
    %10 = arith.subf %8, %9 : vector<1x8xf32>
    %cst_6 = arith.constant 0.000000e+00 : f32
    %11 = vector.broadcast %cst_6 : f32 to vector<1x8xf32>
    %12 = arith.maximumf %10, %11 : vector<1x8xf32>
    %cst_7 = arith.constant 9.99999974E-6 : f32
    %13 = vector.broadcast %cst_7 : f32 to vector<1x8xf32>
    %14 = arith.addf %12, %13 : vector<1x8xf32>
    %15 = math.rsqrt %14 : vector<1x8xf32>
    %16 = arith.mulf %1, %15 : vector<1x8xf32>
    %17 = arith.mulf %5, %16 : vector<1x8xf32>
    %18 = arith.subf %2, %17 : vector<1x8xf32>
    %c0_8 = arith.constant 0 : index
    %c0_9 = arith.constant 0 : index
    %19 = vector.load %arg1[%c0_8, %c0_9] : memref<256x8xf32, #tpu.memory_space<vmem>>, vector<256x8xf32>
    %20 = vector.broadcast %16 : vector<1x8xf32> to vector<256x8xf32>
    %21 = arith.mulf %19, %20 : vector<256x8xf32>
    %22 = vector.broadcast %18 : vector<1x8xf32> to vector<256x8xf32>
    %23 = arith.addf %21, %22 : vector<256x8xf32>
    %cst_10 = arith.constant 0.000000e+00 : f32
    %24 = vector.broadcast %cst_10 : f32 to vector<256x8xf32>
    %25 = arith.maximumf %23, %24 : vector<256x8xf32>
    %c0_11 = arith.constant 0 : index
    %c0_12 = arith.constant 0 : index
    %26 = vector.load %arg5[%c0_11, %c0_12] : memref<256x8xf32, #tpu.memory_space<vmem>>, vector<256x8xf32>
    tpu.vector_store %arg5[%c0_11, %c0_12], %25 {strides = array<i32>} : memref<256x8xf32, #tpu.memory_space<vmem>>, vector<256x8xf32>,
    return
  }
  func.func @transform_0(%arg0: i32) -> (i32, i32) {
    %c0_i32 = arith.constant 0 : i32
    %c0_i32_0 = arith.constant 0 : i32
    return %arg0, %c0_i32 : i32, i32
  }
  func.func @transform_1(%arg0: i32) -> (i32, i32) {
    %c0_i32 = arith.constant 0 : i32
    %c0_i32_0 = arith.constant 0 : i32
    %c0_i32_1 = arith.constant 0 : i32
    return %c0_i32, %c0_i32_0 : i32, i32
  }
  func.func @transform_2(%arg0: i32) -> (i32, i32) {
    %c0_i32 = arith.constant 0 : i32
    %c0_i32_0 = arith.constant 0 : i32
    %c0_i32_1 = arith.constant 0 : i32
    return %c0_i32, %c0_i32_0 : i32, i32
  }
  func.func @transform_3(%arg0: i32) -> (i32, i32) {
    %c0_i32 = arith.constant 0 : i32
    %c0_i32_0 = arith.constant 0 : i32
    %c0_i32_1 = arith.constant 0 : i32
    return %c0_i32, %c0_i32_0 : i32, i32
  }
  func.func @transform_4(%arg0: i32) -> (i32, i32) {
    %c0_i32 = arith.constant 0 : i32
    %c0_i32_0 = arith.constant 0 : i32
    return %arg0, %c0_i32 : i32, i32
  }
}

module attributes {stable_mosaic.version = 11 : i64} {
  func.func @_moe_conv_stage_kernel(%arg0: i32, %arg1: memref<1x18x18x4xf32, #tpu.memory_space<vmem>>, %arg2: memref<36x16xf32, #tpu.memory_space<vmem>>, %arg3: memref<2x8xf32, #tpu.memory_space<vmem>>, %arg4: memref<2x2xf32, #tpu.memory_space<smem>>, %arg5: memref<4x8xf32, #tpu.memory_space<vmem>>, %arg6: memref<256x8xf32, #tpu.memory_space<vmem>>, %arg7: memref<2x8xf32, #tpu.memory_space<vmem>>, %arg8: memref<256x8xf32, #tpu.memory_space<vmem>>, %arg9: memref<2x8xf32, #tpu.memory_space<vmem>>) attributes {dimension_semantics = [#tpu.dimension_semantics<arbitrary>], iteration_bounds = array<i64: 2>, scalar_prefetch = 0 : i64, scratch_operands = 0 : i64, tpu.core_type = #tpu.core_type<tc>, window_params = [{transform_indices = @transform_0, window_bounds = array<i64: 1, 18, 18, 4>}, {pipeline_mode = #tpu.pipeline_mode<synchronous>, transform_indices = @transform_1, window_bounds = array<i64: 36, 16>}, {pipeline_mode = #tpu.pipeline_mode<synchronous>, transform_indices = @transform_2, window_bounds = array<i64: 2, 8>}, {transform_indices = @transform_3, window_bounds = array<i64: 2, 2>}, {pipeline_mode = #tpu.pipeline_mode<synchronous>, transform_indices = @transform_4, window_bounds = array<i64: 4, 8>}, {transform_indices = @transform_5, window_bounds = array<i64: 256, 8>}, {pipeline_mode = #tpu.pipeline_mode<synchronous>, transform_indices = @transform_6, window_bounds = array<i64: 2, 8>}, {transform_indices = @transform_7, window_bounds = array<i64: 256, 8>}, {pipeline_mode = #tpu.pipeline_mode<synchronous>, transform_indices = @transform_8, window_bounds = array<i64: 2, 8>}]} {
    %c0 = arith.constant 0 : index
    %c0_0 = arith.constant 0 : index
    %c0_1 = arith.constant 0 : index
    %c0_2 = arith.constant 0 : index
    %0 = vector.load %arg1[%c0, %c0_0, %c0_1, %c0_2] : memref<1x18x18x4xf32, #tpu.memory_space<vmem>>, vector<1x16x16x4xf32>
    %1 = vector.shape_cast %0 : vector<1x16x16x4xf32> to vector<256x4xf32>
    %c0_3 = arith.constant 0 : index
    %c0_4 = arith.constant 0 : index
    %c1 = arith.constant 1 : index
    %c0_5 = arith.constant 0 : index
    %2 = vector.load %arg1[%c0_3, %c0_4, %c1, %c0_5] : memref<1x18x18x4xf32, #tpu.memory_space<vmem>>, vector<1x16x16x4xf32>
    %3 = vector.shape_cast %2 : vector<1x16x16x4xf32> to vector<256x4xf32>
    %c0_6 = arith.constant 0 : index
    %c0_7 = arith.constant 0 : index
    %c2 = arith.constant 2 : index
    %c0_8 = arith.constant 0 : index
    %4 = vector.load %arg1[%c0_6, %c0_7, %c2, %c0_8] : memref<1x18x18x4xf32, #tpu.memory_space<vmem>>, vector<1x16x16x4xf32>
    %5 = vector.shape_cast %4 : vector<1x16x16x4xf32> to vector<256x4xf32>
    %c0_9 = arith.constant 0 : index
    %c1_10 = arith.constant 1 : index
    %c0_11 = arith.constant 0 : index
    %c0_12 = arith.constant 0 : index
    %6 = vector.load %arg1[%c0_9, %c1_10, %c0_11, %c0_12] : memref<1x18x18x4xf32, #tpu.memory_space<vmem>>, vector<1x16x16x4xf32>
    %7 = vector.shape_cast %6 : vector<1x16x16x4xf32> to vector<256x4xf32>
    %c0_13 = arith.constant 0 : index
    %c1_14 = arith.constant 1 : index
    %c1_15 = arith.constant 1 : index
    %c0_16 = arith.constant 0 : index
    %8 = vector.load %arg1[%c0_13, %c1_14, %c1_15, %c0_16] : memref<1x18x18x4xf32, #tpu.memory_space<vmem>>, vector<1x16x16x4xf32>
    %9 = vector.shape_cast %8 : vector<1x16x16x4xf32> to vector<256x4xf32>
    %c0_17 = arith.constant 0 : index
    %c1_18 = arith.constant 1 : index
    %c2_19 = arith.constant 2 : index
    %c0_20 = arith.constant 0 : index
    %10 = vector.load %arg1[%c0_17, %c1_18, %c2_19, %c0_20] : memref<1x18x18x4xf32, #tpu.memory_space<vmem>>, vector<1x16x16x4xf32>
    %11 = vector.shape_cast %10 : vector<1x16x16x4xf32> to vector<256x4xf32>
    %c0_21 = arith.constant 0 : index
    %c2_22 = arith.constant 2 : index
    %c0_23 = arith.constant 0 : index
    %c0_24 = arith.constant 0 : index
    %12 = vector.load %arg1[%c0_21, %c2_22, %c0_23, %c0_24] : memref<1x18x18x4xf32, #tpu.memory_space<vmem>>, vector<1x16x16x4xf32>
    %13 = vector.shape_cast %12 : vector<1x16x16x4xf32> to vector<256x4xf32>
    %c0_25 = arith.constant 0 : index
    %c2_26 = arith.constant 2 : index
    %c1_27 = arith.constant 1 : index
    %c0_28 = arith.constant 0 : index
    %14 = vector.load %arg1[%c0_25, %c2_26, %c1_27, %c0_28] : memref<1x18x18x4xf32, #tpu.memory_space<vmem>>, vector<1x16x16x4xf32>
    %15 = vector.shape_cast %14 : vector<1x16x16x4xf32> to vector<256x4xf32>
    %c0_29 = arith.constant 0 : index
    %c2_30 = arith.constant 2 : index
    %c2_31 = arith.constant 2 : index
    %c0_32 = arith.constant 0 : index
    %16 = vector.load %arg1[%c0_29, %c2_30, %c2_31, %c0_32] : memref<1x18x18x4xf32, #tpu.memory_space<vmem>>, vector<1x16x16x4xf32>
    %17 = vector.shape_cast %16 : vector<1x16x16x4xf32> to vector<256x4xf32>
    %18 = tpu.concatenate %1, %3, %5, %7, %9, %11, %13, %15, %17 in 1 : vector<256x4xf32>, vector<256x4xf32>, vector<256x4xf32>, vector<256x4xf32>, vector<256x4xf32>, vector<256x4xf32>, vector<256x4xf32>, vector<256x4xf32>, vector<256x4xf32> -> vector<256x36xf32>
    %c0_33 = arith.constant 0 : index
    %c0_34 = arith.constant 0 : index
    %19 = vector.load %arg2[%c0_33, %c0_34] : memref<36x16xf32, #tpu.memory_space<vmem>>, vector<36x16xf32>
    %cst = arith.constant dense<0.000000e+00> : vector<256x16xf32>
    %20 = tpu.matmul %18, %19, %cst {dimension_numbers = #tpu.dot_dimension_numbers<[1], [0], [0], [1], [0, 0, 1, 1], [], []>} : vector<256x36xf32>, vector<36x16xf32>, vector<256x16xf32> -> vector<256x16xf32>
    %cst_35 = arith.constant 0.000000e+00 : f32
    %21 = vector.broadcast %cst_35 : f32 to vector<256x8xf32>
    %cst_36 = arith.constant 0.000000e+00 : f32
    %22 = vector.broadcast %cst_36 : f32 to vector<1x8xf32>
    %23 = arith.index_cast %arg0 : i32 to index
    %c0_37 = arith.constant 0 : index
    %24 = memref.load %arg4[%23, %c0_37] : memref<2x2xf32, #tpu.memory_space<smem>>
    %25 = vector.extract_strided_slice %20 {offsets = [0, 0], sizes = [256, 8], strides = [1, 1]} : vector<256x16xf32> to vector<256x8xf32>
    %26 = vector.broadcast %24 : f32 to vector<256x8xf32>
    %27 = arith.mulf %26, %25 : vector<256x8xf32>
    %28 = arith.addf %21, %27 : vector<256x8xf32>
    %c0_38 = arith.constant 0 : index
    %c0_39 = arith.constant 0 : index
    %29 = vector.load %arg3[%c0_38, %c0_39] : memref<2x8xf32, #tpu.memory_space<vmem>>, vector<1x8xf32>
    %30 = vector.broadcast %24 : f32 to vector<1x8xf32>
    %31 = arith.mulf %30, %29 : vector<1x8xf32>
    %32 = arith.addf %22, %31 : vector<1x8xf32>
    %33 = arith.index_cast %arg0 : i32 to index
    %c1_40 = arith.constant 1 : index
    %34 = memref.load %arg4[%33, %c1_40] : memref<2x2xf32, #tpu.memory_space<smem>>
    %35 = vector.extract_strided_slice %20 {offsets = [0, 8], sizes = [256, 8], strides = [1, 1]} : vector<256x16xf32> to vector<256x8xf32>
    %36 = vector.broadcast %34 : f32 to vector<256x8xf32>
    %37 = arith.mulf %36, %35 : vector<256x8xf32>
    %38 = arith.addf %28, %37 : vector<256x8xf32>
    %c1_41 = arith.constant 1 : index
    %c0_42 = arith.constant 0 : index
    %39 = vector.load %arg3[%c1_41, %c0_42] : memref<2x8xf32, #tpu.memory_space<vmem>>, vector<1x8xf32>
    %40 = vector.broadcast %34 : f32 to vector<1x8xf32>
    %41 = arith.mulf %40, %39 : vector<1x8xf32>
    %42 = arith.addf %32, %41 : vector<1x8xf32>
    %43 = vector.broadcast %42 : vector<1x8xf32> to vector<256x8xf32>
    %44 = arith.addf %38, %43 : vector<256x8xf32>
    %c0_43 = arith.constant 0 : index
    %c0_44 = arith.constant 0 : index
    %45 = vector.load %arg6[%c0_43, %c0_44] : memref<256x8xf32, #tpu.memory_space<vmem>>, vector<256x8xf32>
    tpu.vector_store %arg6[%c0_43, %c0_44], %44 {strides = array<i32>} : memref<256x8xf32, #tpu.memory_space<vmem>>, vector<256x8xf32>,
    %cst_45 = arith.constant dense<0.000000e+00> : vector<8xf32>
    %46 = vector.multi_reduction <add>, %44, %cst_45 [0] : vector<256x8xf32> to vector<8xf32>
    %47 = vector.shape_cast %46 : vector<8xf32> to vector<1x8xf32>
    %48 = arith.mulf %44, %44 : vector<256x8xf32>
    %cst_46 = arith.constant dense<0.000000e+00> : vector<8xf32>
    %49 = vector.multi_reduction <add>, %48, %cst_46 [0] : vector<256x8xf32> to vector<8xf32>
    %50 = vector.shape_cast %49 : vector<8xf32> to vector<1x8xf32>
    %51 = tpu.concatenate %47, %50 in 0 : vector<1x8xf32>, vector<1x8xf32> -> vector<2x8xf32>
    %c0_i32 = arith.constant 0 : i32
    %52 = arith.cmpi eq, %arg0, %c0_i32 : i32
    %53 = arith.extui %52 : i1 to i32
    %c0_i32_47 = arith.constant 0 : i32
    %54 = arith.cmpi ne, %53, %c0_i32_47 : i32
    scf.if %54 {
      %cst_65 = arith.constant 0.000000e+00 : f32
      %73 = vector.broadcast %cst_65 : f32 to vector<2x8xf32>
      %c0_66 = arith.constant 0 : index
      %c0_67 = arith.constant 0 : index
      %74 = vector.load %arg7[%c0_66, %c0_67] : memref<2x8xf32, #tpu.memory_space<vmem>>, vector<2x8xf32>
      tpu.vector_store %arg7[%c0_66, %c0_67], %73 {strides = array<i32>} : memref<2x8xf32, #tpu.memory_space<vmem>>, vector<2x8xf32>,
    } else {
    }
    %c0_48 = arith.constant 0 : index
    %c0_49 = arith.constant 0 : index
    %55 = vector.load %arg7[%c0_48, %c0_49] : memref<2x8xf32, #tpu.memory_space<vmem>>, vector<2x8xf32>
    %56 = arith.addf %55, %51 : vector<2x8xf32>
    %c0_50 = arith.constant 0 : index
    %c0_51 = arith.constant 0 : index
    %57 = vector.load %arg7[%c0_50, %c0_51] : memref<2x8xf32, #tpu.memory_space<vmem>>, vector<2x8xf32>
    tpu.vector_store %arg7[%c0_50, %c0_51], %56 {strides = array<i32>} : memref<2x8xf32, #tpu.memory_space<vmem>>, vector<2x8xf32>,
    %c0_52 = arith.constant 0 : index
    %c0_53 = arith.constant 0 : index
    %58 = vector.load %arg5[%c0_52, %c0_53] : memref<4x8xf32, #tpu.memory_space<vmem>>, vector<4x8xf32>
    %cst_54 = arith.constant dense<0.000000e+00> : vector<256x8xf32>
    %59 = tpu.matmul %9, %58, %cst_54 {dimension_numbers = #tpu.dot_dimension_numbers<[1], [0], [0], [1], [0, 0, 1, 1], [], []>} : vector<256x4xf32>, vector<4x8xf32>, vector<256x8xf32> -> vector<256x8xf32>
    %c0_55 = arith.constant 0 : index
    %c0_56 = arith.constant 0 : index
    %60 = vector.load %arg8[%c0_55, %c0_56] : memref<256x8xf32, #tpu.memory_space<vmem>>, vector<256x8xf32>
    tpu.vector_store %arg8[%c0_55, %c0_56], %59 {strides = array<i32>} : memref<256x8xf32, #tpu.memory_space<vmem>>, vector<256x8xf32>,
    %cst_57 = arith.constant dense<0.000000e+00> : vector<8xf32>
    %61 = vector.multi_reduction <add>, %59, %cst_57 [0] : vector<256x8xf32> to vector<8xf32>
    %62 = vector.shape_cast %61 : vector<8xf32> to vector<1x8xf32>
    %63 = arith.mulf %59, %59 : vector<256x8xf32>
    %cst_58 = arith.constant dense<0.000000e+00> : vector<8xf32>
    %64 = vector.multi_reduction <add>, %63, %cst_58 [0] : vector<256x8xf32> to vector<8xf32>
    %65 = vector.shape_cast %64 : vector<8xf32> to vector<1x8xf32>
    %66 = tpu.concatenate %62, %65 in 0 : vector<1x8xf32>, vector<1x8xf32> -> vector<2x8xf32>
    %c0_i32_59 = arith.constant 0 : i32
    %67 = arith.cmpi eq, %arg0, %c0_i32_59 : i32
    %68 = arith.extui %67 : i1 to i32
    %c0_i32_60 = arith.constant 0 : i32
    %69 = arith.cmpi ne, %68, %c0_i32_60 : i32
    scf.if %69 {
      %cst_65 = arith.constant 0.000000e+00 : f32
      %73 = vector.broadcast %cst_65 : f32 to vector<2x8xf32>
      %c0_66 = arith.constant 0 : index
      %c0_67 = arith.constant 0 : index
      %74 = vector.load %arg9[%c0_66, %c0_67] : memref<2x8xf32, #tpu.memory_space<vmem>>, vector<2x8xf32>
      tpu.vector_store %arg9[%c0_66, %c0_67], %73 {strides = array<i32>} : memref<2x8xf32, #tpu.memory_space<vmem>>, vector<2x8xf32>,
    } else {
    }
    %c0_61 = arith.constant 0 : index
    %c0_62 = arith.constant 0 : index
    %70 = vector.load %arg9[%c0_61, %c0_62] : memref<2x8xf32, #tpu.memory_space<vmem>>, vector<2x8xf32>
    %71 = arith.addf %70, %66 : vector<2x8xf32>
    %c0_63 = arith.constant 0 : index
    %c0_64 = arith.constant 0 : index
    %72 = vector.load %arg9[%c0_63, %c0_64] : memref<2x8xf32, #tpu.memory_space<vmem>>, vector<2x8xf32>
    tpu.vector_store %arg9[%c0_63, %c0_64], %71 {strides = array<i32>} : memref<2x8xf32, #tpu.memory_space<vmem>>, vector<2x8xf32>,
    return
  }
  func.func @transform_0(%arg0: i32) -> (i32, i32, i32, i32) {
    %c0_i32 = arith.constant 0 : i32
    %c0_i32_0 = arith.constant 0 : i32
    %c0_i32_1 = arith.constant 0 : i32
    %c0_i32_2 = arith.constant 0 : i32
    return %arg0, %c0_i32, %c0_i32_0, %c0_i32_1 : i32, i32, i32, i32
  }
  func.func @transform_1(%arg0: i32) -> (i32, i32) {
    %c0_i32 = arith.constant 0 : i32
    %c0_i32_0 = arith.constant 0 : i32
    %c0_i32_1 = arith.constant 0 : i32
    return %c0_i32, %c0_i32_0 : i32, i32
  }
  func.func @transform_2(%arg0: i32) -> (i32, i32) {
    %c0_i32 = arith.constant 0 : i32
    %c0_i32_0 = arith.constant 0 : i32
    %c0_i32_1 = arith.constant 0 : i32
    return %c0_i32, %c0_i32_0 : i32, i32
  }
  func.func @transform_3(%arg0: i32) -> (i32, i32) {
    %c0_i32 = arith.constant 0 : i32
    %c0_i32_0 = arith.constant 0 : i32
    %c0_i32_1 = arith.constant 0 : i32
    return %c0_i32, %c0_i32_0 : i32, i32
  }
  func.func @transform_4(%arg0: i32) -> (i32, i32) {
    %c0_i32 = arith.constant 0 : i32
    %c0_i32_0 = arith.constant 0 : i32
    %c0_i32_1 = arith.constant 0 : i32
    return %c0_i32, %c0_i32_0 : i32, i32
  }
  func.func @transform_5(%arg0: i32) -> (i32, i32) {
    %c0_i32 = arith.constant 0 : i32
    %c0_i32_0 = arith.constant 0 : i32
    return %arg0, %c0_i32 : i32, i32
  }
  func.func @transform_6(%arg0: i32) -> (i32, i32) {
    %c0_i32 = arith.constant 0 : i32
    %c0_i32_0 = arith.constant 0 : i32
    %c0_i32_1 = arith.constant 0 : i32
    return %c0_i32, %c0_i32_0 : i32, i32
  }
  func.func @transform_7(%arg0: i32) -> (i32, i32) {
    %c0_i32 = arith.constant 0 : i32
    %c0_i32_0 = arith.constant 0 : i32
    return %arg0, %c0_i32 : i32, i32
  }
  func.func @transform_8(%arg0: i32) -> (i32, i32) {
    %c0_i32 = arith.constant 0 : i32
    %c0_i32_0 = arith.constant 0 : i32
    %c0_i32_1 = arith.constant 0 : i32
    return %c0_i32, %c0_i32_0 : i32, i32
  }
}

module attributes {stable_mosaic.version = 11 : i64} {
  func.func @_moe_conv_stage_kernel(%arg0: i32, %arg1: memref<1x18x18x8xf32, #tpu.memory_space<vmem>>, %arg2: memref<72x16xf32, #tpu.memory_space<vmem>>, %arg3: memref<2x8xf32, #tpu.memory_space<vmem>>, %arg4: memref<2x2xf32, #tpu.memory_space<smem>>, %arg5: memref<256x8xf32, #tpu.memory_space<vmem>>, %arg6: memref<2x8xf32, #tpu.memory_space<vmem>>) attributes {dimension_semantics = [#tpu.dimension_semantics<arbitrary>], iteration_bounds = array<i64: 2>, scalar_prefetch = 0 : i64, scratch_operands = 0 : i64, tpu.core_type = #tpu.core_type<tc>, window_params = [{transform_indices = @transform_0, window_bounds = array<i64: 1, 18, 18, 8>}, {pipeline_mode = #tpu.pipeline_mode<synchronous>, transform_indices = @transform_1, window_bounds = array<i64: 72, 16>}, {pipeline_mode = #tpu.pipeline_mode<synchronous>, transform_indices = @transform_2, window_bounds = array<i64: 2, 8>}, {transform_indices = @transform_3, window_bounds = array<i64: 2, 2>}, {transform_indices = @transform_4, window_bounds = array<i64: 256, 8>}, {pipeline_mode = #tpu.pipeline_mode<synchronous>, transform_indices = @transform_5, window_bounds = array<i64: 2, 8>}]} {
    %c0 = arith.constant 0 : index
    %c0_0 = arith.constant 0 : index
    %c0_1 = arith.constant 0 : index
    %c0_2 = arith.constant 0 : index
    %0 = vector.load %arg1[%c0, %c0_0, %c0_1, %c0_2] : memref<1x18x18x8xf32, #tpu.memory_space<vmem>>, vector<1x16x16x8xf32>
    %1 = vector.shape_cast %0 : vector<1x16x16x8xf32> to vector<256x8xf32>
    %c0_3 = arith.constant 0 : index
    %c0_4 = arith.constant 0 : index
    %c1 = arith.constant 1 : index
    %c0_5 = arith.constant 0 : index
    %2 = vector.load %arg1[%c0_3, %c0_4, %c1, %c0_5] : memref<1x18x18x8xf32, #tpu.memory_space<vmem>>, vector<1x16x16x8xf32>
    %3 = vector.shape_cast %2 : vector<1x16x16x8xf32> to vector<256x8xf32>
    %c0_6 = arith.constant 0 : index
    %c0_7 = arith.constant 0 : index
    %c2 = arith.constant 2 : index
    %c0_8 = arith.constant 0 : index
    %4 = vector.load %arg1[%c0_6, %c0_7, %c2, %c0_8] : memref<1x18x18x8xf32, #tpu.memory_space<vmem>>, vector<1x16x16x8xf32>
    %5 = vector.shape_cast %4 : vector<1x16x16x8xf32> to vector<256x8xf32>
    %c0_9 = arith.constant 0 : index
    %c1_10 = arith.constant 1 : index
    %c0_11 = arith.constant 0 : index
    %c0_12 = arith.constant 0 : index
    %6 = vector.load %arg1[%c0_9, %c1_10, %c0_11, %c0_12] : memref<1x18x18x8xf32, #tpu.memory_space<vmem>>, vector<1x16x16x8xf32>
    %7 = vector.shape_cast %6 : vector<1x16x16x8xf32> to vector<256x8xf32>
    %c0_13 = arith.constant 0 : index
    %c1_14 = arith.constant 1 : index
    %c1_15 = arith.constant 1 : index
    %c0_16 = arith.constant 0 : index
    %8 = vector.load %arg1[%c0_13, %c1_14, %c1_15, %c0_16] : memref<1x18x18x8xf32, #tpu.memory_space<vmem>>, vector<1x16x16x8xf32>
    %9 = vector.shape_cast %8 : vector<1x16x16x8xf32> to vector<256x8xf32>
    %c0_17 = arith.constant 0 : index
    %c1_18 = arith.constant 1 : index
    %c2_19 = arith.constant 2 : index
    %c0_20 = arith.constant 0 : index
    %10 = vector.load %arg1[%c0_17, %c1_18, %c2_19, %c0_20] : memref<1x18x18x8xf32, #tpu.memory_space<vmem>>, vector<1x16x16x8xf32>
    %11 = vector.shape_cast %10 : vector<1x16x16x8xf32> to vector<256x8xf32>
    %c0_21 = arith.constant 0 : index
    %c2_22 = arith.constant 2 : index
    %c0_23 = arith.constant 0 : index
    %c0_24 = arith.constant 0 : index
    %12 = vector.load %arg1[%c0_21, %c2_22, %c0_23, %c0_24] : memref<1x18x18x8xf32, #tpu.memory_space<vmem>>, vector<1x16x16x8xf32>
    %13 = vector.shape_cast %12 : vector<1x16x16x8xf32> to vector<256x8xf32>
    %c0_25 = arith.constant 0 : index
    %c2_26 = arith.constant 2 : index
    %c1_27 = arith.constant 1 : index
    %c0_28 = arith.constant 0 : index
    %14 = vector.load %arg1[%c0_25, %c2_26, %c1_27, %c0_28] : memref<1x18x18x8xf32, #tpu.memory_space<vmem>>, vector<1x16x16x8xf32>
    %15 = vector.shape_cast %14 : vector<1x16x16x8xf32> to vector<256x8xf32>
    %c0_29 = arith.constant 0 : index
    %c2_30 = arith.constant 2 : index
    %c2_31 = arith.constant 2 : index
    %c0_32 = arith.constant 0 : index
    %16 = vector.load %arg1[%c0_29, %c2_30, %c2_31, %c0_32] : memref<1x18x18x8xf32, #tpu.memory_space<vmem>>, vector<1x16x16x8xf32>
    %17 = vector.shape_cast %16 : vector<1x16x16x8xf32> to vector<256x8xf32>
    %18 = tpu.concatenate %1, %3, %5, %7, %9, %11, %13, %15, %17 in 1 : vector<256x8xf32>, vector<256x8xf32>, vector<256x8xf32>, vector<256x8xf32>, vector<256x8xf32>, vector<256x8xf32>, vector<256x8xf32>, vector<256x8xf32>, vector<256x8xf32> -> vector<256x72xf32>
    %c0_33 = arith.constant 0 : index
    %c0_34 = arith.constant 0 : index
    %19 = vector.load %arg2[%c0_33, %c0_34] : memref<72x16xf32, #tpu.memory_space<vmem>>, vector<72x16xf32>
    %cst = arith.constant dense<0.000000e+00> : vector<256x16xf32>
    %20 = tpu.matmul %18, %19, %cst {dimension_numbers = #tpu.dot_dimension_numbers<[1], [0], [0], [1], [0, 0, 1, 1], [], []>} : vector<256x72xf32>, vector<72x16xf32>, vector<256x16xf32> -> vector<256x16xf32>
    %cst_35 = arith.constant 0.000000e+00 : f32
    %21 = vector.broadcast %cst_35 : f32 to vector<256x8xf32>
    %cst_36 = arith.constant 0.000000e+00 : f32
    %22 = vector.broadcast %cst_36 : f32 to vector<1x8xf32>
    %23 = arith.index_cast %arg0 : i32 to index
    %c0_37 = arith.constant 0 : index
    %24 = memref.load %arg4[%23, %c0_37] : memref<2x2xf32, #tpu.memory_space<smem>>
    %25 = vector.extract_strided_slice %20 {offsets = [0, 0], sizes = [256, 8], strides = [1, 1]} : vector<256x16xf32> to vector<256x8xf32>
    %26 = vector.broadcast %24 : f32 to vector<256x8xf32>
    %27 = arith.mulf %26, %25 : vector<256x8xf32>
    %28 = arith.addf %21, %27 : vector<256x8xf32>
    %c0_38 = arith.constant 0 : index
    %c0_39 = arith.constant 0 : index
    %29 = vector.load %arg3[%c0_38, %c0_39] : memref<2x8xf32, #tpu.memory_space<vmem>>, vector<1x8xf32>
    %30 = vector.broadcast %24 : f32 to vector<1x8xf32>
    %31 = arith.mulf %30, %29 : vector<1x8xf32>
    %32 = arith.addf %22, %31 : vector<1x8xf32>
    %33 = arith.index_cast %arg0 : i32 to index
    %c1_40 = arith.constant 1 : index
    %34 = memref.load %arg4[%33, %c1_40] : memref<2x2xf32, #tpu.memory_space<smem>>
    %35 = vector.extract_strided_slice %20 {offsets = [0, 8], sizes = [256, 8], strides = [1, 1]} : vector<256x16xf32> to vector<256x8xf32>
    %36 = vector.broadcast %34 : f32 to vector<256x8xf32>
    %37 = arith.mulf %36, %35 : vector<256x8xf32>
    %38 = arith.addf %28, %37 : vector<256x8xf32>
    %c1_41 = arith.constant 1 : index
    %c0_42 = arith.constant 0 : index
    %39 = vector.load %arg3[%c1_41, %c0_42] : memref<2x8xf32, #tpu.memory_space<vmem>>, vector<1x8xf32>
    %40 = vector.broadcast %34 : f32 to vector<1x8xf32>
    %41 = arith.mulf %40, %39 : vector<1x8xf32>
    %42 = arith.addf %32, %41 : vector<1x8xf32>
    %43 = vector.broadcast %42 : vector<1x8xf32> to vector<256x8xf32>
    %44 = arith.addf %38, %43 : vector<256x8xf32>
    %c0_43 = arith.constant 0 : index
    %c0_44 = arith.constant 0 : index
    %45 = vector.load %arg5[%c0_43, %c0_44] : memref<256x8xf32, #tpu.memory_space<vmem>>, vector<256x8xf32>
    tpu.vector_store %arg5[%c0_43, %c0_44], %44 {strides = array<i32>} : memref<256x8xf32, #tpu.memory_space<vmem>>, vector<256x8xf32>,
    %cst_45 = arith.constant dense<0.000000e+00> : vector<8xf32>
    %46 = vector.multi_reduction <add>, %44, %cst_45 [0] : vector<256x8xf32> to vector<8xf32>
    %47 = vector.shape_cast %46 : vector<8xf32> to vector<1x8xf32>
    %48 = arith.mulf %44, %44 : vector<256x8xf32>
    %cst_46 = arith.constant dense<0.000000e+00> : vector<8xf32>
    %49 = vector.multi_reduction <add>, %48, %cst_46 [0] : vector<256x8xf32> to vector<8xf32>
    %50 = vector.shape_cast %49 : vector<8xf32> to vector<1x8xf32>
    %51 = tpu.concatenate %47, %50 in 0 : vector<1x8xf32>, vector<1x8xf32> -> vector<2x8xf32>
    %c0_i32 = arith.constant 0 : i32
    %52 = arith.cmpi eq, %arg0, %c0_i32 : i32
    %53 = arith.extui %52 : i1 to i32
    %c0_i32_47 = arith.constant 0 : i32
    %54 = arith.cmpi ne, %53, %c0_i32_47 : i32
    scf.if %54 {
      %cst_52 = arith.constant 0.000000e+00 : f32
      %58 = vector.broadcast %cst_52 : f32 to vector<2x8xf32>
      %c0_53 = arith.constant 0 : index
      %c0_54 = arith.constant 0 : index
      %59 = vector.load %arg6[%c0_53, %c0_54] : memref<2x8xf32, #tpu.memory_space<vmem>>, vector<2x8xf32>
      tpu.vector_store %arg6[%c0_53, %c0_54], %58 {strides = array<i32>} : memref<2x8xf32, #tpu.memory_space<vmem>>, vector<2x8xf32>,
    } else {
    }
    %c0_48 = arith.constant 0 : index
    %c0_49 = arith.constant 0 : index
    %55 = vector.load %arg6[%c0_48, %c0_49] : memref<2x8xf32, #tpu.memory_space<vmem>>, vector<2x8xf32>
    %56 = arith.addf %55, %51 : vector<2x8xf32>
    %c0_50 = arith.constant 0 : index
    %c0_51 = arith.constant 0 : index
    %57 = vector.load %arg6[%c0_50, %c0_51] : memref<2x8xf32, #tpu.memory_space<vmem>>, vector<2x8xf32>
    tpu.vector_store %arg6[%c0_50, %c0_51], %56 {strides = array<i32>} : memref<2x8xf32, #tpu.memory_space<vmem>>, vector<2x8xf32>,
    return
  }
  func.func @transform_0(%arg0: i32) -> (i32, i32, i32, i32) {
    %c0_i32 = arith.constant 0 : i32
    %c0_i32_0 = arith.constant 0 : i32
    %c0_i32_1 = arith.constant 0 : i32
    %c0_i32_2 = arith.constant 0 : i32
    return %arg0, %c0_i32, %c0_i32_0, %c0_i32_1 : i32, i32, i32, i32
  }
  func.func @transform_1(%arg0: i32) -> (i32, i32) {
    %c0_i32 = arith.constant 0 : i32
    %c0_i32_0 = arith.constant 0 : i32
    %c0_i32_1 = arith.constant 0 : i32
    return %c0_i32, %c0_i32_0 : i32, i32
  }
  func.func @transform_2(%arg0: i32) -> (i32, i32) {
    %c0_i32 = arith.constant 0 : i32
    %c0_i32_0 = arith.constant 0 : i32
    %c0_i32_1 = arith.constant 0 : i32
    return %c0_i32, %c0_i32_0 : i32, i32
  }
  func.func @transform_3(%arg0: i32) -> (i32, i32) {
    %c0_i32 = arith.constant 0 : i32
    %c0_i32_0 = arith.constant 0 : i32
    %c0_i32_1 = arith.constant 0 : i32
    return %c0_i32, %c0_i32_0 : i32, i32
  }
  func.func @transform_4(%arg0: i32) -> (i32, i32) {
    %c0_i32 = arith.constant 0 : i32
    %c0_i32_0 = arith.constant 0 : i32
    return %arg0, %c0_i32 : i32, i32
  }
  func.func @transform_5(%arg0: i32) -> (i32, i32) {
    %c0_i32 = arith.constant 0 : i32
    %c0_i32_0 = arith.constant 0 : i32
    %c0_i32_1 = arith.constant 0 : i32
    return %c0_i32, %c0_i32_0 : i32, i32
  }
}

module attributes {stable_mosaic.version = 11 : i64} {
  func.func @_bn_add_act_kernel(%arg0: i32, %arg1: memref<256x8xf32, #tpu.memory_space<vmem>>, %arg2: memref<2x8xf32, #tpu.memory_space<vmem>>, %arg3: memref<1x8xf32, #tpu.memory_space<vmem>>, %arg4: memref<1x8xf32, #tpu.memory_space<vmem>>, %arg5: memref<256x8xf32, #tpu.memory_space<vmem>>, %arg6: memref<2x8xf32, #tpu.memory_space<vmem>>, %arg7: memref<1x8xf32, #tpu.memory_space<vmem>>, %arg8: memref<1x8xf32, #tpu.memory_space<vmem>>, %arg9: memref<256x8xf32, #tpu.memory_space<vmem>>) attributes {dimension_semantics = [#tpu.dimension_semantics<parallel>], iteration_bounds = array<i64: 2>, scalar_prefetch = 0 : i64, scratch_operands = 0 : i64, tpu.core_type = #tpu.core_type<tc>, window_params = [{transform_indices = @transform_0, window_bounds = array<i64: 256, 8>}, {pipeline_mode = #tpu.pipeline_mode<synchronous>, transform_indices = @transform_1, window_bounds = array<i64: 2, 8>}, {pipeline_mode = #tpu.pipeline_mode<synchronous>, transform_indices = @transform_2, window_bounds = array<i64: 1, 8>}, {pipeline_mode = #tpu.pipeline_mode<synchronous>, transform_indices = @transform_3, window_bounds = array<i64: 1, 8>}, {transform_indices = @transform_4, window_bounds = array<i64: 256, 8>}, {pipeline_mode = #tpu.pipeline_mode<synchronous>, transform_indices = @transform_5, window_bounds = array<i64: 2, 8>}, {pipeline_mode = #tpu.pipeline_mode<synchronous>, transform_indices = @transform_6, window_bounds = array<i64: 1, 8>}, {pipeline_mode = #tpu.pipeline_mode<synchronous>, transform_indices = @transform_7, window_bounds = array<i64: 1, 8>}, {transform_indices = @transform_8, window_bounds = array<i64: 256, 8>}]} {
    %c0 = arith.constant 0 : index
    %c0_0 = arith.constant 0 : index
    %0 = vector.load %arg2[%c0, %c0_0] : memref<2x8xf32, #tpu.memory_space<vmem>>, vector<2x8xf32>
    %c0_1 = arith.constant 0 : index
    %c0_2 = arith.constant 0 : index
    %1 = vector.load %arg3[%c0_1, %c0_2] : memref<1x8xf32, #tpu.memory_space<vmem>>, vector<1x8xf32>
    %c0_3 = arith.constant 0 : index
    %c0_4 = arith.constant 0 : index
    %2 = vector.load %arg4[%c0_3, %c0_4] : memref<1x8xf32, #tpu.memory_space<vmem>>, vector<1x8xf32>
    %3 = vector.extract_strided_slice %0 {offsets = [0, 0], sizes = [1, 8], strides = [1, 1]} : vector<2x8xf32> to vector<1x8xf32>
    %cst = arith.constant 0.001953125 : f32
    %4 = vector.broadcast %cst : f32 to vector<1x8xf32>
    %5 = arith.mulf %3, %4 : vector<1x8xf32>
    %6 = vector.extract_strided_slice %0 {offsets = [1, 0], sizes = [1, 8], strides = [1, 1]} : vector<2x8xf32> to vector<1x8xf32>
    %cst_5 = arith.constant 0.001953125 : f32
    %7 = vector.broadcast %cst_5 : f32 to vector<1x8xf32>
    %8 = arith.mulf %6, %7 : vector<1x8xf32>
    %9 = arith.mulf %5, %5 : vector<1x8xf32>
    %10 = arith.subf %8, %9 : vector<1x8xf32>
    %cst_6 = arith.constant 0.000000e+00 : f32
    %11 = vector.broadcast %cst_6 : f32 to vector<1x8xf32>
    %12 = arith.maximumf %10, %11 : vector<1x8xf32>
    %cst_7 = arith.constant 9.99999974E-6 : f32
    %13 = vector.broadcast %cst_7 : f32 to vector<1x8xf32>
    %14 = arith.addf %12, %13 : vector<1x8xf32>
    %15 = math.rsqrt %14 : vector<1x8xf32>
    %16 = arith.mulf %1, %15 : vector<1x8xf32>
    %17 = arith.mulf %5, %16 : vector<1x8xf32>
    %18 = arith.subf %2, %17 : vector<1x8xf32>
    %c0_8 = arith.constant 0 : index
    %c0_9 = arith.constant 0 : index
    %19 = vector.load %arg1[%c0_8, %c0_9] : memref<256x8xf32, #tpu.memory_space<vmem>>, vector<256x8xf32>
    %20 = vector.broadcast %16 : vector<1x8xf32> to vector<256x8xf32>
    %21 = arith.mulf %19, %20 : vector<256x8xf32>
    %22 = vector.broadcast %18 : vector<1x8xf32> to vector<256x8xf32>
    %23 = arith.addf %21, %22 : vector<256x8xf32>
    %c0_10 = arith.constant 0 : index
    %c0_11 = arith.constant 0 : index
    %24 = vector.load %arg6[%c0_10, %c0_11] : memref<2x8xf32, #tpu.memory_space<vmem>>, vector<2x8xf32>
    %c0_12 = arith.constant 0 : index
    %c0_13 = arith.constant 0 : index
    %25 = vector.load %arg7[%c0_12, %c0_13] : memref<1x8xf32, #tpu.memory_space<vmem>>, vector<1x8xf32>
    %c0_14 = arith.constant 0 : index
    %c0_15 = arith.constant 0 : index
    %26 = vector.load %arg8[%c0_14, %c0_15] : memref<1x8xf32, #tpu.memory_space<vmem>>, vector<1x8xf32>
    %27 = vector.extract_strided_slice %24 {offsets = [0, 0], sizes = [1, 8], strides = [1, 1]} : vector<2x8xf32> to vector<1x8xf32>
    %cst_16 = arith.constant 0.001953125 : f32
    %28 = vector.broadcast %cst_16 : f32 to vector<1x8xf32>
    %29 = arith.mulf %27, %28 : vector<1x8xf32>
    %30 = vector.extract_strided_slice %24 {offsets = [1, 0], sizes = [1, 8], strides = [1, 1]} : vector<2x8xf32> to vector<1x8xf32>
    %cst_17 = arith.constant 0.001953125 : f32
    %31 = vector.broadcast %cst_17 : f32 to vector<1x8xf32>
    %32 = arith.mulf %30, %31 : vector<1x8xf32>
    %33 = arith.mulf %29, %29 : vector<1x8xf32>
    %34 = arith.subf %32, %33 : vector<1x8xf32>
    %cst_18 = arith.constant 0.000000e+00 : f32
    %35 = vector.broadcast %cst_18 : f32 to vector<1x8xf32>
    %36 = arith.maximumf %34, %35 : vector<1x8xf32>
    %cst_19 = arith.constant 9.99999974E-6 : f32
    %37 = vector.broadcast %cst_19 : f32 to vector<1x8xf32>
    %38 = arith.addf %36, %37 : vector<1x8xf32>
    %39 = math.rsqrt %38 : vector<1x8xf32>
    %40 = arith.mulf %25, %39 : vector<1x8xf32>
    %41 = arith.mulf %29, %40 : vector<1x8xf32>
    %42 = arith.subf %26, %41 : vector<1x8xf32>
    %c0_20 = arith.constant 0 : index
    %c0_21 = arith.constant 0 : index
    %43 = vector.load %arg5[%c0_20, %c0_21] : memref<256x8xf32, #tpu.memory_space<vmem>>, vector<256x8xf32>
    %44 = vector.broadcast %40 : vector<1x8xf32> to vector<256x8xf32>
    %45 = arith.mulf %43, %44 : vector<256x8xf32>
    %46 = vector.broadcast %42 : vector<1x8xf32> to vector<256x8xf32>
    %47 = arith.addf %45, %46 : vector<256x8xf32>
    %48 = arith.addf %23, %47 : vector<256x8xf32>
    %cst_22 = arith.constant 0.000000e+00 : f32
    %49 = vector.broadcast %cst_22 : f32 to vector<256x8xf32>
    %50 = arith.maximumf %48, %49 : vector<256x8xf32>
    %c0_23 = arith.constant 0 : index
    %c0_24 = arith.constant 0 : index
    %51 = vector.load %arg9[%c0_23, %c0_24] : memref<256x8xf32, #tpu.memory_space<vmem>>, vector<256x8xf32>
    tpu.vector_store %arg9[%c0_23, %c0_24], %50 {strides = array<i32>} : memref<256x8xf32, #tpu.memory_space<vmem>>, vector<256x8xf32>,
    return
  }
  func.func @transform_0(%arg0: i32) -> (i32, i32) {
    %c0_i32 = arith.constant 0 : i32
    %c0_i32_0 = arith.constant 0 : i32
    return %arg0, %c0_i32 : i32, i32
  }
  func.func @transform_1(%arg0: i32) -> (i32, i32) {
    %c0_i32 = arith.constant 0 : i32
    %c0_i32_0 = arith.constant 0 : i32
    %c0_i32_1 = arith.constant 0 : i32
    return %c0_i32, %c0_i32_0 : i32, i32
  }
  func.func @transform_2(%arg0: i32) -> (i32, i32) {
    %c0_i32 = arith.constant 0 : i32
    %c0_i32_0 = arith.constant 0 : i32
    %c0_i32_1 = arith.constant 0 : i32
    return %c0_i32, %c0_i32_0 : i32, i32
  }
  func.func @transform_3(%arg0: i32) -> (i32, i32) {
    %c0_i32 = arith.constant 0 : i32
    %c0_i32_0 = arith.constant 0 : i32
    %c0_i32_1 = arith.constant 0 : i32
    return %c0_i32, %c0_i32_0 : i32, i32
  }
  func.func @transform_4(%arg0: i32) -> (i32, i32) {
    %c0_i32 = arith.constant 0 : i32
    %c0_i32_0 = arith.constant 0 : i32
    return %arg0, %c0_i32 : i32, i32
  }
  func.func @transform_5(%arg0: i32) -> (i32, i32) {
    %c0_i32 = arith.constant 0 : i32
    %c0_i32_0 = arith.constant 0 : i32
    %c0_i32_1 = arith.constant 0 : i32
    return %c0_i32, %c0_i32_0 : i32, i32
  }
  func.func @transform_6(%arg0: i32) -> (i32, i32) {
    %c0_i32 = arith.constant 0 : i32
    %c0_i32_0 = arith.constant 0 : i32
    %c0_i32_1 = arith.constant 0 : i32
    return %c0_i32, %c0_i32_0 : i32, i32
  }
  func.func @transform_7(%arg0: i32) -> (i32, i32) {
    %c0_i32 = arith.constant 0 : i32
    %c0_i32_0 = arith.constant 0 : i32
    %c0_i32_1 = arith.constant 0 : i32
    return %c0_i32, %c0_i32_0 : i32, i32
  }
  func.func @transform_8(%arg0: i32) -> (i32, i32) {
    %c0_i32 = arith.constant 0 : i32
    %c0_i32_0 = arith.constant 0 : i32
    return %arg0, %c0_i32 : i32, i32
  }
}

</mosaic_0001>

<bundles_post_ra>
// kernel: moe_residual_block_forward.5
= control target key start
LH: loop header
LB: loop body
LE: loop exit
PB: predicated region body
PF: predicated region fallthrough
CT: control target
= control target key end

     0   :  { %s518_s15 = smov 0   ;;  %s719_s0 = inlined_call_operand.vmem [shape: f32[512,8], index: 0, kind: input, shape index: {}]   ;;  %s720_s1 = inlined_call_operand.vmem [shape: f32[2,8], index: 1, kind: input, shape index: {}]   ;;  %s721_s2 = inlined_call_operand.vmem [shape: f32[1,8], index: 2, kind: input, shape index: {}]   ;;  %s722_s3 = inlined_call_operand.vmem [shape: f32[1,8], index: 3, kind: input, shape index: {}]   ;;  %s723_s4 = inlined_call_operand.vmem [shape: f32[512,8], index: 4, kind: output, shape index: {}]  }
   0x1 LB: > { %s462_s16 = sadd.s32 4294967295, %s490_s15   ;;  %p466_p0 = scmp.ge.s32.totalorder %s490_s15, 1  ;;  %s490_s15 = sphi %s518_s15, %s14_s15  }
   0x2   : > { %p163_p1 = scmp.lt.s32.totalorder %s490_s15, 3 }
   0x4   : > { %p164_p2 = pnand %p466_p0, %p163_p1 }
   0x5   : > { %s467_s19 = sshll.u32 (!%p164_p2), %s462_s16, 5 }
   0x6   : > { %167 = sbr.rel (%p164_p2) target bundleno = 78 (0x4e), region = 36  ;;  %p190_p3 = scmp.lt.s32.totalorder (!%p164_p2), %s467_s19, 63 }
   0xb   : > { %v201_v0 = vld [vmem:[%s720_s1] sm:$0x3]  ;;  %v492_v7 = vmov 1966171168   ;;  %v217_v9 = vlaneseq  ;;  %s725_s19 = smov (!%p190_p3, %s467_s19), 63  ;;  %vm373_vm0 = vcmask 64512  }
   0xc   : > { %v204_v1 = vmul.f32 0.001953125, %v201_v0  ;;  %v215_v8 = vunpack.c.l.s4 %v492_v7  ;;  %s468_s20 = sshll.u32 %s725_s19, 3  ;;  %v202_v16 = vld [vmem:[%s721_s2] sm:$0x1] }
   0xd   : > { %v218_v11 = vshrl.u32 %v217_v9, 7  ;;  %s537_s23 = scalar_lea.vmem %s719_s0, %s468_s20  ;;  %v203_v19 = vld [vmem:[%s722_s3] sm:$0x1]  ;;  %s586_s30 = scalar_lea.vmem %s723_s4, %s468_s20 }
   0xe   : > { %v205_v2 = vmul.f32 %v204_v1, %v204_v1  ;;  %v216_v10 = vunpack.c.0.s8 %v215_v8  ;;  %v233_v21 = vld [vmem:[%s537_s23] sm:$0xff]  ;;  %v234_v22 = vld [vmem:[%s537_s23 + $0x8] sm:$0xff]  ;;  %v235_v23 = vld [vmem:[%s537_s23 + $0x10] sm:$0xff] }
   0xf   : > { %v268_v18 = vsub.s32 0, %v218_v11  ;;  %v236_v24 = vld [vmem:[%s537_s23 + $0x18] sm:$0xff]  ;;  %v237_v25 = vld [vmem:[%s537_s23 + $0x20] sm:$0xff]  ;;  %v238_v28 = vld [vmem:[%s537_s23 + $0x28] sm:$0xff] }
  0x10   : > { %v207_v3 = vrot.slane %v205_v2, 7  ;;  %v219_v12 = vsub.s32 %v216_v10, %v218_v11  ;;  %v239_v29 = vld [vmem:[%s537_s23 + $0x30] sm:$0xff]  ;;  %v240_v30 = vld [vmem:[%s537_s23 + $0x38] sm:$0xff]  ;;  %v241_v31 = vld [vmem:[%s537_s23 + $0x40] sm:$0xff] }
  0x11   : > { %v242_v32 = vld [vmem:[%s537_s23 + $0x48] sm:$0xff]  ;;  %v243_v33 = vld [vmem:[%s537_s23 + $0x50] sm:$0xff]  ;;  %v244_v38 = vld [vmem:[%s537_s23 + $0x58] sm:$0xff] }
  0x12   : > { %v209_v4 = vsub.f32 %v204_v1, %v207_v3  ;;  %v245_v39 = vld [vmem:[%s537_s23 + $0x60] sm:$0xff]  ;;  %v246_v40 = vld [vmem:[%s537_s23 + $0x68] sm:$0xff]  ;;  %v248_v2 = vld [vmem:[%s537_s23 + $0x78] sm:$0xff] }
  0x13   : > { %v249_v11 = vld [vmem:[%s537_s23 + $0x80] sm:$0xff] }
  0x14   : > { %v210_v5 = vmax.f32 %v209_v4, 0.0 }
  0x16   : > { %v211_v6 = vadd.f32 1e-05, %v210_v5 }
  0x18   : > { %482 = vrsqrt.f32 %v211_v6 }
  0x25   : > { %v483_v13 = vpop.eup %482 }
  0x26   : > { %v220_v14 = vrot.slane %v483_v13, %v219_v12 }
  0x28   : > { %v221_v15 = vcombine.high %v220_v14, %v220_v14 }
  0x2a   : > { %v228_v17 = vrot.slane %v221_v15, %v219_v12 }
  0x2c   : > { %v230_v20 = vmul.f32 %v228_v17, %v202_v16  ;;  %v250_v16 = vld [vmem:[%s537_s23 + $0x88] sm:$0xff]  ;;  %v251_v17 = vld [vmem:[%s537_s23 + $0x90] sm:$0xff] }
  0x2e   : > { %v231_v26 = vmul.f32 %v230_v20, %v204_v1  ;;  %v550_v27 = vrot.slane %v230_v20, %v268_v18  ;;  %v247_v1 = vld [vmem:[%s537_s23 + $0x70] sm:$0xff] }
  0x30   : > { %v232_v34 = vsub.f32 %v203_v19, %v231_v26  ;;  %v271_v35 = vmul.f32 %v550_v27, %v233_v21  ;;  %v272_v36 = vmul.f32 %v550_v27, %v234_v22  ;;  %v273_v37 = vmul.f32 %v550_v27, %v235_v23  ;;  %v253_v23 = vld [vmem:[%s537_s23 + $0xa0] sm:$0xff] }
  0x31   : > { %v274_v41 = vmul.f32 %v550_v27, %v236_v24  ;;  %v275_v42 = vmul.f32 %v550_v27, %v237_v25  ;;  %v276_v43 = vmul.f32 %v550_v27, %v238_v28  ;;  %v277_v44 = vmul.f32 %v550_v27, %v239_v29  ;;  %v254_v24 = vld [vmem:[%s537_s23 + $0xa8] sm:$0xff] }
  0x32   : > { %v568_v45 = vrot.slane %v232_v34, %v268_v18  ;;  %v278_v46 = vmul.f32 %v550_v27, %v240_v30  ;;  %v279_v47 = vmul.f32 %v550_v27, %v241_v31  ;;  %v280_v48 = vmul.f32 %v550_v27, %v242_v32  ;;  %v252_v18 = vld [vmem:[%s537_s23 + $0x98] sm:$0xff]  ;;  %v255_v34 = vld [vmem:[%s537_s23 + $0xb0] sm:$0xff] }
  0x33   : > { %v281_v49 = vmul.f32 %v550_v27, %v243_v33  ;;  %v282_v50 = vmul.f32 %v550_v27, %v244_v38  ;;  %v283_v51 = vmul.f32 %v550_v27, %v245_v39  ;;  %v284_v52 = vmul.f32 %v550_v27, %v246_v40 }
  0x34   : > { %v309_v53 = vadd.f32 %v568_v45, %v271_v35  ;;  %v310_v54 = vadd.f32 %v568_v45, %v272_v36  ;;  %v311_v55 = vadd.f32 %v568_v45, %v273_v37  ;;  %v312_v56 = vadd.f32 %v568_v45, %v274_v41  ;;  %v256_v35 = vld [vmem:[%s537_s23 + $0xb8] sm:$0xff] }
  0x35   : > { %v313_v57 = vadd.f32 %v568_v45, %v275_v42  ;;  %v314_v58 = vadd.f32 %v568_v45, %v276_v43  ;;  %v315_v59 = vadd.f32 %v568_v45, %v277_v44  ;;  %v316_v60 = vadd.f32 %v568_v45, %v278_v46  ;;  %v257_v44 = vld [vmem:[%s537_s23 + $0xc0] sm:$0xff] }
  0x36   : > { %v341_v61 = vmax.f32 %v309_v53, 0.0  ;;  %v342_v62 = vmax.f32 %v310_v54, 0.0  ;;  %v343_v63 = vmax.f32 %v311_v55, 0.0  ;;  %v344_v0 = vmax.f32 %v312_v56, 0.0 }
  0x37   : > { %v345_v3 = vmax.f32 %v313_v57, 0.0  ;;  %v346_v4 = vmax.f32 %v314_v58, 0.0  ;;  %v347_v5 = vmax.f32 %v315_v59, 0.0  ;;  %v348_v6 = vmax.f32 %v316_v60, 0.0  ;;  %v261_v57 = vld [vmem:[%s537_s23 + $0xe0] sm:$0xff]  ;;  %v262_v58 = vld [vmem:[%s537_s23 + $0xe8] sm:$0xff] }
  0x38   : > { %374 = vst.msk [vmem:[%s586_s30] sm:$0xff] %vm373_vm0, %v341_v61  ;;  %375 = vst.msk [vmem:[%s586_s30 + $0x8] sm:$0xff] %vm373_vm0, %v342_v62  ;;  %v317_v7 = vadd.f32 %v568_v45, %v279_v47  ;;  %v318_v8 = vadd.f32 %v568_v45, %v280_v48  ;;  %v319_v9 = vadd.f32 %v568_v45, %v281_v49 }
  0x39   : > { %376 = vst.msk [vmem:[%s586_s30 + $0x10] sm:$0xff] %vm373_vm0, %v343_v63  ;;  %377 = vst.msk [vmem:[%s586_s30 + $0x18] sm:$0xff] %vm373_vm0, %v344_v0  ;;  %v320_v10 = vadd.f32 %v568_v45, %v282_v50  ;;  %v321_v12 = vadd.f32 %v568_v45, %v283_v51  ;;  %v322_v13 = vadd.f32 %v568_v45, %v284_v52  ;;  %v258_v50 = vld [vmem:[%s537_s23 + $0xc8] sm:$0xff]  ;;  %v259_v51 = vld [vmem:[%s537_s23 + $0xd0] sm:$0xff] }
  0x3a   : > { %378 = vst.msk [vmem:[%s586_s30 + $0x20] sm:$0xff] %vm373_vm0, %v345_v3  ;;  %379 = vst.msk [vmem:[%s586_s30 + $0x28] sm:$0xff] %vm373_vm0, %v346_v4  ;;  %v285_v14 = vmul.f32 %v550_v27, %v247_v1  ;;  %v286_v15 = vmul.f32 %v550_v27, %v248_v2  ;;  %v349_v19 = vmax.f32 %v317_v7, 0.0  ;;  %v350_v20 = vmax.f32 %v318_v8, 0.0  ;;  %v260_v52 = vld [vmem:[%s537_s23 + $0xd8] sm:$0xff]  ;;  %v263_v3 = vld [vmem:[%s537_s23 + $0xf0] sm:$0xff] }
  0x3b   : > { %380 = vst.msk [vmem:[%s586_s30 + $0x30] sm:$0xff] %vm373_vm0, %v347_v5  ;;  %381 = vst.msk [vmem:[%s586_s30 + $0x38] sm:$0xff] %vm373_vm0, %v348_v6  ;;  %v351_v21 = vmax.f32 %v319_v9, 0.0  ;;  %v352_v22 = vmax.f32 %v320_v10, 0.0  ;;  %v353_v25 = vmax.f32 %v321_v12, 0.0  ;;  %v354_v26 = vmax.f32 %v322_v13, 0.0 }
  0x3c   : > { %v323_v28 = vadd.f32 %v568_v45, %v285_v14  ;;  %v324_v29 = vadd.f32 %v568_v45, %v286_v15  ;;  %382 = vst.msk [vmem:[%s586_s30 + $0x40] sm:$0xff] %vm373_vm0, %v349_v19  ;;  %383 = vst.msk [vmem:[%s586_s30 + $0x48] sm:$0xff] %vm373_vm0, %v350_v20  ;;  %v287_v30 = vmul.f32 %v550_v27, %v249_v11  ;;  %v264_v4 = vld [vmem:[%s537_s23 + $0xf8] sm:$0xff] }
  0x3d   : > { %384 = vst.msk [vmem:[%s586_s30 + $0x50] sm:$0xff] %vm373_vm0, %v351_v21  ;;  %385 = vst.msk [vmem:[%s586_s30 + $0x58] sm:$0xff] %vm373_vm0, %v352_v22  ;;  %v288_v31 = vmul.f32 %v550_v27, %v250_v16  ;;  %v289_v32 = vmul.f32 %v550_v27, %v251_v17  ;;  %v290_v33 = vmul.f32 %v550_v27, %v252_v18 }
  0x3e   : > { %386 = vst.msk [vmem:[%s586_s30 + $0x60] sm:$0xff] %vm373_vm0, %v353_v25  ;;  %387 = vst.msk [vmem:[%s586_s30 + $0x68] sm:$0xff] %vm373_vm0, %v354_v26  ;;  %v355_v36 = vmax.f32 %v323_v28, 0.0  ;;  %v356_v37 = vmax.f32 %v324_v29, 0.0  ;;  %v291_v38 = vmul.f32 %v550_v27, %v253_v23  ;;  %v292_v39 = vmul.f32 %v550_v27, %v254_v24 }
  0x3f   : > { %v325_v40 = vadd.f32 %v568_v45, %v287_v30  ;;  %v326_v41 = vadd.f32 %v568_v45, %v288_v31  ;;  %v327_v42 = vadd.f32 %v568_v45, %v289_v32  ;;  %v328_v43 = vadd.f32 %v568_v45, %v290_v33 }
  0x40   : > { %388 = vst.msk [vmem:[%s586_s30 + $0x70] sm:$0xff] %vm373_vm0, %v355_v36  ;;  %389 = vst.msk [vmem:[%s586_s30 + $0x78] sm:$0xff] %vm373_vm0, %v356_v37  ;;  %v329_v46 = vadd.f32 %v568_v45, %v291_v38  ;;  %v330_v47 = vadd.f32 %v568_v45, %v292_v39  ;;  %v293_v48 = vmul.f32 %v550_v27, %v255_v34 }
  0x41   : > { %v294_v49 = vmul.f32 %v550_v27, %v256_v35  ;;  %v357_v53 = vmax.f32 %v325_v40, 0.0  ;;  %v358_v54 = vmax.f32 %v326_v41, 0.0  ;;  %v359_v55 = vmax.f32 %v327_v42, 0.0 }
  0x42   : > { %v360_v56 = vmax.f32 %v328_v43, 0.0  ;;  %v361_v59 = vmax.f32 %v329_v46, 0.0  ;;  %v362_v60 = vmax.f32 %v330_v47, 0.0  ;;  %v331_v61 = vadd.f32 %v568_v45, %v293_v48 }
  0x43   : > { %v332_v62 = vadd.f32 %v568_v45, %v294_v49  ;;  %390 = vst.msk [vmem:[%s586_s30 + $0x80] sm:$0xff] %vm373_vm0, %v357_v53  ;;  %391 = vst.msk [vmem:[%s586_s30 + $0x88] sm:$0xff] %vm373_vm0, %v358_v54  ;;  %v295_v63 = vmul.f32 %v550_v27, %v257_v44  ;;  %v296_v0 = vmul.f32 %v550_v27, %v258_v50 }
  0x44   : > { %392 = vst.msk [vmem:[%s586_s30 + $0x90] sm:$0xff] %vm373_vm0, %v359_v55  ;;  %393 = vst.msk [vmem:[%s586_s30 + $0x98] sm:$0xff] %vm373_vm0, %v360_v56  ;;  %v297_v1 = vmul.f32 %v550_v27, %v259_v51  ;;  %v298_v2 = vmul.f32 %v550_v27, %v260_v52  ;;  %v363_v5 = vmax.f32 %v331_v61, 0.0  ;;  %v299_v7 = vmul.f32 %v550_v27, %v261_v57 }
  0x45   : > { %394 = vst.msk [vmem:[%s586_s30 + $0xa0] sm:$0xff] %vm373_vm0, %v361_v59  ;;  %395 = vst.msk [vmem:[%s586_s30 + $0xa8] sm:$0xff] %vm373_vm0, %v362_v60  ;;  %v364_v6 = vmax.f32 %v332_v62, 0.0  ;;  %v300_v8 = vmul.f32 %v550_v27, %v262_v58  ;;  %v333_v9 = vadd.f32 %v568_v45, %v295_v63  ;;  %v334_v10 = vadd.f32 %v568_v45, %v296_v0 }
  0x46   : > { %v335_v11 = vadd.f32 %v568_v45, %v297_v1  ;;  %v336_v12 = vadd.f32 %v568_v45, %v298_v2  ;;  %396 = vst.msk [vmem:[%s586_s30 + $0xb0] sm:$0xff] %vm373_vm0, %v363_v5  ;;  %v337_v13 = vadd.f32 %v568_v45, %v299_v7  ;;  %v301_v15 = vmul.f32 %v550_v27, %v263_v3 }
  0x47   : > { %397 = vst.msk [vmem:[%s586_s30 + $0xb8] sm:$0xff] %vm373_vm0, %v364_v6  ;;  %v338_v14 = vadd.f32 %v568_v45, %v300_v8  ;;  %v302_v16 = vmul.f32 %v550_v27, %v264_v4  ;;  %v365_v17 = vmax.f32 %v333_v9, 0.0  ;;  %v366_v18 = vmax.f32 %v334_v10, 0.0 }
  0x48   : > { %v367_v19 = vmax.f32 %v335_v11, 0.0  ;;  %v368_v20 = vmax.f32 %v336_v12, 0.0  ;;  %v369_v21 = vmax.f32 %v337_v13, 0.0  ;;  %v339_v23 = vadd.f32 %v568_v45, %v301_v15 }
  0x49   : > { %v370_v22 = vmax.f32 %v338_v14, 0.0  ;;  %v340_v24 = vadd.f32 %v568_v45, %v302_v16  ;;  %398 = vst.msk [vmem:[%s586_s30 + $0xc0] sm:$0xff] %vm373_vm0, %v365_v17  ;;  %399 = vst.msk [vmem:[%s586_s30 + $0xc8] sm:$0xff] %vm373_vm0, %v366_v18 }
  0x4a   : > { %400 = vst.msk [vmem:[%s586_s30 + $0xd0] sm:$0xff] %vm373_vm0, %v367_v19  ;;  %401 = vst.msk [vmem:[%s586_s30 + $0xd8] sm:$0xff] %vm373_vm0, %v368_v20  ;;  %v371_v27 = vmax.f32 %v339_v23, 0.0 }
  0x4b   : > { %402 = vst.msk [vmem:[%s586_s30 + $0xe0] sm:$0xff] %vm373_vm0, %v369_v21  ;;  %403 = vst.msk [vmem:[%s586_s30 + $0xe8] sm:$0xff] %vm373_vm0, %v370_v22  ;;  %v372_v25 = vmax.f32 %v340_v24, 0.0 }
  0x4c   : > { %404 = vst.msk [vmem:[%s586_s30 + $0xf0] sm:$0xff] %vm373_vm0, %v371_v27 }
  0x4d   : > { %405 = vst.msk [vmem:[%s586_s30 + $0xf8] sm:$0xff] %vm373_vm0, %v372_v25 }
  0x4e PF: > { %s14_s15 = sadd.s32 1, %s490_s15  }
  0x4f   : > { %p11_p4 = scmp.ge.s32.totalorder %s14_s15, 4  }
  0x51   :  { %13 = sbr.rel (!%p11_p4) target bundleno = 1 (0x1), region = 66 }

// kernel: moe_residual_block_forward.7
= control target key start
LH: loop header
LB: loop body
LE: loop exit
PB: predicated region body
PF: predicated region fallthrough
CT: control target
= control target key end

     0   :  { %s856_s27 = smov 0   ;;  %s1169_s0 = inlined_call_operand.vmem [shape: f32[512,8], index: 0, kind: input, shape index: {}]   ;;  %s1170_s1 = inlined_call_operand.vmem [shape: f32[2,8], index: 1, kind: input, shape index: {}]   ;;  %s1171_s2 = inlined_call_operand.vmem [shape: f32[1,8], index: 2, kind: input, shape index: {}]   ;;  %s1172_s3 = inlined_call_operand.vmem [shape: f32[1,8], index: 3, kind: input, shape index: {}]   ;;  %s1173_s4 = inlined_call_operand.vmem [shape: f32[512,8], index: 4, kind: input, shape index: {}]   ;;  %s1174_s5 = inlined_call_operand.vmem [shape: f32[2,8], index: 5, kind: input, shape index: {}]   ;;  %s1175_s6 = inlined_call_operand.vmem [shape: f32[1,8], index: 6, kind: input, shape index: {}]   ;;  %s1176_s7 = inlined_call_operand.vmem [shape: f32[1,8], index: 7, kind: input, shape index: {}]   ;;  %s1177_s8 = inlined_call_operand.vmem [shape: f32[512,8], index: 8, kind: output, shape index: {}]  }
   0x1 LB: > { %s776_s28 = sadd.s32 4294967295, %s808_s27   ;;  %p780_p0 = scmp.ge.s32.totalorder %s808_s27, 1  ;;  %s808_s27 = sphi %s856_s27, %s18_s27  }
   0x2   : > { %p274_p1 = scmp.lt.s32.totalorder %s808_s27, 3 }
   0x4   : > { %p275_p2 = pnand %p780_p0, %p274_p1 }
   0x5   : > { %s781_s11 = sshll.u32 (!%p275_p2), %s776_s28, 5 }
   0x6   : > { %278 = sbr.rel (%p275_p2) target bundleno = 104 (0x68), region = 52  ;;  %p314_p3 = scmp.lt.s32.totalorder (!%p275_p2), %s781_s11, 63 }
   0xb   : > { %v331_v0 = vld [vmem:[%s1170_s1] sm:$0x3]  ;;  %v810_v14 = vmov 1966171168   ;;  %v347_v16 = vlaneseq  ;;  %s1179_s11 = smov (!%p314_p3, %s781_s11), 63  ;;  %vm675_vm0 = vcmask 64512  }
   0xc   : > { %v334_v1 = vmul.f32 0.001953125, %v331_v0  ;;  %v471_v2 = vld [vmem:[%s1174_s5] sm:$0x3]  ;;  %v345_v15 = vunpack.c.l.s4 %v810_v14  ;;  %s870_s12 = sshll.u32 %s1179_s11, 3 }
   0xd   : > { %v474_v4 = vmul.f32 0.001953125, %v471_v2  ;;  %v348_v18 = vshrl.u32 %v347_v16, 7  ;;  %v332_v25 = vld [vmem:[%s1171_s2] sm:$0x1]  ;;  %s879_s17 = scalar_lea.vmem %s1169_s0, %s870_s12  ;;  %s888_s22 = scalar_lea.vmem %s1173_s4, %s870_s12 }
   0xe   : > { %v335_v3 = vmul.f32 %v334_v1, %v334_v1  ;;  %v346_v17 = vunpack.c.0.s8 %v345_v15  ;;  %v472_v29 = vld [vmem:[%s1175_s6] sm:$0x1]  ;;  %v364_v35 = vld [vmem:[%s879_s17 + $0x8] sm:$0xff]  ;;  %v365_v39 = vld [vmem:[%s879_s17 + $0x10] sm:$0xff]  ;;  %s950_s30 = scalar_lea.vmem %s1177_s8, %s870_s12 }
   0xf   : > { %v475_v6 = vmul.f32 %v474_v4, %v474_v4  ;;  %v398_v27 = vsub.s32 0, %v348_v18  ;;  %v333_v30 = vld [vmem:[%s1172_s3] sm:$0x1]  ;;  %v366_v40 = vld [vmem:[%s879_s17 + $0x18] sm:$0xff]  ;;  %v504_v43 = vld [vmem:[%s888_s22 + $0x8] sm:$0xff] }
  0x10   : > { %v337_v5 = vrot.slane %v335_v3, 7  ;;  %v349_v19 = vsub.s32 %v346_v17, %v348_v18  ;;  %v363_v33 = vld [vmem:[%s879_s17] sm:$0xff]  ;;  %v505_v44 = vld [vmem:[%s888_s22 + $0x10] sm:$0xff]  ;;  %v506_v49 = vld [vmem:[%s888_s22 + $0x18] sm:$0xff] }
  0x11   : > { %v477_v8 = vrot.slane %v475_v6, 7  ;;  %v473_v34 = vld [vmem:[%s1176_s7] sm:$0x1]  ;;  %v368_v51 = vld [vmem:[%s879_s17 + $0x28] sm:$0xff]  ;;  %v509_v6 = vld [vmem:[%s888_s22 + $0x30] sm:$0xff] }
  0x12   : > { %v339_v7 = vsub.f32 %v334_v1, %v337_v5  ;;  %v367_v41 = vld [vmem:[%s879_s17 + $0x20] sm:$0xff]  ;;  %v508_v60 = vld [vmem:[%s888_s22 + $0x28] sm:$0xff]  ;;  %v369_v5 = vld [vmem:[%s879_s17 + $0x30] sm:$0xff] }
  0x13   : > { %v479_v10 = vsub.f32 %v474_v4, %v477_v8  ;;  %v503_v42 = vld [vmem:[%s888_s22] sm:$0xff] }
  0x14   : > { %v340_v9 = vmax.f32 %v339_v7, 0.0  ;;  %v507_v50 = vld [vmem:[%s888_s22 + $0x20] sm:$0xff] }
  0x15   : > { %v480_v12 = vmax.f32 %v479_v10, 0.0 }
  0x16   : > { %v341_v11 = vadd.f32 1e-05, %v340_v9 }
  0x17   : > { %v481_v13 = vadd.f32 1e-05, %v480_v12 }
  0x18   : > { %798 = vrsqrt.f32 %v341_v11 }
  0x19   : > { %800 = vrsqrt.f32 %v481_v13 }
  0x25   : > { %v799_v20 = vpop.eup %798 }
  0x26   : > { %v350_v21 = vrot.slane %v799_v20, %v349_v19  ;;  %v801_v22 = vpop.eup %800 }
  0x27   : > { %v490_v24 = vrot.slane %v801_v22, %v349_v19 }
  0x28   : > { %v351_v23 = vcombine.high %v350_v21, %v350_v21 }
  0x29   : > { %v491_v28 = vcombine.high %v490_v24, %v490_v24  ;;  %v510_v24 = vld [vmem:[%s888_s22 + $0x38] sm:$0xff] }
  0x2a   : > { %v358_v26 = vrot.slane %v351_v23, %v349_v19  ;;  %v370_v23 = vld [vmem:[%s879_s17 + $0x38] sm:$0xff] }
  0x2b   : > { %v498_v32 = vrot.slane %v491_v28, %v349_v19 }
  0x2c   : > { %v360_v31 = vmul.f32 %v358_v26, %v332_v25 }
  0x2d   : > { %v500_v38 = vmul.f32 %v498_v32, %v472_v29  ;;  %v371_v29 = vld [vmem:[%s879_s17 + $0x40] sm:$0xff] }
  0x2e   : > { %v361_v36 = vmul.f32 %v360_v31, %v334_v1  ;;  %v898_v37 = vrot.slane %v360_v31, %v398_v27  ;;  %v372_v31 = vld [vmem:[%s879_s17 + $0x48] sm:$0xff] }
  0x2f   : > { %v501_v47 = vmul.f32 %v500_v38, %v474_v4  ;;  %v907_v48 = vrot.slane %v500_v38, %v398_v27  ;;  %v373_v38 = vld [vmem:[%s879_s17 + $0x50] sm:$0xff] }
  0x30   : > { %v362_v45 = vsub.f32 %v333_v30, %v361_v36  ;;  %v401_v46 = vmul.f32 %v898_v37, %v363_v33  ;;  %v402_v52 = vmul.f32 %v898_v37, %v364_v35  ;;  %v403_v53 = vmul.f32 %v898_v37, %v365_v39  ;;  %v511_v30 = vld [vmem:[%s888_s22 + $0x40] sm:$0xff]  ;;  %v512_v36 = vld [vmem:[%s888_s22 + $0x48] sm:$0xff] }
  0x31   : > { %v404_v54 = vmul.f32 %v898_v37, %v366_v40  ;;  %v405_v55 = vmul.f32 %v898_v37, %v367_v41  ;;  %v502_v57 = vsub.f32 %v473_v34, %v501_v47  ;;  %v541_v58 = vmul.f32 %v907_v48, %v503_v42  ;;  %v513_v47 = vld [vmem:[%s888_s22 + $0x50] sm:$0xff] }
  0x32   : > { %v916_v56 = vrot.slane %v362_v45, %v398_v27  ;;  %v542_v59 = vmul.f32 %v907_v48, %v504_v43  ;;  %v543_v61 = vmul.f32 %v907_v48, %v505_v44  ;;  %v544_v62 = vmul.f32 %v907_v48, %v506_v49  ;;  %v374_v49 = vld [vmem:[%s879_s17 + $0x58] sm:$0xff] }
  0x33   : > { %v545_v63 = vmul.f32 %v907_v48, %v507_v50  ;;  %v406_v0 = vmul.f32 %v898_v37, %v368_v51  ;;  %v926_v2 = vrot.slane %v502_v57, %v398_v27  ;;  %v546_v10 = vmul.f32 %v907_v48, %v508_v60 }
  0x34   : > { %v439_v1 = vadd.f32 %v916_v56, %v401_v46  ;;  %v440_v3 = vadd.f32 %v916_v56, %v402_v52  ;;  %v441_v4 = vadd.f32 %v916_v56, %v403_v53  ;;  %v442_v7 = vadd.f32 %v916_v56, %v404_v54  ;;  %v514_v54 = vld [vmem:[%s888_s22 + $0x58] sm:$0xff] }
  0x35   : > { %v443_v8 = vadd.f32 %v916_v56, %v405_v55  ;;  %v444_v9 = vadd.f32 %v916_v56, %v406_v0  ;;  %v579_v11 = vadd.f32 %v926_v2, %v541_v58  ;;  %v580_v12 = vadd.f32 %v926_v2, %v542_v59  ;;  %v375_v55 = vld [vmem:[%s879_s17 + $0x60] sm:$0xff] }
  0x36   : > { %v581_v13 = vadd.f32 %v926_v2, %v543_v61  ;;  %v582_v14 = vadd.f32 %v926_v2, %v544_v62  ;;  %v583_v15 = vadd.f32 %v926_v2, %v545_v63  ;;  %v584_v16 = vadd.f32 %v926_v2, %v546_v10  ;;  %v515_v61 = vld [vmem:[%s888_s22 + $0x60] sm:$0xff] }
  0x37   : > { %v407_v17 = vmul.f32 %v898_v37, %v369_v5  ;;  %v547_v18 = vmul.f32 %v907_v48, %v509_v6  ;;  %v611_v19 = vadd.f32 %v579_v11, %v439_v1  ;;  %v612_v20 = vadd.f32 %v580_v12, %v440_v3  ;;  %v516_v12 = vld [vmem:[%s888_s22 + $0x68] sm:$0xff] }
  0x38   : > { %v613_v21 = vadd.f32 %v581_v13, %v441_v4  ;;  %v614_v22 = vadd.f32 %v582_v14, %v442_v7  ;;  %v615_v25 = vadd.f32 %v583_v15, %v443_v8  ;;  %v616_v26 = vadd.f32 %v584_v16, %v444_v9  ;;  %v376_v7 = vld [vmem:[%s879_s17 + $0x68] sm:$0xff]  ;;  %v377_v13 = vld [vmem:[%s879_s17 + $0x70] sm:$0xff] }
  0x39   : > { %v445_v27 = vadd.f32 %v916_v56, %v407_v17  ;;  %v585_v28 = vadd.f32 %v926_v2, %v547_v18  ;;  %v643_v32 = vmax.f32 %v611_v19, 0.0  ;;  %v644_v33 = vmax.f32 %v612_v20, 0.0  ;;  %v517_v14 = vld [vmem:[%s888_s22 + $0x70] sm:$0xff]  ;;  %v378_v19 = vld [vmem:[%s879_s17 + $0x78] sm:$0xff] }
  0x3a   : > { %v645_v34 = vmax.f32 %v613_v21, 0.0  ;;  %v646_v35 = vmax.f32 %v614_v22, 0.0  ;;  %v647_v39 = vmax.f32 %v615_v25, 0.0  ;;  %v648_v40 = vmax.f32 %v616_v26, 0.0 }
  0x3b   : > { %v617_v41 = vadd.f32 %v585_v28, %v445_v27  ;;  %v408_v42 = vmul.f32 %v898_v37, %v370_v23  ;;  %676 = vst.msk [vmem:[%s950_s30] sm:$0xff] %vm675_vm0, %v643_v32  ;;  %677 = vst.msk [vmem:[%s950_s30 + $0x8] sm:$0xff] %vm675_vm0, %v644_v33  ;;  %v548_v43 = vmul.f32 %v907_v48, %v510_v24  ;;  %v518_v28 = vld [vmem:[%s888_s22 + $0x78] sm:$0xff] }
  0x3c   : > { %678 = vst.msk [vmem:[%s950_s30 + $0x10] sm:$0xff] %vm675_vm0, %v645_v34  ;;  %679 = vst.msk [vmem:[%s950_s30 + $0x18] sm:$0xff] %vm675_vm0, %v646_v35  ;;  %v409_v44 = vmul.f32 %v898_v37, %v371_v29  ;;  %v549_v45 = vmul.f32 %v907_v48, %v511_v30  ;;  %v410_v46 = vmul.f32 %v898_v37, %v372_v31  ;;  %v379_v29 = vld [vmem:[%s879_s17 + $0x80] sm:$0xff]  ;;  %v380_v35 = vld [vmem:[%s879_s17 + $0x88] sm:$0xff] }
  0x3d   : > { %680 = vst.msk [vmem:[%s950_s30 + $0x20] sm:$0xff] %vm675_vm0, %v647_v39  ;;  %681 = vst.msk [vmem:[%s950_s30 + $0x28] sm:$0xff] %vm675_vm0, %v648_v40  ;;  %v649_v50 = vmax.f32 %v617_v41, 0.0  ;;  %v446_v51 = vadd.f32 %v916_v56, %v408_v42  ;;  %v550_v52 = vmul.f32 %v907_v48, %v512_v36  ;;  %v411_v53 = vmul.f32 %v898_v37, %v373_v38  ;;  %v519_v34 = vld [vmem:[%s888_s22 + $0x80] sm:$0xff]  ;;  %v520_v41 = vld [vmem:[%s888_s22 + $0x88] sm:$0xff] }
  0x3e   : > { %v586_v57 = vadd.f32 %v926_v2, %v548_v43  ;;  %v447_v58 = vadd.f32 %v916_v56, %v409_v44  ;;  %v587_v59 = vadd.f32 %v926_v2, %v549_v45  ;;  %v448_v60 = vadd.f32 %v916_v56, %v410_v46  ;;  %v381_v42 = vld [vmem:[%s879_s17 + $0x90] sm:$0xff] }
  0x3f   : > { %682 = vst.msk [vmem:[%s950_s30 + $0x30] sm:$0xff] %vm675_vm0, %v649_v50  ;;  %v588_v62 = vadd.f32 %v926_v2, %v550_v52  ;;  %v449_v63 = vadd.f32 %v916_v56, %v411_v53  ;;  %v551_v0 = vmul.f32 %v907_v48, %v513_v47  ;;  %v412_v1 = vmul.f32 %v898_v37, %v374_v49  ;;  %v521_v52 = vld [vmem:[%s888_s22 + $0x90] sm:$0xff] }
  0x40   : > { %v618_v3 = vadd.f32 %v586_v57, %v446_v51  ;;  %v619_v4 = vadd.f32 %v587_v59, %v447_v58  ;;  %v552_v5 = vmul.f32 %v907_v48, %v514_v54  ;;  %v413_v6 = vmul.f32 %v898_v37, %v375_v55  ;;  %v382_v58 = vld [vmem:[%s879_s17 + $0x98] sm:$0xff] }
  0x41   : > { %v620_v8 = vadd.f32 %v588_v62, %v448_v60  ;;  %v589_v9 = vadd.f32 %v926_v2, %v551_v0  ;;  %v450_v10 = vadd.f32 %v916_v56, %v412_v1  ;;  %v553_v11 = vmul.f32 %v907_v48, %v515_v61  ;;  %v522_v59 = vld [vmem:[%s888_s22 + $0x98] sm:$0xff]  ;;  %v383_v60 = vld [vmem:[%s879_s17 + $0xa0] sm:$0xff] }
  0x42   : > { %v650_v15 = vmax.f32 %v618_v3, 0.0  ;;  %v651_v16 = vmax.f32 %v619_v4, 0.0  ;;  %v590_v17 = vadd.f32 %v926_v2, %v552_v5  ;;  %v451_v18 = vadd.f32 %v916_v56, %v413_v6  ;;  %v523_v1 = vld [vmem:[%s888_s22 + $0xa0] sm:$0xff] }
  0x43   : > { %v652_v20 = vmax.f32 %v620_v8, 0.0  ;;  %v621_v21 = vadd.f32 %v589_v9, %v449_v63  ;;  %v591_v22 = vadd.f32 %v926_v2, %v553_v11  ;;  %v414_v23 = vmul.f32 %v898_v37, %v376_v7  ;;  %v384_v11 = vld [vmem:[%s879_s17 + $0xa8] sm:$0xff] }
  0x44   : > { %683 = vst.msk [vmem:[%s950_s30 + $0x38] sm:$0xff] %vm675_vm0, %v650_v15  ;;  %684 = vst.msk [vmem:[%s950_s30 + $0x40] sm:$0xff] %vm675_vm0, %v651_v16  ;;  %v622_v24 = vadd.f32 %v590_v17, %v450_v10  ;;  %v554_v25 = vmul.f32 %v907_v48, %v516_v12  ;;  %v415_v26 = vmul.f32 %v898_v37, %v377_v13  ;;  %v524_v16 = vld [vmem:[%s888_s22 + $0xa8] sm:$0xff]  ;;  %v385_v17 = vld [vmem:[%s879_s17 + $0xb0] sm:$0xff] }
  0x45   : > { %v555_v27 = vmul.f32 %v907_v48, %v517_v14  ;;  %685 = vst.msk [vmem:[%s950_s30 + $0x48] sm:$0xff] %vm675_vm0, %v652_v20  ;;  %v653_v30 = vmax.f32 %v621_v21, 0.0  ;;  %v623_v31 = vadd.f32 %v591_v22, %v451_v18  ;;  %v452_v32 = vadd.f32 %v916_v56, %v414_v23  ;;  %v525_v18 = vld [vmem:[%s888_s22 + $0xb0] sm:$0xff]  ;;  %v386_v23 = vld [vmem:[%s879_s17 + $0xb8] sm:$0xff] }
  0x46   : > { %v416_v33 = vmul.f32 %v898_v37, %v378_v19  ;;  %v654_v36 = vmax.f32 %v622_v24, 0.0  ;;  %v592_v38 = vadd.f32 %v926_v2, %v554_v25  ;;  %v453_v39 = vadd.f32 %v916_v56, %v415_v26 }
  0x47   : > { %v593_v40 = vadd.f32 %v926_v2, %v555_v27  ;;  %686 = vst.msk [vmem:[%s950_s30 + $0x50] sm:$0xff] %vm675_vm0, %v653_v30  ;;  %v655_v43 = vmax.f32 %v623_v31, 0.0  ;;  %v556_v45 = vmul.f32 %v907_v48, %v518_v28  ;;  %v417_v46 = vmul.f32 %v898_v37, %v379_v29 }
  0x48   : > { %v454_v44 = vadd.f32 %v916_v56, %v416_v33  ;;  %687 = vst.msk [vmem:[%s950_s30 + $0x58] sm:$0xff] %vm675_vm0, %v654_v36  ;;  %v624_v47 = vadd.f32 %v592_v38, %v452_v32  ;;  %v557_v50 = vmul.f32 %v907_v48, %v519_v34  ;;  %v418_v51 = vmul.f32 %v898_v37, %v380_v35  ;;  %v526_v32 = vld [vmem:[%s888_s22 + $0xb8] sm:$0xff]  ;;  %v387_v33 = vld [vmem:[%s879_s17 + $0xc0] sm:$0xff] }
  0x49   : > { %v625_v49 = vadd.f32 %v593_v40, %v453_v39  ;;  %688 = vst.msk [vmem:[%s950_s30 + $0x60] sm:$0xff] %vm675_vm0, %v655_v43  ;;  %v594_v53 = vadd.f32 %v926_v2, %v556_v45  ;;  %v455_v54 = vadd.f32 %v916_v56, %v417_v46  ;;  %v558_v55 = vmul.f32 %v907_v48, %v520_v41  ;;  %v527_v39 = vld [vmem:[%s888_s22 + $0xc0] sm:$0xff]  ;;  %v388_v40 = vld [vmem:[%s879_s17 + $0xc8] sm:$0xff]  ;;  %v389_v46 = vld [vmem:[%s879_s17 + $0xd0] sm:$0xff] }
  0x4a   : > { %v419_v57 = vmul.f32 %v898_v37, %v381_v42  ;;  %v656_v61 = vmax.f32 %v624_v47, 0.0  ;;  %v595_v63 = vadd.f32 %v926_v2, %v557_v50  ;;  %v456_v0 = vadd.f32 %v916_v56, %v418_v51  ;;  %v528_v45 = vld [vmem:[%s888_s22 + $0xc8] sm:$0xff] }
  0x4b   : > { %v657_v62 = vmax.f32 %v625_v49, 0.0  ;;  %v626_v3 = vadd.f32 %v594_v53, %v454_v44  ;;  %v596_v4 = vadd.f32 %v926_v2, %v558_v55  ;;  %v559_v6 = vmul.f32 %v907_v48, %v521_v52 }
  0x4c   : > { %v457_v5 = vadd.f32 %v916_v56, %v419_v57  ;;  %689 = vst.msk [vmem:[%s950_s30 + $0x68] sm:$0xff] %vm675_vm0, %v656_v61  ;;  %v627_v7 = vadd.f32 %v595_v63, %v455_v54  ;;  %v420_v8 = vmul.f32 %v898_v37, %v382_v58  ;;  %v560_v9 = vmul.f32 %v907_v48, %v522_v59  ;;  %v529_v57 = vld [vmem:[%s888_s22 + $0xd0] sm:$0xff]  ;;  %v530_v63 = vld [vmem:[%s888_s22 + $0xd8] sm:$0xff] }
  0x4d   : > { %690 = vst.msk [vmem:[%s950_s30 + $0x70] sm:$0xff] %vm675_vm0, %v657_v62  ;;  %v421_v10 = vmul.f32 %v898_v37, %v383_v60  ;;  %v658_v12 = vmax.f32 %v626_v3, 0.0  ;;  %v628_v13 = vadd.f32 %v596_v4, %v456_v0  ;;  %v597_v14 = vadd.f32 %v926_v2, %v559_v6  ;;  %v390_v62 = vld [vmem:[%s879_s17 + $0xd8] sm:$0xff]  ;;  %v391_v0 = vld [vmem:[%s879_s17 + $0xe0] sm:$0xff] }
  0x4e   : > { %v561_v15 = vmul.f32 %v907_v48, %v523_v1  ;;  %v659_v19 = vmax.f32 %v627_v7, 0.0  ;;  %v458_v20 = vadd.f32 %v916_v56, %v420_v8  ;;  %v598_v21 = vadd.f32 %v926_v2, %v560_v9  ;;  %v531_v6 = vld [vmem:[%s888_s22 + $0xe0] sm:$0xff] }
  0x4f   : > { %v459_v22 = vadd.f32 %v916_v56, %v421_v10  ;;  %691 = vst.msk [vmem:[%s950_s30 + $0x78] sm:$0xff] %vm675_vm0, %v658_v12  ;;  %v660_v24 = vmax.f32 %v628_v13, 0.0  ;;  %v629_v25 = vadd.f32 %v597_v14, %v457_v5  ;;  %v422_v27 = vmul.f32 %v898_v37, %v384_v11 }
  0x50   : > { %v599_v26 = vadd.f32 %v926_v2, %v561_v15  ;;  %692 = vst.msk [vmem:[%s950_s30 + $0x80] sm:$0xff] %vm675_vm0, %v659_v19  ;;  %v630_v28 = vadd.f32 %v598_v21, %v458_v20  ;;  %v562_v29 = vmul.f32 %v907_v48, %v524_v16  ;;  %v423_v30 = vmul.f32 %v898_v37, %v385_v17  ;;  %v392_v15 = vld [vmem:[%s879_s17 + $0xe8] sm:$0xff]  ;;  %v393_v21 = vld [vmem:[%s879_s17 + $0xf0] sm:$0xff] }
  0x51   : > { %v563_v31 = vmul.f32 %v907_v48, %v525_v18  ;;  %693 = vst.msk [vmem:[%s950_s30 + $0x88] sm:$0xff] %vm675_vm0, %v660_v24  ;;  %v661_v34 = vmax.f32 %v629_v25, 0.0  ;;  %v460_v36 = vadd.f32 %v916_v56, %v422_v27  ;;  %v424_v38 = vmul.f32 %v898_v37, %v386_v23  ;;  %v532_v20 = vld [vmem:[%s888_s22 + $0xe8] sm:$0xff]  ;;  %v394_v27 = vld [vmem:[%s879_s17 + $0xf8] sm:$0xff] }
  0x52   : > { %v631_v35 = vadd.f32 %v599_v26, %v459_v22  ;;  %v662_v41 = vmax.f32 %v630_v28, 0.0  ;;  %v600_v42 = vadd.f32 %v926_v2, %v562_v29  ;;  %v461_v43 = vadd.f32 %v916_v56, %v423_v30  ;;  %v533_v22 = vld [vmem:[%s888_s22 + $0xf0] sm:$0xff] }
  0x53   : > { %v601_v44 = vadd.f32 %v926_v2, %v563_v31  ;;  %694 = vst.msk [vmem:[%s950_s30 + $0x90] sm:$0xff] %vm675_vm0, %v661_v34  ;;  %v462_v49 = vadd.f32 %v916_v56, %v424_v38  ;;  %v564_v50 = vmul.f32 %v907_v48, %v526_v32  ;;  %v425_v51 = vmul.f32 %v898_v37, %v387_v33 }
  0x54   : > { %v663_v47 = vmax.f32 %v631_v35, 0.0  ;;  %695 = vst.msk [vmem:[%s950_s30 + $0x98] sm:$0xff] %vm675_vm0, %v662_v41  ;;  %v632_v52 = vadd.f32 %v600_v42, %v460_v36  ;;  %v565_v54 = vmul.f32 %v907_v48, %v527_v39  ;;  %v426_v55 = vmul.f32 %v898_v37, %v388_v40  ;;  %v534_v36 = vld [vmem:[%s888_s22 + $0xf8] sm:$0xff] }
  0x55   : > { %v633_v53 = vadd.f32 %v601_v44, %v461_v43  ;;  %v602_v58 = vadd.f32 %v926_v2, %v564_v50  ;;  %v463_v59 = vadd.f32 %v916_v56, %v425_v51  ;;  %v566_v60 = vmul.f32 %v907_v48, %v528_v45 }
  0x56   : > { %696 = vst.msk [vmem:[%s950_s30 + $0xa0] sm:$0xff] %vm675_vm0, %v663_v47  ;;  %v427_v61 = vmul.f32 %v898_v37, %v389_v46  ;;  %v664_v1 = vmax.f32 %v632_v52, 0.0  ;;  %v603_v4 = vadd.f32 %v926_v2, %v565_v54  ;;  %v464_v5 = vadd.f32 %v916_v56, %v426_v55 }
  0x57   : > { %v665_v3 = vmax.f32 %v633_v53, 0.0  ;;  %v634_v7 = vadd.f32 %v602_v58, %v462_v49  ;;  %v604_v8 = vadd.f32 %v926_v2, %v566_v60  ;;  %v567_v10 = vmul.f32 %v907_v48, %v529_v57 }
  0x58   : > { %v465_v9 = vadd.f32 %v916_v56, %v427_v61  ;;  %697 = vst.msk [vmem:[%s950_s30 + $0xa8] sm:$0xff] %vm675_vm0, %v664_v1  ;;  %v635_v11 = vadd.f32 %v603_v4, %v463_v59  ;;  %v428_v12 = vmul.f32 %v898_v37, %v390_v62  ;;  %v568_v13 = vmul.f32 %v907_v48, %v530_v63 }
  0x59   : > { %698 = vst.msk [vmem:[%s950_s30 + $0xb0] sm:$0xff] %vm675_vm0, %v665_v3  ;;  %v429_v14 = vmul.f32 %v898_v37, %v391_v0  ;;  %v666_v16 = vmax.f32 %v634_v7, 0.0  ;;  %v636_v17 = vadd.f32 %v604_v8, %v464_v5  ;;  %v605_v18 = vadd.f32 %v926_v2, %v567_v10 }
  0x5a   : > { %v569_v19 = vmul.f32 %v907_v48, %v531_v6  ;;  %v667_v23 = vmax.f32 %v635_v11, 0.0  ;;  %v466_v24 = vadd.f32 %v916_v56, %v428_v12  ;;  %v606_v25 = vadd.f32 %v926_v2, %v568_v13 }
  0x5b   : > { %v467_v26 = vadd.f32 %v916_v56, %v429_v14  ;;  %699 = vst.msk [vmem:[%s950_s30 + $0xb8] sm:$0xff] %vm675_vm0, %v666_v16  ;;  %v668_v28 = vmax.f32 %v636_v17, 0.0  ;;  %v637_v29 = vadd.f32 %v605_v18, %v465_v9  ;;  %v430_v31 = vmul.f32 %v898_v37, %v392_v15 }
  0x5c   : > { %v607_v30 = vadd.f32 %v926_v2, %v569_v19  ;;  %700 = vst.msk [vmem:[%s950_s30 + $0xc0] sm:$0xff] %vm675_vm0, %v667_v23  ;;  %v638_v32 = vadd.f32 %v606_v25, %v466_v24  ;;  %v570_v33 = vmul.f32 %v907_v48, %v532_v20  ;;  %v431_v34 = vmul.f32 %v898_v37, %v393_v21 }
  0x5d   : > { %v571_v35 = vmul.f32 %v907_v48, %v533_v22  ;;  %701 = vst.msk [vmem:[%s950_s30 + $0xc8] sm:$0xff] %vm675_vm0, %v668_v28  ;;  %v669_v38 = vmax.f32 %v637_v29, 0.0  ;;  %v468_v40 = vadd.f32 %v916_v56, %v430_v31  ;;  %v432_v41 = vmul.f32 %v898_v37, %v394_v27 }
  0x5e   : > { %v639_v39 = vadd.f32 %v607_v30, %v467_v26  ;;  %v670_v42 = vmax.f32 %v638_v32, 0.0  ;;  %v608_v43 = vadd.f32 %v926_v2, %v570_v33  ;;  %v469_v44 = vadd.f32 %v916_v56, %v431_v34 }
  0x5f   : > { %v609_v45 = vadd.f32 %v926_v2, %v571_v35  ;;  %702 = vst.msk [vmem:[%s950_s30 + $0xd0] sm:$0xff] %vm675_vm0, %v669_v38  ;;  %v470_v47 = vadd.f32 %v916_v56, %v432_v41  ;;  %v572_v49 = vmul.f32 %v907_v48, %v534_v36 }
  0x60   : > { %v671_v46 = vmax.f32 %v639_v39, 0.0  ;;  %703 = vst.msk [vmem:[%s950_s30 + $0xd8] sm:$0xff] %vm675_vm0, %v670_v42  ;;  %v640_v37 = vadd.f32 %v608_v43, %v468_v40 }
  0x61   : > { %v641_v50 = vadd.f32 %v609_v45, %v469_v44  ;;  %v610_v51 = vadd.f32 %v926_v2, %v572_v49 }
  0x62   : > { %704 = vst.msk [vmem:[%s950_s30 + $0xe0] sm:$0xff] %vm675_vm0, %v671_v46  ;;  %v672_v52 = vmax.f32 %v640_v37, 0.0 }
  0x63   : > { %v673_v53 = vmax.f32 %v641_v50, 0.0  ;;  %v642_v54 = vadd.f32 %v610_v51, %v470_v47 }
  0x64   : > { %705 = vst.msk [vmem:[%s950_s30 + $0xe8] sm:$0xff] %vm675_vm0, %v672_v52 }
  0x65   : > { %706 = vst.msk [vmem:[%s950_s30 + $0xf0] sm:$0xff] %vm675_vm0, %v673_v53  ;;  %v674_v55 = vmax.f32 %v642_v54, 0.0 }
  0x67   : > { %707 = vst.msk [vmem:[%s950_s30 + $0xf8] sm:$0xff] %vm675_vm0, %v674_v55 }
  0x68 PF: > { %s18_s27 = sadd.s32 1, %s808_s27  }
  0x69   : > { %p15_p4 = scmp.ge.s32.totalorder %s18_s27, 4  }
  0x6b   :  { %17 = sbr.rel (!%p15_p4) target bundleno = 1 (0x1), region = 85 }

// kernel: moe_residual_block_forward.4
= control target key start
LH: loop header
LB: loop body
LE: loop exit
PB: predicated region body
PF: predicated region fallthrough
CT: control target
= control target key end

     0   :  { %14 = vsyncpa [#allocation3], 0  ;;  %s3950_s27 = smov 0   ;;  %s5942_s0 = inlined_call_operand.vmem [shape: f32[2,18,18,4], index: 0, kind: input, shape index: {}]   ;;  %s5943_s1 = inlined_call_operand.vmem [shape: f32[36,16], index: 1, kind: input, shape index: {}]   ;;  %s5944_s2 = inlined_call_operand.vmem [shape: f32[2,8], index: 2, kind: input, shape index: {}]   ;;  %s5945_s3 = inlined_call_operand.vmem [shape: f32[2,2], index: 3, kind: input, shape index: {}]   ;;  %s5946_s4 = inlined_call_operand.vmem [shape: f32[4,8], index: 4, kind: input, shape index: {}]   ;;  %s5947_s5 = inlined_call_operand.vmem [shape: f32[512,8], index: 5, kind: output, shape index: {0}]   ;;  %s5948_s6 = inlined_call_operand.vmem [shape: f32[2,8], index: 6, kind: output, shape index: {1}]   ;;  %s5949_s7 = inlined_call_operand.vmem [shape: f32[512,8], index: 7, kind: output, shape index: {2}]   ;;  %s5950_s8 = inlined_call_operand.vmem [shape: f32[2,8], index: 8, kind: output, shape index: {3}]  }
   0x1 LB: > { %s3956_s28 = sadd.s32 4294967295, %s3891_s27   ;;  %p3375_p0 = scmp.ge.s32.totalorder %s3891_s27, 1  ;;  %s3891_s27 = sphi %s3950_s27, %s20_s27  }
   0x2   : > { %p229_p1 = scmp.lt.s32.totalorder %s3891_s27, 3  ;;  %s248_s9 = sshll.u32 %s5945_s3, 4  ;;  %s249_s9 = int_to_ptr.vmem [resolvable:$true] %s248_s9 }
   0x3   : > { %p3835_p4 = scmp.eq.s32.totalorder %s3956_s28, 0  ;;  %s3866_s11 = scalar_lea.vmem %s249_s9, 32 }
   0x4   : > { %p3964_p3 = pnand %p3375_p0, %p229_p1  ;;  %p3867_p7 = scmp.ne.s32.totalorder %s249_s9, %s3866_s11 }
   0x5   : > { %p3874_p11 = scmp.lt.s32.totalorder %s249_s9, %s249_s9  ;;  %p3875_p12 = scmp.lt.s32.totalorder %s3866_s11, %s3866_s11 }
   0x6   : > { %p3831_p5 = pneg %p3964_p3 }
   0x7   : > { %p3876_p13 = por %p3875_p12, %p3874_p11 }
   0x8   : > { %p3832_p6 = pnand %p3835_p4, %p3831_p5 }
   0xa   : > { %p3868_p8 = pneg %p3832_p6 }
   0xc   : > { %p3869_p9 = pnand %p3868_p8, %p3867_p7 }
   0xe   : > { %p3870_p10 = pneg %p3869_p9 }
  0x10   : > { %p3877_p2 = pnand %p3876_p13, %p3870_p10 }
  0x12   : > { %3880 = shalt.err (!%p3877_p2)
}
  0x13   : > { %s3893_s12 = smov [#allocation2]   ;;  %272 = sbr.rel (%p3964_p3) target bundleno = 1288 (0x508), region = 40 }
  0x14   : > { %3834 = dma.vmem_to_smem (!%p3832_p6), %s249_s9, 32, %s3893_s12, [#allocation3]  }
  0x18   : > { %3886 = dma.done.wait (%p3835_p4), [#allocation3], 32  }
  0x19   : > { %3888 = vsyncadd (%p3835_p4), [#allocation3], 4294967264 }
  0x1a   : > { %278 = sfence }
  0x1b   : > { %p312_p0 = scmp.lt.s32.totalorder %s3956_s28, 1  ;;  %s3894_s18 = smov 4   ;;  %vm2009_vm0 = vcmask 1043456   ;;  %vm1643_vm1 = vcmask 31744   ;;  %vm1676_vm2 = vcmask 64512   ;;  %vm1709_vm3 = vcmask 97280  }
  0x1c   : > { %s3895_s19 = smov 8   ;;  %s3896_s20 = smov 12   ;;  %vm1742_vm4 = vcmask 130048   ;;  %vm1775_vm5 = vcmask 162816   ;;  %vm1808_vm6 = vcmask 195584   ;;  %vm1841_vm7 = vcmask 228352  }
  0x1d   : > { %s313_s13 = scalar_select %p312_p0, %s3956_s28, 1  ;;  %vm1874_vm8 = vcmask 261120   ;;  %vm1912_vm9 = vcmask 293888   ;;  %vm2744_vm10 = vcmask 1040384  }
  0x1e   : > { %s3897_s21 = smov 16   ;;  %s3898_s26 = smov 20  }
  0x1f   : > { %s3826_s14 = smul.u32 432, %s313_s13  ;;  %s3899_s11 = smov 24  }
  0x20   : > { %s3901_s15 = smov 32   ;;  %s3610_s16 = sshll.u32 %s3956_s28, 7 }
  0x21   : > { %s3984_s17 = scalar_lea.vmem %s5942_s0, %s3826_s14  ;;  %s3900_s14 = smov 28  }
  0x22   : > { %v3987_v0 = vld [vmem:[%s3984_s17 + $0x19] sm:$0xff]  ;;  %v361_v1 = vld [vmem:[%s3984_s17 + $0x1] sm:$0xff]  ;;  %v362_v3 = vld [vmem:[%s3984_s17 + $0x9] sm:$0xff]  ;;  %s3902_s25 = smov 120   ;;  %p6111_p2 = scmp.ne.s32.totalorder %s3956_s28, 0 }
  0x23   : > { %5971 = vst [vmem:[#allocation5_spill] sm:$0xff] %v3987_v0  ;;  %655 = vrot.lane.b32.xlu1 %v3987_v0, %s3894_s18  ;;  %651 = vrot.lane.b32.xlu0 %v361_v1, %s3894_s18  ;;  %v3994_v2 = vld [vmem:[%s3984_s17 + $0x21] sm:$0xff]  ;;  %v4001_v4 = vld [vmem:[%s3984_s17 + $0x39] sm:$0xff] }
  0x24   : > { %5972 = vst [vmem:[#allocation6_spill] sm:$0xff] %v3994_v2  ;;  %5973 = vst [vmem:[#allocation7_spill] sm:$0xff] %v4001_v4  ;;  %v4004_v5 = vld [vmem:[%s3984_s17 + $0x31] sm:$0xff]  ;;  %v4014_v7 = vld [vmem:[%s3984_s17 + $0x49] sm:$0xff] }
  0x25   : > { %5974 = vst [vmem:[#allocation8_spill] sm:$0xff] %v4004_v5  ;;  %v4011_v6 = vld [vmem:[%s3984_s17 + $0x51] sm:$0xff]  ;;  %5976 = vst [vmem:[#allocation10_spill] sm:$0xff] %v4014_v7  ;;  %v4021_v8 = vld [vmem:[%s3984_s17 + $0x69] sm:$0xff] }
  0x26   : > { %5975 = vst [vmem:[#allocation9_spill] sm:$0xff] %v4011_v6  ;;  %5977 = vst [vmem:[#allocation11_spill] sm:$0xff] %v4021_v8  ;;  %v4024_v9 = vld [vmem:[%s3984_s17 + $0x61] sm:$0xff]  ;;  %v4034_v11 = vld [vmem:[%s3984_s17 + $0x79] sm:$0xff] }
  0x27   : > { %657 = vrot.lane.b32.xlu1 %v3994_v2, %s3894_s18  ;;  %653 = vrot.lane.b32.xlu0 %v362_v3, %s3894_s18  ;;  %5978 = vst [vmem:[#allocation12_spill] sm:$0xff] %v4024_v9  ;;  %v4031_v10 = vld [vmem:[%s3984_s17 + $0x81] sm:$0xff]  ;;  %5980 = vst [vmem:[#allocation14_spill] sm:$0xff] %v4034_v11  ;;  %v4041_v12 = vld [vmem:[%s3984_s17 + $0x99] sm:$0xff] }
  0x28   : > { %5979 = vst [vmem:[#allocation13_spill] sm:$0xff] %v4031_v10  ;;  %5981 = vst [vmem:[#allocation15_spill] sm:$0xff] %v4041_v12  ;;  %v4044_v13 = vld [vmem:[%s3984_s17 + $0x91] sm:$0xff]  ;;  %v4054_v15 = vld [vmem:[%s3984_s17 + $0xa9] sm:$0xff] }
  0x29   : > { %5982 = vst [vmem:[#allocation16_spill] sm:$0xff] %v4044_v13  ;;  %v4051_v14 = vld [vmem:[%s3984_s17 + $0xb1] sm:$0xff]  ;;  %5984 = vst [vmem:[#allocation18_spill] sm:$0xff] %v4054_v15  ;;  %v378_v16 = vld [vmem:[%s3984_s17 + $0xc9] sm:$0xff] }
  0x2a   : > { %5983 = vst [vmem:[#allocation17_spill] sm:$0xff] %v4051_v14  ;;  %v377_v17 = vld [vmem:[%s3984_s17 + $0xc1] sm:$0xff]  ;;  %v379_v19 = vld [vmem:[%s3984_s17 + $0xd9] sm:$0xff]  ;;  %v381_v21 = vld [vmem:[%s3984_s17 + $0xf1] sm:$0xff] }
  0x2b   : > { %661 = vrot.lane.b32.xlu1 %v4001_v4, %s3894_s18  ;;  %659 = vrot.lane.b32.xlu0 %v4004_v5, %s3894_s18  ;;  %v380_v18 = vld [vmem:[%s3984_s17 + $0xe1] sm:$0xff]  ;;  %v382_v20 = vld [vmem:[%s3984_s17 + $0xf9] sm:$0xff] }
  0x2c   : > { %v384_v22 = vld [vmem:[%s3984_s17 + $0x111] sm:$0xff]  ;;  %v383_v23 = vld [vmem:[%s3984_s17 + $0x109] sm:$0xff]  ;;  %v385_v25 = vld [vmem:[%s3984_s17 + $0x121] sm:$0xff] }
  0x2d   : > { %v386_v24 = vld [vmem:[%s3984_s17 + $0x129] sm:$0xff]  ;;  %v388_v26 = vld [vmem:[%s3984_s17 + $0x141] sm:$0xff]  ;;  %v387_v27 = vld [vmem:[%s3984_s17 + $0x139] sm:$0xff] }
  0x2e   : > { %v390_v28 = vld [vmem:[%s3984_s17 + $0x159] sm:$0xff]  ;;  %v389_v29 = vld [vmem:[%s3984_s17 + $0x151] sm:$0xff]  ;;  %v391_v31 = vld [vmem:[%s3984_s17 + $0x169] sm:$0xff] }
  0x2f   : > { %665 = vrot.lane.b32.xlu1 %v4011_v6, %s3894_s18  ;;  %663 = vrot.lane.b32.xlu0 %v4014_v7, %s3894_s18  ;;  %v392_v30 = vld [vmem:[%s3984_s17 + $0x171] sm:$0xff]  ;;  %v393_v33 = vld [vmem:[%s3984_s17 + $0x2] sm:$0xff] }
  0x30   : > { %v394_v32 = vld [vmem:[%s3984_s17 + $0xa] sm:$0xff]  ;;  %v4097_v34 = vld [vmem:[%s3984_s17 + $0x22] sm:$0xff]  ;;  %v4100_v35 = vld [vmem:[%s3984_s17 + $0x1a] sm:$0xff] }
  0x31   : > { %v4107_v36 = vld [vmem:[%s3984_s17 + $0x3a] sm:$0xff]  ;;  %v4110_v37 = vld [vmem:[%s3984_s17 + $0x32] sm:$0xff]  ;;  %v4120_v39 = vld [vmem:[%s3984_s17 + $0x4a] sm:$0xff] }
  0x32   : > { %v4117_v38 = vld [vmem:[%s3984_s17 + $0x52] sm:$0xff]  ;;  %v4127_v40 = vld [vmem:[%s3984_s17 + $0x6a] sm:$0xff]  ;;  %v4130_v41 = vld [vmem:[%s3984_s17 + $0x62] sm:$0xff] }
  0x33   : > { %669 = vrot.lane.b32.xlu1 %v4021_v8, %s3894_s18  ;;  %667 = vrot.lane.b32.xlu0 %v4024_v9, %s3894_s18  ;;  %v4137_v42 = vld [vmem:[%s3984_s17 + $0x82] sm:$0xff]  ;;  %v4140_v43 = vld [vmem:[%s3984_s17 + $0x7a] sm:$0xff] }
  0x34   : > { %v4147_v44 = vld [vmem:[%s3984_s17 + $0x9a] sm:$0xff]  ;;  %v4150_v45 = vld [vmem:[%s3984_s17 + $0x92] sm:$0xff]  ;;  %v4160_v47 = vld [vmem:[%s3984_s17 + $0xaa] sm:$0xff] }
  0x35   : > { %v4157_v46 = vld [vmem:[%s3984_s17 + $0xb2] sm:$0xff]  ;;  %v4167_v48 = vld [vmem:[%s3984_s17 + $0xca] sm:$0xff]  ;;  %v4170_v49 = vld [vmem:[%s3984_s17 + $0xc2] sm:$0xff] }
  0x36   : > { %v412_v50 = vld [vmem:[%s3984_s17 + $0xe2] sm:$0xff]  ;;  %v411_v51 = vld [vmem:[%s3984_s17 + $0xda] sm:$0xff]  ;;  %v413_v53 = vld [vmem:[%s3984_s17 + $0xf2] sm:$0xff] }
  0x37   : > { %673 = vrot.lane.b32.xlu1 %v4031_v10, %s3894_s18  ;;  %671 = vrot.lane.b32.xlu0 %v4034_v11, %s3894_s18  ;;  %v414_v52 = vld [vmem:[%s3984_s17 + $0xfa] sm:$0xff]  ;;  %v416_v54 = vld [vmem:[%s3984_s17 + $0x112] sm:$0xff] }
  0x38   : > { %v415_v55 = vld [vmem:[%s3984_s17 + $0x10a] sm:$0xff]  ;;  %v417_v57 = vld [vmem:[%s3984_s17 + $0x122] sm:$0xff]  ;;  %v419_v59 = vld [vmem:[%s3984_s17 + $0x13a] sm:$0xff] }
  0x39   : > { %v418_v56 = vld [vmem:[%s3984_s17 + $0x12a] sm:$0xff]  ;;  %v420_v58 = vld [vmem:[%s3984_s17 + $0x142] sm:$0xff]  ;;  %v422_v62 = vld [vmem:[%s3984_s17 + $0x15a] sm:$0xff] }
  0x3a   : > { %v421_v63 = vld [vmem:[%s3984_s17 + $0x152] sm:$0xff] }
  0x3b   : > { %677 = vrot.lane.b32.xlu1 %v4041_v12, %s3894_s18  ;;  %675 = vrot.lane.b32.xlu0 %v4044_v13, %s3894_s18 }
  0x3f   : > { %681 = vrot.lane.b32.xlu1 %v4051_v14, %s3894_s18  ;;  %679 = vrot.lane.b32.xlu0 %v4054_v15, %s3894_s18 }
  0x43   : > { %685 = vrot.lane.b32.xlu1 %v378_v16, %s3894_s18  ;;  %683 = vrot.lane.b32.xlu0 %v377_v17, %s3894_s18  ;;  %v424_v16 = vld [vmem:[%s3984_s17 + $0x172] sm:$0xff]  ;;  %v423_v17 = vld [vmem:[%s3984_s17 + $0x16a] sm:$0xff] }
  0x47   : > { %689 = vrot.lane.b32.xlu1 %v380_v18, %s3894_s18  ;;  %687 = vrot.lane.b32.xlu0 %v379_v19, %s3894_s18 }
  0x4b   : > { %693 = vrot.lane.b32.xlu1 %v382_v20, %s3894_s18  ;;  %691 = vrot.lane.b32.xlu0 %v381_v21, %s3894_s18 }
  0x4f   : > { %697 = vrot.lane.b32.xlu1 %v384_v22, %s3894_s18  ;;  %695 = vrot.lane.b32.xlu0 %v383_v23, %s3894_s18  ;;  %v4221_v22 = vld [vmem:[%s3984_s17 + $0x18] sm:$0xff]  ;;  %v4224_v23 = vld [vmem:[%s3984_s17 + $0x20] sm:$0xff] }
  0x53   : > { %701 = vrot.lane.b32.xlu1 %v386_v24, %s3894_s18  ;;  %699 = vrot.lane.b32.xlu0 %v385_v25, %s3894_s18 }
  0x57   : > { %705 = vrot.lane.b32.xlu1 %v388_v26, %s3894_s18  ;;  %703 = vrot.lane.b32.xlu0 %v387_v27, %s3894_s18  ;;  %v4235_v26 = vld [vmem:[%s3984_s17 + $0x38] sm:$0xff]  ;;  %v4238_v27 = vld [vmem:[%s3984_s17 + $0x30] sm:$0xff] }
  0x5b   : > { %709 = vrot.lane.b32.xlu1 %v390_v28, %s3894_s18  ;;  %707 = vrot.lane.b32.xlu0 %v389_v29, %s3894_s18 }
  0x5f   : > { %713 = vrot.lane.b32.xlu1 %v392_v30, %s3894_s18  ;;  %711 = vrot.lane.b32.xlu0 %v391_v31, %s3894_s18  ;;  %v4249_v30 = vld [vmem:[%s3984_s17 + $0x50] sm:$0xff]  ;;  %v4252_v31 = vld [vmem:[%s3984_s17 + $0x48] sm:$0xff]  ;;  %s2308_s18 = sadd.s32 1, %s3610_s16 }
  0x63   : > { %781 = vrot.lane.b32.xlu1 %v394_v32, %s3895_s19  ;;  %779 = vrot.lane.b32.xlu0 %v393_v33, %s3895_s19 }
  0x67   : > { %785 = vrot.lane.b32.xlu1 %v4097_v34, %s3895_s19  ;;  %783 = vrot.lane.b32.xlu0 %v4100_v35, %s3895_s19 }
  0x6b   : > { %789 = vrot.lane.b32.xlu1 %v4107_v36, %s3895_s19  ;;  %787 = vrot.lane.b32.xlu0 %v4110_v37, %s3895_s19 }
  0x6f   : > { %793 = vrot.lane.b32.xlu1 %v4117_v38, %s3895_s19  ;;  %791 = vrot.lane.b32.xlu0 %v4120_v39, %s3895_s19 }
  0x73   : > { %797 = vrot.lane.b32.xlu1 %v4127_v40, %s3895_s19  ;;  %795 = vrot.lane.b32.xlu0 %v4130_v41, %s3895_s19 }
  0x77   : > { %801 = vrot.lane.b32.xlu1 %v4137_v42, %s3895_s19  ;;  %799 = vrot.lane.b32.xlu0 %v4140_v43, %s3895_s19 }
  0x7b   : > { %805 = vrot.lane.b32.xlu1 %v4147_v44, %s3895_s19  ;;  %803 = vrot.lane.b32.xlu0 %v4150_v45, %s3895_s19 }
  0x7f   : > { %809 = vrot.lane.b32.xlu1 %v4157_v46, %s3895_s19  ;;  %807 = vrot.lane.b32.xlu0 %v4160_v47, %s3895_s19 }
  0x83   : > { %813 = vrot.lane.b32.xlu1 %v4167_v48, %s3895_s19  ;;  %811 = vrot.lane.b32.xlu0 %v4170_v49, %s3895_s19 }
  0x87   : > { %817 = vrot.lane.b32.xlu1 %v412_v50, %s3895_s19  ;;  %815 = vrot.lane.b32.xlu0 %v411_v51, %s3895_s19  ;;  %v4263_v50 = vld [vmem:[%s3984_s17 + $0x68] sm:$0xff]  ;;  %v4266_v51 = vld [vmem:[%s3984_s17 + $0x60] sm:$0xff] }
  0x8b   : > { %821 = vrot.lane.b32.xlu1 %v414_v52, %s3895_s19  ;;  %819 = vrot.lane.b32.xlu0 %v413_v53, %s3895_s19 }
  0x8f   : > { %825 = vrot.lane.b32.xlu1 %v416_v54, %s3895_s19  ;;  %823 = vrot.lane.b32.xlu0 %v415_v55, %s3895_s19  ;;  %v4277_v54 = vld [vmem:[%s3984_s17 + $0x80] sm:$0xff]  ;;  %v4280_v55 = vld [vmem:[%s3984_s17 + $0x78] sm:$0xff] }
  0x93   : > { %829 = vrot.lane.b32.xlu1 %v418_v56, %s3895_s19  ;;  %827 = vrot.lane.b32.xlu0 %v417_v57, %s3895_s19 }
  0x95   : > { %v4194_v60 = vpop.permute.xlu1 %655  ;;  %v4196_v61 = vpop.permute.xlu0 %651 }
  0x97   : > { %833 = vrot.lane.b32.xlu1 %v420_v58, %s3895_s19  ;;  %831 = vrot.lane.b32.xlu0 %v419_v59, %s3895_s19  ;;  %v4291_v58 = vld [vmem:[%s3984_s17 + $0x98] sm:$0xff]  ;;  %v4294_v59 = vld [vmem:[%s3984_s17 + $0x90] sm:$0xff] }
  0x98   : > { %5996 = vst [vmem:[#allocation30_spill] sm:$0xff] %v4291_v58 }
  0x99   : > { %v4202_v1 = vpop.permute.xlu1 %657  ;;  %v4204_v3 = vpop.permute.xlu0 %653 }
  0x9b   : > { %837 = vrot.lane.b32.xlu1 %v422_v62, %s3895_s19  ;;  %835 = vrot.lane.b32.xlu0 %v421_v63, %s3895_s19 }
  0x9d   : > { %v4210_v18 = vpop.permute.xlu1 %661  ;;  %v4212_v19 = vpop.permute.xlu0 %659 }
  0x9f   : > { %841 = vrot.lane.b32.xlu1 %v424_v16, %s3895_s19  ;;  %839 = vrot.lane.b32.xlu0 %v423_v17, %s3895_s19  ;;  %v4305_v16 = vld [vmem:[%s3984_s17 + $0xb0] sm:$0xff]  ;;  %v4308_v17 = vld [vmem:[%s3984_s17 + $0xa8] sm:$0xff]  ;;  %s3381_s19 = sshll.u32 %s3956_s28, 5 }
  0xa0   : > { %5999 = vst [vmem:[#allocation33_spill] sm:$0xff] %v4305_v16  ;;  %6000 = vst [vmem:[#allocation34_spill] sm:$0xff] %v4308_v17  ;;  %p318_p1 = scmp.lt.s32.totalorder %s3381_s19, 63 }
  0xa1   : > { %v4216_v20 = vpop.permute.xlu1 %665  ;;  %v4218_v21 = vpop.permute.xlu0 %663 }
  0xa2   : > { %5985 = vst [vmem:[#allocation19_spill] sm:$0xff] %v4216_v20  ;;  %v4375_v20 = vld [vmem:[%s3984_s17 + $0x120] sm:$0xff]  ;;  %s6128_s19 = smov (!%p318_p1, %s3381_s19), 63 }
  0xa3   : > { %909 = vrot.lane.b32.xlu1 %v4224_v23, %s3896_s20  ;;  %907 = vrot.lane.b32.xlu0 %v4221_v22, %s3896_s20  ;;  %6012 = vst [vmem:[#allocation46_spill] sm:$0xff] %v4375_v20 }
  0xa5   : > { %v4230_v24 = vpop.permute.xlu1 %669  ;;  %v4232_v25 = vpop.permute.xlu0 %667 }
  0xa6   : > { %5986 = vst [vmem:[#allocation20_spill] sm:$0xff] %v4230_v24  ;;  %5987 = vst [vmem:[#allocation21_spill] sm:$0xff] %v4232_v25  ;;  %v4361_v24 = vld [vmem:[%s3984_s17 + $0x110] sm:$0xff]  ;;  %v4364_v25 = vld [vmem:[%s3984_s17 + $0x108] sm:$0xff] }
  0xa7   : > { %913 = vrot.lane.b32.xlu1 %v4235_v26, %s3896_s20  ;;  %911 = vrot.lane.b32.xlu0 %v4238_v27, %s3896_s20  ;;  %6009 = vst [vmem:[#allocation43_spill] sm:$0xff] %v4361_v24 }
  0xa9   : > { %v4244_v28 = vpop.permute.xlu1 %673  ;;  %v4246_v29 = vpop.permute.xlu0 %671 }
  0xaa   : > { %5988 = vst [vmem:[#allocation22_spill] sm:$0xff] %v4244_v28  ;;  %5989 = vst [vmem:[#allocation23_spill] sm:$0xff] %v4246_v29  ;;  %v4347_v28 = vld [vmem:[%s3984_s17 + $0xf8] sm:$0xff] }
  0xab   : > { %917 = vrot.lane.b32.xlu1 %v4249_v30, %s3896_s20  ;;  %915 = vrot.lane.b32.xlu0 %v4252_v31, %s3896_s20 }
  0xad   : > { %v4258_v32 = vpop.permute.xlu1 %677  ;;  %v4260_v33 = vpop.permute.xlu0 %675 }
  0xae   : > { %5990 = vst [vmem:[#allocation24_spill] sm:$0xff] %v4258_v32  ;;  %5991 = vst [vmem:[#allocation25_spill] sm:$0xff] %v4260_v33  ;;  %v4333_v32 = vld [vmem:[%s3984_s17 + $0xe0] sm:$0xff] }
  0xaf   : > { %921 = vrot.lane.b32.xlu1 %v4263_v50, %s3896_s20  ;;  %919 = vrot.lane.b32.xlu0 %v4266_v51, %s3896_s20 }
  0xb1   : > { %v4272_v52 = vpop.permute.xlu1 %681  ;;  %v4274_v53 = vpop.permute.xlu0 %679 }
  0xb2   : > { %5992 = vst [vmem:[#allocation26_spill] sm:$0xff] %v4272_v52  ;;  %5993 = vst [vmem:[#allocation27_spill] sm:$0xff] %v4274_v53  ;;  %v4319_v52 = vld [vmem:[%s3984_s17 + $0xc8] sm:$0xff] }
  0xb3   : > { %925 = vrot.lane.b32.xlu1 %v4277_v54, %s3896_s20  ;;  %923 = vrot.lane.b32.xlu0 %v4280_v55, %s3896_s20 }
  0xb5   : > { %v4286_v56 = vpop.permute.xlu1 %685  ;;  %v4288_v57 = vpop.permute.xlu0 %683 }
  0xb6   : > { %5994 = vst [vmem:[#allocation28_spill] sm:$0xff] %v4286_v56  ;;  %5995 = vst [vmem:[#allocation29_spill] sm:$0xff] %v4288_v57 }
  0xb7   : > { %929 = vrot.lane.b32.xlu1 %v4291_v58, %s3896_s20  ;;  %927 = vrot.lane.b32.xlu0 %v4294_v59, %s3896_s20 }
  0xb9   : > { %v4300_v62 = vpop.permute.xlu1 %689  ;;  %v4302_v63 = vpop.permute.xlu0 %687 }
  0xba   : > { %5997 = vst [vmem:[#allocation31_spill] sm:$0xff] %v4300_v62  ;;  %5998 = vst [vmem:[#allocation32_spill] sm:$0xff] %v4302_v63  ;;  %v4322_v62 = vld [vmem:[%s3984_s17 + $0xc0] sm:$0xff] }
  0xbb   : > { %933 = vrot.lane.b32.xlu1 %v4305_v16, %s3896_s20  ;;  %931 = vrot.lane.b32.xlu0 %v4308_v17, %s3896_s20 }
  0xbd   : > { %v4314_v56 = vpop.permute.xlu1 %693  ;;  %v4316_v57 = vpop.permute.xlu0 %691 }
  0xbe   : > { %6001 = vst [vmem:[#allocation35_spill] sm:$0xff] %v4314_v56  ;;  %6002 = vst [vmem:[#allocation36_spill] sm:$0xff] %v4316_v57  ;;  %v4336_v56 = vld [vmem:[%s3984_s17 + $0xd8] sm:$0xff] }
  0xbf   : > { %937 = vrot.lane.b32.xlu1 %v4319_v52, %s3896_s20  ;;  %935 = vrot.lane.b32.xlu0 %v4322_v62, %s3896_s20 }
  0xc1   : > { %v4328_v63 = vpop.permute.xlu1 %697  ;;  %v4330_v53 = vpop.permute.xlu0 %695 }
  0xc2   : > { %6003 = vst [vmem:[#allocation37_spill] sm:$0xff] %v4328_v63  ;;  %6004 = vst [vmem:[#allocation38_spill] sm:$0xff] %v4330_v53  ;;  %v4350_v63 = vld [vmem:[%s3984_s17 + $0xf0] sm:$0xff] }
  0xc3   : > { %941 = vrot.lane.b32.xlu1 %v4333_v32, %s3896_s20  ;;  %939 = vrot.lane.b32.xlu0 %v4336_v56, %s3896_s20 }
  0xc5   : > { %v4342_v57 = vpop.permute.xlu1 %701  ;;  %v4344_v33 = vpop.permute.xlu0 %699 }
  0xc6   : > { %6005 = vst [vmem:[#allocation39_spill] sm:$0xff] %v4342_v57  ;;  %6006 = vst [vmem:[#allocation40_spill] sm:$0xff] %v4344_v33 }
  0xc7   : > { %945 = vrot.lane.b32.xlu1 %v4347_v28, %s3896_s20  ;;  %943 = vrot.lane.b32.xlu0 %v4350_v63, %s3896_s20 }
  0xc9   : > { %v4356_v53 = vpop.permute.xlu1 %705  ;;  %v4358_v29 = vpop.permute.xlu0 %703 }
  0xca   : > { %6007 = vst [vmem:[#allocation41_spill] sm:$0xff] %v4356_v53  ;;  %6008 = vst [vmem:[#allocation42_spill] sm:$0xff] %v4358_v29  ;;  %v1911_v53 = vld [vmem:[%s5943_s1 + $0x20] sm:$0xf] }
  0xcb   : > { %949 = vrot.lane.b32.xlu1 %v4361_v24, %s3896_s20  ;;  %947 = vrot.lane.b32.xlu0 %v4364_v25, %s3896_s20 }
  0xcc   : > { %3718 = vmatprep.subr.msk.mxu0 %vm2009_vm0, %v1911_v53 }
  0xcd   : > { %v4370_v57 = vpop.permute.xlu1 %709  ;;  %v4372_v33 = vpop.permute.xlu0 %707  ;;  %3719 = vmatpush3.msk.msra.mxu0 %vm2009_vm0, %v1911_v53  ;;  %v1908_v53 = vld [vmem:[%s5943_s1 + $0x8] sm:$0xff] }
  0xce   : > { %6010 = vst [vmem:[#allocation44_spill] sm:$0xff] %v4370_v57  ;;  %6011 = vst [vmem:[#allocation45_spill] sm:$0xff] %v4372_v33  ;;  %v1909_v33 = vld [vmem:[%s5943_s1 + $0x10] sm:$0xff] }
  0xcf   : > { %1035 = vrot.lane.b32.xlu1 %v3987_v0, %s3897_s21  ;;  %951 = vrot.lane.b32.xlu0 %v4375_v20, %s3896_s20  ;;  %v1910_v0 = vld [vmem:[%s5943_s1 + $0x18] sm:$0xff] }
  0xd0   : > { %3720 = vmatprep.subr.mxu0 %v1910_v0 }
  0xd1   : > { %v4385_v29 = vpop.permute.xlu1 %713  ;;  %v4387_v57 = vpop.permute.xlu0 %711  ;;  %3721 = vmatpush3.msra.mxu0 %v1910_v0  ;;  %v1907_v0 = vld [vmem:[%s5943_s1] sm:$0xff] }
  0xd2   : > { %6013 = vst [vmem:[#allocation47_spill] sm:$0xff] %v4385_v29  ;;  %6014 = vst [vmem:[#allocation48_spill] sm:$0xff] %v4387_v57  ;;  %3722 = vmatprep.subr.mxu0 %v1909_v33 }
  0xd3   : > { %1163 = vrot.lane.b32.xlu1 %v4100_v35, %s3898_s26  ;;  %1037 = vrot.lane.b32.xlu0 %v3994_v2, %s3897_s21 }
  0xd4   : > { %3723 = vmatpush3.msra.mxu0 %v1909_v33 }
  0xd5   : > { %v4400_v29 = vpop.permute.xlu1 %781  ;;  %v4402_v57 = vpop.permute.xlu0 %779  ;;  %3724 = vmatprep.subr.mxu0 %v1908_v53 }
  0xd6   : > { %3725 = vmatpush3.msra.mxu0 %v1908_v53 }
  0xd7   : > { %1291 = vrot.lane.b32.xlu1 %v4238_v27, %s3899_s11  ;;  %1165 = vrot.lane.b32.xlu0 %v4097_v34, %s3898_s26 }
  0xd8   : > { %3726 = vmatprep.subr.mxu0 %v1907_v0 }
  0xd9   : > { %v4411_v35 = vpop.permute.xlu1 %785  ;;  %v4413_v2 = vpop.permute.xlu0 %783  ;;  %3727 = vmatpush3.msra.mxu0 %v1907_v0 }
  0xdb   : > { %1419 = vrot.lane.b32.xlu1 %v4004_v5, %s3900_s14  ;;  %1293 = vrot.lane.b32.xlu0 %v4235_v26, %s3899_s11 }
  0xdd   : > { %v4422_v34 = vpop.permute.xlu1 %789  ;;  %v4424_v33 = vpop.permute.xlu0 %787 }
  0xdf   : > { %1421 = vrot.lane.b32.xlu1 %v4001_v4, %s3900_s14  ;;  %1039 = vrot.lane.b32.xlu0 %v4004_v5, %s3897_s21 }
  0xe1   : > { %v4430_v53 = vpop.permute.xlu1 %793  ;;  %v4432_v20 = vpop.permute.xlu0 %791 }
  0xe2   : > { %6015 = vst [vmem:[#allocation49_spill] sm:$0xff] %v4430_v53 }
  0xe3   : > { %1041 = vrot.lane.b32.xlu1 %v4001_v4, %s3897_s21  ;;  %1547 = vrot.lane.b32.xlu0 %v4110_v37, %s3901_s15 }
  0xe5   : > { %v4438_v24 = vpop.permute.xlu1 %797  ;;  %v4440_v0 = vpop.permute.xlu0 %795 }
  0xe6   : > { %6016 = vst [vmem:[#allocation50_spill] sm:$0xff] %v4438_v24 }
  0xe7   : > { %1549 = vrot.lane.b32.xlu1 %v4107_v36, %s3901_s15  ;;  %1167 = vrot.lane.b32.xlu0 %v4110_v37, %s3898_s26 }
  0xe9   : > { %v4446_v5 = vpop.permute.xlu1 %801  ;;  %v4448_v53 = vpop.permute.xlu0 %799 }
  0xea   : > { %6017 = vst [vmem:[#allocation51_spill] sm:$0xff] %v4446_v5 }
  0xeb   : > { %1295 = vrot.lane.b32.xlu1 %v4252_v31, %s3899_s11  ;;  %1169 = vrot.lane.b32.xlu0 %v4107_v36, %s3898_s26 }
  0xed   : > { %v4454_v4 = vpop.permute.xlu1 %805  ;;  %v4456_v24 = vpop.permute.xlu0 %803 }
  0xee   : > { %6018 = vst [vmem:[#allocation52_spill] sm:$0xff] %v4454_v4  ;;  %6019 = vst [vmem:[#allocation53_spill] sm:$0xff] %v4456_v24 }
  0xef   : > { %1423 = vrot.lane.b32.xlu1 %v4014_v7, %s3900_s14  ;;  %1297 = vrot.lane.b32.xlu0 %v4249_v30, %s3899_s11 }
  0xf1   : > { %v4462_v37 = vpop.permute.xlu1 %809  ;;  %v4464_v5 = vpop.permute.xlu0 %807 }
  0xf2   : > { %6020 = vst [vmem:[#allocation54_spill] sm:$0xff] %v4462_v37  ;;  %6021 = vst [vmem:[#allocation55_spill] sm:$0xff] %v4464_v5 }
  0xf3   : > { %1425 = vrot.lane.b32.xlu1 %v4011_v6, %s3900_s14  ;;  %1043 = vrot.lane.b32.xlu0 %v4014_v7, %s3897_s21 }
  0xf5   : > { %v4470_v36 = vpop.permute.xlu1 %813  ;;  %v4472_v4 = vpop.permute.xlu0 %811 }
  0xf6   : > { %6022 = vst [vmem:[#allocation56_spill] sm:$0xff] %v4470_v36  ;;  %6023 = vst [vmem:[#allocation57_spill] sm:$0xff] %v4472_v4 }
  0xf7   : > { %1045 = vrot.lane.b32.xlu1 %v4011_v6, %s3897_s21  ;;  %1551 = vrot.lane.b32.xlu0 %v4120_v39, %s3901_s15 }
  0xf9   : > { %v4478_v24 = vpop.permute.xlu1 %817  ;;  %v4480_v37 = vpop.permute.xlu0 %815 }
  0xfa   : > { %6024 = vst [vmem:[#allocation58_spill] sm:$0xff] %v4478_v24  ;;  %6025 = vst [vmem:[#allocation59_spill] sm:$0xff] %v4480_v37 }
  0xfb   : > { %1553 = vrot.lane.b32.xlu1 %v4117_v38, %s3901_s15  ;;  %1171 = vrot.lane.b32.xlu0 %v4120_v39, %s3898_s26 }
  0xfd   : > { %v4486_v7 = vpop.permute.xlu1 %821  ;;  %v4488_v36 = vpop.permute.xlu0 %819 }
  0xfe   : > { %6026 = vst [vmem:[#allocation60_spill] sm:$0xff] %v4486_v7  ;;  %6027 = vst [vmem:[#allocation61_spill] sm:$0xff] %v4488_v36 }
  0xff   : > { %1299 = vrot.lane.b32.xlu1 %v4266_v51, %s3899_s11  ;;  %1173 = vrot.lane.b32.xlu0 %v4117_v38, %s3898_s26 }
 0x101   : > { %v4494_v6 = vpop.permute.xlu1 %825  ;;  %v4496_v24 = vpop.permute.xlu0 %823 }
 0x102   : > { %6028 = vst [vmem:[#allocation62_spill] sm:$0xff] %v4494_v6  ;;  %6029 = vst [vmem:[#allocation63_spill] sm:$0xff] %v4496_v24 }
 0x103   : > { %1427 = vrot.lane.b32.xlu1 %v4024_v9, %s3900_s14  ;;  %1301 = vrot.lane.b32.xlu0 %v4263_v50, %s3899_s11 }
 0x105   : > { %v4502_v39 = vpop.permute.xlu1 %829  ;;  %v4504_v7 = vpop.permute.xlu0 %827 }
 0x106   : > { %6030 = vst [vmem:[#allocation64_spill] sm:$0xff] %v4502_v39  ;;  %6031 = vst [vmem:[#allocation65_spill] sm:$0xff] %v4504_v7 }
 0x107   : > { %1429 = vrot.lane.b32.xlu1 %v4021_v8, %s3900_s14  ;;  %1047 = vrot.lane.b32.xlu0 %v4024_v9, %s3897_s21 }
 0x109   : > { %v4510_v38 = vpop.permute.xlu1 %833  ;;  %v4512_v6 = vpop.permute.xlu0 %831 }
 0x10a   : > { %6032 = vst [vmem:[#allocation66_spill] sm:$0xff] %v4510_v38  ;;  %6033 = vst [vmem:[#allocation67_spill] sm:$0xff] %v4512_v6 }
 0x10b   : > { %1049 = vrot.lane.b32.xlu1 %v4021_v8, %s3897_s21  ;;  %1555 = vrot.lane.b32.xlu0 %v4130_v41, %s3901_s15 }
 0x10d   : > { %v4518_v24 = vpop.permute.xlu1 %837  ;;  %v4520_v39 = vpop.permute.xlu0 %835 }
 0x10e   : > { %6034 = vst [vmem:[#allocation68_spill] sm:$0xff] %v4518_v24  ;;  %6035 = vst [vmem:[#allocation69_spill] sm:$0xff] %v4520_v39 }
 0x10f   : > { %1557 = vrot.lane.b32.xlu1 %v4127_v40, %s3901_s15  ;;  %1175 = vrot.lane.b32.xlu0 %v4130_v41, %s3898_s26 }
 0x111   : > { %v4526_v9 = vpop.permute.xlu1 %841  ;;  %v4528_v38 = vpop.permute.xlu0 %839 }
 0x112   : > { %6036 = vst [vmem:[#allocation70_spill] sm:$0xff] %v4526_v9  ;;  %6037 = vst [vmem:[#allocation71_spill] sm:$0xff] %v4528_v38 }
 0x113   : > { %1303 = vrot.lane.b32.xlu1 %v4280_v55, %s3899_s11  ;;  %1177 = vrot.lane.b32.xlu0 %v4127_v40, %s3898_s26 }
 0x115   : > { %v4534_v8 = vpop.permute.xlu1 %909  ;;  %v4536_v24 = vpop.permute.xlu0 %907 }
 0x117   : > { %1431 = vrot.lane.b32.xlu1 %v4034_v11, %s3900_s14  ;;  %1305 = vrot.lane.b32.xlu0 %v4277_v54, %s3899_s11 }
 0x119   : > { %v4542_v41 = vpop.permute.xlu1 %913  ;;  %v4544_v9 = vpop.permute.xlu0 %911 }
 0x11b   : > { %1433 = vrot.lane.b32.xlu1 %v4031_v10, %s3900_s14  ;;  %1051 = vrot.lane.b32.xlu0 %v4034_v11, %s3897_s21 }
 0x11d   : > { %v4550_v40 = vpop.permute.xlu1 %917  ;;  %v4552_v38 = vpop.permute.xlu0 %915 }
 0x11f   : > { %1053 = vrot.lane.b32.xlu1 %v4031_v10, %s3897_s21  ;;  %1559 = vrot.lane.b32.xlu0 %v4140_v43, %s3901_s15 }
 0x121   : > { %v4558_v39 = vpop.permute.xlu1 %921  ;;  %v4560_v6 = vpop.permute.xlu0 %919 }
 0x123   : > { %1561 = vrot.lane.b32.xlu1 %v4137_v42, %s3901_s15  ;;  %1179 = vrot.lane.b32.xlu0 %v4140_v43, %s3898_s26 }
 0x125   : > { %v4566_v11 = vpop.permute.xlu1 %925  ;;  %v4568_v7 = vpop.permute.xlu0 %923 }
 0x127   : > { %1307 = vrot.lane.b32.xlu1 %v4294_v59, %s3899_s11  ;;  %1181 = vrot.lane.b32.xlu0 %v4137_v42, %s3898_s26 }
 0x129   : > { %v4574_v10 = vpop.permute.xlu1 %929  ;;  %v4576_v36 = vpop.permute.xlu0 %927 }
 0x12b   : > { %1435 = vrot.lane.b32.xlu1 %v4044_v13, %s3900_s14  ;;  %1309 = vrot.lane.b32.xlu0 %v4291_v58, %s3899_s11 }
 0x12d   : > { %v4582_v43 = vpop.permute.xlu1 %933  ;;  %v4584_v37 = vpop.permute.xlu0 %931 }
 0x12e   : > { %6038 = vst [vmem:[#allocation72_spill] sm:$0xff] %v4582_v43 }
 0x12f   : > { %1437 = vrot.lane.b32.xlu1 %v4041_v12, %s3900_s14  ;;  %1055 = vrot.lane.b32.xlu0 %v4044_v13, %s3897_s21 }
 0x131   : > { %v4590_v42 = vpop.permute.xlu1 %937  ;;  %v4592_v4 = vpop.permute.xlu0 %935 }
 0x132   : > { %6039 = vst [vmem:[#allocation73_spill] sm:$0xff] %v4590_v42  ;;  %6040 = vst [vmem:[#allocation74_spill] sm:$0xff] %v4592_v4  ;;  %v4647_v4 = vld [vmem:[%s3984_s17 + $0xc1] sm:$0xff] }
 0x133   : > { %1057 = vrot.lane.b32.xlu1 %v4041_v12, %s3897_s21  ;;  %1563 = vrot.lane.b32.xlu0 %v4150_v45, %s3901_s15 }
 0x135   : > { %v4598_v5 = vpop.permute.xlu1 %941  ;;  %v4600_v43 = vpop.permute.xlu0 %939 }
 0x136   : > { %6041 = vst [vmem:[#allocation75_spill] sm:$0xff] %v4598_v5  ;;  %6042 = vst [vmem:[#allocation76_spill] sm:$0xff] %v4600_v43 }
 0x137   : > { %1565 = vrot.lane.b32.xlu1 %v4147_v44, %s3901_s15  ;;  %1183 = vrot.lane.b32.xlu0 %v4150_v45, %s3898_s26 }
 0x139   : > { %v4606_v13 = vpop.permute.xlu1 %945  ;;  %v4608_v42 = vpop.permute.xlu0 %943 }
 0x13a   : > { %6043 = vst [vmem:[#allocation77_spill] sm:$0xff] %v4606_v13  ;;  %6044 = vst [vmem:[#allocation78_spill] sm:$0xff] %v4608_v42 }
 0x13b   : > { %1311 = vrot.lane.b32.xlu1 %v4308_v17, %s3899_s11  ;;  %1185 = vrot.lane.b32.xlu0 %v4147_v44, %s3898_s26 }
 0x13d   : > { %v4614_v12 = vpop.permute.xlu1 %949  ;;  %v4616_v5 = vpop.permute.xlu0 %947 }
 0x13e   : > { %6045 = vst [vmem:[#allocation79_spill] sm:$0xff] %v4614_v12  ;;  %6046 = vst [vmem:[#allocation80_spill] sm:$0xff] %v4616_v5 }
 0x13f   : > { %1439 = vrot.lane.b32.xlu1 %v4054_v15, %s3900_s14  ;;  %1313 = vrot.lane.b32.xlu0 %v4305_v16, %s3899_s11  ;;  %v330_v16 = vld [vmem:[%s3984_s17 + $0x8] sm:$0xff] }
 0x141   : > { %v1036_v45 = vpop.permute.xlu1 %1035  ;;  %v4622_v13 = vpop.permute.xlu0 %951 }
 0x142   : > { %6047 = vst [vmem:[#allocation81_spill] sm:$0xff] %v4622_v13 }
 0x143   : > { %1441 = vrot.lane.b32.xlu1 %v4051_v14, %s3900_s14  ;;  %1059 = vrot.lane.b32.xlu0 %v4054_v15, %s3897_s21  ;;  %v329_v15 = vld [vmem:[%s3984_s17] sm:$0xff] }
 0x145   : > { %v1164_v44 = vpop.permute.xlu1 %1163  ;;  %v1038_v12 = vpop.permute.xlu0 %1037 }
 0x147   : > { %1061 = vrot.lane.b32.xlu1 %v4051_v14, %s3897_s21  ;;  %1567 = vrot.lane.b32.xlu0 %v4160_v47, %s3901_s15  ;;  %v1644_v14 = vsel %vm1643_vm1, %v329_v15, %v4196_v61 }
 0x149   : > { %v1292_v5 = vpop.permute.xlu1 %1291  ;;  %v1166_v42 = vpop.permute.xlu0 %1165 }
 0x14b   : > { %1569 = vrot.lane.b32.xlu1 %v4157_v46, %s3901_s15  ;;  %1187 = vrot.lane.b32.xlu0 %v4160_v47, %s3898_s26  ;;  %v1677_v47 = vsel %vm1676_vm2, %v1644_v14, %v4402_v57  ;;  %v4663_v57 = vld [vmem:[%s3984_s17 + $0xc9] sm:$0xff] }
 0x14c   : > { %v1710_v17 = vsel %vm1709_vm3, %v1677_v47, %v4536_v24 }
 0x14d   : > { %v1420_v13 = vpop.permute.xlu1 %1419  ;;  %v1294_v43 = vpop.permute.xlu0 %1293  ;;  %v1743_v58 = vsel %vm1742_vm4, %v1710_v17, %v1036_v45 }
 0x14f   : > { %1315 = vrot.lane.b32.xlu1 %v4322_v62, %s3899_s11  ;;  %1189 = vrot.lane.b32.xlu0 %v4157_v46, %s3898_s26  ;;  %v1645_v46 = vsel %vm1643_vm1, %v330_v16, %v4204_v3  ;;  %v1776_v62 = vsel %vm1775_vm5, %v1743_v58, %v1164_v44 }
 0x150   : > { %v1678_v14 = vsel %vm1676_vm2, %v1645_v46, %v4400_v29  ;;  %v1809_v24 = vsel %vm1808_vm6, %v1776_v62, %v1292_v5  ;;  %v1646_v46 = vsel %vm1643_vm1, %v4221_v22, %v4194_v60  ;;  %v1647_v60 = vsel %vm1643_vm1, %v4224_v23, %v4202_v1 }
 0x151   : > { %v1422_v15 = vpop.permute.xlu1 %1421  ;;  %v1040_v61 = vpop.permute.xlu0 %1039  ;;  %v1711_v17 = vsel %vm1709_vm3, %v1678_v14, %v4534_v8  ;;  %v1842_v3 = vsel %vm1841_vm7, %v1809_v24, %v1420_v13  ;;  %v1679_v62 = vsel %vm1676_vm2, %v1646_v46, %v4413_v2  ;;  %v4698_v14 = vld [vmem:[%s3984_s17 + $0xd9] sm:$0xff]  ;;  %v1680_v2 = vsel %vm1676_vm2, %v1647_v60, %v4411_v35 }
 0x152   : > { %v1744_v45 = vsel %vm1742_vm4, %v1711_v17, %v1038_v12 }
 0x153   : > { %1443 = vrot.lane.b32.xlu1 %v4647_v4, %s3900_s14  ;;  %1317 = vrot.lane.b32.xlu0 %v4319_v52, %s3899_s11  ;;  %v1777_v44 = vsel %vm1775_vm5, %v1744_v45, %v1166_v42 }
 0x154   : > { %v1810_v5 = vsel %vm1808_vm6, %v1777_v44, %v1294_v43 }
 0x155   : > { %v1042_v58 = vpop.permute.xlu1 %1041  ;;  %v1548_v16 = vpop.permute.xlu0 %1547  ;;  %v1843_v8 = vsel %vm1841_vm7, %v1810_v5, %v1422_v15 }
 0x156   : > { %v1875_v52 = vsel %vm1874_vm8, %v1842_v3, %v1548_v16 }
 0x157   : > { %1445 = vrot.lane.b32.xlu1 %v4663_v57, %s3900_s14  ;;  %1063 = vrot.lane.b32.xlu0 %v4647_v4, %s3897_s21 }
 0x158   : > { %3728 = vmatprep.mubr.msk.f32.mxu0 %vm1912_vm9, %v1875_v52 }
 0x159   : > { %v1550_v13 = vpop.permute.xlu1 %1549  ;;  %v1168_v29 = vpop.permute.xlu0 %1167 }
 0x15a   : > { %v1876_v12 = vsel %vm1874_vm8, %v1843_v8, %v1550_v13  ;;  %v3560_v8 = vld [vmem:[%s3984_s17 + $0xe2] sm:$0xff] }
 0x15b   : > { %1065 = vrot.lane.b32.xlu1 %v4663_v57, %s3897_s21  ;;  %1571 = vrot.lane.b32.xlu0 %v4170_v49, %s3901_s15 }
 0x15c   : > { %3729 = vmatmul.mubr.msk.f32.vlgmr.msra.gmra.mxu0 %vm1912_vm9, %v1876_v12 }
 0x15d   : > { %v1296_v42 = vpop.permute.xlu1 %1295  ;;  %v1170_v47 = vpop.permute.xlu0 %1169 }
 0x15f   : > { %1573 = vrot.lane.b32.xlu1 %v4167_v48, %s3901_s15  ;;  %1191 = vrot.lane.b32.xlu0 %v4170_v49, %s3898_s26  ;;  %v1712_v49 = vsel %vm1709_vm3, %v1679_v62, %v4544_v9 }
 0x160   : > { %v1745_v3 = vsel %vm1742_vm4, %v1712_v49, %v1040_v61 }
 0x161   : > { %v1424_v43 = vpop.permute.xlu1 %1423  ;;  %v1298_v15 = vpop.permute.xlu0 %1297  ;;  %v1778_v22 = vsel %vm1775_vm5, %v1745_v3, %v1168_v29 }
 0x162   : > { %v1811_v9 = vsel %vm1808_vm6, %v1778_v22, %v1296_v42 }
 0x163   : > { %1319 = vrot.lane.b32.xlu1 %v4336_v56, %s3899_s11  ;;  %1193 = vrot.lane.b32.xlu0 %v4167_v48, %s3898_s26  ;;  %v4715_v48 = vld [vmem:[%s3984_s17 + $0xe1] sm:$0xff]  ;;  %v1713_v56 = vsel %vm1709_vm3, %v1680_v2, %v4542_v41  ;;  %v1844_v1 = vsel %vm1841_vm7, %v1811_v9, %v1424_v43 }
 0x164   : > { %v1746_v16 = vsel %vm1742_vm4, %v1713_v56, %v1042_v58  ;;  %v3559_v41 = vld [vmem:[%s3984_s17 + $0xda] sm:$0xff] }
 0x165   : > { %v1426_v24 = vpop.permute.xlu1 %1425  ;;  %v1044_v17 = vpop.permute.xlu0 %1043 }
 0x167   : > { %1447 = vrot.lane.b32.xlu1 %v4698_v14, %s3900_s14  ;;  %1321 = vrot.lane.b32.xlu0 %v4333_v32, %s3899_s11  ;;  %v1779_v32 = vsel %vm1775_vm5, %v1746_v16, %v1170_v47  ;;  %v1648_v47 = vsel %vm1643_vm1, %v4238_v27, %v4212_v19  ;;  %v1649_v19 = vsel %vm1643_vm1, %v4235_v26, %v4210_v18 }
 0x168   : > { %v1812_v35 = vsel %vm1808_vm6, %v1779_v32, %v1298_v15  ;;  %v1681_v43 = vsel %vm1676_vm2, %v1648_v47, %v4424_v33  ;;  %v4748_v15 = vld [vmem:[%s3984_s17 + $0xf1] sm:$0xff] }
 0x169   : > { %v1046_v23 = vpop.permute.xlu1 %1045  ;;  %v1552_v61 = vpop.permute.xlu0 %1551  ;;  %v1845_v52 = vsel %vm1841_vm7, %v1812_v35, %v1426_v24  ;;  %v1714_v46 = vsel %vm1709_vm3, %v1681_v43, %v4552_v38  ;;  %v4765_v38 = vld [vmem:[%s3984_s17 + $0xf9] sm:$0xff]  ;;  %v1650_v35 = vsel %vm1643_vm1, %v4252_v31, %v4218_v21 }
 0x16a   : > { %v1877_v45 = vsel %vm1874_vm8, %v1844_v1, %v1552_v61  ;;  %v1747_v24 = vsel %vm1742_vm4, %v1714_v46, %v1044_v17  ;;  %v6050_v31 = vld [vmem:[#allocation49_spill] sm:$0xff] }
 0x16b   : > { %1449 = vrot.lane.b32.xlu1 %v4715_v48, %s3900_s14  ;;  %1067 = vrot.lane.b32.xlu0 %v4698_v14, %s3897_s21 }
 0x16c   : > { %3731 = vmatprep.mubr.msk.f32.mxu0 %vm1912_vm9, %v1877_v45 }
 0x16d   : > { %v1554_v44 = vpop.permute.xlu1 %1553  ;;  %v1172_v5 = vpop.permute.xlu0 %1171 }
 0x16e   : > { %v1878_v58 = vsel %vm1874_vm8, %v1845_v52, %v1554_v44  ;;  %v1780_v27 = vsel %vm1775_vm5, %v1747_v24, %v1172_v5  ;;  %v4798_v52 = vld [vmem:[%s3984_s17 + $0x109] sm:$0xff] }
 0x16f   : > { %1069 = vrot.lane.b32.xlu1 %v4715_v48, %s3897_s21  ;;  %1575 = vrot.lane.b32.xlu0 %v3559_v41, %s3901_s15 }
 0x170   : > { %3732 = vmatmul.mubr.msk.f32.gmra.mxu0 %vm1912_vm9, %v1878_v58 }
 0x171   : > { %v1300_v13 = vpop.permute.xlu1 %1299  ;;  %v1174_v29 = vpop.permute.xlu0 %1173 }
 0x172   : > { %v1813_v33 = vsel %vm1808_vm6, %v1780_v27, %v1300_v13  ;;  %v6048_v13 = vld [vmem:[#allocation19_spill] sm:$0xff] }
 0x173   : > { %1577 = vrot.lane.b32.xlu1 %v3560_v8, %s3901_s15  ;;  %1195 = vrot.lane.b32.xlu0 %v3559_v41, %s3898_s26  ;;  %v1683_v41 = vsel %vm1676_vm2, %v1650_v35, %v4432_v20  ;;  %v1651_v21 = vsel %vm1643_vm1, %v4249_v30, %v6048_v13  ;;  %v6049_v20 = vld [vmem:[#allocation43_spill] sm:$0xff] }
 0x174   : > { %v1716_v44 = vsel %vm1709_vm3, %v1683_v41, %v4560_v6  ;;  %v1684_v6 = vsel %vm1676_vm2, %v1651_v21, %v6050_v31  ;;  %v4881_v21 = vld [vmem:[%s3984_s17 + $0x129] sm:$0xff] }
 0x175   : > { %v1428_v12 = vpop.permute.xlu1 %1427  ;;  %v1302_v42 = vpop.permute.xlu0 %1301 }
 0x176   : > { %v1846_v18 = vsel %vm1841_vm7, %v1813_v33, %v1428_v12  ;;  %v4815_v12 = vld [vmem:[%s3984_s17 + $0x111] sm:$0xff] }
 0x177   : > { %1323 = vrot.lane.b32.xlu1 %v4350_v63, %s3899_s11  ;;  %1197 = vrot.lane.b32.xlu0 %v3560_v8, %s3898_s26  ;;  %v1682_v63 = vsel %vm1676_vm2, %v1649_v19, %v4422_v34 }
 0x178   : > { %v1715_v17 = vsel %vm1709_vm3, %v1682_v63, %v4550_v40  ;;  %v3561_v40 = vld [vmem:[%s3984_s17 + $0xf2] sm:$0xff] }
 0x179   : > { %v1430_v62 = vpop.permute.xlu1 %1429  ;;  %v1048_v49 = vpop.permute.xlu0 %1047  ;;  %v1748_v60 = vsel %vm1742_vm4, %v1715_v17, %v1046_v23  ;;  %v3562_v23 = vld [vmem:[%s3984_s17 + $0xfa] sm:$0xff]  ;;  %v3564_v17 = vld [vmem:[%s3984_s17 + $0x112] sm:$0xff] }
 0x17a   : > { %v1749_v8 = vsel %vm1742_vm4, %v1716_v44, %v1048_v49 }
 0x17b   : > { %1451 = vrot.lane.b32.xlu1 %v4748_v15, %s3900_s14  ;;  %1325 = vrot.lane.b32.xlu0 %v4347_v28, %s3899_s11  ;;  %v1781_v28 = vsel %vm1775_vm5, %v1748_v60, %v1174_v29 }
 0x17c   : > { %v1814_v34 = vsel %vm1808_vm6, %v1781_v28, %v1302_v42  ;;  %v1717_v42 = vsel %vm1709_vm3, %v1684_v6, %v4558_v39  ;;  %v3563_v39 = vld [vmem:[%s3984_s17 + $0x10a] sm:$0xff] }
 0x17d   : > { %v1050_v26 = vpop.permute.xlu1 %1049  ;;  %v1556_v3 = vpop.permute.xlu0 %1555  ;;  %v1847_v2 = vsel %vm1841_vm7, %v1814_v34, %v1430_v62  ;;  %v6052_v34 = vld [vmem:[#allocation46_spill] sm:$0xff] }
 0x17e   : > { %v1879_v22 = vsel %vm1874_vm8, %v1846_v18, %v1556_v3  ;;  %v1750_v46 = vsel %vm1742_vm4, %v1717_v42, %v1050_v26 }
 0x17f   : > { %1453 = vrot.lane.b32.xlu1 %v4765_v38, %s3900_s14  ;;  %1071 = vrot.lane.b32.xlu0 %v4748_v15, %s3897_s21 }
 0x180   : > { %3734 = vmatprep.mubr.msk.f32.mxu0 %vm1912_vm9, %v1879_v22  ;;  %v6051_v22 = vld [vmem:[#allocation21_spill] sm:$0xff] }
 0x181   : > { %v1558_v9 = vpop.permute.xlu1 %1557  ;;  %v1176_v56 = vpop.permute.xlu0 %1175  ;;  %v1652_v28 = vsel %vm1643_vm1, %v4266_v51, %v6051_v22  ;;  %v6053_v51 = vld [vmem:[#allocation20_spill] sm:$0xff] }
 0x182   : > { %v1880_v1 = vsel %vm1874_vm8, %v1847_v2, %v1558_v9  ;;  %v4848_v2 = vld [vmem:[%s3984_s17 + $0x121] sm:$0xff] }
 0x183   : > { %1073 = vrot.lane.b32.xlu1 %v4765_v38, %s3897_s21  ;;  %1579 = vrot.lane.b32.xlu0 %v3561_v40, %s3901_s15 }
 0x184   : > { %3735 = vmatmul.mubr.msk.f32.gmra.mxu0 %vm1912_vm9, %v1880_v1 }
 0x185   : > { %v1304_v61 = vpop.permute.xlu1 %1303  ;;  %v1178_v16 = vpop.permute.xlu0 %1177 }
 0x186   : > { %v1783_v49 = vsel %vm1775_vm5, %v1750_v46, %v1178_v16  ;;  %v1653_v16 = vsel %vm1643_vm1, %v4263_v50, %v6053_v51  ;;  %v6055_v46 = vld [vmem:[#allocation23_spill] sm:$0xff] }
 0x187   : > { %1581 = vrot.lane.b32.xlu1 %v3562_v23, %s3901_s15  ;;  %1199 = vrot.lane.b32.xlu0 %v3561_v40, %s3898_s26  ;;  %v1685_v40 = vsel %vm1676_vm2, %v1652_v28, %v4440_v0 }
 0x188   : > { %v1718_v9 = vsel %vm1709_vm3, %v1685_v40, %v4568_v7  ;;  %v6054_v7 = vld [vmem:[#allocation50_spill] sm:$0xff] }
 0x189   : > { %v1432_v45 = vpop.permute.xlu1 %1431  ;;  %v1306_v32 = vpop.permute.xlu0 %1305  ;;  %v1686_v0 = vsel %vm1676_vm2, %v1653_v16, %v6054_v7  ;;  %v3567_v16 = vld [vmem:[%s3984_s17 + $0x13a] sm:$0xff] }
 0x18a   : > { %v1816_v24 = vsel %vm1808_vm6, %v1783_v49, %v1306_v32  ;;  %v1719_v35 = vsel %vm1709_vm3, %v1686_v0, %v4566_v11  ;;  %v3565_v11 = vld [vmem:[%s3984_s17 + $0x122] sm:$0xff] }
 0x18b   : > { %1327 = vrot.lane.b32.xlu1 %v4364_v25, %s3899_s11  ;;  %1201 = vrot.lane.b32.xlu0 %v3562_v23, %s3898_s26  ;;  %v1782_v25 = vsel %vm1775_vm5, %v1749_v8, %v1176_v56  ;;  %v4853_v23 = vld [vmem:[%s3984_s17 + $0x128] sm:$0xff] }
 0x18c   : > { %v1815_v29 = vsel %vm1808_vm6, %v1782_v25, %v1304_v61 }
 0x18d   : > { %v1434_v5 = vpop.permute.xlu1 %1433  ;;  %v1052_v58 = vpop.permute.xlu0 %1051  ;;  %v1848_v30 = vsel %vm1841_vm7, %v1815_v29, %v1432_v45 }
 0x18e   : > { %v1849_v19 = vsel %vm1841_vm7, %v1816_v24, %v1434_v5  ;;  %v1751_v61 = vsel %vm1742_vm4, %v1718_v9, %v1052_v58  ;;  %v3409_v24 = vld [vmem:[%s3984_s17 + $0x138] sm:$0xff] }
 0x18f   : > { %1455 = vrot.lane.b32.xlu1 %v4798_v52, %s3900_s14  ;;  %1329 = vrot.lane.b32.xlu0 %v6049_v20, %s3899_s11 }
 0x191   : > { %v1054_v47 = vpop.permute.xlu1 %1053  ;;  %v1560_v43 = vpop.permute.xlu0 %1559 }
 0x192   : > { %v1881_v62 = vsel %vm1874_vm8, %v1848_v30, %v1560_v43  ;;  %v1752_v5 = vsel %vm1742_vm4, %v1719_v35, %v1054_v47  ;;  %v3472_v30 = vld [vmem:[%s3984_s17 + $0x12a] sm:$0xff] }
 0x193   : > { %1457 = vrot.lane.b32.xlu1 %v4815_v12, %s3900_s14  ;;  %1075 = vrot.lane.b32.xlu0 %v4798_v52, %s3897_s21 }
 0x194   : > { %3737 = vmatprep.mubr.msk.f32.mxu0 %vm1912_vm9, %v1881_v62  ;;  %v1654_v62 = vsel %vm1643_vm1, %v4280_v55, %v6055_v46 }
 0x195   : > { %v1562_v27 = vpop.permute.xlu1 %1561  ;;  %v1180_v63 = vpop.permute.xlu0 %1179  ;;  %v1687_v49 = vsel %vm1676_vm2, %v1654_v62, %v4448_v53 }
 0x196   : > { %v1882_v33 = vsel %vm1874_vm8, %v1849_v19, %v1562_v27  ;;  %v1784_v45 = vsel %vm1775_vm5, %v1751_v61, %v1180_v63 }
 0x197   : > { %1077 = vrot.lane.b32.xlu1 %v4815_v12, %s3897_s21  ;;  %1583 = vrot.lane.b32.xlu0 %v3563_v39, %s3901_s15 }
 0x198   : > { %3738 = vmatmul.mubr.msk.f32.gmra.mxu0 %vm1912_vm9, %v1882_v33  ;;  %v6056_v33 = vld [vmem:[#allocation22_spill] sm:$0xff] }
 0x199   : > { %v1308_v18 = vpop.permute.xlu1 %1307  ;;  %v1182_v26 = vpop.permute.xlu0 %1181  ;;  %v1655_v55 = vsel %vm1643_vm1, %v4277_v54, %v6056_v33  ;;  %v3506_v33 = vld [vmem:[%s3984_s17 + $0x158] sm:$0xff] }
 0x19a   : > { %v1817_v32 = vsel %vm1808_vm6, %v1784_v45, %v1308_v18  ;;  %v1785_v8 = vsel %vm1775_vm5, %v1752_v5, %v1182_v26  ;;  %v6057_v18 = vld [vmem:[#allocation51_spill] sm:$0xff]  ;;  %v4936_v45 = vld [vmem:[%s3984_s17 + $0x141] sm:$0xff] }
 0x19b   : > { %1585 = vrot.lane.b32.xlu1 %v3564_v17, %s3901_s15  ;;  %1203 = vrot.lane.b32.xlu0 %v3563_v39, %s3898_s26  ;;  %v1720_v39 = vsel %vm1709_vm3, %v1687_v49, %v4576_v36  ;;  %v1688_v53 = vsel %vm1676_vm2, %v1655_v55, %v6057_v18  ;;  %v4914_v36 = vld [vmem:[%s3984_s17 + $0x139] sm:$0xff] }
 0x19d   : > { %v1436_v3 = vpop.permute.xlu1 %1435  ;;  %v1310_v60 = vpop.permute.xlu0 %1309 }
 0x19e   : > { %v1850_v50 = vsel %vm1841_vm7, %v1817_v32, %v1436_v3  ;;  %v1818_v13 = vsel %vm1808_vm6, %v1785_v8, %v1310_v60  ;;  %v3504_v3 = vld [vmem:[%s3984_s17 + $0x140] sm:$0xff]  ;;  %v1721_v60 = vsel %vm1709_vm3, %v1688_v53, %v4574_v10 }
 0x19f   : > { %1331 = vrot.lane.b32.xlu1 %v6052_v34, %s3899_s11  ;;  %1205 = vrot.lane.b32.xlu0 %v3564_v17, %s3898_s26 }
 0x1a1   : > { %v1438_v56 = vpop.permute.xlu1 %1437  ;;  %v1056_v1 = vpop.permute.xlu0 %1055 }
 0x1a2   : > { %v1851_v25 = vsel %vm1841_vm7, %v1818_v13, %v1438_v56  ;;  %v1753_v63 = vsel %vm1742_vm4, %v1720_v39, %v1056_v1 }
 0x1a3   : > { %1459 = vrot.lane.b32.xlu1 %v4848_v2, %s3900_s14  ;;  %1333 = vrot.lane.b32.xlu0 %v4853_v23, %s3899_s11 }
 0x1a5   : > { %v1058_v41 = vpop.permute.xlu1 %1057  ;;  %v1564_v44 = vpop.permute.xlu0 %1563 }
 0x1a6   : > { %v1883_v58 = vsel %vm1874_vm8, %v1850_v50, %v1564_v44  ;;  %v1754_v34 = vsel %vm1742_vm4, %v1721_v60, %v1058_v41  ;;  %v6058_v50 = vld [vmem:[#allocation25_spill] sm:$0xff]  ;;  %v3569_v60 = vld [vmem:[%s3984_s17 + $0x152] sm:$0xff] }
 0x1a7   : > { %1079 = vrot.lane.b32.xlu1 %v4848_v2, %s3897_s21  ;;  %953 = vrot.lane.b32.xlu0 %v4853_v23, %s3896_s20  ;;  %v1656_v41 = vsel %vm1643_vm1, %v4294_v59, %v6058_v50  ;;  %v6059_v44 = vld [vmem:[#allocation53_spill] sm:$0xff] }
 0x1a8   : > { %3740 = vmatprep.mubr.msk.f32.mxu0 %vm1912_vm9, %v1883_v58  ;;  %v1689_v5 = vsel %vm1676_vm2, %v1656_v41, %v6059_v44  ;;  %v3474_v58 = vld [vmem:[%s3984_s17 + $0x142] sm:$0xff] }
 0x1a9   : > { %v1566_v20 = vpop.permute.xlu1 %1565  ;;  %v1184_v31 = vpop.permute.xlu0 %1183  ;;  %v1722_v8 = vsel %vm1709_vm3, %v1689_v5, %v4584_v37  ;;  %v6070_v41 = vld [vmem:[#allocation54_spill] sm:$0xff] }
 0x1aa   : > { %v1884_v6 = vsel %vm1874_vm8, %v1851_v25, %v1566_v20  ;;  %v1786_v17 = vsel %vm1775_vm5, %v1753_v63, %v1184_v31  ;;  %v6060_v20 = vld [vmem:[#allocation24_spill] sm:$0xff]  ;;  %v6061_v31 = vld [vmem:[#allocation30_spill] sm:$0xff] }
 0x1ab   : > { %1587 = vrot.lane.b32.xlu1 %v3565_v11, %s3901_s15  ;;  %1461 = vrot.lane.b32.xlu0 %v4881_v21, %s3900_s14  ;;  %v1657_v59 = vsel %vm1643_vm1, %v6061_v31, %v6060_v20  ;;  %v4974_v63 = vld [vmem:[%s3984_s17 + $0x151] sm:$0xff] }
 0x1ac   : > { %3741 = vmatmul.mubr.msk.f32.gmra.mxu0 %vm1912_vm9, %v1884_v6 }
 0x1ad   : > { %v1312_v29 = vpop.permute.xlu1 %1311  ;;  %v1186_v42 = vpop.permute.xlu0 %1185 }
 0x1ae   : > { %v1819_v26 = vsel %vm1808_vm6, %v1786_v17, %v1312_v29  ;;  %v1787_v9 = vsel %vm1775_vm5, %v1754_v34, %v1186_v42  ;;  %v6062_v29 = vld [vmem:[#allocation52_spill] sm:$0xff]  ;;  %v6064_v34 = vld [vmem:[#allocation27_spill] sm:$0xff] }
 0x1af   : > { %1207 = vrot.lane.b32.xlu1 %v3565_v11, %s3898_s26  ;;  %1081 = vrot.lane.b32.xlu0 %v4881_v21, %s3897_s21  ;;  %v1690_v42 = vsel %vm1676_vm2, %v1657_v59, %v6062_v29 }
 0x1b1   : > { %v1440_v47 = vpop.permute.xlu1 %1439  ;;  %v1314_v43 = vpop.permute.xlu0 %1313 }
 0x1b2   : > { %v1852_v22 = vsel %vm1841_vm7, %v1819_v26, %v1440_v47  ;;  %v1820_v56 = vsel %vm1808_vm6, %v1787_v9, %v1314_v43  ;;  %v6063_v47 = vld [vmem:[#allocation72_spill] sm:$0xff] }
 0x1b3   : > { %1209 = vrot.lane.b32.xlu1 %v3472_v30, %s3898_s26  ;;  %1589 = vrot.lane.b32.xlu0 %v3472_v30, %s3901_s15  ;;  %v3411_v30 = vld [vmem:[%s3984_s17 + $0x150] sm:$0xff]  ;;  %v1723_v43 = vsel %vm1709_vm3, %v1690_v42, %v6063_v47  ;;  %v3413_v42 = vld [vmem:[%s3984_s17 + $0x168] sm:$0xff] }
 0x1b5   : > { %v1442_v19 = vpop.permute.xlu1 %1441  ;;  %v1060_v27 = vpop.permute.xlu0 %1059 }
 0x1b6   : > { %v1853_v10 = vsel %vm1841_vm7, %v1820_v56, %v1442_v19  ;;  %v1755_v25 = vsel %vm1742_vm4, %v1722_v8, %v1060_v27  ;;  %v6066_v56 = vld [vmem:[#allocation55_spill] sm:$0xff]  ;;  %v6071_v8 = vld [vmem:[#allocation73_spill] sm:$0xff] }
 0x1b7   : > { %955 = vrot.lane.b32.xlu1 %v3409_v24, %s3896_s20  ;;  %1335 = vrot.lane.b32.xlu0 %v3409_v24, %s3899_s11 }
 0x1b9   : > { %v1062_v54 = vpop.permute.xlu1 %1061  ;;  %v1568_v28 = vpop.permute.xlu0 %1567 }
 0x1ba   : > { %v1885_v40 = vsel %vm1874_vm8, %v1852_v22, %v1568_v28  ;;  %v1756_v24 = vsel %vm1742_vm4, %v1723_v43, %v1062_v54  ;;  %v4988_v22 = vld [vmem:[%s3984_s17 + $0x159] sm:$0xff] }
 0x1bb   : > { %1463 = vrot.lane.b32.xlu1 %v4914_v36, %s3900_s14  ;;  %1337 = vrot.lane.b32.xlu0 %v3504_v3, %s3899_s11 }
 0x1bc   : > { %3743 = vmatprep.mubr.msk.f32.mxu0 %vm1912_vm9, %v1885_v40  ;;  %v6065_v40 = vld [vmem:[#allocation34_spill] sm:$0xff] }
 0x1bd   : > { %v1570_v1 = vpop.permute.xlu1 %1569  ;;  %v1188_v61 = vpop.permute.xlu0 %1187  ;;  %v1658_v9 = vsel %vm1643_vm1, %v6065_v40, %v6064_v34  ;;  %v3858_v40 = vld [vmem:[%s3984_s17 + $0xc8] sm:$0xff] }
 0x1be   : > { %v1886_v51 = vsel %vm1874_vm8, %v1853_v10, %v1570_v1  ;;  %v1788_v6 = vsel %vm1775_vm5, %v1755_v25, %v1188_v61  ;;  %v1691_v10 = vsel %vm1676_vm2, %v1658_v9, %v6066_v56  ;;  %v6067_v1 = vld [vmem:[#allocation74_spill] sm:$0xff]  ;;  %v6075_v9 = vld [vmem:[#allocation28_spill] sm:$0xff] }
 0x1bf   : > { %1083 = vrot.lane.b32.xlu1 %v4914_v36, %s3897_s21  ;;  %957 = vrot.lane.b32.xlu0 %v3504_v3, %s3896_s20  ;;  %v1724_v61 = vsel %vm1709_vm3, %v1691_v10, %v6067_v1  ;;  %v1661_v56 = vsel %vm1643_vm1, %v3858_v40, %v6075_v9  ;;  %v6076_v1 = vld [vmem:[#allocation56_spill] sm:$0xff]  ;;  %v5107_v40 = vld [vmem:[%s3984_s17 + $0x189] sm:$0xff] }
 0x1c0   : > { %3744 = vmatmul.mubr.msk.f32.gmra.mxu0 %vm1912_vm9, %v1886_v51 }
 0x1c1   : > { %v1316_v7 = vpop.permute.xlu1 %1315  ;;  %v1190_v0 = vpop.permute.xlu0 %1189 }
 0x1c2   : > { %v1821_v37 = vsel %vm1808_vm6, %v1788_v6, %v1316_v7  ;;  %v1789_v19 = vsel %vm1775_vm5, %v1756_v24, %v1190_v0  ;;  %v6068_v0 = vld [vmem:[#allocation26_spill] sm:$0xff] }
 0x1c3   : > { %1591 = vrot.lane.b32.xlu1 %v3567_v16, %s3901_s15  ;;  %1465 = vrot.lane.b32.xlu0 %v4936_v45, %s3900_s14 }
 0x1c5   : > { %v1444_v32 = vpop.permute.xlu1 %1443  ;;  %v1318_v35 = vpop.permute.xlu0 %1317 }
 0x1c6   : > { %v1854_v46 = vsel %vm1841_vm7, %v1821_v37, %v1444_v32  ;;  %v1822_v27 = vsel %vm1808_vm6, %v1789_v19, %v1318_v35  ;;  %v6069_v32 = vld [vmem:[#allocation33_spill] sm:$0xff] }
 0x1c7   : > { %1211 = vrot.lane.b32.xlu1 %v3567_v16, %s3898_s26  ;;  %1085 = vrot.lane.b32.xlu0 %v4936_v45, %s3897_s21  ;;  %v1659_v35 = vsel %vm1643_vm1, %v6069_v32, %v6068_v0 }
 0x1c8   : > { %v1692_v44 = vsel %vm1676_vm2, %v1659_v35, %v6070_v41 }
 0x1c9   : > { %v1446_v13 = vpop.permute.xlu1 %1445  ;;  %v1064_v11 = vpop.permute.xlu0 %1063 }
 0x1ca   : > { %v1855_v55 = vsel %vm1841_vm7, %v1822_v27, %v1446_v13  ;;  %v1757_v7 = vsel %vm1742_vm4, %v1724_v61, %v1064_v11  ;;  %v1725_v13 = vsel %vm1709_vm3, %v1692_v44, %v6071_v8  ;;  %v3857_v27 = vld [vmem:[%s3984_s17 + $0xc0] sm:$0xff]  ;;  %v1694_v61 = vsel %vm1676_vm2, %v1661_v56, %v6076_v1 }
 0x1cb   : > { %1213 = vrot.lane.b32.xlu1 %v3474_v58, %s3898_s26  ;;  %1593 = vrot.lane.b32.xlu0 %v3474_v58, %s3901_s15  ;;  %v3476_v58 = vld [vmem:[%s3984_s17 + $0x15a] sm:$0xff] }
 0x1cd   : > { %v1066_v62 = vpop.permute.xlu1 %1065  ;;  %v1572_v49 = vpop.permute.xlu0 %1571 }
 0x1ce   : > { %v1887_v39 = vsel %vm1874_vm8, %v1854_v46, %v1572_v49  ;;  %v1758_v31 = vsel %vm1742_vm4, %v1725_v13, %v1066_v62  ;;  %v5029_v46 = vld [vmem:[%s3984_s17 + $0x169] sm:$0xff] }
 0x1cf   : > { %959 = vrot.lane.b32.xlu1 %v3411_v30, %s3896_s20  ;;  %1339 = vrot.lane.b32.xlu0 %v3411_v30, %s3899_s11  ;;  %v3508_v62 = vld [vmem:[%s3984_s17 + $0x170] sm:$0xff] }
 0x1d0   : > { %3746 = vmatprep.mubr.msk.f32.mxu0 %vm1912_vm9, %v1887_v39 }
 0x1d1   : > { %v1574_v17 = vpop.permute.xlu1 %1573  ;;  %v1192_v18 = vpop.permute.xlu0 %1191 }
 0x1d2   : > { %v1888_v53 = vsel %vm1874_vm8, %v1855_v55, %v1574_v17  ;;  %v1790_v50 = vsel %vm1775_vm5, %v1757_v7, %v1192_v18  ;;  %v6073_v17 = vld [vmem:[#allocation57_spill] sm:$0xff]  ;;  %v6077_v7 = vld [vmem:[#allocation75_spill] sm:$0xff] }
 0x1d3   : > { %1467 = vrot.lane.b32.xlu1 %v4974_v63, %s3900_s14  ;;  %1341 = vrot.lane.b32.xlu0 %v3506_v33, %s3899_s11 }
 0x1d4   : > { %3747 = vmatmul.mubr.msk.f32.gmra.mxu0 %vm1912_vm9, %v1888_v53  ;;  %v3571_v53 = vld [vmem:[%s3984_s17 + $0x16a] sm:$0xff] }
 0x1d5   : > { %v1320_v26 = vpop.permute.xlu1 %1319  ;;  %v1194_v3 = vpop.permute.xlu0 %1193 }
 0x1d6   : > { %v1823_v5 = vsel %vm1808_vm6, %v1790_v50, %v1320_v26  ;;  %v1791_v6 = vsel %vm1775_vm5, %v1758_v31, %v1194_v3  ;;  %v5045_v26 = vld [vmem:[%s3984_s17 + $0x171] sm:$0xff] }
 0x1d7   : > { %1087 = vrot.lane.b32.xlu1 %v4974_v63, %s3897_s21  ;;  %961 = vrot.lane.b32.xlu0 %v3506_v33, %s3896_s20  ;;  %v6072_v33 = vld [vmem:[#allocation29_spill] sm:$0xff]  ;;  %v6074_v3 = vld [vmem:[#allocation76_spill] sm:$0xff] }
 0x1d8   : > { %v1660_v55 = vsel %vm1643_vm1, %v3857_v27, %v6072_v33 }
 0x1d9   : > { %v1448_v54 = vpop.permute.xlu1 %1447  ;;  %v1322_v28 = vpop.permute.xlu0 %1321  ;;  %v1693_v18 = vsel %vm1676_vm2, %v1660_v55, %v6073_v17  ;;  %v3860_v55 = vld [vmem:[%s3984_s17 + $0xe0] sm:$0xff]  ;;  %v6081_v17 = vld [vmem:[#allocation31_spill] sm:$0xff] }
 0x1da   : > { %v1856_v11 = vsel %vm1841_vm7, %v1823_v5, %v1448_v54  ;;  %v1824_v29 = vsel %vm1808_vm6, %v1791_v6, %v1322_v28  ;;  %v5081_v6 = vld [vmem:[%s3984_s17 + $0x181] sm:$0xff] }
 0x1db   : > { %1595 = vrot.lane.b32.xlu1 %v3569_v60, %s3901_s15  ;;  %1469 = vrot.lane.b32.xlu0 %v4988_v22, %s3900_s14 }
 0x1dd   : > { %v1450_v51 = vpop.permute.xlu1 %1449  ;;  %v1068_v16 = vpop.permute.xlu0 %1067 }
 0x1de   : > { %v1857_v37 = vsel %vm1841_vm7, %v1824_v29, %v1450_v51  ;;  %v3510_v29 = vld [vmem:[%s3984_s17 + $0x188] sm:$0xff] }
 0x1df   : > { %1215 = vrot.lane.b32.xlu1 %v3569_v60, %s3898_s26  ;;  %1089 = vrot.lane.b32.xlu0 %v4988_v22, %s3897_s21  ;;  %v1726_v60 = vsel %vm1709_vm3, %v1693_v18, %v6074_v3  ;;  %v1663_v18 = vsel %vm1643_vm1, %v3860_v55, %v6081_v17  ;;  %v6082_v3 = vld [vmem:[#allocation58_spill] sm:$0xff]  ;;  %v3575_v55 = vld [vmem:[%s3984_s17 + $0x19a] sm:$0xff] }
 0x1e0   : > { %v1759_v34 = vsel %vm1742_vm4, %v1726_v60, %v1068_v16  ;;  %v1727_v16 = vsel %vm1709_vm3, %v1694_v61, %v6077_v7  ;;  %v1696_v60 = vsel %vm1676_vm2, %v1663_v18, %v6082_v3 }
 0x1e1   : > { %v1070_v25 = vpop.permute.xlu1 %1069  ;;  %v1576_v20 = vpop.permute.xlu0 %1575 }
 0x1e2   : > { %v1889_v59 = vsel %vm1874_vm8, %v1856_v11, %v1576_v20  ;;  %v1760_v50 = vsel %vm1742_vm4, %v1727_v16, %v1070_v25  ;;  %v3415_v20 = vld [vmem:[%s3984_s17 + $0x180] sm:$0xff] }
 0x1e3   : > { %1217 = vrot.lane.b32.xlu1 %v3476_v58, %s3898_s26  ;;  %1597 = vrot.lane.b32.xlu0 %v3476_v58, %s3901_s15  ;;  %v3478_v58 = vld [vmem:[%s3984_s17 + $0x172] sm:$0xff] }
 0x1e4   : > { %3749 = vmatprep.mubr.msk.f32.mxu0 %vm1912_vm9, %v1889_v59 }
 0x1e5   : > { %v1578_v30 = vpop.permute.xlu1 %1577  ;;  %v1196_v47 = vpop.permute.xlu0 %1195 }
 0x1e6   : > { %v1890_v43 = vsel %vm1874_vm8, %v1857_v37, %v1578_v30  ;;  %v1792_v10 = vsel %vm1775_vm5, %v1759_v34, %v1196_v47  ;;  %v3859_v30 = vld [vmem:[%s3984_s17 + $0xd8] sm:$0xff]  ;;  %v3573_v34 = vld [vmem:[%s3984_s17 + $0x182] sm:$0xff] }
 0x1e7   : > { %963 = vrot.lane.b32.xlu1 %v3413_v42, %s3896_s20  ;;  %1343 = vrot.lane.b32.xlu0 %v3413_v42, %s3899_s11  ;;  %v6078_v47 = vld [vmem:[#allocation32_spill] sm:$0xff] }
 0x1e8   : > { %3750 = vmatmul.mubr.msk.f32.gmra.mxu0 %vm1912_vm9, %v1890_v43  ;;  %v1662_v43 = vsel %vm1643_vm1, %v3859_v30, %v6078_v47  ;;  %v6086_v30 = vld [vmem:[#allocation80_spill] sm:$0xff] }
 0x1e9   : > { %v1324_v49 = vpop.permute.xlu1 %1323  ;;  %v1198_v24 = vpop.permute.xlu0 %1197 }
 0x1ea   : > { %v1825_v51 = vsel %vm1808_vm6, %v1792_v10, %v1324_v49  ;;  %v1793_v44 = vsel %vm1775_vm5, %v1760_v50, %v1198_v24  ;;  %v6080_v24 = vld [vmem:[#allocation78_spill] sm:$0xff] }
 0x1eb   : > { %1471 = vrot.lane.b32.xlu1 %v5029_v46, %s3900_s14  ;;  %1345 = vrot.lane.b32.xlu0 %v3508_v62, %s3899_s11 }
 0x1ed   : > { %v1452_v39 = vpop.permute.xlu1 %1451  ;;  %v1326_v19 = vpop.permute.xlu0 %1325 }
 0x1ee   : > { %v1858_v0 = vsel %vm1841_vm7, %v1825_v51, %v1452_v39  ;;  %v1826_v5 = vsel %vm1808_vm6, %v1793_v44, %v1326_v19 }
 0x1ef   : > { %1091 = vrot.lane.b32.xlu1 %v5029_v46, %s3897_s21  ;;  %965 = vrot.lane.b32.xlu0 %v3508_v62, %s3896_s20  ;;  %v6079_v62 = vld [vmem:[#allocation59_spill] sm:$0xff] }
 0x1f0   : > { %v1695_v49 = vsel %vm1676_vm2, %v1662_v43, %v6079_v62 }
 0x1f1   : > { %v1454_v54 = vpop.permute.xlu1 %1453  ;;  %v1072_v28 = vpop.permute.xlu0 %1071  ;;  %v1728_v39 = vsel %vm1709_vm3, %v1695_v49, %v6080_v24 }
 0x1f2   : > { %v1859_v8 = vsel %vm1841_vm7, %v1826_v5, %v1454_v54  ;;  %v1761_v33 = vsel %vm1742_vm4, %v1728_v39, %v1072_v28  ;;  %v6083_v28 = vld [vmem:[#allocation77_spill] sm:$0xff] }
 0x1f3   : > { %1599 = vrot.lane.b32.xlu1 %v3571_v53, %s3901_s15  ;;  %1473 = vrot.lane.b32.xlu0 %v5045_v26, %s3900_s14  ;;  %v1729_v9 = vsel %vm1709_vm3, %v1696_v60, %v6083_v28 }
 0x1f5   : > { %v1074_v32 = vpop.permute.xlu1 %1073  ;;  %v1580_v35 = vpop.permute.xlu0 %1579 }
 0x1f6   : > { %v1891_v41 = vsel %vm1874_vm8, %v1858_v0, %v1580_v35  ;;  %v1762_v61 = vsel %vm1742_vm4, %v1729_v9, %v1074_v32  ;;  %v6088_v9 = vld [vmem:[#allocation60_spill] sm:$0xff] }
 0x1f7   : > { %1219 = vrot.lane.b32.xlu1 %v3571_v53, %s3898_s26  ;;  %1093 = vrot.lane.b32.xlu0 %v5045_v26, %s3897_s21 }
 0x1f8   : > { %3752 = vmatprep.mubr.msk.f32.mxu0 %vm1912_vm9, %v1891_v41  ;;  %v3480_v41 = vld [vmem:[%s3984_s17 + $0x18a] sm:$0xff] }
 0x1f9   : > { %v1582_v13 = vpop.permute.xlu1 %1581  ;;  %v1200_v11 = vpop.permute.xlu0 %1199 }
 0x1fa   : > { %v1892_v25 = vsel %vm1874_vm8, %v1859_v8, %v1582_v13  ;;  %v1794_v53 = vsel %vm1775_vm5, %v1761_v33, %v1200_v11  ;;  %v3511_v8 = vld [vmem:[%s3984_s17 + $0x198] sm:$0xff]  ;;  %v3576_v33 = vld [vmem:[%s3984_s17 + $0x1a2] sm:$0xff] }
 0x1fb   : > { %1221 = vrot.lane.b32.xlu1 %v3478_v58, %s3898_s26  ;;  %1601 = vrot.lane.b32.xlu0 %v3478_v58, %s3901_s15  ;;  %v3512_v58 = vld [vmem:[%s3984_s17 + $0x1a0] sm:$0xff] }
 0x1fc   : > { %3753 = vmatmul.mubr.msk.f32.gmra.mxu0 %vm1912_vm9, %v1892_v25  ;;  %v3861_v25 = vld [vmem:[%s3984_s17 + $0xf0] sm:$0xff] }
 0x1fd   : > { %v1328_v31 = vpop.permute.xlu1 %1327  ;;  %v1202_v59 = vpop.permute.xlu0 %1201 }
 0x1fe   : > { %v1827_v54 = vsel %vm1808_vm6, %v1794_v53, %v1328_v31  ;;  %v1795_v7 = vsel %vm1775_vm5, %v1762_v61, %v1202_v59  ;;  %v6085_v59 = vld [vmem:[#allocation61_spill] sm:$0xff] }
 0x1ff   : > { %967 = vrot.lane.b32.xlu1 %v3415_v20, %s3896_s20  ;;  %1347 = vrot.lane.b32.xlu0 %v3415_v20, %s3899_s11  ;;  %v6084_v20 = vld [vmem:[#allocation36_spill] sm:$0xff] }
 0x200   : > { %v1664_v31 = vsel %vm1643_vm1, %v3861_v25, %v6084_v20 }
 0x201   : > { %v1456_v42 = vpop.permute.xlu1 %1455  ;;  %v1330_v37 = vpop.permute.xlu0 %1329 }
 0x202   : > { %v1860_v56 = vsel %vm1841_vm7, %v1827_v54, %v1456_v42  ;;  %v1828_v16 = vsel %vm1808_vm6, %v1795_v7, %v1330_v37  ;;  %v3544_v42 = vld [vmem:[%s3984_s17 + $0x1a1] sm:$0xff]  ;;  %v3543_v37 = vld [vmem:[%s3984_s17 + $0x199] sm:$0xff] }
 0x203   : > { %1475 = vrot.lane.b32.xlu1 %v5081_v6, %s3900_s14  ;;  %1349 = vrot.lane.b32.xlu0 %v3510_v29, %s3899_s11  ;;  %v3862_v54 = vld [vmem:[%s3984_s17 + $0xf8] sm:$0xff] }
 0x205   : > { %v1458_v19 = vpop.permute.xlu1 %1457  ;;  %v1076_v27 = vpop.permute.xlu0 %1075 }
 0x206   : > { %v1861_v0 = vsel %vm1841_vm7, %v1828_v16, %v1458_v19 }
 0x207   : > { %1095 = vrot.lane.b32.xlu1 %v5081_v6, %s3897_s21  ;;  %969 = vrot.lane.b32.xlu0 %v3510_v29, %s3896_s20  ;;  %s2309_s20 = sld [smem:[#allocation2 + %s2308_s18]]  ;;  %v1697_v29 = vsel %vm1676_vm2, %v1664_v31, %v6085_v59  ;;  %v6090_v31 = vld [vmem:[#allocation38_spill] sm:$0xff] }
 0x208   : > { %v1730_v47 = vsel %vm1709_vm3, %v1697_v29, %v6086_v30  ;;  %v6091_v29 = vld [vmem:[#allocation63_spill] sm:$0xff] }
 0x209   : > { %v5112_v10 = vpop.permute.xlu1 %1077  ;;  %v1584_v1 = vpop.permute.xlu0 %1583  ;;  %v1763_v49 = vsel %vm1742_vm4, %v1730_v47, %v1076_v27 }
 0x20a   : > { %v1893_v51 = vsel %vm1874_vm8, %v1860_v56, %v1584_v1  ;;  %v6089_v1 = vld [vmem:[#allocation79_spill] sm:$0xff] }
 0x20b   : > { %1603 = vrot.lane.b32.xlu1 %v3573_v34, %s3901_s15  ;;  %1477 = vrot.lane.b32.xlu0 %v5107_v40, %s3900_s14 }
 0x20c   : > { %3755 = vmatprep.mubr.msk.f32.mxu0 %vm1912_vm9, %v1893_v51 }
 0x20d   : > { %v1586_v32 = vpop.permute.xlu1 %1585  ;;  %v1204_v35 = vpop.permute.xlu0 %1203  ;;  %v5170_v53 = vstv %s2309_s20 }
 0x20e   : > { %v1894_v50 = vsel %vm1874_vm8, %v1861_v0, %v1586_v32  ;;  %v1796_v24 = vsel %vm1775_vm5, %v1763_v49, %v1204_v35 }
 0x20f   : > { %1223 = vrot.lane.b32.xlu1 %v3573_v34, %s3898_s26  ;;  %1097 = vrot.lane.b32.xlu0 %v5107_v40, %s3897_s21  ;;  %s3382_s21 = sshll.u32 %s6128_s19, 3  ;;  %v6087_v34 = vld [vmem:[#allocation35_spill] sm:$0xff] }
 0x210   : > { %3756 = vmatmul.mubr.msk.f32.gmra.mxu0 %vm1912_vm9, %v1894_v50  ;;  %s5159_s24 = scalar_lea.vmem %s5949_s7, %s3382_s21  ;;  %v1665_v28 = vsel %vm1643_vm1, %v3862_v54, %v6087_v34  ;;  %s5399_s12 = scalar_lea.vmem %s5947_s5, %s3382_s21 }
 0x211   : > { %v1332_v44 = vpop.permute.xlu1 %1331  ;;  %v1206_v5 = vpop.permute.xlu0 %1205  ;;  %v1698_v56 = vsel %vm1676_vm2, %v1665_v28, %v6088_v9  ;;  %v6093_v28 = vld [vmem:[#allocation37_spill] sm:$0xff] }
 0x212   : > { %v1829_v39 = vsel %vm1808_vm6, %v1796_v24, %v1332_v44  ;;  %v1731_v61 = vsel %vm1709_vm3, %v1698_v56, %v6089_v1  ;;  %v6094_v56 = vld [vmem:[#allocation62_spill] sm:$0xff] }
 0x213   : > { %1225 = vrot.lane.b32.xlu1 %v3480_v41, %s3898_s26  ;;  %1605 = vrot.lane.b32.xlu0 %v3480_v41, %s3901_s15  ;;  %v1764_v32 = vsel %vm1742_vm4, %v1731_v61, %v5112_v10  ;;  %s2239_s26 = sld [smem:[#allocation2 + %s3610_s16]] }
 0x214   : > { %v1797_v35 = vsel %vm1775_vm5, %v1764_v32, %v1206_v5  ;;  %v3863_v5 = vld [vmem:[%s3984_s17 + $0x108] sm:$0xff] }
 0x215   : > { %v1460_v13 = vpop.permute.xlu1 %1459  ;;  %v1334_v11 = vpop.permute.xlu0 %1333  ;;  %v1666_v59 = vsel %vm1643_vm1, %v3863_v5, %v6090_v31 }
 0x216   : > { %v1862_v27 = vsel %vm1841_vm7, %v1829_v39, %v1460_v13  ;;  %v1830_v50 = vsel %vm1808_vm6, %v1797_v35, %v1334_v11 }
 0x217   : > { %1353 = vrot.lane.b32.xlu1 %v3512_v58, %s3899_s11  ;;  %1351 = vrot.lane.b32.xlu0 %v3511_v8, %s3899_s11 }
 0x219   : > { %v1080_v43 = vpop.permute.xlu1 %1079  ;;  %v5150_v62 = vpop.permute.xlu0 %953 }
 0x21b   : > { %1481 = vrot.lane.b32.xlu1 %v3544_v42, %s3900_s14  ;;  %1479 = vrot.lane.b32.xlu0 %v3543_v37, %s3900_s14  ;;  %v1699_v42 = vsel %vm1676_vm2, %v1666_v59, %v6091_v29  ;;  %v6092_v37 = vld [vmem:[#allocation81_spill] sm:$0xff]  ;;  %v6095_v59 = vld [vmem:[#allocation40_spill] sm:$0xff] }
 0x21c   : > { %v5165_v19 = vpop.f32.mrf.mxu0  ;;  %v1732_v30 = vsel %vm1709_vm3, %v1699_v42, %v6092_v37  ;;  %v6096_v37 = vld [vmem:[#allocation65_spill] sm:$0xff] }
 0x21d   : > { %v1588_v17 = vpop.permute.xlu1 %1587  ;;  %v1462_v18 = vpop.permute.xlu0 %1461  ;;  %v2312_v51 = vmul.f32 %v5165_v19, %v5170_v53  ;;  %v1765_v39 = vsel %vm1742_vm4, %v1732_v30, %v1080_v43  ;;  %v3864_v43 = vld [vmem:[%s3984_s17 + $0x110] sm:$0xff] }
 0x21e   : > { %v1895_v3 = vsel %vm1874_vm8, %v1862_v27, %v1588_v17  ;;  %v5173_v60 = vpop.f32.mrf.mxu0  ;;  %v1863_v41 = vsel %vm1841_vm7, %v1830_v50, %v1462_v18  ;;  %v1667_v9 = vsel %vm1643_vm1, %v3864_v43, %v6093_v28  ;;  %v6097_v28 = vld [vmem:[#allocation39_spill] sm:$0xff] }
 0x21f   : > { %1609 = vrot.lane.b32.xlu1 %v3576_v33, %s3901_s15  ;;  %1607 = vrot.lane.b32.xlu0 %v3575_v55, %s3901_s15  ;;  %v2311_v7 = vmul.f32 %v5170_v53, %v5173_v60  ;;  %v1700_v1 = vsel %vm1676_vm2, %v1667_v9, %v6094_v56  ;;  %v6098_v9 = vld [vmem:[#allocation64_spill] sm:$0xff] }
 0x220   : > { %3758 = vmatprep.mubr.msk.f32.mxu0 %vm1912_vm9, %v1895_v3  ;;  %v1733_v61 = vsel %vm1709_vm3, %v1700_v1, %v5150_v62 }
 0x221   : > { %v1208_v16 = vpop.permute.xlu1 %1207  ;;  %v1082_v0 = vpop.permute.xlu0 %1081 }
 0x222   : > { %v1798_v55 = vsel %vm1775_vm5, %v1765_v39, %v1208_v16  ;;  %v1766_v16 = vsel %vm1742_vm4, %v1733_v61, %v1082_v0 }
 0x223   : > { %2377 = vrot.lane.b32.xlu1 %v2312_v51, %s3902_s25  ;;  %2375 = vrot.lane.b32.xlu0 %v2311_v7, %s3902_s25 }
 0x225   : > { %v1210_v44 = vpop.permute.xlu1 %1209  ;;  %v1590_v58 = vpop.permute.xlu0 %1589 }
 0x226   : > { %v1896_v8 = vsel %vm1874_vm8, %v1863_v41, %v1590_v58  ;;  %v1799_v32 = vsel %vm1775_vm5, %v1766_v16, %v1210_v44 }
 0x227   : > { %3759 = vmatmul.mubr.msk.f32.gmra.mxu0 %vm1912_vm9, %v1896_v8 }
 0x229   : > { %v956_v13 = vpop.permute.xlu1 %955  ;;  %v1336_v25 = vpop.permute.xlu0 %1335 }
 0x22a   : > { %v1831_v17 = vsel %vm1808_vm6, %v1798_v55, %v1336_v25 }
 0x22d   : > { %v1464_v10 = vpop.permute.xlu1 %1463  ;;  %v1338_v20 = vpop.permute.xlu0 %1337 }
 0x22e   : > { %v1864_v18 = vsel %vm1841_vm7, %v1831_v17, %v1464_v10  ;;  %v1832_v35 = vsel %vm1808_vm6, %v1799_v32, %v1338_v20  ;;  %v3865_v20 = vld [vmem:[%s3984_s17 + $0x120] sm:$0xff] }
 0x22f   : > { %v1668_v29 = vsel %vm1643_vm1, %v3865_v20, %v6095_v59  ;;  %v6099_v59 = vld [vmem:[#allocation42_spill] sm:$0xff] }
 0x230   : > { %v5203_v11 = vpop.f32.mrf.mxu0  ;;  %v1701_v30 = vsel %vm1676_vm2, %v1668_v29, %v6096_v37 }
 0x231   : > { %v2314_v47 = vmul.f32 %v5203_v11, %v5170_v53  ;;  %v1084_v49 = vpop.permute.xlu1 %1083  ;;  %v958_v24 = vpop.permute.xlu0 %957 }
 0x232   : > { %v5210_v33 = vpop.f32.mrf.mxu0 }
 0x233   : > { %v2313_v27 = vmul.f32 %v5170_v53, %v5210_v33  ;;  %2381 = vrot.lane.b32.xlu1 %v2314_v47, %s3902_s25  ;;  %v1734_v47 = vsel %vm1709_vm3, %v1701_v30, %v956_v13  ;;  %v1669_v13 = vsel %vm1643_vm1, %v4853_v23, %v6097_v28 }
 0x234   : > { %v1702_v56 = vsel %vm1676_vm2, %v1669_v13, %v6098_v9  ;;  %v6101_v9 = vld [vmem:[#allocation41_spill] sm:$0xff] }
 0x235   : > { %2379 = vrot.lane.b32.xlu0 %v2313_v27, %s3902_s25  ;;  %v1592_v3 = vpop.permute.xlu1 %1591  ;;  %v1466_v54 = vpop.permute.xlu0 %1465  ;;  %v1767_v27 = vsel %vm1742_vm4, %v1734_v47, %v1084_v49  ;;  %v1735_v49 = vsel %vm1709_vm3, %v1702_v56, %v958_v24 }
 0x236   : > { %v1897_v34 = vsel %vm1874_vm8, %v1864_v18, %v1592_v3  ;;  %v1865_v50 = vsel %vm1841_vm7, %v1832_v35, %v1466_v54 }
 0x237   : > { %3761 = vmatprep.mubr.msk.f32.mxu0 %vm1912_vm9, %v1897_v34 }
 0x239   : > { %v1212_v51 = vpop.permute.xlu1 %1211  ;;  %v1086_v7 = vpop.permute.xlu0 %1085 }
 0x23a   : > { %v1800_v17 = vsel %vm1775_vm5, %v1767_v27, %v1212_v51  ;;  %v1768_v51 = vsel %vm1742_vm4, %v1735_v49, %v1086_v7 }
 0x23d   : > { %v1214_v41 = vpop.permute.xlu1 %1213  ;;  %v1594_v58 = vpop.permute.xlu0 %1593 }
 0x23e   : > { %v1898_v8 = vsel %vm1874_vm8, %v1865_v50, %v1594_v58  ;;  %v1801_v16 = vsel %vm1775_vm5, %v1768_v51, %v1214_v41 }
 0x23f   : > { %3762 = vmatmul.mubr.msk.f32.gmra.mxu0 %vm1912_vm9, %v1898_v8 }
 0x241   : > { %v960_v25 = vpop.permute.xlu1 %959  ;;  %v1340_v10 = vpop.permute.xlu0 %1339 }
 0x242   : > { %v1833_v18 = vsel %vm1808_vm6, %v1800_v17, %v1340_v10 }
 0x244   : > { %v5234_v62 = vpop.f32.mrf.mxu0 }
 0x245   : > { %v2316_v5 = vmul.f32 %v5234_v62, %v5170_v53  ;;  %v1468_v0 = vpop.permute.xlu1 %1467  ;;  %v1342_v31 = vpop.permute.xlu0 %1341 }
 0x246   : > { %v5238_v44 = vpop.f32.mrf.mxu0  ;;  %v1866_v3 = vsel %vm1841_vm7, %v1833_v18, %v1468_v0  ;;  %v1834_v32 = vsel %vm1808_vm6, %v1801_v16, %v1342_v31  ;;  %v355_v0 = vld [vmem:[%s3984_s17 + $0x138] sm:$0xff] }
 0x247   : > { %v2315_v42 = vmul.f32 %v5170_v53, %v5238_v44  ;;  %2385 = vrot.lane.b32.xlu1 %v2316_v5, %s3902_s25  ;;  %v1670_v29 = vsel %vm1643_vm1, %v355_v0, %v6099_v59 }
 0x249   : > { %2383 = vrot.lane.b32.xlu0 %v2315_v42, %s3902_s25  ;;  %v1088_v39 = vpop.permute.xlu1 %1087  ;;  %v962_v55 = vpop.permute.xlu0 %961  ;;  %v6100_v42 = vld [vmem:[#allocation67_spill] sm:$0xff] }
 0x24a   : > { %v1703_v37 = vsel %vm1676_vm2, %v1670_v29, %v6100_v42  ;;  %v6103_v42 = vld [vmem:[#allocation45_spill] sm:$0xff] }
 0x24b   : > { %v1736_v30 = vsel %vm1709_vm3, %v1703_v37, %v960_v25  ;;  %v6102_v25 = vld [vmem:[#allocation66_spill] sm:$0xff] }
 0x24c   : > { %v1769_v17 = vsel %vm1742_vm4, %v1736_v30, %v1088_v39  ;;  %v6104_v30 = vld [vmem:[#allocation69_spill] sm:$0xff] }
 0x24d   : > { %v1596_v54 = vpop.permute.xlu1 %1595  ;;  %v1470_v34 = vpop.permute.xlu0 %1469 }
 0x24e   : > { %v1899_v43 = vsel %vm1874_vm8, %v1866_v3, %v1596_v54  ;;  %v1867_v35 = vsel %vm1841_vm7, %v1834_v32, %v1470_v34  ;;  %v356_v3 = vld [vmem:[%s3984_s17 + $0x140] sm:$0xff] }
 0x24f   : > { %3764 = vmatprep.mubr.msk.f32.mxu0 %vm1912_vm9, %v1899_v43  ;;  %v1671_v56 = vsel %vm1643_vm1, %v356_v3, %v6101_v9 }
 0x250   : > { %v1704_v49 = vsel %vm1676_vm2, %v1671_v56, %v6102_v25 }
 0x251   : > { %v1216_v1 = vpop.permute.xlu1 %1215  ;;  %v1090_v61 = vpop.permute.xlu0 %1089  ;;  %v1737_v39 = vsel %vm1709_vm3, %v1704_v49, %v962_v55 }
 0x252   : > { %v1802_v18 = vsel %vm1775_vm5, %v1769_v17, %v1216_v1  ;;  %v1770_v16 = vsel %vm1742_vm4, %v1737_v39, %v1090_v61  ;;  %v6105_v39 = vld [vmem:[#allocation44_spill] sm:$0xff] }
 0x255   : > { %v1218_v50 = vpop.permute.xlu1 %1217  ;;  %v1598_v23 = vpop.permute.xlu0 %1597 }
 0x256   : > { %v1900_v58 = vsel %vm1874_vm8, %v1867_v35, %v1598_v23  ;;  %v1803_v32 = vsel %vm1775_vm5, %v1770_v16, %v1218_v50 }
 0x257   : > { %3765 = vmatmul.mubr.msk.f32.gmra.mxu0 %vm1912_vm9, %v1900_v58 }
 0x258   : > { %v5268_v8 = vpop.f32.mrf.mxu0 }
 0x259   : > { %v2318_v24 = vmul.f32 %v5268_v8, %v5170_v53  ;;  %v964_v10 = vpop.permute.xlu1 %963  ;;  %v1344_v7 = vpop.permute.xlu0 %1343 }
 0x25a   : > { %v5272_v5 = vpop.f32.mrf.mxu0  ;;  %v1835_v54 = vsel %vm1808_vm6, %v1802_v18, %v1344_v7 }
 0x25b   : > { %v2317_v41 = vmul.f32 %v5170_v53, %v5272_v5  ;;  %2389 = vrot.lane.b32.xlu1 %v2318_v24, %s3902_s25 }
 0x25d   : > { %2387 = vrot.lane.b32.xlu0 %v2317_v41, %s3902_s25  ;;  %v1472_v31 = vpop.permute.xlu1 %1471  ;;  %v1346_v20 = vpop.permute.xlu0 %1345 }
 0x25e   : > { %v1868_v34 = vsel %vm1841_vm7, %v1835_v54, %v1472_v31  ;;  %v1836_v35 = vsel %vm1808_vm6, %v1803_v32, %v1346_v20  ;;  %v357_v20 = vld [vmem:[%s3984_s17 + $0x150] sm:$0xff] }
 0x25f   : > { %v1672_v37 = vsel %vm1643_vm1, %v357_v20, %v6103_v42 }
 0x260   : > { %v1705_v17 = vsel %vm1676_vm2, %v1672_v37, %v6104_v30  ;;  %v360_v37 = vld [vmem:[%s3984_s17 + $0x170] sm:$0xff]  ;;  %v359_v30 = vld [vmem:[%s3984_s17 + $0x168] sm:$0xff] }
 0x261   : > { %v1092_v47 = vpop.permute.xlu1 %1091  ;;  %v966_v27 = vpop.permute.xlu0 %965  ;;  %v1738_v18 = vsel %vm1709_vm3, %v1705_v17, %v964_v10  ;;  %v6106_v10 = vld [vmem:[#allocation68_spill] sm:$0xff] }
 0x265   : > { %v1600_v43 = vpop.permute.xlu1 %1599  ;;  %v1474_v28 = vpop.permute.xlu0 %1473 }
 0x266   : > { %v1901_v13 = vsel %vm1874_vm8, %v1868_v34, %v1600_v43  ;;  %v1869_v58 = vsel %vm1841_vm7, %v1836_v35, %v1474_v28  ;;  %v1771_v34 = vsel %vm1742_vm4, %v1738_v18, %v1092_v47  ;;  %v358_v28 = vld [vmem:[%s3984_s17 + $0x158] sm:$0xff] }
 0x267   : > { %3767 = vmatprep.mubr.msk.f32.mxu0 %vm1912_vm9, %v1901_v13  ;;  %v1673_v16 = vsel %vm1643_vm1, %v358_v28, %v6105_v39  ;;  %v6110_v39 = vld [vmem:[#allocation71_spill] sm:$0xff] }
 0x268   : > { %v1706_v47 = vsel %vm1676_vm2, %v1673_v16, %v6106_v10 }
 0x269   : > { %v1220_v1 = vpop.permute.xlu1 %1219  ;;  %v1094_v51 = vpop.permute.xlu0 %1093 }
 0x26a   : > { %v1804_v43 = vsel %vm1775_vm5, %v1771_v34, %v1220_v1  ;;  %v1739_v1 = vsel %vm1709_vm3, %v1706_v47, %v966_v27  ;;  %v2305_v34 = vld [vmem:[%s5944_s2] sm:$0x1] }
 0x26c   : > { %v5299_v23 = vpop.f32.mrf.mxu0 }
 0x26d   : > { %v2320_v24 = vmul.f32 %v5299_v23, %v5170_v53  ;;  %v1222_v7 = vpop.permute.xlu1 %1221  ;;  %v1602_v41 = vpop.permute.xlu0 %1601 }
 0x26e   : > { %v1902_v55 = vsel %vm1874_vm8, %v1869_v58, %v1602_v41  ;;  %v5305_v0 = vpop.f32.mrf.mxu0  ;;  %v1772_v41 = vsel %vm1742_vm4, %v1739_v1, %v1094_v51 }
 0x26f   : > { %v2319_v61 = vmul.f32 %v5170_v53, %v5305_v0  ;;  %2393 = vrot.lane.b32.xlu1 %v2320_v24, %s3902_s25  ;;  %3768 = vmatmul.mubr.msk.f32.gmra.mxu0 %vm1912_vm9, %v1902_v55 }
 0x271   : > { %2391 = vrot.lane.b32.xlu0 %v2319_v61, %s3902_s25  ;;  %v968_v50 = vpop.permute.xlu1 %967  ;;  %v1348_v31 = vpop.permute.xlu0 %1347  ;;  %v1805_v61 = vsel %vm1775_vm5, %v1772_v41, %v1222_v7  ;;  %v2506_v7 = vlaneseq }
 0x272   : > { %v1837_v13 = vsel %vm1808_vm6, %v1804_v43, %v1348_v31  ;;  %v6107_v43 = vld [vmem:[#allocation47_spill] sm:$0xff] }
 0x273   : > { %v1675_v28 = vsel %vm1643_vm1, %v360_v37, %v6107_v43  ;;  %v2507_v1 = vshrl.u32 %v2506_v7, 7 }
 0x275   : > { %v1476_v59 = vpop.permute.xlu1 %1475  ;;  %v1350_v29 = vpop.permute.xlu0 %1349  ;;  %v2508_v7 = vsub.s32 0, %v2507_v1 }
 0x276   : > { %v1870_v9 = vsel %vm1841_vm7, %v1837_v13, %v1476_v59  ;;  %v1838_v27 = vsel %vm1808_vm6, %v1805_v61, %v1350_v29  ;;  %v2503_v29 = vld [vmem:[%s5944_s2 + $0x1] sm:$0x1]  ;;  %v6108_v13 = vld [vmem:[#allocation48_spill] sm:$0xff] }
 0x277   : > { %v2504_v47 = vmul.f32 %v2503_v29, %v5170_v53 }
 0x279   : > { %v1096_v3 = vpop.permute.xlu1 %1095  ;;  %v970_v54 = vpop.permute.xlu0 %969 }
 0x27d   : > { %v1604_v56 = vpop.permute.xlu1 %1603  ;;  %v1478_v25 = vpop.permute.xlu0 %1477 }
 0x27e   : > { %v1903_v49 = vsel %vm1874_vm8, %v1870_v9, %v1604_v56  ;;  %v1871_v20 = vsel %vm1841_vm7, %v1838_v27, %v1478_v25  ;;  %v1674_v9 = vsel %vm1643_vm1, %v359_v30, %v6108_v13  ;;  %v6109_v56 = vld [vmem:[#allocation70_spill] sm:$0xff] }
 0x27f   : > { %3770 = vmatprep.mubr.msk.f32.mxu0 %vm1912_vm9, %v1903_v49  ;;  %v1708_v25 = vsel %vm1676_vm2, %v1675_v28, %v6109_v56  ;;  %v5362_v49 = vstv %s2239_s26  ;;  %v1707_v16 = vsel %vm1676_vm2, %v1674_v9, %v6110_v39 }
 0x280   : > { %v5329_v32 = vpop.f32.mrf.mxu0  ;;  %v2306_v10 = vmul.f32 %v2305_v34, %v5362_v49  ;;  %v1741_v41 = vsel %vm1709_vm3, %v1708_v25, %v970_v54 }
 0x281   : > { %v2322_v35 = vmul.f32 %v5329_v32, %v5170_v53  ;;  %v1224_v58 = vpop.permute.xlu1 %1223  ;;  %v1098_v24 = vpop.permute.xlu0 %1097 }
 0x282   : > { %v5335_v55 = vpop.f32.mrf.mxu0  ;;  %v2505_v34 = vadd.f32 %v2504_v47, %v2306_v10 }
 0x283   : > { %v2321_v31 = vmul.f32 %v5170_v53, %v5335_v55  ;;  %2397 = vrot.lane.b32.xlu1 %v2322_v35, %s3902_s25  ;;  %v1740_v35 = vsel %vm1709_vm3, %v1707_v16, %v968_v50 }
 0x284   : > { %v1773_v27 = vsel %vm1742_vm4, %v1740_v35, %v1096_v3 }
 0x285   : > { %2395 = vrot.lane.b32.xlu0 %v2321_v31, %s3902_s25  ;;  %v1226_v59 = vpop.permute.xlu1 %1225  ;;  %v1606_v42 = vpop.permute.xlu0 %1605 }
 0x286   : > { %v1904_v51 = vsel %vm1874_vm8, %v1871_v20, %v1606_v42  ;;  %v1774_v20 = vsel %vm1742_vm4, %v1741_v41, %v1098_v24  ;;  %v1806_v42 = vsel %vm1775_vm5, %v1773_v27, %v1224_v58  ;;  %v2242_v58 = vmul.f32 %v5165_v19, %v5362_v49 }
 0x287   : > { %3771 = vmatmul.mubr.msk.f32.gmra.mxu0 %vm1912_vm9, %v1904_v51  ;;  %v1807_v51 = vsel %vm1775_vm5, %v1774_v20, %v1226_v59  ;;  %v2241_v59 = vmul.f32 %v5362_v49, %v5173_v60  ;;  %v2244_v20 = vmul.f32 %v5203_v11, %v5362_v49 }
 0x289   : > { %v1354_v17 = vpop.permute.xlu1 %1353  ;;  %v1352_v18 = vpop.permute.xlu0 %1351 }
 0x28a   : > { %v1840_v37 = vsel %vm1808_vm6, %v1807_v51, %v1354_v17  ;;  %v1839_v30 = vsel %vm1808_vm6, %v1806_v42, %v1352_v18  ;;  %v5388_v18 = vrot.slane %v2505_v34, %v2508_v7  ;;  %v2243_v51 = vmul.f32 %v5362_v49, %v5210_v33 }
 0x28d   : > { %v1482_v61 = vpop.permute.xlu1 %1481  ;;  %v1480_v31 = vpop.permute.xlu0 %1479 }
 0x28e   : > { %v1873_v50 = vsel %vm1841_vm7, %v1840_v37, %v1482_v61  ;;  %v1872_v54 = vsel %vm1841_vm7, %v1839_v30, %v1480_v31 }
 0x291   : > { %v1610_v29 = vpop.permute.xlu1 %1609  ;;  %v1608_v43 = vpop.permute.xlu0 %1607 }
 0x292   : > { %v1906_v3 = vsel %vm1874_vm8, %v1873_v50, %v1610_v29  ;;  %v1905_v24 = vsel %vm1874_vm8, %v1872_v54, %v1608_v43 }
 0x293   : > { %3773 = vmatprep.mubr.msk.f32.mxu0 %vm1912_vm9, %v1905_v24 }
 0x294   : > { %v5385_v17 = vpop.f32.mrf.mxu0  ;;  %3774 = vmatmul.mubr.msk.f32.gmra.mxu0 %vm1912_vm9, %v1906_v3 }
 0x295   : > { %v2324_v28 = vmul.f32 %v5385_v17, %v5170_v53  ;;  %v2378_v13 = vpop.permute.xlu1 %2377  ;;  %v2376_v9 = vpop.permute.xlu0 %2375 }
 0x296   : > { %v2472_v56 = vadd.f32 %v2378_v13, %v2242_v58  ;;  %v2471_v25 = vadd.f32 %v2376_v9, %v2241_v59  ;;  %v5392_v39 = vpop.f32.mrf.mxu0 }
 0x297   : > { %v2323_v19 = vmul.f32 %v5170_v53, %v5392_v39  ;;  %2401 = vrot.lane.b32.xlu1 %v2324_v28, %s3902_s25 }
 0x298   : > { %v2511_v60 = vadd.f32 %v5388_v18, %v2472_v56  ;;  %v2510_v16 = vadd.f32 %v5388_v18, %v2471_v25 }
 0x299   : > { %2399 = vrot.lane.b32.xlu0 %v2323_v19, %s3902_s25  ;;  %v2246_v19 = vmul.f32 %v5234_v62, %v5362_v49 }
 0x29a   : > { %2543 = vst.msk [vmem:[%s5399_s12 + $0x8] sm:$0xff] %vm1676_vm2, %v2511_v60  ;;  %v2575_v10 = vsel %vm1676_vm2, %v2511_v60, 0.0  ;;  %v2644_v47 = vmul.f32 %v2511_v60, %v2511_v60  ;;  %2542 = vst.msk [vmem:[%s5399_s12] sm:$0xff] %vm1676_vm2, %v2510_v16  ;;  %v2574_v1 = vsel %vm1676_vm2, %v2510_v16, 0.0  ;;  %v2643_v35 = vmul.f32 %v2510_v16, %v2510_v16 }
 0x29b   : > { %v2576_v41 = vadd.f32 %v2575_v10, %v2574_v1  ;;  %v2245_v16 = vmul.f32 %v5362_v49, %v5238_v44 }
 0x29c   : > { %v2676_v61 = vsel %vm1676_vm2, %v2644_v47, 0.0  ;;  %v2675_v31 = vsel %vm1676_vm2, %v2643_v35, 0.0 }
 0x29d   : > { %v2677_v27 = vadd.f32 %v2676_v61, %v2675_v31 }
 0x2a5   : > { %v2382_v42 = vpop.permute.xlu1 %2381 }
 0x2a6   : > { %v2474_v37 = vadd.f32 %v2382_v42, %v2244_v20 }
 0x2a7   : > { %v2380_v30 = vpop.permute.xlu0 %2379 }
 0x2a8   : > { %v2513_v34 = vadd.f32 %v5388_v18, %v2474_v37  ;;  %v2473_v7 = vadd.f32 %v2380_v30, %v2243_v51  ;;  %v5420_v50 = vpop.f32.mrf.mxu0 }
 0x2a9   : > { %v2326_v54 = vmul.f32 %v5420_v50, %v5170_v53 }
 0x2aa   : > { %2545 = vst.msk [vmem:[%s5399_s12 + $0x18] sm:$0xff] %vm1676_vm2, %v2513_v34  ;;  %v2512_v29 = vadd.f32 %v5388_v18, %v2473_v7  ;;  %v5427_v43 = vpop.f32.mrf.mxu0  ;;  %v2646_v33 = vmul.f32 %v2513_v34, %v2513_v34  ;;  %v2579_v59 = vsel %vm1676_vm2, %v2513_v34, 0.0 }
 0x2ab   : > { %v2325_v11 = vmul.f32 %v5170_v53, %v5427_v43  ;;  %2405 = vrot.lane.b32.xlu1 %v2326_v54, %s3902_s25 }
 0x2ac   : > { %2544 = vst.msk [vmem:[%s5399_s12 + $0x10] sm:$0xff] %vm1676_vm2, %v2512_v29  ;;  %v2577_v3 = vsel %vm1676_vm2, %v2512_v29, 0.0  ;;  %v2645_v24 = vmul.f32 %v2512_v29, %v2512_v29  ;;  %v2680_v56 = vsel %vm1676_vm2, %v2646_v33, 0.0 }
 0x2ad   : > { %v2578_v58 = vadd.f32 %v2577_v3, %v2576_v41  ;;  %2403 = vrot.lane.b32.xlu0 %v2325_v11, %s3902_s25  ;;  %v2248_v11 = vmul.f32 %v5268_v8, %v5362_v49  ;;  %v2247_v3 = vmul.f32 %v5362_v49, %v5272_v5 }
 0x2ae   : > { %v2678_v28 = vsel %vm1676_vm2, %v2645_v24, 0.0 }
 0x2af   : > { %v2679_v13 = vadd.f32 %v2678_v28, %v2677_v27  ;;  %v2580_v9 = vadd.f32 %v2579_v59, %v2578_v58 }
 0x2b1   : > { %v2681_v25 = vadd.f32 %v2680_v56, %v2679_v13 }
 0x2b9   : > { %v2386_v60 = vpop.permute.xlu1 %2385 }
 0x2ba   : > { %v2476_v10 = vadd.f32 %v2386_v60, %v2246_v19 }
 0x2bb   : > { %v2384_v47 = vpop.permute.xlu0 %2383 }
 0x2bc   : > { %v2515_v1 = vadd.f32 %v5388_v18, %v2476_v10  ;;  %v2475_v35 = vadd.f32 %v2384_v47, %v2245_v16  ;;  %v5444_v41 = vpop.f32.mrf.mxu0 }
 0x2bd   : > { %v2328_v61 = vmul.f32 %v5444_v41, %v5170_v53 }
 0x2be   : > { %2547 = vst.msk [vmem:[%s5399_s12 + $0x28] sm:$0xff] %vm1676_vm2, %v2515_v1  ;;  %v2514_v31 = vadd.f32 %v5388_v18, %v2475_v35  ;;  %v5451_v27 = vpop.f32.mrf.mxu0  ;;  %v2648_v44 = vmul.f32 %v2515_v1, %v2515_v1  ;;  %v2583_v37 = vsel %vm1676_vm2, %v2515_v1, 0.0 }
 0x2bf   : > { %v2327_v62 = vmul.f32 %v5170_v53, %v5451_v27  ;;  %2409 = vrot.lane.b32.xlu1 %v2328_v61, %s3902_s25 }
 0x2c0   : > { %2546 = vst.msk [vmem:[%s5399_s12 + $0x20] sm:$0xff] %vm1676_vm2, %v2514_v31  ;;  %v2581_v20 = vsel %vm1676_vm2, %v2514_v31, 0.0  ;;  %v2647_v42 = vmul.f32 %v2514_v31, %v2514_v31  ;;  %v2684_v54 = vsel %vm1676_vm2, %v2648_v44, 0.0 }
 0x2c1   : > { %v2582_v51 = vadd.f32 %v2581_v20, %v2580_v9  ;;  %2407 = vrot.lane.b32.xlu0 %v2327_v62, %s3902_s25  ;;  %v2250_v62 = vmul.f32 %v5299_v23, %v5362_v49  ;;  %v2249_v20 = vmul.f32 %v5362_v49, %v5305_v0 }
 0x2c2   : > { %v2682_v30 = vsel %vm1676_vm2, %v2647_v42, 0.0 }
 0x2c3   : > { %v2683_v34 = vadd.f32 %v2682_v30, %v2681_v25  ;;  %v2584_v7 = vadd.f32 %v2583_v37, %v2582_v51 }
 0x2c5   : > { %v2685_v29 = vadd.f32 %v2684_v54, %v2683_v34 }
 0x2cd   : > { %v2390_v33 = vpop.permute.xlu1 %2389 }
 0x2ce   : > { %v2478_v24 = vadd.f32 %v2390_v33, %v2248_v11 }
 0x2cf   : > { %v2388_v58 = vpop.permute.xlu0 %2387 }
 0x2d0   : > { %v2517_v59 = vadd.f32 %v5388_v18, %v2478_v24  ;;  %v2477_v28 = vadd.f32 %v2388_v58, %v2247_v3  ;;  %v5468_v13 = vpop.f32.mrf.mxu0 }
 0x2d1   : > { %v2330_v9 = vmul.f32 %v5468_v13, %v5170_v53 }
 0x2d2   : > { %2549 = vst.msk [vmem:[%s5399_s12 + $0x38] sm:$0xff] %vm1676_vm2, %v2517_v59  ;;  %v2516_v56 = vadd.f32 %v5388_v18, %v2477_v28  ;;  %v5475_v25 = vpop.f32.mrf.mxu0  ;;  %v2650_v5 = vmul.f32 %v2517_v59, %v2517_v59  ;;  %v2587_v10 = vsel %vm1676_vm2, %v2517_v59, 0.0 }
 0x2d3   : > { %v2329_v8 = vmul.f32 %v5170_v53, %v5475_v25  ;;  %2413 = vrot.lane.b32.xlu1 %v2330_v9, %s3902_s25 }
 0x2d4   : > { %2548 = vst.msk [vmem:[%s5399_s12 + $0x30] sm:$0xff] %vm1676_vm2, %v2516_v56  ;;  %v2585_v19 = vsel %vm1676_vm2, %v2516_v56, 0.0  ;;  %v2649_v60 = vmul.f32 %v2516_v56, %v2516_v56  ;;  %v2688_v61 = vsel %vm1676_vm2, %v2650_v5, 0.0 }
 0x2d5   : > { %v2586_v16 = vadd.f32 %v2585_v19, %v2584_v7  ;;  %2411 = vrot.lane.b32.xlu0 %v2329_v8, %s3902_s25  ;;  %v2252_v8 = vmul.f32 %v5329_v32, %v5362_v49  ;;  %v2251_v19 = vmul.f32 %v5362_v49, %v5335_v55 }
 0x2d6   : > { %v2686_v47 = vsel %vm1676_vm2, %v2649_v60, 0.0 }
 0x2d7   : > { %v2687_v1 = vadd.f32 %v2686_v47, %v2685_v29  ;;  %v2588_v35 = vadd.f32 %v2587_v10, %v2586_v16 }
 0x2d9   : > { %v2689_v31 = vadd.f32 %v2688_v61, %v2687_v1 }
 0x2e1   : > { %v2394_v44 = vpop.permute.xlu1 %2393 }
 0x2e2   : > { %v2480_v42 = vadd.f32 %v2394_v44, %v2250_v62 }
 0x2e3   : > { %v2392_v51 = vpop.permute.xlu0 %2391 }
 0x2e4   : > { %v2519_v37 = vadd.f32 %v5388_v18, %v2480_v42  ;;  %v2479_v30 = vadd.f32 %v2392_v51, %v2249_v20 }
 0x2e6   : > { %2551 = vst.msk [vmem:[%s5399_s12 + $0x48] sm:$0xff] %vm1676_vm2, %v2519_v37  ;;  %v2518_v34 = vadd.f32 %v5388_v18, %v2479_v30  ;;  %v2652_v54 = vmul.f32 %v2519_v37, %v2519_v37  ;;  %v2591_v3 = vsel %vm1676_vm2, %v2519_v37, 0.0 }
 0x2e7   : > { %v5495_v7 = vpop.f32.mrf.mxu0 }
 0x2e8   : > { %2550 = vst.msk [vmem:[%s5399_s12 + $0x40] sm:$0xff] %vm1676_vm2, %v2518_v34  ;;  %v2589_v23 = vsel %vm1676_vm2, %v2518_v34, 0.0  ;;  %v2651_v29 = vmul.f32 %v2518_v34, %v2518_v34  ;;  %v2332_v0 = vmul.f32 %v5495_v7, %v5170_v53  ;;  %v2692_v9 = vsel %vm1676_vm2, %v2652_v54, 0.0 }
 0x2e9   : > { %v2590_v11 = vadd.f32 %v2589_v23, %v2588_v35  ;;  %v5502_v33 = vpop.f32.mrf.mxu0  ;;  %v2254_v23 = vmul.f32 %v5385_v17, %v5362_v49 }
 0x2ea   : > { %v2690_v24 = vsel %vm1676_vm2, %v2651_v29, 0.0  ;;  %v2331_v58 = vmul.f32 %v5170_v53, %v5502_v33  ;;  %2417 = vrot.lane.b32.xlu1 %v2332_v0, %s3902_s25 }
 0x2eb   : > { %v2691_v59 = vadd.f32 %v2690_v24, %v2689_v31  ;;  %v2592_v28 = vadd.f32 %v2591_v3, %v2590_v11  ;;  %v2253_v11 = vmul.f32 %v5362_v49, %v5392_v39 }
 0x2ec   : > { %2415 = vrot.lane.b32.xlu0 %v2331_v58, %s3902_s25 }
 0x2ed   : > { %v2693_v56 = vadd.f32 %v2692_v9, %v2691_v59 }
 0x2f5   : > { %v2398_v5 = vpop.permute.xlu1 %2397 }
 0x2f6   : > { %v2482_v60 = vadd.f32 %v2398_v5, %v2252_v8 }
 0x2f7   : > { %v2396_v16 = vpop.permute.xlu0 %2395 }
 0x2f8   : > { %v2521_v10 = vadd.f32 %v5388_v18, %v2482_v60  ;;  %v2481_v47 = vadd.f32 %v2396_v16, %v2251_v19 }
 0x2fa   : > { %2553 = vst.msk [vmem:[%s5399_s12 + $0x58] sm:$0xff] %vm1676_vm2, %v2521_v10  ;;  %v2520_v1 = vadd.f32 %v5388_v18, %v2481_v47  ;;  %v2654_v35 = vmul.f32 %v2521_v10, %v2521_v10  ;;  %v2595_v62 = vsel %vm1676_vm2, %v2521_v10, 0.0 }
 0x2fc   : > { %2552 = vst.msk [vmem:[%s5399_s12 + $0x50] sm:$0xff] %vm1676_vm2, %v2520_v1  ;;  %v2593_v61 = vsel %vm1676_vm2, %v2520_v1, 0.0  ;;  %v2653_v31 = vmul.f32 %v2520_v1, %v2520_v1  ;;  %v2696_v51 = vsel %vm1676_vm2, %v2654_v35, 0.0 }
 0x2fd   : > { %v2594_v32 = vadd.f32 %v2593_v61, %v2592_v28  ;;  %v2256_v61 = vmul.f32 %v5420_v50, %v5362_v49 }
 0x2fe   : > { %v2694_v55 = vsel %vm1676_vm2, %v2653_v31, 0.0 }
 0x2ff   : > { %v2695_v44 = vadd.f32 %v2694_v55, %v2693_v56  ;;  %v5524_v20 = vpop.f32.mrf.mxu0  ;;  %v2596_v42 = vadd.f32 %v2595_v62, %v2594_v32  ;;  %v2255_v32 = vmul.f32 %v5362_v49, %v5427_v43 }
 0x300   : > { %v2334_v37 = vmul.f32 %v5524_v20, %v5170_v53 }
 0x301   : > { %v5529_v30 = vpop.f32.mrf.mxu0  ;;  %v2697_v34 = vadd.f32 %v2696_v51, %v2695_v44 }
 0x302   : > { %v2333_v54 = vmul.f32 %v5170_v53, %v5529_v30  ;;  %2421 = vrot.lane.b32.xlu1 %v2334_v37, %s3902_s25 }
 0x304   : > { %2419 = vrot.lane.b32.xlu0 %v2333_v54, %s3902_s25 }
 0x309   : > { %v2402_v29 = vpop.permute.xlu1 %2401 }
 0x30a   : > { %v2484_v0 = vadd.f32 %v2402_v29, %v2254_v23 }
 0x30b   : > { %v2400_v3 = vpop.permute.xlu0 %2399 }
 0x30c   : > { %v2523_v24 = vadd.f32 %v5388_v18, %v2484_v0  ;;  %v2483_v58 = vadd.f32 %v2400_v3, %v2253_v11 }
 0x30e   : > { %2555 = vst.msk [vmem:[%s5399_s12 + $0x68] sm:$0xff] %vm1676_vm2, %v2523_v24  ;;  %v2522_v59 = vadd.f32 %v5388_v18, %v2483_v58  ;;  %v2656_v28 = vmul.f32 %v2523_v24, %v2523_v24  ;;  %v2599_v8 = vsel %vm1676_vm2, %v2523_v24, 0.0  ;;  %v2258_v58 = vmul.f32 %v5444_v41, %v5362_v49 }
 0x310   : > { %2554 = vst.msk [vmem:[%s5399_s12 + $0x60] sm:$0xff] %vm1676_vm2, %v2522_v59  ;;  %v2597_v9 = vsel %vm1676_vm2, %v2522_v59, 0.0  ;;  %v2655_v56 = vmul.f32 %v2522_v59, %v2522_v59  ;;  %v2700_v60 = vsel %vm1676_vm2, %v2656_v28, 0.0 }
 0x311   : > { %v2598_v17 = vadd.f32 %v2597_v9, %v2596_v42 }
 0x312   : > { %v2698_v39 = vsel %vm1676_vm2, %v2655_v56, 0.0  ;;  %v2257_v56 = vmul.f32 %v5362_v49, %v5451_v27 }
 0x313   : > { %v2699_v5 = vadd.f32 %v2698_v39, %v2697_v34  ;;  %v2600_v19 = vadd.f32 %v2599_v8, %v2598_v17 }
 0x315   : > { %v2701_v16 = vadd.f32 %v2700_v60, %v2699_v5 }
 0x317   : > { %v5549_v10 = vpop.f32.mrf.mxu0 }
 0x318   : > { %v2336_v47 = vmul.f32 %v5549_v10, %v5170_v53 }
 0x319   : > { %v5553_v1 = vpop.f32.mrf.mxu0 }
 0x31a   : > { %v2335_v35 = vmul.f32 %v5170_v53, %v5553_v1  ;;  %2425 = vrot.lane.b32.xlu1 %v2336_v47, %s3902_s25 }
 0x31c   : > { %2423 = vrot.lane.b32.xlu0 %v2335_v35, %s3902_s25 }
 0x31d   : > { %v2406_v31 = vpop.permute.xlu1 %2405 }
 0x31e   : > { %v2486_v62 = vadd.f32 %v2406_v31, %v2256_v61 }
 0x31f   : > { %v2404_v55 = vpop.permute.xlu0 %2403 }
 0x320   : > { %v2525_v44 = vadd.f32 %v5388_v18, %v2486_v62  ;;  %v2485_v42 = vadd.f32 %v2404_v55, %v2255_v32 }
 0x322   : > { %2557 = vst.msk [vmem:[%s5399_s12 + $0x78] sm:$0xff] %vm1676_vm2, %v2525_v44  ;;  %v2524_v51 = vadd.f32 %v5388_v18, %v2485_v42  ;;  %v2658_v37 = vmul.f32 %v2525_v44, %v2525_v44  ;;  %v2603_v23 = vsel %vm1676_vm2, %v2525_v44, 0.0  ;;  %v2260_v44 = vmul.f32 %v5468_v13, %v5362_v49 }
 0x324   : > { %2556 = vst.msk [vmem:[%s5399_s12 + $0x70] sm:$0xff] %vm1676_vm2, %v2524_v51  ;;  %v2601_v50 = vsel %vm1676_vm2, %v2524_v51, 0.0  ;;  %v2657_v34 = vmul.f32 %v2524_v51, %v2524_v51  ;;  %v2704_v0 = vsel %vm1676_vm2, %v2658_v37, 0.0  ;;  %v2259_v51 = vmul.f32 %v5362_v49, %v5475_v25 }
 0x325   : > { %v2602_v54 = vadd.f32 %v2601_v50, %v2600_v19 }
 0x326   : > { %v2702_v43 = vsel %vm1676_vm2, %v2657_v34, 0.0 }
 0x327   : > { %v2703_v29 = vadd.f32 %v2702_v43, %v2701_v16  ;;  %v2604_v11 = vadd.f32 %v2603_v23, %v2602_v54 }
 0x329   : > { %v2705_v3 = vadd.f32 %v2704_v0, %v2703_v29 }
 0x32f   : > { %v5573_v24 = vpop.f32.mrf.mxu0 }
 0x330   : > { %v2338_v59 = vmul.f32 %v5573_v24, %v5170_v53 }
 0x331   : > { %v2410_v28 = vpop.permute.xlu1 %2409  ;;  %v5579_v9 = vpop.f32.mrf.mxu0 }
 0x332   : > { %v2488_v17 = vadd.f32 %v2410_v28, %v2258_v58  ;;  %v2337_v8 = vmul.f32 %v5170_v53, %v5579_v9  ;;  %2429 = vrot.lane.b32.xlu1 %v2338_v59, %s3902_s25 }
 0x333   : > { %v2408_v39 = vpop.permute.xlu0 %2407 }
 0x334   : > { %v2527_v5 = vadd.f32 %v5388_v18, %v2488_v17  ;;  %v2487_v19 = vadd.f32 %v2408_v39, %v2257_v56  ;;  %2427 = vrot.lane.b32.xlu0 %v2337_v8, %s3902_s25 }
 0x336   : > { %2559 = vst.msk [vmem:[%s5399_s12 + $0x88] sm:$0xff] %vm1676_vm2, %v2527_v5  ;;  %v2526_v41 = vadd.f32 %v5388_v18, %v2487_v19  ;;  %v2660_v60 = vmul.f32 %v2527_v5, %v2527_v5  ;;  %v2607_v35 = vsel %vm1676_vm2, %v2527_v5, 0.0 }
 0x338   : > { %2558 = vst.msk [vmem:[%s5399_s12 + $0x80] sm:$0xff] %vm1676_vm2, %v2526_v41  ;;  %v2605_v27 = vsel %vm1676_vm2, %v2526_v41, 0.0  ;;  %v2659_v16 = vmul.f32 %v2526_v41, %v2526_v41  ;;  %v2708_v62 = vsel %vm1676_vm2, %v2660_v60, 0.0 }
 0x339   : > { %v2606_v47 = vadd.f32 %v2605_v27, %v2604_v11  ;;  %v2262_v27 = vmul.f32 %v5495_v7, %v5362_v49 }
 0x33a   : > { %v2706_v61 = vsel %vm1676_vm2, %v2659_v16, 0.0  ;;  %v2261_v16 = vmul.f32 %v5362_v49, %v5502_v33 }
 0x33b   : > { %v2707_v31 = vadd.f32 %v2706_v61, %v2705_v3  ;;  %v2608_v32 = vadd.f32 %v2607_v35, %v2606_v47 }
 0x33d   : > { %v2709_v55 = vadd.f32 %v2708_v62, %v2707_v31 }
 0x345   : > { %v2414_v42 = vpop.permute.xlu1 %2413 }
 0x346   : > { %v2490_v37 = vadd.f32 %v2414_v42, %v2260_v44 }
 0x347   : > { %v2412_v50 = vpop.permute.xlu0 %2411  ;;  %v5601_v34 = vpop.f32.mrf.mxu0 }
 0x348   : > { %v2529_v54 = vadd.f32 %v5388_v18, %v2490_v37  ;;  %v2489_v23 = vadd.f32 %v2412_v50, %v2259_v51  ;;  %v2340_v43 = vmul.f32 %v5601_v34, %v5170_v53 }
 0x349   : > { %v5606_v29 = vpop.f32.mrf.mxu0 }
 0x34a   : > { %2561 = vst.msk [vmem:[%s5399_s12 + $0x98] sm:$0xff] %vm1676_vm2, %v2529_v54  ;;  %v2528_v13 = vadd.f32 %v5388_v18, %v2489_v23  ;;  %2433 = vrot.lane.b32.xlu1 %v2340_v43, %s3902_s25  ;;  %v2339_v25 = vmul.f32 %v5170_v53, %v5606_v29  ;;  %v2662_v11 = vmul.f32 %v2529_v54, %v2529_v54  ;;  %v2611_v59 = vsel %vm1676_vm2, %v2529_v54, 0.0 }
 0x34b   : > { %v2264_v23 = vmul.f32 %v5524_v20, %v5362_v49 }
 0x34c   : > { %2560 = vst.msk [vmem:[%s5399_s12 + $0x90] sm:$0xff] %vm1676_vm2, %v2528_v13  ;;  %v2609_v0 = vsel %vm1676_vm2, %v2528_v13, 0.0  ;;  %v2661_v3 = vmul.f32 %v2528_v13, %v2528_v13  ;;  %2431 = vrot.lane.b32.xlu0 %v2339_v25, %s3902_s25  ;;  %v2712_v8 = vsel %vm1676_vm2, %v2662_v11, 0.0  ;;  %v2263_v13 = vmul.f32 %v5362_v49, %v5529_v30 }
 0x34d   : > { %v2610_v58 = vadd.f32 %v2609_v0, %v2608_v32 }
 0x34e   : > { %v2710_v28 = vsel %vm1676_vm2, %v2661_v3, 0.0 }
 0x34f   : > { %v2711_v56 = vadd.f32 %v2710_v28, %v2709_v55  ;;  %v2612_v17 = vadd.f32 %v2611_v59, %v2610_v58 }
 0x351   : > { %v2713_v39 = vadd.f32 %v2712_v8, %v2711_v56 }
 0x354   : > { %v5621_v5 = vpop.f32.mrf.mxu0 }
 0x355   : > { %v2342_v19 = vmul.f32 %v5621_v5, %v5170_v53 }
 0x356   : > { %v5625_v41 = vpop.f32.mrf.mxu0 }
 0x357   : > { %v2341_v60 = vmul.f32 %v5170_v53, %v5625_v41  ;;  %2437 = vrot.lane.b32.xlu1 %v2342_v19, %s3902_s25 }
 0x359   : > { %2435 = vrot.lane.b32.xlu0 %v2341_v60, %s3902_s25 }
 0x35c   : > { %v2418_v47 = vpop.permute.xlu1 %2417 }
 0x35d   : > { %v2492_v35 = vadd.f32 %v2418_v47, %v2262_v27  ;;  %v2266_v27 = vmul.f32 %v5549_v10, %v5362_v49  ;;  %v2265_v47 = vmul.f32 %v5362_v49, %v5553_v1 }
 0x35e   : > { %v2416_v61 = vpop.permute.xlu0 %2415 }
 0x35f   : > { %v2491_v31 = vadd.f32 %v2416_v61, %v2261_v16  ;;  %v2531_v32 = vadd.f32 %v5388_v18, %v2492_v35 }
 0x361   : > { %v2530_v62 = vadd.f32 %v5388_v18, %v2491_v31  ;;  %2563 = vst.msk [vmem:[%s5399_s12 + $0xa8] sm:$0xff] %vm1676_vm2, %v2531_v32  ;;  %v2664_v53 = vmul.f32 %v2531_v32, %v2531_v32  ;;  %v2615_v33 = vsel %vm1676_vm2, %v2531_v32, 0.0 }
 0x363   : > { %2562 = vst.msk [vmem:[%s5399_s12 + $0xa0] sm:$0xff] %vm1676_vm2, %v2530_v62  ;;  %v2613_v55 = vsel %vm1676_vm2, %v2530_v62, 0.0  ;;  %v2663_v7 = vmul.f32 %v2530_v62, %v2530_v62  ;;  %v2716_v50 = vsel %vm1676_vm2, %v2664_v53, 0.0 }
 0x364   : > { %v2614_v44 = vadd.f32 %v2613_v55, %v2612_v17 }
 0x365   : > { %v2714_v42 = vsel %vm1676_vm2, %v2663_v7, 0.0 }
 0x366   : > { %v2715_v51 = vadd.f32 %v2714_v42, %v2713_v39  ;;  %v2616_v37 = vadd.f32 %v2615_v33, %v2614_v44 }
 0x368   : > { %v2717_v54 = vadd.f32 %v2716_v50, %v2715_v51  ;;  %v2268_v50 = vmul.f32 %v5573_v24, %v5362_v49 }
 0x374   : > { %v2422_v43 = vpop.permute.xlu1 %2421 }
 0x375   : > { %v2494_v25 = vadd.f32 %v2422_v43, %v2264_v23  ;;  %v2267_v23 = vmul.f32 %v5362_v49, %v5579_v9 }
 0x376   : > { %v2420_v11 = vpop.permute.xlu0 %2419 }
 0x377   : > { %v2533_v0 = vadd.f32 %v5388_v18, %v2494_v25  ;;  %v2493_v3 = vadd.f32 %v2420_v11, %v2263_v13 }
 0x379   : > { %2565 = vst.msk [vmem:[%s5399_s12 + $0xb8] sm:$0xff] %vm1676_vm2, %v2533_v0  ;;  %v2532_v58 = vadd.f32 %v5388_v18, %v2493_v3  ;;  %v2666_v59 = vmul.f32 %v2533_v0, %v2533_v0  ;;  %v2619_v17 = vsel %vm1676_vm2, %v2533_v0, 0.0 }
 0x37b   : > { %2564 = vst.msk [vmem:[%s5399_s12 + $0xb0] sm:$0xff] %vm1676_vm2, %v2532_v58  ;;  %v2617_v28 = vsel %vm1676_vm2, %v2532_v58, 0.0  ;;  %v2665_v20 = vmul.f32 %v2532_v58, %v2532_v58  ;;  %v2720_v19 = vsel %vm1676_vm2, %v2666_v59, 0.0 }
 0x37c   : > { %v2618_v56 = vadd.f32 %v2617_v28, %v2616_v37 }
 0x37d   : > { %v2718_v30 = vsel %vm1676_vm2, %v2665_v20, 0.0 }
 0x37e   : > { %v2719_v8 = vadd.f32 %v2718_v30, %v2717_v54  ;;  %v2620_v39 = vadd.f32 %v2619_v17, %v2618_v56 }
 0x380   : > { %v2721_v60 = vadd.f32 %v2720_v19, %v2719_v8  ;;  %v2270_v8 = vmul.f32 %v5601_v34, %v5362_v49 }
 0x38c   : > { %v2426_v16 = vpop.permute.xlu1 %2425 }
 0x38d   : > { %v2496_v35 = vadd.f32 %v2426_v16, %v2266_v27 }
 0x38e   : > { %v2424_v61 = vpop.permute.xlu0 %2423 }
 0x38f   : > { %v2535_v31 = vadd.f32 %v5388_v18, %v2496_v35  ;;  %v2495_v32 = vadd.f32 %v2424_v61, %v2265_v47 }
 0x391   : > { %2567 = vst.msk [vmem:[%s5399_s12 + $0xc8] sm:$0xff] %vm1676_vm2, %v2535_v31  ;;  %v2534_v62 = vadd.f32 %v5388_v18, %v2495_v32  ;;  %v2668_v53 = vmul.f32 %v2535_v31, %v2535_v31  ;;  %v2623_v44 = vsel %vm1676_vm2, %v2535_v31, 0.0 }
 0x393   : > { %2566 = vst.msk [vmem:[%s5399_s12 + $0xc0] sm:$0xff] %vm1676_vm2, %v2534_v62  ;;  %v2621_v55 = vsel %vm1676_vm2, %v2534_v62, 0.0  ;;  %v2667_v10 = vmul.f32 %v2534_v62, %v2534_v62  ;;  %v2724_v51 = vsel %vm1676_vm2, %v2668_v53, 0.0 }
 0x394   : > { %v2622_v7 = vadd.f32 %v2621_v55, %v2620_v39 }
 0x395   : > { %v2722_v1 = vsel %vm1676_vm2, %v2667_v10, 0.0  ;;  %v2272_v10 = vmul.f32 %v5621_v5, %v5362_v49 }
 0x396   : > { %v2723_v33 = vadd.f32 %v2722_v1, %v2721_v60  ;;  %v2624_v42 = vadd.f32 %v2623_v44, %v2622_v7  ;;  %v2269_v60 = vmul.f32 %v5362_v49, %v5606_v29 }
 0x398   : > { %v2725_v37 = vadd.f32 %v2724_v51, %v2723_v33  ;;  %v2271_v33 = vmul.f32 %v5362_v49, %v5625_v41 }
 0x3a4   : > { %v2430_v54 = vpop.permute.xlu1 %2429 }
 0x3a5   : > { %v2498_v43 = vadd.f32 %v2430_v54, %v2268_v50 }
 0x3a6   : > { %v2428_v13 = vpop.permute.xlu0 %2427 }
 0x3a7   : > { %v2537_v25 = vadd.f32 %v5388_v18, %v2498_v43  ;;  %v2497_v11 = vadd.f32 %v2428_v13, %v2267_v23 }
 0x3a9   : > { %2569 = vst.msk [vmem:[%s5399_s12 + $0xd8] sm:$0xff] %vm1676_vm2, %v2537_v25  ;;  %v2536_v0 = vadd.f32 %v5388_v18, %v2497_v11  ;;  %v2670_v3 = vmul.f32 %v2537_v25, %v2537_v25  ;;  %v2627_v28 = vsel %vm1676_vm2, %v2537_v25, 0.0 }
 0x3ab   : > { %2568 = vst.msk [vmem:[%s5399_s12 + $0xd0] sm:$0xff] %vm1676_vm2, %v2536_v0  ;;  %v2625_v58 = vsel %vm1676_vm2, %v2536_v0, 0.0  ;;  %v2669_v24 = vmul.f32 %v2536_v0, %v2536_v0  ;;  %v2728_v17 = vsel %vm1676_vm2, %v2670_v3, 0.0 }
 0x3ac   : > { %v2626_v59 = vadd.f32 %v2625_v58, %v2624_v42 }
 0x3ad   : > { %v2726_v9 = vsel %vm1676_vm2, %v2669_v24, 0.0 }
 0x3ae   : > { %v2727_v20 = vadd.f32 %v2726_v9, %v2725_v37  ;;  %v2628_v56 = vadd.f32 %v2627_v28, %v2626_v59 }
 0x3b0   : > { %v2729_v30 = vadd.f32 %v2728_v17, %v2727_v20 }
 0x3bc   : > { %v2434_v39 = vpop.permute.xlu1 %2433 }
 0x3bd   : > { %v2500_v19 = vadd.f32 %v2434_v39, %v2270_v8 }
 0x3be   : > { %v2432_v16 = vpop.permute.xlu0 %2431 }
 0x3bf   : > { %v2539_v27 = vadd.f32 %v5388_v18, %v2500_v19  ;;  %v2499_v47 = vadd.f32 %v2432_v16, %v2269_v60 }
 0x3c1   : > { %2571 = vst.msk [vmem:[%s5399_s12 + $0xe8] sm:$0xff] %vm1676_vm2, %v2539_v27  ;;  %v2538_v35 = vadd.f32 %v5388_v18, %v2499_v47  ;;  %v2672_v61 = vmul.f32 %v2539_v27, %v2539_v27  ;;  %v2631_v62 = vsel %vm1676_vm2, %v2539_v27, 0.0 }
 0x3c3   : > { %2570 = vst.msk [vmem:[%s5399_s12 + $0xe0] sm:$0xff] %vm1676_vm2, %v2538_v35  ;;  %v2629_v31 = vsel %vm1676_vm2, %v2538_v35, 0.0  ;;  %v2671_v34 = vmul.f32 %v2538_v35, %v2538_v35  ;;  %v2732_v7 = vsel %vm1676_vm2, %v2672_v61, 0.0 }
 0x3c4   : > { %v2630_v32 = vadd.f32 %v2629_v31, %v2628_v56 }
 0x3c5   : > { %v2730_v29 = vsel %vm1676_vm2, %v2671_v34, 0.0 }
 0x3c6   : > { %v2731_v53 = vadd.f32 %v2730_v29, %v2729_v30  ;;  %v2632_v55 = vadd.f32 %v2631_v62, %v2630_v32 }
 0x3c8   : > { %v2733_v1 = vadd.f32 %v2732_v7, %v2731_v53 }
 0x3c9   : > { %v2438_v44 = vpop.permute.xlu1 %2437 }
 0x3ca   : > { %v2502_v42 = vadd.f32 %v2438_v44, %v2272_v10 }
 0x3cb   : > { %v2436_v51 = vpop.permute.xlu0 %2435 }
 0x3cc   : > { %v2541_v37 = vadd.f32 %v5388_v18, %v2502_v42  ;;  %v2501_v50 = vadd.f32 %v2436_v51, %v2271_v33 }
 0x3ce   : > { %2573 = vst.msk [vmem:[%s5399_s12 + $0xf8] sm:$0xff] %vm1676_vm2, %v2541_v37  ;;  %v2540_v54 = vadd.f32 %v5388_v18, %v2501_v50  ;;  %v2674_v23 = vmul.f32 %v2541_v37, %v2541_v37  ;;  %v2635_v25 = vsel %vm1676_vm2, %v2541_v37, 0.0 }
 0x3d0   : > { %2572 = vst.msk [vmem:[%s5399_s12 + $0xf0] sm:$0xff] %vm1676_vm2, %v2540_v54  ;;  %v2633_v5 = vsel %vm1676_vm2, %v2540_v54, 0.0  ;;  %v2673_v43 = vmul.f32 %v2540_v54, %v2540_v54  ;;  %v2736_v0 = vsel %vm1676_vm2, %v2674_v23, 0.0 }
 0x3d1   : > { %v2634_v13 = vadd.f32 %v2633_v5, %v2632_v55 }
 0x3d2   : > { %v2734_v49 = vsel %vm1676_vm2, %v2673_v43, 0.0 }
 0x3d3   : > { %v2636_v41 = vadd.f32 %v2635_v25, %v2634_v13  ;;  %v2735_v11 = vadd.f32 %v2734_v49, %v2733_v1 }
 0x3d5   : > { %v2637_v3 = vrot.slane %v2636_v41, 4  ;;  %v2737_v58 = vadd.f32 %v2736_v0, %v2735_v11 }
 0x3d7   : > { %v2638_v24 = vadd.f32 %v2637_v3, %v2636_v41  ;;  %v2738_v59 = vrot.slane %v2737_v58, 4 }
 0x3d9   : > { %v2639_v18 = vrot.slane %v2638_v24, 2  ;;  %v2739_v28 = vadd.f32 %v2738_v59, %v2737_v58 }
 0x3db   : > { %v2640_v9 = vadd.f32 %v2639_v18, %v2638_v24  ;;  %v2740_v20 = vrot.slane %v2739_v28, 2 }
 0x3dd   : > { %v2641_v56 = vrot.slane %v2640_v9, 1  ;;  %v2741_v17 = vadd.f32 %v2740_v20, %v2739_v28 }
 0x3df   : > { %v2742_v30 = vrot.slane %v2741_v17, 1  ;;  %v2642_v8 = vadd.f32 %v2641_v56, %v2640_v9  ;;  %2749 = sbr.rel (%p6111_p2) target bundleno = 998 (0x3e6), region = 48 }
 0x3e1   : > { %v2743_v39 = vadd.f32 %v2742_v30, %v2741_v17 }
 0x3e3   : > { %v2745_v19 = vsel %vm2744_vm10, %v2642_v8, %v2743_v39 }
 0x3e4   : > { %vm2750_vm11 = vcmask 58368   ;;  %v3903_v60 = vmov 0.0  }
 0x3e5   : > { %2751 = vst.msk [vmem:[%s5948_s6] sm:$0x3] %vm2750_vm11, %v3903_v60 }
 0x3e6 PF: > { %vm2754_vm12 = vcmask 58368   ;;  %v2756_v16 = vld [vmem:[%s5946_s4] sm:$0xf]  ;;  %v6113_v61 = vld [vmem:[#allocation6_spill] sm:$0xff]  ;;  %v6114_v31 = vld [vmem:[#allocation8_spill] sm:$0xff]  ;;  %p6126_p3 = scmp.ne.s32.totalorder %s3956_s28, 0 }
 0x3e7   : > { %v6112_v47 = vld [vmem:[#allocation5_spill] sm:$0xff]  ;;  %3776 = vmatprep.subr.msk.mxu1 %vm2009_vm0, %v2756_v16  ;;  %v6115_v34 = vld [vmem:[#allocation7_spill] sm:$0xff]  ;;  %v6116_v32 = vld [vmem:[#allocation10_spill] sm:$0xff] }
 0x3e8   : > { %3778 = vmatprep.mubr.msk.f32.mxu1 %vm1643_vm1, %v6112_v47  ;;  %3777 = vmatpush3.msk.msra.mxu1 %vm2009_vm0, %v2756_v16  ;;  %v6117_v62 = vld [vmem:[#allocation9_spill] sm:$0xff]  ;;  %v6118_v29 = vld [vmem:[#allocation12_spill] sm:$0xff]  ;;  %v6119_v53 = vld [vmem:[#allocation11_spill] sm:$0xff] }
 0x3e9   : > { %3779 = vmatmul.mubr.msk.f32.vlgmr.msra.gmra.mxu1 %vm1643_vm1, %v6113_v61  ;;  %v6120_v55 = vld [vmem:[#allocation14_spill] sm:$0xff]  ;;  %v6121_v10 = vld [vmem:[#allocation13_spill] sm:$0xff]  ;;  %v6122_v7 = vld [vmem:[#allocation16_spill] sm:$0xff] }
 0x3ea   : > { %3781 = vmatprep.mubr.msk.f32.mxu1 %vm1643_vm1, %v6114_v31  ;;  %v6123_v44 = vld [vmem:[#allocation15_spill] sm:$0xff]  ;;  %v6124_v1 = vld [vmem:[#allocation18_spill] sm:$0xff]  ;;  %v6125_v33 = vld [vmem:[#allocation17_spill] sm:$0xff] }
 0x3ec   : > { %v2752_v27 = vld [vmem:[%s5948_s6] sm:$0x3] }
 0x3ed   : > { %v2753_v35 = vadd.f32 %v2752_v27, %v2745_v19  ;;  %3782 = vmatmul.mubr.msk.f32.gmra.mxu1 %vm1643_vm1, %v6115_v34 }
 0x3ee   : > { %3784 = vmatprep.mubr.msk.f32.mxu1 %vm1643_vm1, %v6116_v32 }
 0x3ef   : > { %2755 = vst.msk [vmem:[%s5948_s6] sm:$0x3] %vm2754_vm12, %v2753_v35 }
 0x3f1   : > { %3785 = vmatmul.mubr.msk.f32.gmra.mxu1 %vm1643_vm1, %v6117_v62 }
 0x3f2   : > { %3787 = vmatprep.mubr.msk.f32.mxu1 %vm1643_vm1, %v6118_v29 }
 0x3f5   : > { %3788 = vmatmul.mubr.msk.f32.gmra.mxu1 %vm1643_vm1, %v6119_v53 }
 0x3f6   : > { %3790 = vmatprep.mubr.msk.f32.mxu1 %vm1643_vm1, %v6120_v55 }
 0x3f9   : > { %3791 = vmatmul.mubr.msk.f32.gmra.mxu1 %vm1643_vm1, %v6121_v10 }
 0x3fa   : > { %3793 = vmatprep.mubr.msk.f32.mxu1 %vm1643_vm1, %v6122_v7 }
 0x3fd   : > { %3794 = vmatmul.mubr.msk.f32.gmra.mxu1 %vm1643_vm1, %v6123_v44 }
 0x3fe   : > { %3796 = vmatprep.mubr.msk.f32.mxu1 %vm1643_vm1, %v6124_v1 }
 0x401   : > { %3797 = vmatmul.mubr.msk.f32.gmra.mxu1 %vm1643_vm1, %v6125_v33 }
 0x402   : > { %3799 = vmatprep.mubr.msk.f32.mxu1 %vm1643_vm1, %v4647_v4 }
 0x405   : > { %3800 = vmatmul.mubr.msk.f32.gmra.mxu1 %vm1643_vm1, %v4663_v57 }
 0x406   : > { %3802 = vmatprep.mubr.msk.f32.mxu1 %vm1643_vm1, %v4698_v14 }
 0x409   : > { %3803 = vmatmul.mubr.msk.f32.gmra.mxu1 %vm1643_vm1, %v4715_v48 }
 0x40a   : > { %3805 = vmatprep.mubr.msk.f32.mxu1 %vm1643_vm1, %v4748_v15 }
 0x40d   : > { %3806 = vmatmul.mubr.msk.f32.gmra.mxu1 %vm1643_vm1, %v4765_v38 }
 0x40e   : > { %3808 = vmatprep.mubr.msk.f32.mxu1 %vm1643_vm1, %v4798_v52 }
 0x411   : > { %3809 = vmatmul.mubr.msk.f32.gmra.mxu1 %vm1643_vm1, %v4815_v12 }
 0x412   : > { %3811 = vmatprep.mubr.msk.f32.mxu1 %vm1643_vm1, %v4848_v2 }
 0x415   : > { %3812 = vmatmul.mubr.msk.f32.gmra.mxu1 %vm1643_vm1, %v4881_v21 }
 0x416   : > { %3814 = vmatprep.mubr.msk.f32.mxu1 %vm1643_vm1, %v4914_v36 }
 0x419   : > { %3815 = vmatmul.mubr.msk.f32.gmra.mxu1 %vm1643_vm1, %v4936_v45 }
 0x41a   : > { %3817 = vmatprep.mubr.msk.f32.mxu1 %vm1643_vm1, %v4974_v63 }
 0x41d   : > { %3818 = vmatmul.mubr.msk.f32.gmra.mxu1 %vm1643_vm1, %v4988_v22 }
 0x41e   : > { %3820 = vmatprep.mubr.msk.f32.mxu1 %vm1643_vm1, %v5029_v46 }
 0x421   : > { %3821 = vmatmul.mubr.msk.f32.gmra.mxu1 %vm1643_vm1, %v5045_v26 }
 0x422   : > { %3823 = vmatprep.mubr.msk.f32.mxu1 %vm1643_vm1, %v5081_v6 }
 0x425   : > { %3824 = vmatmul.mubr.msk.f32.gmra.mxu1 %vm1643_vm1, %v5107_v40 }
 0x4a9   : > { %v3780_v4 = vpop.f32.mrf.mxu1 }
 0x4aa   : > { %3050 = vst.msk [vmem:[%s5159_s24 + $0x8] sm:$0xff] %vm1676_vm2, %v3780_v4  ;;  %v3151_v14 = vmul.f32 %v3780_v4, %v3780_v4  ;;  %v3082_v52 = vsel %vm1676_vm2, %v3780_v4, 0.0 }
 0x4ab   : > { %v2890_v57 = vpop.f32.mrf.mxu1 }
 0x4ac   : > { %3049 = vst.msk [vmem:[%s5159_s24] sm:$0xff] %vm1676_vm2, %v2890_v57  ;;  %v3081_v48 = vsel %vm1676_vm2, %v2890_v57, 0.0  ;;  %v3150_v15 = vmul.f32 %v2890_v57, %v2890_v57  ;;  %v3183_v36 = vsel %vm1676_vm2, %v3151_v14, 0.0 }
 0x4ad   : > { %v3783_v38 = vpop.f32.mrf.mxu1  ;;  %v3083_v2 = vadd.f32 %v3082_v52, %v3081_v48 }
 0x4ae   : > { %v3182_v12 = vsel %vm1676_vm2, %v3150_v15, 0.0  ;;  %3052 = vst.msk [vmem:[%s5159_s24 + $0x18] sm:$0xff] %vm1676_vm2, %v3783_v38  ;;  %v3153_v45 = vmul.f32 %v3783_v38, %v3783_v38  ;;  %v3086_v40 = vsel %vm1676_vm2, %v3783_v38, 0.0 }
 0x4af   : > { %v2900_v21 = vpop.f32.mrf.mxu1  ;;  %v3184_v46 = vadd.f32 %v3183_v36, %v3182_v12 }
 0x4b0   : > { %3051 = vst.msk [vmem:[%s5159_s24 + $0x10] sm:$0xff] %vm1676_vm2, %v2900_v21  ;;  %v3084_v63 = vsel %vm1676_vm2, %v2900_v21, 0.0  ;;  %v3152_v22 = vmul.f32 %v2900_v21, %v2900_v21  ;;  %v3187_v54 = vsel %vm1676_vm2, %v3153_v45, 0.0 }
 0x4b1   : > { %v3085_v26 = vadd.f32 %v3084_v63, %v3083_v2  ;;  %v3786_v6 = vpop.f32.mrf.mxu1 }
 0x4b2   : > { %v3185_v42 = vsel %vm1676_vm2, %v3152_v22, 0.0  ;;  %3054 = vst.msk [vmem:[%s5159_s24 + $0x28] sm:$0xff] %vm1676_vm2, %v3786_v6  ;;  %v3155_v23 = vmul.f32 %v3786_v6, %v3786_v6  ;;  %v3090_v41 = vsel %vm1676_vm2, %v3786_v6, 0.0 }
 0x4b3   : > { %v3186_v51 = vadd.f32 %v3185_v42, %v3184_v46  ;;  %v2910_v37 = vpop.f32.mrf.mxu1  ;;  %v3087_v50 = vadd.f32 %v3086_v40, %v3085_v26 }
 0x4b4   : > { %3053 = vst.msk [vmem:[%s5159_s24 + $0x20] sm:$0xff] %vm1676_vm2, %v2910_v37  ;;  %v3088_v5 = vsel %vm1676_vm2, %v2910_v37, 0.0  ;;  %v3154_v43 = vmul.f32 %v2910_v37, %v2910_v37  ;;  %v3191_v24 = vsel %vm1676_vm2, %v3155_v23, 0.0 }
 0x4b5   : > { %v3089_v13 = vadd.f32 %v3088_v5, %v3087_v50  ;;  %v3188_v25 = vadd.f32 %v3187_v54, %v3186_v51  ;;  %v3789_v49 = vpop.f32.mrf.mxu1 }
 0x4b6   : > { %v3189_v11 = vsel %vm1676_vm2, %v3154_v43, 0.0  ;;  %3056 = vst.msk [vmem:[%s5159_s24 + $0x38] sm:$0xff] %vm1676_vm2, %v3789_v49  ;;  %v3157_v59 = vmul.f32 %v3789_v49, %v3789_v49  ;;  %v3094_v17 = vsel %vm1676_vm2, %v3789_v49, 0.0 }
 0x4b7   : > { %v3190_v0 = vadd.f32 %v3189_v11, %v3188_v25  ;;  %v2920_v3 = vpop.f32.mrf.mxu1  ;;  %v3091_v58 = vadd.f32 %v3090_v41, %v3089_v13 }
 0x4b8   : > { %3055 = vst.msk [vmem:[%s5159_s24 + $0x30] sm:$0xff] %vm1676_vm2, %v2920_v3  ;;  %v3092_v18 = vsel %vm1676_vm2, %v2920_v3, 0.0  ;;  %v3156_v28 = vmul.f32 %v2920_v3, %v2920_v3  ;;  %v3195_v60 = vsel %vm1676_vm2, %v3157_v59, 0.0 }
 0x4b9   : > { %v3093_v9 = vadd.f32 %v3092_v18, %v3091_v58  ;;  %v3192_v20 = vadd.f32 %v3191_v24, %v3190_v0  ;;  %v3792_v56 = vpop.f32.mrf.mxu1 }
 0x4ba   : > { %v3193_v30 = vsel %vm1676_vm2, %v3156_v28, 0.0  ;;  %3058 = vst.msk [vmem:[%s5159_s24 + $0x48] sm:$0xff] %vm1676_vm2, %v3792_v56  ;;  %v3159_v27 = vmul.f32 %v3792_v56, %v3792_v56  ;;  %v3098_v34 = vsel %vm1676_vm2, %v3792_v56, 0.0 }
 0x4bb   : > { %v3194_v8 = vadd.f32 %v3193_v30, %v3192_v20  ;;  %v2930_v39 = vpop.f32.mrf.mxu1  ;;  %v3095_v19 = vadd.f32 %v3094_v17, %v3093_v9 }
 0x4bc   : > { %3057 = vst.msk [vmem:[%s5159_s24 + $0x40] sm:$0xff] %vm1676_vm2, %v2930_v39  ;;  %v3096_v16 = vsel %vm1676_vm2, %v2930_v39, 0.0  ;;  %v3158_v47 = vmul.f32 %v2930_v39, %v2930_v39  ;;  %v3199_v55 = vsel %vm1676_vm2, %v3159_v27, 0.0 }
 0x4bd   : > { %v3097_v35 = vadd.f32 %v3096_v16, %v3095_v19  ;;  %v3196_v61 = vadd.f32 %v3195_v60, %v3194_v8  ;;  %v3795_v31 = vpop.f32.mrf.mxu1 }
 0x4be   : > { %v3197_v32 = vsel %vm1676_vm2, %v3158_v47, 0.0  ;;  %3060 = vst.msk [vmem:[%s5159_s24 + $0x58] sm:$0xff] %vm1676_vm2, %v3795_v31  ;;  %v3161_v10 = vmul.f32 %v3795_v31, %v3795_v31  ;;  %v3102_v57 = vsel %vm1676_vm2, %v3795_v31, 0.0 }
 0x4bf   : > { %v3198_v62 = vadd.f32 %v3197_v32, %v3196_v61  ;;  %v2940_v29 = vpop.f32.mrf.mxu1  ;;  %v3099_v53 = vadd.f32 %v3098_v34, %v3097_v35 }
 0x4c0   : > { %3059 = vst.msk [vmem:[%s5159_s24 + $0x50] sm:$0xff] %vm1676_vm2, %v2940_v29  ;;  %v3100_v7 = vsel %vm1676_vm2, %v2940_v29, 0.0  ;;  %v3160_v44 = vmul.f32 %v2940_v29, %v2940_v29  ;;  %v3203_v52 = vsel %vm1676_vm2, %v3161_v10, 0.0 }
 0x4c1   : > { %v3101_v1 = vadd.f32 %v3100_v7, %v3099_v53  ;;  %v3200_v33 = vadd.f32 %v3199_v55, %v3198_v62  ;;  %v3798_v4 = vpop.f32.mrf.mxu1 }
 0x4c2   : > { %v3201_v14 = vsel %vm1676_vm2, %v3160_v44, 0.0  ;;  %3062 = vst.msk [vmem:[%s5159_s24 + $0x68] sm:$0xff] %vm1676_vm2, %v3798_v4  ;;  %v3163_v12 = vmul.f32 %v3798_v4, %v3798_v4  ;;  %v3106_v22 = vsel %vm1676_vm2, %v3798_v4, 0.0 }
 0x4c3   : > { %v3202_v48 = vadd.f32 %v3201_v14, %v3200_v33  ;;  %v2950_v15 = vpop.f32.mrf.mxu1  ;;  %v3103_v38 = vadd.f32 %v3102_v57, %v3101_v1 }
 0x4c4   : > { %3061 = vst.msk [vmem:[%s5159_s24 + $0x60] sm:$0xff] %vm1676_vm2, %v2950_v15  ;;  %v3104_v2 = vsel %vm1676_vm2, %v2950_v15, 0.0  ;;  %v3162_v21 = vmul.f32 %v2950_v15, %v2950_v15  ;;  %v3207_v42 = vsel %vm1676_vm2, %v3163_v12, 0.0 }
 0x4c5   : > { %v3105_v36 = vadd.f32 %v3104_v2, %v3103_v38  ;;  %v3204_v45 = vadd.f32 %v3203_v52, %v3202_v48  ;;  %v3801_v63 = vpop.f32.mrf.mxu1 }
 0x4c6   : > { %v3205_v46 = vsel %vm1676_vm2, %v3162_v21, 0.0  ;;  %3064 = vst.msk [vmem:[%s5159_s24 + $0x78] sm:$0xff] %vm1676_vm2, %v3801_v63  ;;  %v3165_v51 = vmul.f32 %v3801_v63, %v3801_v63  ;;  %v3110_v43 = vsel %vm1676_vm2, %v3801_v63, 0.0 }
 0x4c7   : > { %v3206_v26 = vadd.f32 %v3205_v46, %v3204_v45  ;;  %v2960_v6 = vpop.f32.mrf.mxu1  ;;  %v3107_v40 = vadd.f32 %v3106_v22, %v3105_v36 }
 0x4c8   : > { %3063 = vst.msk [vmem:[%s5159_s24 + $0x70] sm:$0xff] %vm1676_vm2, %v2960_v6  ;;  %v3108_v37 = vsel %vm1676_vm2, %v2960_v6, 0.0  ;;  %v3164_v50 = vmul.f32 %v2960_v6, %v2960_v6  ;;  %v3211_v11 = vsel %vm1676_vm2, %v3165_v51, 0.0 }
 0x4c9   : > { %v3109_v54 = vadd.f32 %v3108_v37, %v3107_v40  ;;  %v3208_v23 = vadd.f32 %v3207_v42, %v3206_v26  ;;  %v3804_v5 = vpop.f32.mrf.mxu1 }
 0x4ca   : > { %v3209_v13 = vsel %vm1676_vm2, %v3164_v50, 0.0  ;;  %3066 = vst.msk [vmem:[%s5159_s24 + $0x88] sm:$0xff] %vm1676_vm2, %v3804_v5  ;;  %v3167_v0 = vmul.f32 %v3804_v5, %v3804_v5  ;;  %v3114_v28 = vsel %vm1676_vm2, %v3804_v5, 0.0 }
 0x4cb   : > { %v3210_v25 = vadd.f32 %v3209_v13, %v3208_v23  ;;  %v2970_v49 = vpop.f32.mrf.mxu1  ;;  %v3111_v41 = vadd.f32 %v3110_v43, %v3109_v54 }
 0x4cc   : > { %3065 = vst.msk [vmem:[%s5159_s24 + $0x80] sm:$0xff] %vm1676_vm2, %v2970_v49  ;;  %v3112_v3 = vsel %vm1676_vm2, %v2970_v49, 0.0  ;;  %v3166_v58 = vmul.f32 %v2970_v49, %v2970_v49  ;;  %v3215_v30 = vsel %vm1676_vm2, %v3167_v0, 0.0 }
 0x4cd   : > { %v3113_v24 = vadd.f32 %v3112_v3, %v3111_v41  ;;  %v3212_v59 = vadd.f32 %v3211_v11, %v3210_v25  ;;  %v3807_v18 = vpop.f32.mrf.mxu1 }
 0x4ce   : > { %v3213_v9 = vsel %vm1676_vm2, %v3166_v58, 0.0  ;;  %3068 = vst.msk [vmem:[%s5159_s24 + $0x98] sm:$0xff] %vm1676_vm2, %v3807_v18  ;;  %v3169_v8 = vmul.f32 %v3807_v18, %v3807_v18  ;;  %v3118_v47 = vsel %vm1676_vm2, %v3807_v18, 0.0 }
 0x4cf   : > { %v3214_v20 = vadd.f32 %v3213_v9, %v3212_v59  ;;  %v2980_v56 = vpop.f32.mrf.mxu1  ;;  %v3115_v17 = vadd.f32 %v3114_v28, %v3113_v24 }
 0x4d0   : > { %3067 = vst.msk [vmem:[%s5159_s24 + $0x90] sm:$0xff] %vm1676_vm2, %v2980_v56  ;;  %v3116_v39 = vsel %vm1676_vm2, %v2980_v56, 0.0  ;;  %v3168_v19 = vmul.f32 %v2980_v56, %v2980_v56  ;;  %v3219_v32 = vsel %vm1676_vm2, %v3169_v8, 0.0 }
 0x4d1   : > { %v3117_v60 = vadd.f32 %v3116_v39, %v3115_v17  ;;  %v3216_v27 = vadd.f32 %v3215_v30, %v3214_v20  ;;  %v3810_v16 = vpop.f32.mrf.mxu1 }
 0x4d2   : > { %v3217_v35 = vsel %vm1676_vm2, %v3168_v19, 0.0  ;;  %3070 = vst.msk [vmem:[%s5159_s24 + $0xa8] sm:$0xff] %vm1676_vm2, %v3810_v16  ;;  %v3171_v62 = vmul.f32 %v3810_v16, %v3810_v16  ;;  %v3122_v44 = vsel %vm1676_vm2, %v3810_v16, 0.0 }
 0x4d3   : > { %v3218_v61 = vadd.f32 %v3217_v35, %v3216_v27  ;;  %v2990_v31 = vpop.f32.mrf.mxu1  ;;  %v3119_v34 = vadd.f32 %v3118_v47, %v3117_v60 }
 0x4d4   : > { %3069 = vst.msk [vmem:[%s5159_s24 + $0xa0] sm:$0xff] %vm1676_vm2, %v2990_v31  ;;  %v3120_v29 = vsel %vm1676_vm2, %v2990_v31, 0.0  ;;  %v3170_v53 = vmul.f32 %v2990_v31, %v2990_v31  ;;  %v3223_v14 = vsel %vm1676_vm2, %v3171_v62, 0.0 }
 0x4d5   : > { %v3121_v55 = vadd.f32 %v3120_v29, %v3119_v34  ;;  %v3220_v10 = vadd.f32 %v3219_v32, %v3218_v61  ;;  %v3813_v7 = vpop.f32.mrf.mxu1 }
 0x4d6   : > { %v3221_v1 = vsel %vm1676_vm2, %v3170_v53, 0.0  ;;  %3072 = vst.msk [vmem:[%s5159_s24 + $0xb8] sm:$0xff] %vm1676_vm2, %v3813_v7  ;;  %v3173_v48 = vmul.f32 %v3813_v7, %v3813_v7  ;;  %v3126_v21 = vsel %vm1676_vm2, %v3813_v7, 0.0 }
 0x4d7   : > { %v3222_v33 = vadd.f32 %v3221_v1, %v3220_v10  ;;  %v3000_v4 = vpop.f32.mrf.mxu1  ;;  %v3123_v57 = vadd.f32 %v3122_v44, %v3121_v55 }
 0x4d8   : > { %3071 = vst.msk [vmem:[%s5159_s24 + $0xb0] sm:$0xff] %vm1676_vm2, %v3000_v4  ;;  %v3124_v15 = vsel %vm1676_vm2, %v3000_v4, 0.0  ;;  %v3172_v38 = vmul.f32 %v3000_v4, %v3000_v4  ;;  %v3227_v46 = vsel %vm1676_vm2, %v3173_v48, 0.0 }
 0x4d9   : > { %v3125_v52 = vadd.f32 %v3124_v15, %v3123_v57  ;;  %v3224_v12 = vadd.f32 %v3223_v14, %v3222_v33  ;;  %v3816_v2 = vpop.f32.mrf.mxu1 }
 0x4da   : > { %v3225_v36 = vsel %vm1676_vm2, %v3172_v38, 0.0  ;;  %3074 = vst.msk [vmem:[%s5159_s24 + $0xc8] sm:$0xff] %vm1676_vm2, %v3816_v2  ;;  %v3175_v26 = vmul.f32 %v3816_v2, %v3816_v2  ;;  %v3130_v50 = vsel %vm1676_vm2, %v3816_v2, 0.0 }
 0x4db   : > { %v3226_v45 = vadd.f32 %v3225_v36, %v3224_v12  ;;  %v3010_v63 = vpop.f32.mrf.mxu1  ;;  %v3127_v22 = vadd.f32 %v3126_v21, %v3125_v52 }
 0x4dc   : > { %3073 = vst.msk [vmem:[%s5159_s24 + $0xc0] sm:$0xff] %vm1676_vm2, %v3010_v63  ;;  %v3128_v6 = vsel %vm1676_vm2, %v3010_v63, 0.0  ;;  %v3174_v40 = vmul.f32 %v3010_v63, %v3010_v63  ;;  %v3231_v13 = vsel %vm1676_vm2, %v3175_v26, 0.0 }
 0x4dd   : > { %v3129_v42 = vadd.f32 %v3128_v6, %v3127_v22  ;;  %v3228_v51 = vadd.f32 %v3227_v46, %v3226_v45  ;;  %v3819_v37 = vpop.f32.mrf.mxu1 }
 0x4de   : > { %v3229_v54 = vsel %vm1676_vm2, %v3174_v40, 0.0  ;;  %3076 = vst.msk [vmem:[%s5159_s24 + $0xd8] sm:$0xff] %vm1676_vm2, %v3819_v37  ;;  %v3177_v25 = vmul.f32 %v3819_v37, %v3819_v37  ;;  %v3134_v58 = vsel %vm1676_vm2, %v3819_v37, 0.0 }
 0x4df   : > { %v3230_v23 = vadd.f32 %v3229_v54, %v3228_v51  ;;  %v3020_v5 = vpop.f32.mrf.mxu1  ;;  %v3131_v43 = vadd.f32 %v3130_v50, %v3129_v42 }
 0x4e0   : > { %3075 = vst.msk [vmem:[%s5159_s24 + $0xd0] sm:$0xff] %vm1676_vm2, %v3020_v5  ;;  %v3132_v49 = vsel %vm1676_vm2, %v3020_v5, 0.0  ;;  %v3176_v41 = vmul.f32 %v3020_v5, %v3020_v5  ;;  %v3235_v9 = vsel %vm1676_vm2, %v3177_v25, 0.0 }
 0x4e1   : > { %v3133_v11 = vadd.f32 %v3132_v49, %v3131_v43  ;;  %v3232_v0 = vadd.f32 %v3231_v13, %v3230_v23  ;;  %v3822_v3 = vpop.f32.mrf.mxu1 }
 0x4e2   : > { %v3233_v24 = vsel %vm1676_vm2, %v3176_v41, 0.0  ;;  %3078 = vst.msk [vmem:[%s5159_s24 + $0xe8] sm:$0xff] %vm1676_vm2, %v3822_v3  ;;  %v3179_v20 = vmul.f32 %v3822_v3, %v3822_v3  ;;  %v3138_v19 = vsel %vm1676_vm2, %v3822_v3, 0.0 }
 0x4e3   : > { %v3234_v59 = vadd.f32 %v3233_v24, %v3232_v0  ;;  %v3030_v18 = vpop.f32.mrf.mxu1  ;;  %v3135_v28 = vadd.f32 %v3134_v58, %v3133_v11 }
 0x4e4   : > { %3077 = vst.msk [vmem:[%s5159_s24 + $0xe0] sm:$0xff] %vm1676_vm2, %v3030_v18  ;;  %v3136_v56 = vsel %vm1676_vm2, %v3030_v18, 0.0  ;;  %v3178_v17 = vmul.f32 %v3030_v18, %v3030_v18  ;;  %v3239_v35 = vsel %vm1676_vm2, %v3179_v20, 0.0 }
 0x4e5   : > { %v3137_v30 = vadd.f32 %v3136_v56, %v3135_v28  ;;  %v3236_v8 = vadd.f32 %v3235_v9, %v3234_v59  ;;  %v3825_v39 = vpop.f32.mrf.mxu1 }
 0x4e6   : > { %v3237_v60 = vsel %vm1676_vm2, %v3178_v17, 0.0  ;;  %3080 = vst.msk [vmem:[%s5159_s24 + $0xf8] sm:$0xff] %vm1676_vm2, %v3825_v39  ;;  %v3181_v61 = vmul.f32 %v3825_v39, %v3825_v39  ;;  %v3142_v29 = vsel %vm1676_vm2, %v3825_v39, 0.0 }
 0x4e7   : > { %v3238_v27 = vadd.f32 %v3237_v60, %v3236_v8  ;;  %v3040_v16 = vpop.f32.mrf.mxu1  ;;  %v3139_v47 = vadd.f32 %v3138_v19, %v3137_v30 }
 0x4e8   : > { %3079 = vst.msk [vmem:[%s5159_s24 + $0xf0] sm:$0xff] %vm1676_vm2, %v3040_v16  ;;  %v3140_v31 = vsel %vm1676_vm2, %v3040_v16, 0.0  ;;  %v3180_v34 = vmul.f32 %v3040_v16, %v3040_v16  ;;  %v3243_v7 = vsel %vm1676_vm2, %v3181_v61, 0.0 }
 0x4e9   : > { %v3141_v32 = vadd.f32 %v3140_v31, %v3139_v47  ;;  %v3240_v62 = vadd.f32 %v3239_v35, %v3238_v27 }
 0x4ea   : > { %v3241_v53 = vsel %vm1676_vm2, %v3180_v34, 0.0 }
 0x4eb   : > { %v3143_v55 = vadd.f32 %v3142_v29, %v3141_v32  ;;  %v3242_v10 = vadd.f32 %v3241_v53, %v3240_v62 }
 0x4ed   : > { %v3144_v44 = vrot.slane %v3143_v55, 4  ;;  %v3244_v1 = vadd.f32 %v3243_v7, %v3242_v10 }
 0x4ef   : > { %v3145_v33 = vadd.f32 %v3144_v44, %v3143_v55  ;;  %v3245_v4 = vrot.slane %v3244_v1, 4 }
 0x4f1   : > { %v3146_v57 = vrot.slane %v3145_v33, 2  ;;  %v3246_v14 = vadd.f32 %v3245_v4, %v3244_v1 }
 0x4f3   : > { %v3147_v48 = vadd.f32 %v3146_v57, %v3145_v33  ;;  %v3247_v15 = vrot.slane %v3246_v14, 2 }
 0x4f5   : > { %v3148_v38 = vrot.slane %v3147_v48, 1  ;;  %v3248_v52 = vadd.f32 %v3247_v15, %v3246_v14 }
 0x4f7   : > { %v3249_v12 = vrot.slane %v3248_v52, 1  ;;  %v3149_v2 = vadd.f32 %v3148_v38, %v3147_v48  ;;  %3254 = sbr.rel (%p6126_p3) target bundleno = 1278 (0x4fe), region = 52 }
 0x4f9   : > { %v3250_v21 = vadd.f32 %v3249_v12, %v3248_v52 }
 0x4fb   : > { %v3251_v36 = vsel %vm2744_vm10, %v3149_v2, %v3250_v21 }
 0x4fc   : > { %v3904_v45 = vmov 0.0  }
 0x4fd   : > { %3255 = vst.msk [vmem:[%s5950_s8] sm:$0x3] %vm2754_vm12, %v3904_v45 }
 0x4fe PF:  {}
 0x504   : > { %v3256_v63 = vld [vmem:[%s5950_s8] sm:$0x3] }
 0x505   : > { %v3257_v22 = vadd.f32 %v3256_v63, %v3251_v36 }
 0x507   : > { %3258 = vst.msk [vmem:[%s5950_s8] sm:$0x3] %vm2754_vm12, %v3257_v22 }
 0x508 PF: > { %s20_s27 = sadd.s32 1, %s3891_s27  }
 0x509   : > { %p17_p4 = scmp.ge.s32.totalorder %s20_s27, 4  }
 0x50b   :  { %19 = sbr.rel (!%p17_p4) target bundleno = 1 (0x1), region = 113 }
 0x510   :  { %3310 = vsyncpa [#allocation3], 1 }
 0x511   :  { %3312 = vsyncpa [#allocation3 + $0x1], 1 }

// kernel: moe_residual_block_forward.6
= control target key start
LH: loop header
LB: loop body
LE: loop exit
PB: predicated region body
PF: predicated region fallthrough
CT: control target
= control target key end

     0   :  { %11 = vsyncpa [#allocation3], 0  ;;  %s3211_s18 = smov 0   ;;  %s4922_s0 = inlined_call_operand.vmem [shape: f32[2,18,18,8], index: 0, kind: input, shape index: {}]   ;;  %s4923_s1 = inlined_call_operand.vmem [shape: f32[72,16], index: 1, kind: input, shape index: {}]   ;;  %s4924_s2 = inlined_call_operand.vmem [shape: f32[2,8], index: 2, kind: input, shape index: {}]   ;;  %s4925_s3 = inlined_call_operand.vmem [shape: f32[2,2], index: 3, kind: input, shape index: {}]   ;;  %s4926_s4 = inlined_call_operand.vmem [shape: f32[512,8], index: 4, kind: output, shape index: {0}]   ;;  %s4927_s5 = inlined_call_operand.vmem [shape: f32[2,8], index: 5, kind: output, shape index: {1}]  }
   0x1 LB: > { %s3217_s19 = sadd.s32 4294967295, %s3168_s18   ;;  %p2741_p0 = scmp.ge.s32.totalorder %s3168_s18, 1  ;;  %s3168_s18 = sphi %s3211_s18, %s17_s18  }
   0x2   : > { %p158_p1 = scmp.lt.s32.totalorder %s3168_s18, 3  ;;  %s177_s22 = sshll.u32 %s4925_s3, 4  ;;  %s178_s22 = int_to_ptr.vmem [resolvable:$true] %s177_s22 }
   0x3   : > { %p3111_p4 = scmp.eq.s32.totalorder %s3217_s19, 0  ;;  %s3143_s24 = scalar_lea.vmem %s178_s22, 32 }
   0x4   : > { %p3225_p3 = pnand %p2741_p0, %p158_p1  ;;  %p3144_p7 = scmp.ne.s32.totalorder %s178_s22, %s3143_s24 }
   0x5   : > { %p3151_p11 = scmp.lt.s32.totalorder %s178_s22, %s178_s22  ;;  %p3152_p12 = scmp.lt.s32.totalorder %s3143_s24, %s3143_s24 }
   0x6   : > { %p3107_p5 = pneg %p3225_p3 }
   0x7   : > { %p3153_p13 = por %p3152_p12, %p3151_p11 }
   0x8   : > { %p3108_p6 = pnand %p3111_p4, %p3107_p5 }
   0xa   : > { %p3145_p8 = pneg %p3108_p6 }
   0xc   : > { %p3146_p9 = pnand %p3145_p8, %p3144_p7 }
   0xe   : > { %p3147_p10 = pneg %p3146_p9 }
  0x10   : > { %p3154_p2 = pnand %p3153_p13, %p3147_p10 }
  0x12   : > { %3157 = shalt.err (!%p3154_p2)
}
  0x13   : > { %s3170_s25 = smov [#allocation2]   ;;  %198 = sbr.rel (%p3225_p3) target bundleno = 1008 (0x3f0), region = 36 }
  0x14   : > { %3110 = dma.vmem_to_smem (!%p3108_p6), %s178_s22, 32, %s3170_s25, [#allocation3]  }
  0x18   : > { %3163 = dma.done.wait (%p3111_p4), [#allocation3], 32  }
  0x19   : > { %3165 = vsyncadd (%p3111_p4), [#allocation3], 4294967264 }
  0x1a   : > { %204 = sfence }
  0x1b   : > { %p227_p0 = scmp.lt.s32.totalorder %s3217_s19, 1  ;;  %s3171_s6 = smov 8   ;;  %vm1552_vm0 = vcmask 64512   ;;  %vm1585_vm1 = vcmask 130048   ;;  %vm1618_vm2 = vcmask 195584   ;;  %vm1651_vm3 = vcmask 261120  }
  0x1c   : > { %s3172_s7 = smov 16   ;;  %s3173_s8 = smov 24   ;;  %vm1684_vm4 = vcmask 326656   ;;  %vm1717_vm5 = vcmask 392192   ;;  %vm1750_vm6 = vcmask 457728   ;;  %vm1783_vm7 = vcmask 523264  }
  0x1d   : > { %s228_s26 = scalar_select %p227_p0, %s3217_s19, 1  ;;  %vm1825_vm8 = vcmask 588800   ;;  %vm2653_vm9 = vcmask 1040384  }
  0x1e   : > { %s3174_s17 = smov 32   ;;  %s3175_s22 = smov 40  }
  0x1f   : > { %s3102_s27 = smul.u32 432, %s228_s26  ;;  %s3178_s10 = smov 64  }
  0x20   : > { %s3179_s13 = smov 120   ;;  %s2747_s15 = sshll.u32 %s3217_s19, 5 }
  0x21   : > { %s3245_s30 = scalar_lea.vmem %s4922_s0, %s3102_s27  ;;  %s3176_s27 = smov 48  }
  0x22   : > { %v3248_v0 = vld [vmem:[%s3245_s30 + $0x19] sm:$0xff]  ;;  %v270_v1 = vld [vmem:[%s3245_s30 + $0x1] sm:$0xff]  ;;  %v271_v3 = vld [vmem:[%s3245_s30 + $0x9] sm:$0xff]  ;;  %p4555_p1 = scmp.lt.s32.totalorder %s2747_s15, 63  ;;  %p5056_p2 = scmp.ne.s32.totalorder %s3217_s19, 0 }
  0x23   : > { %564 = vrot.lane.b32.xlu1 %v3248_v0, %s3171_s6  ;;  %560 = vrot.lane.b32.xlu0 %v270_v1, %s3171_s6  ;;  %v3255_v2 = vld [vmem:[%s3245_s30 + $0x21] sm:$0xff]  ;;  %v3262_v4 = vld [vmem:[%s3245_s30 + $0x39] sm:$0xff] }
  0x24   : > { %v3265_v5 = vld [vmem:[%s3245_s30 + $0x31] sm:$0xff]  ;;  %v3275_v7 = vld [vmem:[%s3245_s30 + $0x49] sm:$0xff]  ;;  %v3285_v9 = vld [vmem:[%s3245_s30 + $0x61] sm:$0xff]  ;;  %s5058_s15 = smov (!%p4555_p1, %s2747_s15), 63 }
  0x25   : > { %v3272_v6 = vld [vmem:[%s3245_s30 + $0x51] sm:$0xff]  ;;  %v3282_v8 = vld [vmem:[%s3245_s30 + $0x69] sm:$0xff]  ;;  %v3292_v10 = vld [vmem:[%s3245_s30 + $0x81] sm:$0xff] }
  0x26   : > { %v3295_v11 = vld [vmem:[%s3245_s30 + $0x79] sm:$0xff]  ;;  %v3305_v13 = vld [vmem:[%s3245_s30 + $0x91] sm:$0xff]  ;;  %v3315_v15 = vld [vmem:[%s3245_s30 + $0xa9] sm:$0xff] }
  0x27   : > { %566 = vrot.lane.b32.xlu1 %v3255_v2, %s3171_s6  ;;  %562 = vrot.lane.b32.xlu0 %v271_v3, %s3171_s6  ;;  %v3302_v12 = vld [vmem:[%s3245_s30 + $0x99] sm:$0xff]  ;;  %v3312_v14 = vld [vmem:[%s3245_s30 + $0xb1] sm:$0xff] }
  0x28   : > { %v287_v16 = vld [vmem:[%s3245_s30 + $0xc9] sm:$0xff]  ;;  %v286_v17 = vld [vmem:[%s3245_s30 + $0xc1] sm:$0xff]  ;;  %v288_v19 = vld [vmem:[%s3245_s30 + $0xd9] sm:$0xff] }
  0x29   : > { %v289_v18 = vld [vmem:[%s3245_s30 + $0xe1] sm:$0xff]  ;;  %v291_v20 = vld [vmem:[%s3245_s30 + $0xf9] sm:$0xff]  ;;  %v290_v21 = vld [vmem:[%s3245_s30 + $0xf1] sm:$0xff] }
  0x2a   : > { %v293_v22 = vld [vmem:[%s3245_s30 + $0x111] sm:$0xff]  ;;  %v292_v23 = vld [vmem:[%s3245_s30 + $0x109] sm:$0xff]  ;;  %v294_v25 = vld [vmem:[%s3245_s30 + $0x121] sm:$0xff] }
  0x2b   : > { %570 = vrot.lane.b32.xlu1 %v3262_v4, %s3171_s6  ;;  %568 = vrot.lane.b32.xlu0 %v3265_v5, %s3171_s6  ;;  %v295_v24 = vld [vmem:[%s3245_s30 + $0x129] sm:$0xff]  ;;  %v297_v26 = vld [vmem:[%s3245_s30 + $0x141] sm:$0xff] }
  0x2c   : > { %v296_v27 = vld [vmem:[%s3245_s30 + $0x139] sm:$0xff]  ;;  %v298_v29 = vld [vmem:[%s3245_s30 + $0x151] sm:$0xff]  ;;  %v300_v31 = vld [vmem:[%s3245_s30 + $0x169] sm:$0xff] }
  0x2d   : > { %v299_v28 = vld [vmem:[%s3245_s30 + $0x159] sm:$0xff]  ;;  %v301_v30 = vld [vmem:[%s3245_s30 + $0x171] sm:$0xff]  ;;  %v302_v33 = vld [vmem:[%s3245_s30 + $0x2] sm:$0xff] }
  0x2e   : > { %v303_v32 = vld [vmem:[%s3245_s30 + $0xa] sm:$0xff]  ;;  %v3358_v34 = vld [vmem:[%s3245_s30 + $0x22] sm:$0xff]  ;;  %v3361_v35 = vld [vmem:[%s3245_s30 + $0x1a] sm:$0xff] }
  0x2f   : > { %574 = vrot.lane.b32.xlu1 %v3272_v6, %s3171_s6  ;;  %572 = vrot.lane.b32.xlu0 %v3275_v7, %s3171_s6  ;;  %v3368_v36 = vld [vmem:[%s3245_s30 + $0x3a] sm:$0xff]  ;;  %v3371_v37 = vld [vmem:[%s3245_s30 + $0x32] sm:$0xff] }
  0x30   : > { %v3378_v38 = vld [vmem:[%s3245_s30 + $0x52] sm:$0xff]  ;;  %v3381_v39 = vld [vmem:[%s3245_s30 + $0x4a] sm:$0xff]  ;;  %v3391_v41 = vld [vmem:[%s3245_s30 + $0x62] sm:$0xff] }
  0x31   : > { %v3388_v40 = vld [vmem:[%s3245_s30 + $0x6a] sm:$0xff]  ;;  %v3398_v42 = vld [vmem:[%s3245_s30 + $0x82] sm:$0xff]  ;;  %v3401_v43 = vld [vmem:[%s3245_s30 + $0x7a] sm:$0xff] }
  0x32   : > { %v3408_v44 = vld [vmem:[%s3245_s30 + $0x9a] sm:$0xff]  ;;  %v3411_v45 = vld [vmem:[%s3245_s30 + $0x92] sm:$0xff]  ;;  %v3421_v47 = vld [vmem:[%s3245_s30 + $0xaa] sm:$0xff] }
  0x33   : > { %578 = vrot.lane.b32.xlu1 %v3282_v8, %s3171_s6  ;;  %576 = vrot.lane.b32.xlu0 %v3285_v9, %s3171_s6  ;;  %v3418_v46 = vld [vmem:[%s3245_s30 + $0xb2] sm:$0xff]  ;;  %v3428_v48 = vld [vmem:[%s3245_s30 + $0xca] sm:$0xff] }
  0x34   : > { %v3431_v49 = vld [vmem:[%s3245_s30 + $0xc2] sm:$0xff]  ;;  %v320_v51 = vld [vmem:[%s3245_s30 + $0xda] sm:$0xff]  ;;  %v322_v53 = vld [vmem:[%s3245_s30 + $0xf2] sm:$0xff] }
  0x35   : > { %v321_v50 = vld [vmem:[%s3245_s30 + $0xe2] sm:$0xff]  ;;  %v323_v52 = vld [vmem:[%s3245_s30 + $0xfa] sm:$0xff]  ;;  %v325_v54 = vld [vmem:[%s3245_s30 + $0x112] sm:$0xff] }
  0x36   : > { %v324_v55 = vld [vmem:[%s3245_s30 + $0x10a] sm:$0xff]  ;;  %v326_v57 = vld [vmem:[%s3245_s30 + $0x122] sm:$0xff]  ;;  %v328_v59 = vld [vmem:[%s3245_s30 + $0x13a] sm:$0xff] }
  0x37   : > { %582 = vrot.lane.b32.xlu1 %v3292_v10, %s3171_s6  ;;  %580 = vrot.lane.b32.xlu0 %v3295_v11, %s3171_s6  ;;  %v327_v56 = vld [vmem:[%s3245_s30 + $0x12a] sm:$0xff]  ;;  %v329_v58 = vld [vmem:[%s3245_s30 + $0x142] sm:$0xff] }
  0x38   : > { %v331_v62 = vld [vmem:[%s3245_s30 + $0x15a] sm:$0xff]  ;;  %v330_v63 = vld [vmem:[%s3245_s30 + $0x152] sm:$0xff] }
  0x3b   : > { %586 = vrot.lane.b32.xlu1 %v3302_v12, %s3171_s6  ;;  %584 = vrot.lane.b32.xlu0 %v3305_v13, %s3171_s6 }
  0x3f   : > { %590 = vrot.lane.b32.xlu1 %v3312_v14, %s3171_s6  ;;  %588 = vrot.lane.b32.xlu0 %v3315_v15, %s3171_s6 }
  0x43   : > { %594 = vrot.lane.b32.xlu1 %v287_v16, %s3171_s6  ;;  %592 = vrot.lane.b32.xlu0 %v286_v17, %s3171_s6  ;;  %v333_v16 = vld [vmem:[%s3245_s30 + $0x172] sm:$0xff]  ;;  %v332_v17 = vld [vmem:[%s3245_s30 + $0x16a] sm:$0xff] }
  0x47   : > { %598 = vrot.lane.b32.xlu1 %v289_v18, %s3171_s6  ;;  %596 = vrot.lane.b32.xlu0 %v288_v19, %s3171_s6 }
  0x4b   : > { %602 = vrot.lane.b32.xlu1 %v291_v20, %s3171_s6  ;;  %600 = vrot.lane.b32.xlu0 %v290_v21, %s3171_s6 }
  0x4f   : > { %606 = vrot.lane.b32.xlu1 %v293_v22, %s3171_s6  ;;  %604 = vrot.lane.b32.xlu0 %v292_v23, %s3171_s6  ;;  %v3482_v22 = vld [vmem:[%s3245_s30 + $0x18] sm:$0xff]  ;;  %v3485_v23 = vld [vmem:[%s3245_s30 + $0x20] sm:$0xff] }
  0x53   : > { %610 = vrot.lane.b32.xlu1 %v295_v24, %s3171_s6  ;;  %608 = vrot.lane.b32.xlu0 %v294_v25, %s3171_s6 }
  0x57   : > { %614 = vrot.lane.b32.xlu1 %v297_v26, %s3171_s6  ;;  %612 = vrot.lane.b32.xlu0 %v296_v27, %s3171_s6  ;;  %v3496_v26 = vld [vmem:[%s3245_s30 + $0x38] sm:$0xff]  ;;  %v3499_v27 = vld [vmem:[%s3245_s30 + $0x30] sm:$0xff] }
  0x5b   : > { %618 = vrot.lane.b32.xlu1 %v299_v28, %s3171_s6  ;;  %616 = vrot.lane.b32.xlu0 %v298_v29, %s3171_s6 }
  0x5f   : > { %622 = vrot.lane.b32.xlu1 %v301_v30, %s3171_s6  ;;  %620 = vrot.lane.b32.xlu0 %v300_v31, %s3171_s6  ;;  %v3510_v30 = vld [vmem:[%s3245_s30 + $0x50] sm:$0xff]  ;;  %v3513_v31 = vld [vmem:[%s3245_s30 + $0x48] sm:$0xff]  ;;  %s3177_s6 = smov 56  }
  0x63   : > { %690 = vrot.lane.b32.xlu1 %v303_v32, %s3172_s7  ;;  %688 = vrot.lane.b32.xlu0 %v302_v33, %s3172_s7 }
  0x67   : > { %694 = vrot.lane.b32.xlu1 %v3358_v34, %s3172_s7  ;;  %692 = vrot.lane.b32.xlu0 %v3361_v35, %s3172_s7 }
  0x6b   : > { %698 = vrot.lane.b32.xlu1 %v3368_v36, %s3172_s7  ;;  %696 = vrot.lane.b32.xlu0 %v3371_v37, %s3172_s7 }
  0x6f   : > { %702 = vrot.lane.b32.xlu1 %v3378_v38, %s3172_s7  ;;  %700 = vrot.lane.b32.xlu0 %v3381_v39, %s3172_s7 }
  0x73   : > { %706 = vrot.lane.b32.xlu1 %v3388_v40, %s3172_s7  ;;  %704 = vrot.lane.b32.xlu0 %v3391_v41, %s3172_s7 }
  0x77   : > { %710 = vrot.lane.b32.xlu1 %v3398_v42, %s3172_s7  ;;  %708 = vrot.lane.b32.xlu0 %v3401_v43, %s3172_s7 }
  0x7b   : > { %714 = vrot.lane.b32.xlu1 %v3408_v44, %s3172_s7  ;;  %712 = vrot.lane.b32.xlu0 %v3411_v45, %s3172_s7 }
  0x7f   : > { %718 = vrot.lane.b32.xlu1 %v3418_v46, %s3172_s7  ;;  %716 = vrot.lane.b32.xlu0 %v3421_v47, %s3172_s7 }
  0x83   : > { %722 = vrot.lane.b32.xlu1 %v3428_v48, %s3172_s7  ;;  %720 = vrot.lane.b32.xlu0 %v3431_v49, %s3172_s7 }
  0x87   : > { %726 = vrot.lane.b32.xlu1 %v321_v50, %s3172_s7  ;;  %724 = vrot.lane.b32.xlu0 %v320_v51, %s3172_s7  ;;  %v3524_v50 = vld [vmem:[%s3245_s30 + $0x68] sm:$0xff]  ;;  %v3527_v51 = vld [vmem:[%s3245_s30 + $0x60] sm:$0xff] }
  0x8b   : > { %730 = vrot.lane.b32.xlu1 %v323_v52, %s3172_s7  ;;  %728 = vrot.lane.b32.xlu0 %v322_v53, %s3172_s7 }
  0x8f   : > { %734 = vrot.lane.b32.xlu1 %v325_v54, %s3172_s7  ;;  %732 = vrot.lane.b32.xlu0 %v324_v55, %s3172_s7  ;;  %v3538_v54 = vld [vmem:[%s3245_s30 + $0x80] sm:$0xff]  ;;  %v3541_v55 = vld [vmem:[%s3245_s30 + $0x78] sm:$0xff] }
  0x93   : > { %738 = vrot.lane.b32.xlu1 %v327_v56, %s3172_s7  ;;  %736 = vrot.lane.b32.xlu0 %v326_v57, %s3172_s7 }
  0x95   : > { %v3455_v60 = vpop.permute.xlu1 %564  ;;  %v3457_v61 = vpop.permute.xlu0 %560 }
  0x97   : > { %742 = vrot.lane.b32.xlu1 %v329_v58, %s3172_s7  ;;  %740 = vrot.lane.b32.xlu0 %v328_v59, %s3172_s7  ;;  %v3552_v58 = vld [vmem:[%s3245_s30 + $0x98] sm:$0xff]  ;;  %v3555_v59 = vld [vmem:[%s3245_s30 + $0x90] sm:$0xff] }
  0x98   : > { %4944 = vst [vmem:[#allocation16_spill] sm:$0xff] %v3552_v58 }
  0x99   : > { %v3463_v1 = vpop.permute.xlu1 %566  ;;  %v3465_v3 = vpop.permute.xlu0 %562 }
  0x9b   : > { %746 = vrot.lane.b32.xlu1 %v331_v62, %s3172_s7  ;;  %744 = vrot.lane.b32.xlu0 %v330_v63, %s3172_s7 }
  0x9d   : > { %v3471_v18 = vpop.permute.xlu1 %570  ;;  %v3473_v19 = vpop.permute.xlu0 %568 }
  0x9f   : > { %750 = vrot.lane.b32.xlu1 %v333_v16, %s3172_s7  ;;  %748 = vrot.lane.b32.xlu0 %v332_v17, %s3172_s7  ;;  %v3566_v16 = vld [vmem:[%s3245_s30 + $0xb0] sm:$0xff]  ;;  %v3569_v17 = vld [vmem:[%s3245_s30 + $0xa8] sm:$0xff] }
  0xa1   : > { %v3477_v20 = vpop.permute.xlu1 %574  ;;  %v3479_v21 = vpop.permute.xlu0 %572 }
  0xa2   : > { %4933 = vst [vmem:[#allocation5_spill] sm:$0xff] %v3477_v20  ;;  %v3645_v20 = vld [vmem:[%s3245_s30 + $0x120] sm:$0xff] }
  0xa3   : > { %818 = vrot.lane.b32.xlu1 %v3485_v23, %s3173_s8  ;;  %816 = vrot.lane.b32.xlu0 %v3482_v22, %s3173_s8  ;;  %4959 = vst [vmem:[#allocation31_spill] sm:$0xff] %v3645_v20 }
  0xa5   : > { %v3491_v24 = vpop.permute.xlu1 %578  ;;  %v3493_v25 = vpop.permute.xlu0 %576 }
  0xa6   : > { %4934 = vst [vmem:[#allocation6_spill] sm:$0xff] %v3491_v24  ;;  %4935 = vst [vmem:[#allocation7_spill] sm:$0xff] %v3493_v25  ;;  %v3628_v24 = vld [vmem:[%s3245_s30 + $0x108] sm:$0xff]  ;;  %v1823_v25 = vld [vmem:[%s4923_s1 + $0x38] sm:$0xff] }
  0xa7   : > { %822 = vrot.lane.b32.xlu1 %v3496_v26, %s3173_s8  ;;  %820 = vrot.lane.b32.xlu0 %v3499_v27, %s3173_s8  ;;  %4956 = vst [vmem:[#allocation28_spill] sm:$0xff] %v3628_v24 }
  0xa9   : > { %v3505_v28 = vpop.permute.xlu1 %582  ;;  %v3507_v29 = vpop.permute.xlu0 %580 }
  0xaa   : > { %4936 = vst [vmem:[#allocation8_spill] sm:$0xff] %v3505_v28  ;;  %4937 = vst [vmem:[#allocation9_spill] sm:$0xff] %v3507_v29  ;;  %v3608_v28 = vld [vmem:[%s3245_s30 + $0xf8] sm:$0xff] }
  0xab   : > { %826 = vrot.lane.b32.xlu1 %v3510_v30, %s3173_s8  ;;  %824 = vrot.lane.b32.xlu0 %v3513_v31, %s3173_s8 }
  0xad   : > { %v3519_v32 = vpop.permute.xlu1 %586  ;;  %v3521_v33 = vpop.permute.xlu0 %584 }
  0xae   : > { %4938 = vst [vmem:[#allocation10_spill] sm:$0xff] %v3519_v32  ;;  %4939 = vst [vmem:[#allocation11_spill] sm:$0xff] %v3521_v33  ;;  %v3594_v32 = vld [vmem:[%s3245_s30 + $0xe0] sm:$0xff]  ;;  %v3597_v33 = vld [vmem:[%s3245_s30 + $0xd8] sm:$0xff] }
  0xaf   : > { %830 = vrot.lane.b32.xlu1 %v3524_v50, %s3173_s8  ;;  %828 = vrot.lane.b32.xlu0 %v3527_v51, %s3173_s8 }
  0xb1   : > { %v3533_v52 = vpop.permute.xlu1 %590  ;;  %v3535_v53 = vpop.permute.xlu0 %588 }
  0xb2   : > { %4940 = vst [vmem:[#allocation12_spill] sm:$0xff] %v3533_v52  ;;  %4941 = vst [vmem:[#allocation13_spill] sm:$0xff] %v3535_v53  ;;  %v3580_v52 = vld [vmem:[%s3245_s30 + $0xc8] sm:$0xff] }
  0xb3   : > { %834 = vrot.lane.b32.xlu1 %v3538_v54, %s3173_s8  ;;  %832 = vrot.lane.b32.xlu0 %v3541_v55, %s3173_s8 }
  0xb5   : > { %v3547_v56 = vpop.permute.xlu1 %594  ;;  %v3549_v57 = vpop.permute.xlu0 %592 }
  0xb6   : > { %4942 = vst [vmem:[#allocation14_spill] sm:$0xff] %v3547_v56  ;;  %4943 = vst [vmem:[#allocation15_spill] sm:$0xff] %v3549_v57 }
  0xb7   : > { %838 = vrot.lane.b32.xlu1 %v3552_v58, %s3173_s8  ;;  %836 = vrot.lane.b32.xlu0 %v3555_v59, %s3173_s8 }
  0xb9   : > { %v3561_v62 = vpop.permute.xlu1 %598  ;;  %v3563_v63 = vpop.permute.xlu0 %596 }
  0xba   : > { %4945 = vst [vmem:[#allocation17_spill] sm:$0xff] %v3561_v62  ;;  %4946 = vst [vmem:[#allocation18_spill] sm:$0xff] %v3563_v63  ;;  %v3583_v62 = vld [vmem:[%s3245_s30 + $0xc0] sm:$0xff] }
  0xbb   : > { %842 = vrot.lane.b32.xlu1 %v3566_v16, %s3173_s8  ;;  %840 = vrot.lane.b32.xlu0 %v3569_v17, %s3173_s8 }
  0xbd   : > { %v3575_v56 = vpop.permute.xlu1 %602  ;;  %v3577_v57 = vpop.permute.xlu0 %600 }
  0xbe   : > { %4947 = vst [vmem:[#allocation19_spill] sm:$0xff] %v3575_v56  ;;  %4948 = vst [vmem:[#allocation20_spill] sm:$0xff] %v3577_v57 }
  0xbf   : > { %846 = vrot.lane.b32.xlu1 %v3580_v52, %s3173_s8  ;;  %844 = vrot.lane.b32.xlu0 %v3583_v62, %s3173_s8 }
  0xc1   : > { %v3589_v63 = vpop.permute.xlu1 %606  ;;  %v3591_v53 = vpop.permute.xlu0 %604 }
  0xc2   : > { %4949 = vst [vmem:[#allocation21_spill] sm:$0xff] %v3589_v63  ;;  %4950 = vst [vmem:[#allocation22_spill] sm:$0xff] %v3591_v53  ;;  %v3611_v63 = vld [vmem:[%s3245_s30 + $0xf0] sm:$0xff]  ;;  %v1824_v53 = vld [vmem:[%s4923_s1 + $0x40] sm:$0xff] }
  0xc3   : > { %850 = vrot.lane.b32.xlu1 %v3594_v32, %s3173_s8  ;;  %848 = vrot.lane.b32.xlu0 %v3597_v33, %s3173_s8 }
  0xc4   : > { %3018 = vmatprep.subr.mxu0 %v1824_v53  ;;  %3084 = vmatprep.subr.mxu1 %v1824_v53 }
  0xc5   : > { %v3603_v56 = vpop.permute.xlu1 %610  ;;  %v3605_v57 = vpop.permute.xlu0 %608  ;;  %3019 = vmatpush3.msra.mxu0 %v1824_v53  ;;  %3093 = vmatpush3.msra.mxu1 %v1824_v53 }
  0xc6   : > { %4951 = vst [vmem:[#allocation23_spill] sm:$0xff] %v3603_v56  ;;  %4952 = vst [vmem:[#allocation24_spill] sm:$0xff] %v3605_v57  ;;  %v3625_v57 = vld [vmem:[%s3245_s30 + $0x110] sm:$0xff]  ;;  %3020 = vmatprep.subr.mxu0 %v1823_v25  ;;  %3085 = vmatprep.subr.mxu1 %v1823_v25 }
  0xc7   : > { %854 = vrot.lane.b32.xlu1 %v3608_v28, %s3173_s8  ;;  %852 = vrot.lane.b32.xlu0 %v3611_v63, %s3173_s8  ;;  %4955 = vst [vmem:[#allocation27_spill] sm:$0xff] %v3625_v57 }
  0xc8   : > { %3021 = vmatpush3.msra.mxu0 %v1823_v25  ;;  %3094 = vmatpush3.msra.mxu1 %v1823_v25 }
  0xc9   : > { %v3620_v29 = vpop.permute.xlu1 %614  ;;  %v3622_v56 = vpop.permute.xlu0 %612 }
  0xca   : > { %4953 = vst [vmem:[#allocation25_spill] sm:$0xff] %v3620_v29  ;;  %4954 = vst [vmem:[#allocation26_spill] sm:$0xff] %v3622_v56  ;;  %v1822_v29 = vld [vmem:[%s4923_s1 + $0x30] sm:$0xff] }
  0xcb   : > { %858 = vrot.lane.b32.xlu1 %v3625_v57, %s3173_s8  ;;  %856 = vrot.lane.b32.xlu0 %v3628_v24, %s3173_s8  ;;  %v1821_v57 = vld [vmem:[%s4923_s1 + $0x28] sm:$0xff] }
  0xcc   : > { %3022 = vmatprep.subr.mxu0 %v1822_v29  ;;  %3086 = vmatprep.subr.mxu1 %v1822_v29 }
  0xcd   : > { %v3640_v53 = vpop.permute.xlu1 %618  ;;  %v3642_v56 = vpop.permute.xlu0 %616  ;;  %3023 = vmatpush3.msra.mxu0 %v1822_v29  ;;  %3095 = vmatpush3.msra.mxu1 %v1822_v29 }
  0xce   : > { %4957 = vst [vmem:[#allocation29_spill] sm:$0xff] %v3640_v53  ;;  %4958 = vst [vmem:[#allocation30_spill] sm:$0xff] %v3642_v56  ;;  %3024 = vmatprep.subr.mxu0 %v1821_v57  ;;  %v1820_v56 = vld [vmem:[%s4923_s1 + $0x20] sm:$0xff]  ;;  %3087 = vmatprep.subr.mxu1 %v1821_v57 }
  0xcf   : > { %944 = vrot.lane.b32.xlu1 %v3248_v0, %s3174_s17  ;;  %860 = vrot.lane.b32.xlu0 %v3645_v20, %s3173_s8  ;;  %v1819_v0 = vld [vmem:[%s4923_s1 + $0x18] sm:$0xff] }
  0xd0   : > { %3025 = vmatpush3.msra.mxu0 %v1821_v57  ;;  %3096 = vmatpush3.msra.mxu1 %v1821_v57 }
  0xd1   : > { %v3654_v53 = vpop.permute.xlu1 %622  ;;  %v3656_v25 = vpop.permute.xlu0 %620  ;;  %3026 = vmatprep.subr.mxu0 %v1820_v56  ;;  %3088 = vmatprep.subr.mxu1 %v1820_v56 }
  0xd2   : > { %4960 = vst [vmem:[#allocation32_spill] sm:$0xff] %v3654_v53  ;;  %4961 = vst [vmem:[#allocation33_spill] sm:$0xff] %v3656_v25  ;;  %3027 = vmatpush3.msra.mxu0 %v1820_v56  ;;  %3097 = vmatpush3.msra.mxu1 %v1820_v56  ;;  %v1817_v56 = vld [vmem:[%s4923_s1 + $0x8] sm:$0xff] }
  0xd3   : > { %1072 = vrot.lane.b32.xlu1 %v3361_v35, %s3175_s22  ;;  %946 = vrot.lane.b32.xlu0 %v3255_v2, %s3174_s17  ;;  %v1818_v35 = vld [vmem:[%s4923_s1 + $0x10] sm:$0xff] }
  0xd4   : > { %3028 = vmatprep.subr.mxu0 %v1819_v0  ;;  %3089 = vmatprep.subr.mxu1 %v1819_v0 }
  0xd5   : > { %v3668_v29 = vpop.permute.xlu1 %690  ;;  %v3670_v25 = vpop.permute.xlu0 %688  ;;  %3029 = vmatpush3.msra.mxu0 %v1819_v0  ;;  %3098 = vmatpush3.msra.mxu1 %v1819_v0 }
  0xd6   : > { %3030 = vmatprep.subr.mxu0 %v1818_v35  ;;  %3090 = vmatprep.subr.mxu1 %v1818_v35 }
  0xd7   : > { %1200 = vrot.lane.b32.xlu1 %v3499_v27, %s3176_s27  ;;  %1074 = vrot.lane.b32.xlu0 %v3358_v34, %s3175_s22  ;;  %v1816_v34 = vld [vmem:[%s4923_s1] sm:$0xff] }
  0xd8   : > { %3031 = vmatpush3.msra.mxu0 %v1818_v35  ;;  %3099 = vmatpush3.msra.mxu1 %v1818_v35 }
  0xd9   : > { %v3679_v2 = vpop.permute.xlu1 %694  ;;  %v3681_v57 = vpop.permute.xlu0 %692  ;;  %3032 = vmatprep.subr.mxu0 %v1817_v56  ;;  %3091 = vmatprep.subr.mxu1 %v1817_v56 }
  0xda   : > { %3033 = vmatpush3.msra.mxu0 %v1817_v56  ;;  %3100 = vmatpush3.msra.mxu1 %v1817_v56 }
  0xdb   : > { %1328 = vrot.lane.b32.xlu1 %v3265_v5, %s3177_s6  ;;  %1202 = vrot.lane.b32.xlu0 %v3496_v26, %s3176_s27 }
  0xdc   : > { %3034 = vmatprep.subr.mxu0 %v1816_v34  ;;  %3092 = vmatprep.subr.mxu1 %v1816_v34 }
  0xdd   : > { %v3693_v0 = vpop.permute.xlu1 %698  ;;  %v3695_v53 = vpop.permute.xlu0 %696  ;;  %3035 = vmatpush3.msra.mxu0 %v1816_v34  ;;  %3101 = vmatpush3.msra.mxu1 %v1816_v34 }
  0xdf   : > { %1330 = vrot.lane.b32.xlu1 %v3262_v4, %s3177_s6  ;;  %948 = vrot.lane.b32.xlu0 %v3265_v5, %s3174_s17 }
  0xe1   : > { %v3701_v35 = vpop.permute.xlu1 %702  ;;  %v3703_v20 = vpop.permute.xlu0 %700 }
  0xe3   : > { %950 = vrot.lane.b32.xlu1 %v3262_v4, %s3174_s17  ;;  %1456 = vrot.lane.b32.xlu0 %v3371_v37, %s3178_s10 }
  0xe5   : > { %v3709_v56 = vpop.permute.xlu1 %706  ;;  %v3711_v24 = vpop.permute.xlu0 %704 }
  0xe6   : > { %4962 = vst [vmem:[#allocation34_spill] sm:$0xff] %v3709_v56 }
  0xe7   : > { %1458 = vrot.lane.b32.xlu1 %v3368_v36, %s3178_s10  ;;  %1076 = vrot.lane.b32.xlu0 %v3371_v37, %s3175_s22 }
  0xe9   : > { %v3717_v5 = vpop.permute.xlu1 %710  ;;  %v3719_v34 = vpop.permute.xlu0 %708 }
  0xea   : > { %4963 = vst [vmem:[#allocation35_spill] sm:$0xff] %v3717_v5 }
  0xeb   : > { %1204 = vrot.lane.b32.xlu1 %v3513_v31, %s3176_s27  ;;  %1078 = vrot.lane.b32.xlu0 %v3368_v36, %s3175_s22 }
  0xed   : > { %v3725_v4 = vpop.permute.xlu1 %714  ;;  %v3727_v56 = vpop.permute.xlu0 %712 }
  0xee   : > { %4964 = vst [vmem:[#allocation36_spill] sm:$0xff] %v3725_v4  ;;  %4965 = vst [vmem:[#allocation37_spill] sm:$0xff] %v3727_v56 }
  0xef   : > { %1332 = vrot.lane.b32.xlu1 %v3275_v7, %s3177_s6  ;;  %1206 = vrot.lane.b32.xlu0 %v3510_v30, %s3176_s27 }
  0xf1   : > { %v3733_v37 = vpop.permute.xlu1 %718  ;;  %v3735_v5 = vpop.permute.xlu0 %716 }
  0xf2   : > { %4966 = vst [vmem:[#allocation38_spill] sm:$0xff] %v3733_v37  ;;  %4967 = vst [vmem:[#allocation39_spill] sm:$0xff] %v3735_v5 }
  0xf3   : > { %1334 = vrot.lane.b32.xlu1 %v3272_v6, %s3177_s6  ;;  %952 = vrot.lane.b32.xlu0 %v3275_v7, %s3174_s17 }
  0xf5   : > { %v3741_v36 = vpop.permute.xlu1 %722  ;;  %v3743_v4 = vpop.permute.xlu0 %720 }
  0xf6   : > { %4968 = vst [vmem:[#allocation40_spill] sm:$0xff] %v3741_v36  ;;  %4969 = vst [vmem:[#allocation41_spill] sm:$0xff] %v3743_v4 }
  0xf7   : > { %954 = vrot.lane.b32.xlu1 %v3272_v6, %s3174_s17  ;;  %1460 = vrot.lane.b32.xlu0 %v3381_v39, %s3178_s10 }
  0xf9   : > { %v3749_v56 = vpop.permute.xlu1 %726  ;;  %v3751_v37 = vpop.permute.xlu0 %724 }
  0xfa   : > { %4970 = vst [vmem:[#allocation42_spill] sm:$0xff] %v3749_v56  ;;  %4971 = vst [vmem:[#allocation43_spill] sm:$0xff] %v3751_v37 }
  0xfb   : > { %1462 = vrot.lane.b32.xlu1 %v3378_v38, %s3178_s10  ;;  %1080 = vrot.lane.b32.xlu0 %v3381_v39, %s3175_s22 }
  0xfd   : > { %v3757_v7 = vpop.permute.xlu1 %730  ;;  %v3759_v36 = vpop.permute.xlu0 %728 }
  0xfe   : > { %4972 = vst [vmem:[#allocation44_spill] sm:$0xff] %v3757_v7  ;;  %4973 = vst [vmem:[#allocation45_spill] sm:$0xff] %v3759_v36 }
  0xff   : > { %1208 = vrot.lane.b32.xlu1 %v3527_v51, %s3176_s27  ;;  %1082 = vrot.lane.b32.xlu0 %v3378_v38, %s3175_s22 }
 0x101   : > { %v3765_v6 = vpop.permute.xlu1 %734  ;;  %v3767_v56 = vpop.permute.xlu0 %732 }
 0x102   : > { %4974 = vst [vmem:[#allocation46_spill] sm:$0xff] %v3765_v6  ;;  %4975 = vst [vmem:[#allocation47_spill] sm:$0xff] %v3767_v56 }
 0x103   : > { %1336 = vrot.lane.b32.xlu1 %v3285_v9, %s3177_s6  ;;  %1210 = vrot.lane.b32.xlu0 %v3524_v50, %s3176_s27 }
 0x105   : > { %v3773_v39 = vpop.permute.xlu1 %738  ;;  %v3775_v7 = vpop.permute.xlu0 %736 }
 0x106   : > { %4976 = vst [vmem:[#allocation48_spill] sm:$0xff] %v3773_v39  ;;  %4977 = vst [vmem:[#allocation49_spill] sm:$0xff] %v3775_v7 }
 0x107   : > { %1338 = vrot.lane.b32.xlu1 %v3282_v8, %s3177_s6  ;;  %956 = vrot.lane.b32.xlu0 %v3285_v9, %s3174_s17 }
 0x109   : > { %v3781_v38 = vpop.permute.xlu1 %742  ;;  %v3783_v6 = vpop.permute.xlu0 %740 }
 0x10a   : > { %4978 = vst [vmem:[#allocation50_spill] sm:$0xff] %v3781_v38  ;;  %4979 = vst [vmem:[#allocation51_spill] sm:$0xff] %v3783_v6 }
 0x10b   : > { %958 = vrot.lane.b32.xlu1 %v3282_v8, %s3174_s17  ;;  %1464 = vrot.lane.b32.xlu0 %v3391_v41, %s3178_s10 }
 0x10d   : > { %v3789_v56 = vpop.permute.xlu1 %746  ;;  %v3791_v39 = vpop.permute.xlu0 %744 }
 0x10e   : > { %4980 = vst [vmem:[#allocation52_spill] sm:$0xff] %v3789_v56  ;;  %4981 = vst [vmem:[#allocation53_spill] sm:$0xff] %v3791_v39 }
 0x10f   : > { %1466 = vrot.lane.b32.xlu1 %v3388_v40, %s3178_s10  ;;  %1084 = vrot.lane.b32.xlu0 %v3391_v41, %s3175_s22 }
 0x111   : > { %v3797_v9 = vpop.permute.xlu1 %750  ;;  %v3799_v38 = vpop.permute.xlu0 %748 }
 0x112   : > { %4982 = vst [vmem:[#allocation54_spill] sm:$0xff] %v3797_v9  ;;  %4983 = vst [vmem:[#allocation55_spill] sm:$0xff] %v3799_v38 }
 0x113   : > { %1212 = vrot.lane.b32.xlu1 %v3541_v55, %s3176_s27  ;;  %1086 = vrot.lane.b32.xlu0 %v3388_v40, %s3175_s22 }
 0x115   : > { %v3805_v8 = vpop.permute.xlu1 %818  ;;  %v3807_v56 = vpop.permute.xlu0 %816 }
 0x117   : > { %1340 = vrot.lane.b32.xlu1 %v3295_v11, %s3177_s6  ;;  %1214 = vrot.lane.b32.xlu0 %v3538_v54, %s3176_s27 }
 0x119   : > { %v3813_v41 = vpop.permute.xlu1 %822  ;;  %v3815_v9 = vpop.permute.xlu0 %820 }
 0x11b   : > { %1342 = vrot.lane.b32.xlu1 %v3292_v10, %s3177_s6  ;;  %960 = vrot.lane.b32.xlu0 %v3295_v11, %s3174_s17 }
 0x11d   : > { %v3821_v40 = vpop.permute.xlu1 %826  ;;  %v3823_v38 = vpop.permute.xlu0 %824 }
 0x11f   : > { %962 = vrot.lane.b32.xlu1 %v3292_v10, %s3174_s17  ;;  %1468 = vrot.lane.b32.xlu0 %v3401_v43, %s3178_s10 }
 0x121   : > { %v3829_v39 = vpop.permute.xlu1 %830  ;;  %v3831_v6 = vpop.permute.xlu0 %828 }
 0x123   : > { %1470 = vrot.lane.b32.xlu1 %v3398_v42, %s3178_s10  ;;  %1088 = vrot.lane.b32.xlu0 %v3401_v43, %s3175_s22 }
 0x125   : > { %v3837_v11 = vpop.permute.xlu1 %834  ;;  %v3839_v7 = vpop.permute.xlu0 %832 }
 0x127   : > { %1216 = vrot.lane.b32.xlu1 %v3555_v59, %s3176_s27  ;;  %1090 = vrot.lane.b32.xlu0 %v3398_v42, %s3175_s22 }
 0x129   : > { %v3845_v10 = vpop.permute.xlu1 %838  ;;  %v3847_v36 = vpop.permute.xlu0 %836 }
 0x12b   : > { %1344 = vrot.lane.b32.xlu1 %v3305_v13, %s3177_s6  ;;  %1218 = vrot.lane.b32.xlu0 %v3552_v58, %s3176_s27 }
 0x12d   : > { %v3853_v43 = vpop.permute.xlu1 %842  ;;  %v3855_v37 = vpop.permute.xlu0 %840 }
 0x12e   : > { %4984 = vst [vmem:[#allocation56_spill] sm:$0xff] %v3853_v43 }
 0x12f   : > { %1346 = vrot.lane.b32.xlu1 %v3302_v12, %s3177_s6  ;;  %964 = vrot.lane.b32.xlu0 %v3305_v13, %s3174_s17 }
 0x131   : > { %v3861_v42 = vpop.permute.xlu1 %846  ;;  %v3863_v4 = vpop.permute.xlu0 %844 }
 0x132   : > { %4985 = vst [vmem:[#allocation57_spill] sm:$0xff] %v3861_v42  ;;  %4986 = vst [vmem:[#allocation58_spill] sm:$0xff] %v3863_v4 }
 0x133   : > { %966 = vrot.lane.b32.xlu1 %v3302_v12, %s3174_s17  ;;  %1472 = vrot.lane.b32.xlu0 %v3411_v45, %s3178_s10 }
 0x135   : > { %v3869_v5 = vpop.permute.xlu1 %850  ;;  %v3871_v43 = vpop.permute.xlu0 %848 }
 0x136   : > { %4987 = vst [vmem:[#allocation59_spill] sm:$0xff] %v3869_v5  ;;  %4988 = vst [vmem:[#allocation60_spill] sm:$0xff] %v3871_v43  ;;  %v2889_v43 = vld [vmem:[%s3245_s30 + $0xc1] sm:$0xff] }
 0x137   : > { %1474 = vrot.lane.b32.xlu1 %v3408_v44, %s3178_s10  ;;  %1092 = vrot.lane.b32.xlu0 %v3411_v45, %s3175_s22 }
 0x139   : > { %v3877_v13 = vpop.permute.xlu1 %854  ;;  %v3879_v42 = vpop.permute.xlu0 %852 }
 0x13a   : > { %4989 = vst [vmem:[#allocation61_spill] sm:$0xff] %v3877_v13  ;;  %4990 = vst [vmem:[#allocation62_spill] sm:$0xff] %v3879_v42  ;;  %v239_v42 = vld [vmem:[%s3245_s30 + $0x8] sm:$0xff] }
 0x13b   : > { %1220 = vrot.lane.b32.xlu1 %v3569_v17, %s3176_s27  ;;  %1094 = vrot.lane.b32.xlu0 %v3408_v44, %s3175_s22 }
 0x13d   : > { %v3885_v12 = vpop.permute.xlu1 %858  ;;  %v3887_v5 = vpop.permute.xlu0 %856 }
 0x13e   : > { %4991 = vst [vmem:[#allocation63_spill] sm:$0xff] %v3885_v12  ;;  %4992 = vst [vmem:[#allocation64_spill] sm:$0xff] %v3887_v5 }
 0x13f   : > { %1348 = vrot.lane.b32.xlu1 %v3315_v15, %s3177_s6  ;;  %1222 = vrot.lane.b32.xlu0 %v3566_v16, %s3176_s27 }
 0x141   : > { %v945_v45 = vpop.permute.xlu1 %944  ;;  %v3893_v13 = vpop.permute.xlu0 %860 }
 0x142   : > { %4993 = vst [vmem:[#allocation65_spill] sm:$0xff] %v3893_v13 }
 0x143   : > { %1350 = vrot.lane.b32.xlu1 %v3312_v14, %s3177_s6  ;;  %968 = vrot.lane.b32.xlu0 %v3315_v15, %s3174_s17  ;;  %v238_v15 = vld [vmem:[%s3245_s30] sm:$0xff] }
 0x145   : > { %v1073_v44 = vpop.permute.xlu1 %1072  ;;  %v947_v17 = vpop.permute.xlu0 %946 }
 0x147   : > { %970 = vrot.lane.b32.xlu1 %v3312_v14, %s3174_s17  ;;  %1476 = vrot.lane.b32.xlu0 %v3421_v47, %s3178_s10  ;;  %v1553_v14 = vsel %vm1552_vm0, %v238_v15, %v3457_v61 }
 0x149   : > { %v1201_v12 = vpop.permute.xlu1 %1200  ;;  %v1075_v16 = vpop.permute.xlu0 %1074 }
 0x14b   : > { %1478 = vrot.lane.b32.xlu1 %v3418_v46, %s3178_s10  ;;  %1096 = vrot.lane.b32.xlu0 %v3421_v47, %s3175_s22  ;;  %v1586_v47 = vsel %vm1585_vm1, %v1553_v14, %v3670_v25  ;;  %v2890_v14 = vld [vmem:[%s3245_s30 + $0xc9] sm:$0xff] }
 0x14c   : > { %v1619_v4 = vsel %vm1618_vm2, %v1586_v47, %v3807_v56 }
 0x14d   : > { %v1329_v13 = vpop.permute.xlu1 %1328  ;;  %v1203_v5 = vpop.permute.xlu0 %1202  ;;  %v1652_v15 = vsel %vm1651_vm3, %v1619_v4, %v945_v45 }
 0x14f   : > { %1224 = vrot.lane.b32.xlu1 %v3583_v62, %s3176_s27  ;;  %1098 = vrot.lane.b32.xlu0 %v3418_v46, %s3175_s22  ;;  %v1554_v62 = vsel %vm1552_vm0, %v239_v42, %v3465_v3  ;;  %v1685_v46 = vsel %vm1684_vm4, %v1652_v15, %v1073_v44 }
 0x150   : > { %v1587_v25 = vsel %vm1585_vm1, %v1554_v62, %v3668_v29  ;;  %v1718_v56 = vsel %vm1717_vm5, %v1685_v46, %v1201_v12  ;;  %v2891_v46 = vld [vmem:[%s3245_s30 + $0xd9] sm:$0xff] }
 0x151   : > { %v1331_v58 = vpop.permute.xlu1 %1330  ;;  %v949_v61 = vpop.permute.xlu0 %948  ;;  %v1620_v4 = vsel %vm1618_vm2, %v1587_v25, %v3805_v8  ;;  %v1751_v45 = vsel %vm1750_vm6, %v1718_v56, %v1329_v13 }
 0x152   : > { %v1653_v44 = vsel %vm1651_vm3, %v1620_v4, %v947_v17 }
 0x153   : > { %1352 = vrot.lane.b32.xlu1 %v2889_v43, %s3177_s6  ;;  %1226 = vrot.lane.b32.xlu0 %v3580_v52, %s3176_s27  ;;  %v1686_v52 = vsel %vm1684_vm4, %v1653_v44, %v1075_v16  ;;  %v1555_v16 = vsel %vm1552_vm0, %v3482_v22, %v3455_v60  ;;  %v1556_v60 = vsel %vm1552_vm0, %v3485_v23, %v3463_v1 }
 0x154   : > { %v1719_v29 = vsel %vm1717_vm5, %v1686_v52, %v1203_v5  ;;  %v1588_v62 = vsel %vm1585_vm1, %v1555_v16, %v3681_v57  ;;  %v2892_v57 = vld [vmem:[%s3245_s30 + $0xe1] sm:$0xff] }
 0x155   : > { %v951_v3 = vpop.permute.xlu1 %950  ;;  %v1457_v42 = vpop.permute.xlu0 %1456  ;;  %v1752_v8 = vsel %vm1750_vm6, %v1719_v29, %v1331_v58  ;;  %v2924_v52 = vld [vmem:[%s3245_s30 + $0xe2] sm:$0xff] }
 0x156   : > { %v1784_v47 = vsel %vm1783_vm7, %v1751_v45, %v1457_v42 }
 0x157   : > { %1354 = vrot.lane.b32.xlu1 %v2890_v14, %s3177_s6  ;;  %972 = vrot.lane.b32.xlu0 %v2889_v43, %s3174_s17 }
 0x158   : > { %3036 = vmatprep.mubr.msk.f32.mxu0 %vm1825_vm8, %v1784_v47 }
 0x159   : > { %v1459_v13 = vpop.permute.xlu1 %1458  ;;  %v1077_v12 = vpop.permute.xlu0 %1076 }
 0x15a   : > { %v1785_v15 = vsel %vm1783_vm7, %v1752_v8, %v1459_v13 }
 0x15b   : > { %974 = vrot.lane.b32.xlu1 %v2890_v14, %s3174_s17  ;;  %1480 = vrot.lane.b32.xlu0 %v3431_v49, %s3178_s10 }
 0x15c   : > { %3037 = vmatmul.mubr.msk.f32.vlgmr.msra.gmra.mxu0 %vm1825_vm8, %v1785_v15  ;;  %v1557_v15 = vsel %vm1552_vm0, %v3499_v27, %v3473_v19  ;;  %v1558_v19 = vsel %vm1552_vm0, %v3496_v26, %v3471_v18 }
 0x15d   : > { %v1205_v17 = vpop.permute.xlu1 %1204  ;;  %v1079_v43 = vpop.permute.xlu0 %1078 }
 0x15f   : > { %1482 = vrot.lane.b32.xlu1 %v3428_v48, %s3178_s10  ;;  %1100 = vrot.lane.b32.xlu0 %v3431_v49, %s3175_s22  ;;  %v1621_v49 = vsel %vm1618_vm2, %v1588_v62, %v3815_v9 }
 0x160   : > { %v1654_v14 = vsel %vm1651_vm3, %v1621_v49, %v949_v61 }
 0x161   : > { %v1333_v58 = vpop.permute.xlu1 %1332  ;;  %v1207_v5 = vpop.permute.xlu0 %1206  ;;  %v1687_v22 = vsel %vm1684_vm4, %v1654_v14, %v1077_v12 }
 0x163   : > { %1228 = vrot.lane.b32.xlu1 %v3597_v33, %s3176_s27  ;;  %1102 = vrot.lane.b32.xlu0 %v3428_v48, %s3175_s22  ;;  %v1589_v48 = vsel %vm1585_vm1, %v1556_v60, %v3679_v2  ;;  %v1720_v33 = vsel %vm1717_vm5, %v1687_v22, %v1205_v17  ;;  %v1590_v17 = vsel %vm1585_vm1, %v1557_v15, %v3695_v53 }
 0x164   : > { %v1622_v9 = vsel %vm1618_vm2, %v1589_v48, %v3813_v41  ;;  %v1753_v61 = vsel %vm1750_vm6, %v1720_v33, %v1333_v58  ;;  %v2923_v41 = vld [vmem:[%s3245_s30 + $0xda] sm:$0xff]  ;;  %v1623_v58 = vsel %vm1618_vm2, %v1590_v17, %v3823_v38 }
 0x165   : > { %v1335_v25 = vpop.permute.xlu1 %1334  ;;  %v953_v56 = vpop.permute.xlu0 %952  ;;  %v1655_v4 = vsel %vm1651_vm3, %v1622_v9, %v951_v3  ;;  %v2894_v38 = vld [vmem:[%s3245_s30 + $0xf9] sm:$0xff] }
 0x166   : > { %v1656_v62 = vsel %vm1651_vm3, %v1623_v58, %v953_v56  ;;  %v2926_v33 = vld [vmem:[%s3245_s30 + $0xfa] sm:$0xff] }
 0x167   : > { %1356 = vrot.lane.b32.xlu1 %v2891_v46, %s3177_s6  ;;  %1230 = vrot.lane.b32.xlu0 %v3594_v32, %s3176_s27  ;;  %v1688_v32 = vsel %vm1684_vm4, %v1655_v4, %v1079_v43  ;;  %v2893_v43 = vld [vmem:[%s3245_s30 + $0xf1] sm:$0xff] }
 0x168   : > { %v1721_v2 = vsel %vm1717_vm5, %v1688_v32, %v1207_v5  ;;  %v4994_v4 = vld [vmem:[#allocation28_spill] sm:$0xff]  ;;  %v2895_v32 = vld [vmem:[%s3245_s30 + $0x109] sm:$0xff] }
 0x169   : > { %v955_v1 = vpop.permute.xlu1 %954  ;;  %v1461_v23 = vpop.permute.xlu0 %1460  ;;  %v1754_v42 = vsel %vm1750_vm6, %v1721_v2, %v1335_v25 }
 0x16a   : > { %v1786_v45 = vsel %vm1783_vm7, %v1753_v61, %v1461_v23  ;;  %v1559_v23 = vsel %vm1552_vm0, %v3513_v31, %v3479_v21 }
 0x16b   : > { %1358 = vrot.lane.b32.xlu1 %v2892_v57, %s3177_s6  ;;  %976 = vrot.lane.b32.xlu0 %v2891_v46, %s3174_s17 }
 0x16c   : > { %3039 = vmatprep.mubr.msk.f32.mxu0 %vm1825_vm8, %v1786_v45  ;;  %v1592_v45 = vsel %vm1585_vm1, %v1559_v23, %v3703_v20 }
 0x16d   : > { %v1463_v44 = vpop.permute.xlu1 %1462  ;;  %v1081_v47 = vpop.permute.xlu0 %1080  ;;  %v1625_v2 = vsel %vm1618_vm2, %v1592_v45, %v3831_v6 }
 0x16e   : > { %v1787_v3 = vsel %vm1783_vm7, %v1754_v42, %v1463_v44  ;;  %v1689_v27 = vsel %vm1684_vm4, %v1656_v62, %v1081_v47  ;;  %v4995_v47 = vld [vmem:[#allocation5_spill] sm:$0xff]  ;;  %v2928_v62 = vld [vmem:[%s3245_s30 + $0x112] sm:$0xff] }
 0x16f   : > { %978 = vrot.lane.b32.xlu1 %v2892_v57, %s3174_s17  ;;  %1484 = vrot.lane.b32.xlu0 %v2923_v41, %s3178_s10  ;;  %v1560_v21 = vsel %vm1552_vm0, %v3510_v30, %v4995_v47  ;;  %v2836_v47 = vld [vmem:[%s3245_s30 + $0x12a] sm:$0xff] }
 0x170   : > { %3040 = vmatmul.mubr.msk.f32.gmra.mxu0 %vm1825_vm8, %v1787_v3  ;;  %v4996_v3 = vld [vmem:[#allocation27_spill] sm:$0xff]  ;;  %v1593_v20 = vsel %vm1585_vm1, %v1560_v21, %v3701_v35 }
 0x171   : > { %v1209_v29 = vpop.permute.xlu1 %1208  ;;  %v1083_v8 = vpop.permute.xlu0 %1082 }
 0x172   : > { %v1722_v53 = vsel %vm1717_vm5, %v1689_v27, %v1209_v29  ;;  %v1626_v29 = vsel %vm1618_vm2, %v1593_v20, %v3829_v39  ;;  %v2927_v39 = vld [vmem:[%s3245_s30 + $0x10a] sm:$0xff] }
 0x173   : > { %1486 = vrot.lane.b32.xlu1 %v2924_v52, %s3178_s10  ;;  %1104 = vrot.lane.b32.xlu0 %v2923_v41, %s3175_s22 }
 0x175   : > { %v1337_v13 = vpop.permute.xlu1 %1336  ;;  %v1211_v12 = vpop.permute.xlu0 %1210 }
 0x176   : > { %v1755_v49 = vsel %vm1750_vm6, %v1722_v53, %v1337_v13 }
 0x177   : > { %1232 = vrot.lane.b32.xlu1 %v3611_v63, %s3176_s27  ;;  %1106 = vrot.lane.b32.xlu0 %v2924_v52, %s3175_s22  ;;  %v1591_v63 = vsel %vm1585_vm1, %v1558_v19, %v3693_v0  ;;  %v2896_v52 = vld [vmem:[%s3245_s30 + $0x111] sm:$0xff] }
 0x178   : > { %v1624_v46 = vsel %vm1618_vm2, %v1591_v63, %v3821_v40  ;;  %v2925_v40 = vld [vmem:[%s3245_s30 + $0xf2] sm:$0xff] }
 0x179   : > { %v1339_v5 = vpop.permute.xlu1 %1338  ;;  %v957_v16 = vpop.permute.xlu0 %956  ;;  %v1657_v25 = vsel %vm1651_vm3, %v1624_v46, %v955_v1 }
 0x17a   : > { %v1658_v44 = vsel %vm1651_vm3, %v1625_v2, %v957_v16 }
 0x17b   : > { %1360 = vrot.lane.b32.xlu1 %v2893_v43, %s3177_s6  ;;  %1234 = vrot.lane.b32.xlu0 %v3608_v28, %s3176_s27  ;;  %v1690_v28 = vsel %vm1684_vm4, %v1657_v25, %v1083_v8 }
 0x17c   : > { %v1723_v0 = vsel %vm1717_vm5, %v1690_v28, %v1211_v12 }
 0x17d   : > { %v959_v18 = vpop.permute.xlu1 %958  ;;  %v1465_v26 = vpop.permute.xlu0 %1464  ;;  %v1756_v14 = vsel %vm1750_vm6, %v1723_v0, %v1339_v5  ;;  %v4090_v0 = vld [vmem:[%s3245_s30 + $0x128] sm:$0xff] }
 0x17e   : > { %v1788_v56 = vsel %vm1783_vm7, %v1755_v49, %v1465_v26  ;;  %v1659_v12 = vsel %vm1651_vm3, %v1626_v29, %v959_v18  ;;  %v4998_v49 = vld [vmem:[#allocation31_spill] sm:$0xff]  ;;  %v2897_v26 = vld [vmem:[%s3245_s30 + $0x121] sm:$0xff] }
 0x17f   : > { %1362 = vrot.lane.b32.xlu1 %v2894_v38, %s3177_s6  ;;  %980 = vrot.lane.b32.xlu0 %v2893_v43, %s3174_s17 }
 0x180   : > { %3042 = vmatprep.mubr.msk.f32.mxu0 %vm1825_vm8, %v1788_v56 }
 0x181   : > { %v1467_v60 = vpop.permute.xlu1 %1466  ;;  %v1085_v22 = vpop.permute.xlu0 %1084 }
 0x182   : > { %v1789_v48 = vsel %vm1783_vm7, %v1756_v14, %v1467_v60  ;;  %v1691_v31 = vsel %vm1684_vm4, %v1658_v44, %v1085_v22  ;;  %v4999_v14 = vld [vmem:[#allocation6_spill] sm:$0xff] }
 0x183   : > { %982 = vrot.lane.b32.xlu1 %v2894_v38, %s3174_s17  ;;  %1488 = vrot.lane.b32.xlu0 %v2925_v40, %s3178_s10  ;;  %v4997_v38 = vld [vmem:[#allocation7_spill] sm:$0xff] }
 0x184   : > { %3043 = vmatmul.mubr.msk.f32.gmra.mxu0 %vm1825_vm8, %v1789_v48  ;;  %v1561_v46 = vsel %vm1552_vm0, %v3527_v51, %v4997_v38  ;;  %v1562_v51 = vsel %vm1552_vm0, %v3524_v50, %v4999_v14  ;;  %v5005_v14 = vld [vmem:[#allocation37_spill] sm:$0xff] }
 0x185   : > { %v1213_v57 = vpop.permute.xlu1 %1212  ;;  %v1087_v9 = vpop.permute.xlu0 %1086  ;;  %v1594_v18 = vsel %vm1585_vm1, %v1561_v46, %v3711_v24  ;;  %v5000_v24 = vld [vmem:[#allocation34_spill] sm:$0xff]  ;;  %v2931_v46 = vld [vmem:[%s3245_s30 + $0x13a] sm:$0xff] }
 0x186   : > { %v1724_v6 = vsel %vm1717_vm5, %v1691_v31, %v1213_v57  ;;  %v1692_v17 = vsel %vm1684_vm4, %v1659_v12, %v1087_v9  ;;  %v1627_v25 = vsel %vm1618_vm2, %v1594_v18, %v3839_v7  ;;  %v1595_v7 = vsel %vm1585_vm1, %v1562_v51, %v5000_v24  ;;  %v5002_v12 = vld [vmem:[#allocation8_spill] sm:$0xff] }
 0x187   : > { %1490 = vrot.lane.b32.xlu1 %v2926_v33, %s3178_s10  ;;  %1108 = vrot.lane.b32.xlu0 %v2925_v40, %s3175_s22  ;;  %v1628_v48 = vsel %vm1618_vm2, %v1595_v7, %v3837_v11  ;;  %v2929_v11 = vld [vmem:[%s3245_s30 + $0x122] sm:$0xff] }
 0x189   : > { %v1341_v61 = vpop.permute.xlu1 %1340  ;;  %v1215_v1 = vpop.permute.xlu0 %1214 }
 0x18a   : > { %v1757_v8 = vsel %vm1750_vm6, %v1724_v6, %v1341_v61  ;;  %v1725_v35 = vsel %vm1717_vm5, %v1692_v17, %v1215_v1  ;;  %v5003_v17 = vld [vmem:[#allocation35_spill] sm:$0xff] }
 0x18b   : > { %1236 = vrot.lane.b32.xlu1 %v4994_v4, %s3176_s27  ;;  %1110 = vrot.lane.b32.xlu0 %v2926_v33, %s3175_s22  ;;  %v2898_v4 = vld [vmem:[%s3245_s30 + $0x129] sm:$0xff] }
 0x18d   : > { %v1343_v41 = vpop.permute.xlu1 %1342  ;;  %v961_v42 = vpop.permute.xlu0 %960 }
 0x18e   : > { %v1758_v43 = vsel %vm1750_vm6, %v1725_v35, %v1343_v41  ;;  %v1660_v40 = vsel %vm1651_vm3, %v1627_v25, %v961_v42 }
 0x18f   : > { %1364 = vrot.lane.b32.xlu1 %v2895_v32, %s3177_s6  ;;  %1238 = vrot.lane.b32.xlu0 %v4996_v3, %s3176_s27  ;;  %v5001_v3 = vld [vmem:[#allocation9_spill] sm:$0xff] }
 0x190   : > { %v1563_v20 = vsel %vm1552_vm0, %v3541_v55, %v5001_v3  ;;  %v1564_v55 = vsel %vm1552_vm0, %v3538_v54, %v5002_v12 }
 0x191   : > { %v963_v30 = vpop.permute.xlu1 %962  ;;  %v1469_v13 = vpop.permute.xlu0 %1468  ;;  %v1596_v6 = vsel %vm1585_vm1, %v1563_v20, %v3719_v34  ;;  %v1597_v34 = vsel %vm1585_vm1, %v1564_v55, %v5003_v17  ;;  %v3132_v55 = vld [vmem:[%s3245_s30 + $0xa8] sm:$0xff] }
 0x192   : > { %v1790_v15 = vsel %vm1783_vm7, %v1757_v8, %v1469_v13  ;;  %v1661_v9 = vsel %vm1651_vm3, %v1628_v48, %v963_v30  ;;  %v1629_v29 = vsel %vm1618_vm2, %v1596_v6, %v3847_v36  ;;  %v2899_v36 = vld [vmem:[%s3245_s30 + $0x139] sm:$0xff] }
 0x193   : > { %1366 = vrot.lane.b32.xlu1 %v2896_v52, %s3177_s6  ;;  %984 = vrot.lane.b32.xlu0 %v2895_v32, %s3174_s17 }
 0x194   : > { %3045 = vmatprep.mubr.msk.f32.mxu0 %vm1825_vm8, %v1790_v15 }
 0x195   : > { %v1471_v58 = vpop.permute.xlu1 %1470  ;;  %v1089_v5 = vpop.permute.xlu0 %1088 }
 0x196   : > { %v1791_v16 = vsel %vm1783_vm7, %v1758_v43, %v1471_v58  ;;  %v1693_v60 = vsel %vm1684_vm4, %v1660_v40, %v1089_v5  ;;  %v1630_v43 = vsel %vm1618_vm2, %v1597_v34, %v3845_v10  ;;  %v5011_v34 = vld [vmem:[#allocation39_spill] sm:$0xff] }
 0x197   : > { %986 = vrot.lane.b32.xlu1 %v2896_v52, %s3174_s17  ;;  %1492 = vrot.lane.b32.xlu0 %v2927_v39, %s3178_s10  ;;  %v2773_v52 = vld [vmem:[%s3245_s30 + $0x138] sm:$0xff] }
 0x198   : > { %3046 = vmatmul.mubr.msk.f32.gmra.mxu0 %vm1825_vm8, %v1791_v16 }
 0x199   : > { %v1217_v19 = vpop.permute.xlu1 %1216  ;;  %v1091_v27 = vpop.permute.xlu0 %1090 }
 0x19a   : > { %v1726_v22 = vsel %vm1717_vm5, %v1693_v60, %v1217_v19  ;;  %v1694_v1 = vsel %vm1684_vm4, %v1661_v9, %v1091_v27  ;;  %v2838_v60 = vld [vmem:[%s3245_s30 + $0x142] sm:$0xff]  ;;  %v5008_v9 = vld [vmem:[#allocation36_spill] sm:$0xff] }
 0x19b   : > { %1494 = vrot.lane.b32.xlu1 %v2928_v62, %s3178_s10  ;;  %1112 = vrot.lane.b32.xlu0 %v2927_v39, %s3175_s22  ;;  %v2868_v39 = vld [vmem:[%s3245_s30 + $0x140] sm:$0xff] }
 0x19d   : > { %v1345_v63 = vpop.permute.xlu1 %1344  ;;  %v1219_v53 = vpop.permute.xlu0 %1218 }
 0x19e   : > { %v1759_v33 = vsel %vm1750_vm6, %v1726_v22, %v1345_v63  ;;  %v1727_v23 = vsel %vm1717_vm5, %v1694_v1, %v1219_v53  ;;  %v2775_v1 = vld [vmem:[%s3245_s30 + $0x150] sm:$0xff] }
 0x19f   : > { %1240 = vrot.lane.b32.xlu1 %v4998_v49, %s3176_s27  ;;  %1114 = vrot.lane.b32.xlu0 %v2928_v62, %s3175_s22  ;;  %v2900_v49 = vld [vmem:[%s3245_s30 + $0x141] sm:$0xff] }
 0x1a1   : > { %v1347_v56 = vpop.permute.xlu1 %1346  ;;  %v965_v28 = vpop.permute.xlu0 %964 }
 0x1a2   : > { %v1760_v45 = vsel %vm1750_vm6, %v1727_v23, %v1347_v56  ;;  %v1662_v13 = vsel %vm1651_vm3, %v1629_v29, %v965_v28  ;;  %v5004_v28 = vld [vmem:[#allocation11_spill] sm:$0xff]  ;;  %v5009_v23 = vld [vmem:[#allocation56_spill] sm:$0xff] }
 0x1a3   : > { %1368 = vrot.lane.b32.xlu1 %v2897_v26, %s3177_s6  ;;  %1242 = vrot.lane.b32.xlu0 %v4090_v0, %s3176_s27  ;;  %v1565_v40 = vsel %vm1552_vm0, %v3555_v59, %v5004_v28 }
 0x1a4   : > { %v1598_v51 = vsel %vm1585_vm1, %v1565_v40, %v5005_v14  ;;  %v2777_v14 = vld [vmem:[%s3245_s30 + $0x168] sm:$0xff] }
 0x1a5   : > { %v967_v50 = vpop.permute.xlu1 %966  ;;  %v1473_v57 = vpop.permute.xlu0 %1472  ;;  %v1631_v24 = vsel %vm1618_vm2, %v1598_v51, %v3855_v37 }
 0x1a6   : > { %v1792_v61 = vsel %vm1783_vm7, %v1759_v33, %v1473_v57  ;;  %v1663_v16 = vsel %vm1651_vm3, %v1630_v43, %v967_v50  ;;  %v5006_v33 = vld [vmem:[#allocation10_spill] sm:$0xff]  ;;  %v5007_v50 = vld [vmem:[#allocation16_spill] sm:$0xff] }
 0x1a7   : > { %988 = vrot.lane.b32.xlu1 %v2897_v26, %s3174_s17  ;;  %862 = vrot.lane.b32.xlu0 %v4090_v0, %s3173_s8  ;;  %v1566_v57 = vsel %vm1552_vm0, %v5007_v50, %v5006_v33 }
 0x1a8   : > { %3048 = vmatprep.mubr.msk.f32.mxu0 %vm1825_vm8, %v1792_v61  ;;  %v1599_v61 = vsel %vm1585_vm1, %v1566_v57, %v5008_v9  ;;  %v3134_v9 = vld [vmem:[%s3245_s30 + $0xc0] sm:$0xff] }
 0x1a9   : > { %v1475_v32 = vpop.permute.xlu1 %1474  ;;  %v1093_v2 = vpop.permute.xlu0 %1092 }
 0x1aa   : > { %v1793_v41 = vsel %vm1783_vm7, %v1760_v45, %v1475_v32  ;;  %v1695_v15 = vsel %vm1684_vm4, %v1662_v13, %v1093_v2 }
 0x1ab   : > { %1496 = vrot.lane.b32.xlu1 %v2929_v11, %s3178_s10  ;;  %1370 = vrot.lane.b32.xlu0 %v2898_v4, %s3177_s6 }
 0x1ac   : > { %3049 = vmatmul.mubr.msk.f32.gmra.mxu0 %vm1825_vm8, %v1793_v41 }
 0x1ad   : > { %v1221_v42 = vpop.permute.xlu1 %1220  ;;  %v1095_v44 = vpop.permute.xlu0 %1094 }
 0x1ae   : > { %v1728_v35 = vsel %vm1717_vm5, %v1695_v15, %v1221_v42  ;;  %v1696_v19 = vsel %vm1684_vm4, %v1663_v16, %v1095_v44  ;;  %v5010_v15 = vld [vmem:[#allocation13_spill] sm:$0xff]  ;;  %v5013_v16 = vld [vmem:[#allocation12_spill] sm:$0xff] }
 0x1af   : > { %1116 = vrot.lane.b32.xlu1 %v2929_v11, %s3175_s22  ;;  %990 = vrot.lane.b32.xlu0 %v2898_v4, %s3174_s17  ;;  %v1632_v11 = vsel %vm1618_vm2, %v1599_v61, %v5009_v23  ;;  %v1567_v17 = vsel %vm1552_vm0, %v3132_v55, %v5010_v15  ;;  %v5016_v61 = vld [vmem:[#allocation15_spill] sm:$0xff] }
 0x1b1   : > { %v1349_v21 = vpop.permute.xlu1 %1348  ;;  %v1223_v31 = vpop.permute.xlu0 %1222 }
 0x1b2   : > { %v1761_v58 = vsel %vm1750_vm6, %v1728_v35, %v1349_v21  ;;  %v1729_v27 = vsel %vm1717_vm5, %v1696_v19, %v1223_v31  ;;  %v2870_v21 = vld [vmem:[%s3245_s30 + $0x158] sm:$0xff]  ;;  %v1600_v35 = vsel %vm1585_vm1, %v1567_v17, %v5011_v34 }
 0x1b3   : > { %1118 = vrot.lane.b32.xlu1 %v2836_v47, %s3175_s22  ;;  %1498 = vrot.lane.b32.xlu0 %v2836_v47, %s3178_s10  ;;  %v2901_v47 = vld [vmem:[%s3245_s30 + $0x151] sm:$0xff] }
 0x1b4   : > { %v2842_v34 = vld [vmem:[%s3245_s30 + $0x172] sm:$0xff] }
 0x1b5   : > { %v1351_v8 = vpop.permute.xlu1 %1350  ;;  %v969_v30 = vpop.permute.xlu0 %968 }
 0x1b6   : > { %v1762_v10 = vsel %vm1750_vm6, %v1729_v27, %v1351_v8  ;;  %v1664_v48 = vsel %vm1651_vm3, %v1631_v24, %v969_v30  ;;  %v2933_v8 = vld [vmem:[%s3245_s30 + $0x152] sm:$0xff]  ;;  %v5014_v27 = vld [vmem:[#allocation38_spill] sm:$0xff] }
 0x1b7   : > { %864 = vrot.lane.b32.xlu1 %v2773_v52, %s3173_s8  ;;  %1244 = vrot.lane.b32.xlu0 %v2773_v52, %s3176_s27  ;;  %v2902_v30 = vld [vmem:[%s3245_s30 + $0x159] sm:$0xff] }
 0x1b9   : > { %v971_v5 = vpop.permute.xlu1 %970  ;;  %v1477_v54 = vpop.permute.xlu0 %1476 }
 0x1ba   : > { %v1794_v62 = vsel %vm1783_vm7, %v1761_v58, %v1477_v54  ;;  %v1665_v2 = vsel %vm1651_vm3, %v1632_v11, %v971_v5  ;;  %v3133_v54 = vld [vmem:[%s3245_s30 + $0xb0] sm:$0xff] }
 0x1bb   : > { %1372 = vrot.lane.b32.xlu1 %v2899_v36, %s3177_s6  ;;  %1246 = vrot.lane.b32.xlu0 %v2868_v39, %s3176_s27  ;;  %v2935_v11 = vld [vmem:[%s3245_s30 + $0x16a] sm:$0xff] }
 0x1bc   : > { %3051 = vmatprep.mubr.msk.f32.mxu0 %vm1825_vm8, %v1794_v62  ;;  %v1568_v62 = vsel %vm1552_vm0, %v3133_v54, %v5013_v16  ;;  %v2905_v16 = vld [vmem:[%s3245_s30 + $0x181] sm:$0xff] }
 0x1bd   : > { %v1479_v63 = vpop.permute.xlu1 %1478  ;;  %v1097_v53 = vpop.permute.xlu0 %1096 }
 0x1be   : > { %v1795_v38 = vsel %vm1783_vm7, %v1762_v10, %v1479_v63  ;;  %v1697_v59 = vsel %vm1684_vm4, %v1664_v48, %v1097_v53  ;;  %v1601_v10 = vsel %vm1585_vm1, %v1568_v62, %v5014_v27  ;;  %v2840_v53 = vld [vmem:[%s3245_s30 + $0x15a] sm:$0xff]  ;;  %v2872_v48 = vld [vmem:[%s3245_s30 + $0x170] sm:$0xff]  ;;  %v2874_v62 = vld [vmem:[%s3245_s30 + $0x188] sm:$0xff] }
 0x1bf   : > { %992 = vrot.lane.b32.xlu1 %v2899_v36, %s3174_s17  ;;  %866 = vrot.lane.b32.xlu0 %v2868_v39, %s3173_s8  ;;  %v5012_v36 = vld [vmem:[#allocation58_spill] sm:$0xff] }
 0x1c0   : > { %3052 = vmatmul.mubr.msk.f32.gmra.mxu0 %vm1825_vm8, %v1795_v38  ;;  %v1633_v39 = vsel %vm1618_vm2, %v1600_v35, %v5012_v36  ;;  %v5015_v38 = vld [vmem:[#allocation57_spill] sm:$0xff] }
 0x1c1   : > { %v1225_v18 = vpop.permute.xlu1 %1224  ;;  %v1099_v26 = vpop.permute.xlu0 %1098 }
 0x1c2   : > { %v1730_v37 = vsel %vm1717_vm5, %v1697_v59, %v1225_v18  ;;  %v1698_v42 = vsel %vm1684_vm4, %v1665_v2, %v1099_v26 }
 0x1c3   : > { %1500 = vrot.lane.b32.xlu1 %v2931_v46, %s3178_s10  ;;  %1374 = vrot.lane.b32.xlu0 %v2900_v49, %s3177_s6 }
 0x1c5   : > { %v1353_v25 = vpop.permute.xlu1 %1352  ;;  %v1227_v56 = vpop.permute.xlu0 %1226 }
 0x1c6   : > { %v1763_v4 = vsel %vm1750_vm6, %v1730_v37, %v1353_v25  ;;  %v1731_v44 = vsel %vm1717_vm5, %v1698_v42, %v1227_v56  ;;  %v1569_v37 = vsel %vm1552_vm0, %v3134_v9, %v5016_v61 }
 0x1c7   : > { %1120 = vrot.lane.b32.xlu1 %v2931_v46, %s3175_s22  ;;  %994 = vrot.lane.b32.xlu0 %v2900_v49, %s3174_s17  ;;  %v1634_v46 = vsel %vm1618_vm2, %v1601_v10, %v5015_v38  ;;  %v3136_v10 = vld [vmem:[%s3245_s30 + $0xd8] sm:$0xff]  ;;  %v5023_v38 = vld [vmem:[#allocation43_spill] sm:$0xff] }
 0x1c9   : > { %v1355_v7 = vpop.permute.xlu1 %1354  ;;  %v973_v22 = vpop.permute.xlu0 %972 }
 0x1ca   : > { %v1764_v31 = vsel %vm1750_vm6, %v1731_v44, %v1355_v7  ;;  %v1666_v5 = vsel %vm1651_vm3, %v1633_v39, %v973_v22  ;;  %v2903_v22 = vld [vmem:[%s3245_s30 + $0x169] sm:$0xff] }
 0x1cb   : > { %1122 = vrot.lane.b32.xlu1 %v2838_v60, %s3175_s22  ;;  %1502 = vrot.lane.b32.xlu0 %v2838_v60, %s3178_s10  ;;  %v3135_v44 = vld [vmem:[%s3245_s30 + $0xc8] sm:$0xff] }
 0x1cd   : > { %v975_v45 = vpop.permute.xlu1 %974  ;;  %v1481_v32 = vpop.permute.xlu0 %1480 }
 0x1ce   : > { %v1796_v41 = vsel %vm1783_vm7, %v1763_v4, %v1481_v32  ;;  %v1667_v25 = vsel %vm1651_vm3, %v1634_v46, %v975_v45  ;;  %v2904_v4 = vld [vmem:[%s3245_s30 + $0x171] sm:$0xff] }
 0x1cf   : > { %868 = vrot.lane.b32.xlu1 %v2775_v1, %s3173_s8  ;;  %1248 = vrot.lane.b32.xlu0 %v2775_v1, %s3176_s27  ;;  %v5017_v1 = vld [vmem:[#allocation41_spill] sm:$0xff]  ;;  %v5018_v45 = vld [vmem:[#allocation60_spill] sm:$0xff] }
 0x1d0   : > { %3054 = vmatprep.mubr.msk.f32.mxu0 %vm1825_vm8, %v1796_v41  ;;  %v1602_v23 = vsel %vm1585_vm1, %v1569_v37, %v5017_v1 }
 0x1d1   : > { %v1483_v3 = vpop.permute.xlu1 %1482  ;;  %v1101_v20 = vpop.permute.xlu0 %1100  ;;  %v1635_v32 = vsel %vm1618_vm2, %v1602_v23, %v5018_v45 }
 0x1d2   : > { %v1797_v6 = vsel %vm1783_vm7, %v1764_v31, %v1483_v3  ;;  %v1699_v19 = vsel %vm1684_vm4, %v1666_v5, %v1101_v20  ;;  %v5020_v3 = vld [vmem:[#allocation40_spill] sm:$0xff] }
 0x1d3   : > { %1376 = vrot.lane.b32.xlu1 %v2901_v47, %s3177_s6  ;;  %1250 = vrot.lane.b32.xlu0 %v2870_v21, %s3176_s27 }
 0x1d4   : > { %3055 = vmatmul.mubr.msk.f32.gmra.mxu0 %vm1825_vm8, %v1797_v6 }
 0x1d5   : > { %v1229_v52 = vpop.permute.xlu1 %1228  ;;  %v1103_v29 = vpop.permute.xlu0 %1102 }
 0x1d6   : > { %v1732_v63 = vsel %vm1717_vm5, %v1699_v19, %v1229_v52  ;;  %v1700_v28 = vsel %vm1684_vm4, %v1667_v25, %v1103_v29  ;;  %v5021_v52 = vld [vmem:[#allocation59_spill] sm:$0xff] }
 0x1d7   : > { %996 = vrot.lane.b32.xlu1 %v2901_v47, %s3174_s17  ;;  %870 = vrot.lane.b32.xlu0 %v2870_v21, %s3173_s8  ;;  %v5019_v47 = vld [vmem:[#allocation14_spill] sm:$0xff] }
 0x1d8   : > { %v1570_v21 = vsel %vm1552_vm0, %v3135_v44, %v5019_v47  ;;  %v2876_v44 = vld [vmem:[%s3245_s30 + $0x1a0] sm:$0xff]  ;;  %v2875_v47 = vld [vmem:[%s3245_s30 + $0x198] sm:$0xff] }
 0x1d9   : > { %v1357_v13 = vpop.permute.xlu1 %1356  ;;  %v1231_v12 = vpop.permute.xlu0 %1230  ;;  %v1603_v20 = vsel %vm1585_vm1, %v1570_v21, %v5020_v3  ;;  %v3138_v3 = vld [vmem:[%s3245_s30 + $0xf0] sm:$0xff] }
 0x1da   : > { %v1765_v49 = vsel %vm1750_vm6, %v1732_v63, %v1357_v13  ;;  %v1733_v40 = vsel %vm1717_vm5, %v1700_v28, %v1231_v12  ;;  %v1636_v29 = vsel %vm1618_vm2, %v1603_v20, %v5021_v52  ;;  %v5022_v63 = vld [vmem:[#allocation18_spill] sm:$0xff]  ;;  %v3137_v28 = vld [vmem:[%s3245_s30 + $0xe0] sm:$0xff]  ;;  %v5028_v20 = vld [vmem:[#allocation20_spill] sm:$0xff] }
 0x1db   : > { %1504 = vrot.lane.b32.xlu1 %v2933_v8, %s3178_s10  ;;  %1378 = vrot.lane.b32.xlu0 %v2902_v30, %s3177_s6  ;;  %v5029_v52 = vld [vmem:[#allocation45_spill] sm:$0xff] }
 0x1dd   : > { %v1359_v43 = vpop.permute.xlu1 %1358  ;;  %v977_v58 = vpop.permute.xlu0 %976 }
 0x1de   : > { %v1766_v51 = vsel %vm1750_vm6, %v1733_v40, %v1359_v43  ;;  %v1668_v42 = vsel %vm1651_vm3, %v1635_v32, %v977_v58  ;;  %v2779_v58 = vld [vmem:[%s3245_s30 + $0x180] sm:$0xff] }
 0x1df   : > { %1124 = vrot.lane.b32.xlu1 %v2933_v8, %s3175_s22  ;;  %998 = vrot.lane.b32.xlu0 %v2902_v30, %s3174_s17  ;;  %v5025_v40 = vld [vmem:[#allocation17_spill] sm:$0xff] }
 0x1e1   : > { %v979_v18 = vpop.permute.xlu1 %978  ;;  %v1485_v26 = vpop.permute.xlu0 %1484 }
 0x1e2   : > { %v1798_v56 = vsel %vm1783_vm7, %v1765_v49, %v1485_v26  ;;  %v1669_v12 = vsel %vm1651_vm3, %v1636_v29, %v979_v18  ;;  %v5024_v49 = vld [vmem:[#allocation62_spill] sm:$0xff] }
 0x1e3   : > { %1126 = vrot.lane.b32.xlu1 %v2840_v53, %s3175_s22  ;;  %1506 = vrot.lane.b32.xlu0 %v2840_v53, %s3178_s10  ;;  %v1571_v53 = vsel %vm1552_vm0, %v3136_v10, %v5022_v63  ;;  %v5031_v10 = vld [vmem:[#allocation19_spill] sm:$0xff] }
 0x1e4   : > { %3057 = vmatprep.mubr.msk.f32.mxu0 %vm1825_vm8, %v1798_v56  ;;  %v1604_v46 = vsel %vm1585_vm1, %v1571_v53, %v5023_v38  ;;  %v5032_v53 = vld [vmem:[#allocation44_spill] sm:$0xff] }
 0x1e5   : > { %v1487_v60 = vpop.permute.xlu1 %1486  ;;  %v1105_v24 = vpop.permute.xlu0 %1104  ;;  %v1637_v18 = vsel %vm1618_vm2, %v1604_v46, %v5024_v49  ;;  %v5033_v46 = vld [vmem:[#allocation63_spill] sm:$0xff] }
 0x1e6   : > { %v1799_v7 = vsel %vm1783_vm7, %v1766_v51, %v1487_v60  ;;  %v1701_v31 = vsel %vm1684_vm4, %v1668_v42, %v1105_v24  ;;  %v5026_v60 = vld [vmem:[#allocation42_spill] sm:$0xff] }
 0x1e7   : > { %872 = vrot.lane.b32.xlu1 %v2777_v14, %s3173_s8  ;;  %1252 = vrot.lane.b32.xlu0 %v2777_v14, %s3176_s27  ;;  %v1572_v14 = vsel %vm1552_vm0, %v3137_v28, %v5025_v40 }
 0x1e8   : > { %3058 = vmatmul.mubr.msk.f32.gmra.mxu0 %vm1825_vm8, %v1799_v7  ;;  %v1605_v24 = vsel %vm1585_vm1, %v1572_v14, %v5026_v60 }
 0x1e9   : > { %v1233_v33 = vpop.permute.xlu1 %1232  ;;  %v1107_v50 = vpop.permute.xlu0 %1106 }
 0x1ea   : > { %v1734_v6 = vsel %vm1717_vm5, %v1701_v31, %v1233_v33  ;;  %v1702_v15 = vsel %vm1684_vm4, %v1669_v12, %v1107_v50  ;;  %v5027_v33 = vld [vmem:[#allocation61_spill] sm:$0xff] }
 0x1eb   : > { %1380 = vrot.lane.b32.xlu1 %v2903_v22, %s3177_s6  ;;  %1254 = vrot.lane.b32.xlu0 %v2872_v48, %s3176_s27  ;;  %v1638_v50 = vsel %vm1618_vm2, %v1605_v24, %v5027_v33 }
 0x1ed   : > { %v1361_v57 = vpop.permute.xlu1 %1360  ;;  %v1235_v59 = vpop.permute.xlu0 %1234 }
 0x1ee   : > { %v1767_v8 = vsel %vm1750_vm6, %v1734_v6, %v1361_v57  ;;  %v1735_v17 = vsel %vm1717_vm5, %v1702_v15, %v1235_v59  ;;  %v1573_v6 = vsel %vm1552_vm0, %v3138_v3, %v5028_v20 }
 0x1ef   : > { %1000 = vrot.lane.b32.xlu1 %v2903_v22, %s3174_s17  ;;  %874 = vrot.lane.b32.xlu0 %v2872_v48, %s3173_s8  ;;  %v2937_v22 = vld [vmem:[%s3245_s30 + $0x182] sm:$0xff]  ;;  %v1606_v29 = vsel %vm1585_vm1, %v1573_v6, %v5029_v52  ;;  %v3141_v6 = vld [vmem:[%s3245_s30 + $0x110] sm:$0xff] }
 0x1f0   : > { %v2906_v48 = vld [vmem:[%s3245_s30 + $0x189] sm:$0xff]  ;;  %v5037_v52 = vld [vmem:[#allocation21_spill] sm:$0xff] }
 0x1f1   : > { %v1363_v2 = vpop.permute.xlu1 %1362  ;;  %v981_v41 = vpop.permute.xlu0 %980 }
 0x1f2   : > { %v1768_v35 = vsel %vm1750_vm6, %v1735_v17, %v1363_v2  ;;  %v1670_v56 = vsel %vm1651_vm3, %v1637_v18, %v981_v41  ;;  %v2844_v2 = vld [vmem:[%s3245_s30 + $0x18a] sm:$0xff] }
 0x1f3   : > { %1508 = vrot.lane.b32.xlu1 %v2935_v11, %s3178_s10  ;;  %1382 = vrot.lane.b32.xlu0 %v2904_v4, %s3177_s6 }
 0x1f5   : > { %v983_v30 = vpop.permute.xlu1 %982  ;;  %v1489_v13 = vpop.permute.xlu0 %1488 }
 0x1f6   : > { %v1800_v55 = vsel %vm1783_vm7, %v1767_v8, %v1489_v13  ;;  %v1671_v61 = vsel %vm1651_vm3, %v1638_v50, %v983_v30  ;;  %v2908_v8 = vld [vmem:[%s3245_s30 + $0x1a1] sm:$0xff]  ;;  %v2907_v30 = vld [vmem:[%s3245_s30 + $0x199] sm:$0xff] }
 0x1f7   : > { %1128 = vrot.lane.b32.xlu1 %v2935_v11, %s3175_s22  ;;  %1002 = vrot.lane.b32.xlu0 %v2904_v4, %s3174_s17  ;;  %v5030_v13 = vld [vmem:[#allocation64_spill] sm:$0xff] }
 0x1f8   : > { %3060 = vmatprep.mubr.msk.f32.mxu1 %vm1825_vm8, %v1800_v55  ;;  %v1639_v12 = vsel %vm1618_vm2, %v1606_v29, %v5030_v13  ;;  %v1576_v29 = vsel %vm1552_vm0, %v3141_v6, %v5037_v52 }
 0x1f9   : > { %v1491_v36 = vpop.permute.xlu1 %1490  ;;  %v1109_v39 = vpop.permute.xlu0 %1108 }
 0x1fa   : > { %v1801_v43 = vsel %vm1783_vm7, %v1768_v35, %v1491_v36  ;;  %v1703_v51 = vsel %vm1684_vm4, %v1670_v56, %v1109_v39  ;;  %v2940_v39 = vld [vmem:[%s3245_s30 + $0x1a2] sm:$0xff] }
 0x1fb   : > { %1130 = vrot.lane.b32.xlu1 %v2842_v34, %s3175_s22  ;;  %1510 = vrot.lane.b32.xlu0 %v2842_v34, %s3178_s10 }
 0x1fc   : > { %3061 = vmatmul.mubr.msk.f32.vlgmr.msra.gmra.mxu1 %vm1825_vm8, %v1801_v43  ;;  %v2939_v43 = vld [vmem:[%s3245_s30 + $0x19a] sm:$0xff] }
 0x1fd   : > { %v1237_v5 = vpop.permute.xlu1 %1236  ;;  %v1111_v54 = vpop.permute.xlu0 %1110 }
 0x1fe   : > { %v1736_v7 = vsel %vm1717_vm5, %v1703_v51, %v1237_v5  ;;  %v1704_v1 = vsel %vm1684_vm4, %v1671_v61, %v1111_v54  ;;  %v5035_v61 = vld [vmem:[#allocation47_spill] sm:$0xff] }
 0x1ff   : > { %876 = vrot.lane.b32.xlu1 %v2779_v58, %s3173_s8  ;;  %1256 = vrot.lane.b32.xlu0 %v2779_v58, %s3176_s27 }
 0x201   : > { %v1365_v19 = vpop.permute.xlu1 %1364  ;;  %v1239_v27 = vpop.permute.xlu0 %1238 }
 0x202   : > { %v1769_v57 = vsel %vm1750_vm6, %v1736_v7, %v1365_v19  ;;  %v1737_v23 = vsel %vm1717_vm5, %v1704_v1, %v1239_v27  ;;  %v3139_v27 = vld [vmem:[%s3245_s30 + $0xf8] sm:$0xff] }
 0x203   : > { %1384 = vrot.lane.b32.xlu1 %v2905_v16, %s3177_s6  ;;  %1258 = vrot.lane.b32.xlu0 %v2874_v62, %s3176_s27  ;;  %v1574_v63 = vsel %vm1552_vm0, %v3139_v27, %v5031_v10 }
 0x204   : > { %v1607_v38 = vsel %vm1585_vm1, %v1574_v63, %v5032_v53 }
 0x205   : > { %v1367_v26 = vpop.permute.xlu1 %1366  ;;  %v985_v25 = vpop.permute.xlu0 %984  ;;  %v1640_v49 = vsel %vm1618_vm2, %v1607_v38, %v5033_v46  ;;  %v3142_v38 = vld [vmem:[%s3245_s30 + $0x120] sm:$0xff]  ;;  %v5039_v46 = vld [vmem:[#allocation24_spill] sm:$0xff] }
 0x206   : > { %v1770_v11 = vsel %vm1750_vm6, %v1737_v23, %v1367_v26  ;;  %v1672_v17 = vsel %vm1651_vm3, %v1639_v12, %v985_v25  ;;  %v5036_v23 = vld [vmem:[#allocation65_spill] sm:$0xff] }
 0x207   : > { %1004 = vrot.lane.b32.xlu1 %v2905_v16, %s3174_s17  ;;  %878 = vrot.lane.b32.xlu0 %v2874_v62, %s3173_s8  ;;  %s2973_s8 = sshll.u32 %s3217_s19, 7 }
 0x208   : > { %s2217_s11 = sadd.s32 1, %s2973_s8  ;;  %s2148_s14 = sld [smem:[#allocation2 + %s2973_s8]] }
 0x209   : > { %v4313_v59 = vpop.permute.xlu1 %986  ;;  %v1493_v9 = vpop.permute.xlu0 %1492  ;;  %s2218_s12 = sld [smem:[#allocation2 + %s2217_s11]] }
 0x20a   : > { %v1802_v37 = vsel %vm1783_vm7, %v1769_v57, %v1493_v9  ;;  %v1673_v28 = vsel %vm1651_vm3, %v1640_v49, %v4313_v59  ;;  %v3140_v57 = vld [vmem:[%s3245_s30 + $0x108] sm:$0xff]  ;;  %v1577_v49 = vsel %vm1552_vm0, %v3142_v38, %v5039_v46 }
 0x20b   : > { %1512 = vrot.lane.b32.xlu1 %v2937_v22, %s3178_s10  ;;  %1386 = vrot.lane.b32.xlu0 %v2906_v48, %s3177_s6  ;;  %v5034_v59 = vld [vmem:[#allocation22_spill] sm:$0xff] }
 0x20c   : > { %3063 = vmatprep.mubr.msk.f32.mxu1 %vm1825_vm8, %v1802_v37  ;;  %v1575_v9 = vsel %vm1552_vm0, %v3140_v57, %v5034_v59  ;;  %v5042_v57 = vld [vmem:[#allocation48_spill] sm:$0xff] }
 0x20d   : > { %v1495_v4 = vpop.permute.xlu1 %1494  ;;  %v1113_v45 = vpop.permute.xlu0 %1112  ;;  %v1608_v37 = vsel %vm1585_vm1, %v1575_v9, %v5035_v61 }
 0x20e   : > { %v1803_v32 = vsel %vm1783_vm7, %v1770_v11, %v1495_v4  ;;  %v1705_v34 = vsel %vm1684_vm4, %v1672_v17, %v1113_v45  ;;  %v1641_v11 = vsel %vm1618_vm2, %v1608_v37, %v5036_v23 }
 0x20f   : > { %1132 = vrot.lane.b32.xlu1 %v2937_v22, %s3175_s22  ;;  %1006 = vrot.lane.b32.xlu0 %v2906_v48, %s3174_s17  ;;  %v4358_v16 = vstv %s2218_s12 }
 0x210   : > { %3064 = vmatmul.mubr.msk.f32.gmra.mxu1 %vm1825_vm8, %v1803_v32 }
 0x211   : > { %v1241_v41 = vpop.permute.xlu1 %1240  ;;  %v1115_v42 = vpop.permute.xlu0 %1114 }
 0x212   : > { %v1738_v35 = vsel %vm1717_vm5, %v1705_v34, %v1241_v41  ;;  %v1706_v40 = vsel %vm1684_vm4, %v1673_v28, %v1115_v42 }
 0x213   : > { %1134 = vrot.lane.b32.xlu1 %v2844_v2, %s3175_s22  ;;  %1514 = vrot.lane.b32.xlu0 %v2844_v2, %s3178_s10  ;;  %s2748_s22 = sshll.u32 %s5058_s15, 3 }
 0x214   : > { %s4592_s25 = scalar_lea.vmem %s4926_s4, %s2748_s22 }
 0x215   : > { %v1369_v21 = vpop.permute.xlu1 %1368  ;;  %v1243_v31 = vpop.permute.xlu0 %1242 }
 0x216   : > { %v1771_v58 = vsel %vm1750_vm6, %v1738_v35, %v1369_v21  ;;  %v1739_v14 = vsel %vm1717_vm5, %v1706_v40, %v1243_v31 }
 0x217   : > { %1262 = vrot.lane.b32.xlu1 %v2876_v44, %s3176_s27  ;;  %1260 = vrot.lane.b32.xlu0 %v2875_v47, %s3176_s27 }
 0x219   : > { %v989_v55 = vpop.permute.xlu1 %988  ;;  %v4346_v15 = vpop.permute.xlu0 %862 }
 0x21a   : > { %v1674_v2 = vsel %vm1651_vm3, %v1641_v11, %v989_v55 }
 0x21b   : > { %1390 = vrot.lane.b32.xlu1 %v2908_v8, %s3177_s6  ;;  %1388 = vrot.lane.b32.xlu0 %v2907_v30, %s3177_s6  ;;  %v5038_v8 = vld [vmem:[#allocation46_spill] sm:$0xff] }
 0x21c   : > { %v4353_v36 = vpop.f32.mrf.mxu0  ;;  %v1609_v30 = vsel %vm1585_vm1, %v1576_v29, %v5038_v8  ;;  %v5043_v29 = vld [vmem:[#allocation26_spill] sm:$0xff] }
 0x21d   : > { %v1497_v5 = vpop.permute.xlu1 %1496  ;;  %v1371_v54 = vpop.permute.xlu0 %1370  ;;  %v2221_v18 = vmul.f32 %v4353_v36, %v4358_v16  ;;  %v1642_v13 = vsel %vm1618_vm2, %v1609_v30, %v4346_v15  ;;  %v5044_v30 = vld [vmem:[#allocation51_spill] sm:$0xff] }
 0x21e   : > { %v1804_v62 = vsel %vm1783_vm7, %v1771_v58, %v1497_v5  ;;  %v4361_v19 = vpop.f32.mrf.mxu0  ;;  %v1772_v51 = vsel %vm1750_vm6, %v1739_v14, %v1371_v54 }
 0x21f   : > { %1518 = vrot.lane.b32.xlu1 %v2940_v39, %s3178_s10  ;;  %1516 = vrot.lane.b32.xlu0 %v2939_v43, %s3178_s10  ;;  %v2220_v26 = vmul.f32 %v4358_v16, %v4361_v19 }
 0x220   : > { %3066 = vmatprep.mubr.msk.f32.mxu1 %vm1825_vm8, %v1804_v62 }
 0x221   : > { %v1117_v25 = vpop.permute.xlu1 %1116  ;;  %v991_v56 = vpop.permute.xlu0 %990 }
 0x222   : > { %v1707_v42 = vsel %vm1684_vm4, %v1674_v2, %v1117_v25  ;;  %v1675_v17 = vsel %vm1651_vm3, %v1642_v13, %v991_v56 }
 0x223   : > { %2286 = vrot.lane.b32.xlu1 %v2221_v18, %s3179_s13  ;;  %2284 = vrot.lane.b32.xlu0 %v2220_v26, %s3179_s13  ;;  %v5040_v26 = vld [vmem:[#allocation49_spill] sm:$0xff] }
 0x224   : > { %v1610_v25 = vsel %vm1585_vm1, %v1577_v49, %v5040_v26 }
 0x225   : > { %v1119_v60 = vpop.permute.xlu1 %1118  ;;  %v1499_v24 = vpop.permute.xlu0 %1498 }
 0x226   : > { %v1805_v7 = vsel %vm1783_vm7, %v1772_v51, %v1499_v24  ;;  %v1708_v34 = vsel %vm1684_vm4, %v1675_v17, %v1119_v60 }
 0x227   : > { %3067 = vmatmul.mubr.msk.f32.gmra.mxu1 %vm1825_vm8, %v1805_v7 }
 0x229   : > { %v865_v22 = vpop.permute.xlu1 %864  ;;  %v1245_v48 = vpop.permute.xlu0 %1244 }
 0x22a   : > { %v1740_v47 = vsel %vm1717_vm5, %v1707_v42, %v1245_v48  ;;  %v1643_v56 = vsel %vm1618_vm2, %v1610_v25, %v865_v22 }
 0x22d   : > { %v1373_v33 = vpop.permute.xlu1 %1372  ;;  %v1247_v50 = vpop.permute.xlu0 %1246 }
 0x22e   : > { %v1773_v21 = vsel %vm1750_vm6, %v1740_v47, %v1373_v33  ;;  %v1741_v35 = vsel %vm1717_vm5, %v1708_v34, %v1247_v50  ;;  %v5041_v50 = vld [vmem:[#allocation23_spill] sm:$0xff] }
 0x22f   : > { %v1578_v22 = vsel %vm1552_vm0, %v4090_v0, %v5041_v50 }
 0x230   : > { %v4391_v1 = vpop.f32.mrf.mxu0  ;;  %v1611_v59 = vsel %vm1585_vm1, %v1578_v22, %v5042_v57  ;;  %v266_v22 = vld [vmem:[%s3245_s30 + $0x150] sm:$0xff] }
 0x231   : > { %v2223_v4 = vmul.f32 %v4391_v1, %v4358_v16  ;;  %v993_v45 = vpop.permute.xlu1 %992  ;;  %v867_v32 = vpop.permute.xlu0 %866 }
 0x232   : > { %v4398_v41 = vpop.f32.mrf.mxu0  ;;  %v1676_v14 = vsel %vm1651_vm3, %v1643_v56, %v993_v45  ;;  %v1644_v9 = vsel %vm1618_vm2, %v1611_v59, %v867_v32 }
 0x233   : > { %v2222_v44 = vmul.f32 %v4358_v16, %v4398_v41  ;;  %2290 = vrot.lane.b32.xlu1 %v2223_v4, %s3179_s13 }
 0x235   : > { %2288 = vrot.lane.b32.xlu0 %v2222_v44, %s3179_s13  ;;  %v1501_v31 = vpop.permute.xlu1 %1500  ;;  %v1375_v3 = vpop.permute.xlu0 %1374 }
 0x236   : > { %v1806_v20 = vsel %vm1783_vm7, %v1773_v21, %v1501_v31  ;;  %v1774_v39 = vsel %vm1750_vm6, %v1741_v35, %v1375_v3 }
 0x237   : > { %3069 = vmatprep.mubr.msk.f32.mxu1 %vm1825_vm8, %v1806_v20  ;;  %v264_v20 = vld [vmem:[%s3245_s30 + $0x138] sm:$0xff] }
 0x238   : > { %v1579_v8 = vsel %vm1552_vm0, %v264_v20, %v5043_v29 }
 0x239   : > { %v1121_v12 = vpop.permute.xlu1 %1120  ;;  %v995_v55 = vpop.permute.xlu0 %994  ;;  %v1612_v13 = vsel %vm1585_vm1, %v1579_v8, %v5044_v30 }
 0x23a   : > { %v1709_v51 = vsel %vm1684_vm4, %v1676_v14, %v1121_v12  ;;  %v1677_v23 = vsel %vm1651_vm3, %v1644_v9, %v995_v55  ;;  %v5047_v9 = vld [vmem:[#allocation30_spill] sm:$0xff] }
 0x23d   : > { %v1123_v43 = vpop.permute.xlu1 %1122  ;;  %v1503_v58 = vpop.permute.xlu0 %1502 }
 0x23e   : > { %v1807_v5 = vsel %vm1783_vm7, %v1774_v39, %v1503_v58  ;;  %v1710_v11 = vsel %vm1684_vm4, %v1677_v23, %v1123_v43  ;;  %v265_v39 = vld [vmem:[%s3245_s30 + $0x140] sm:$0xff] }
 0x23f   : > { %3070 = vmatmul.mubr.msk.f32.gmra.mxu1 %vm1825_vm8, %v1807_v5 }
 0x241   : > { %v869_v54 = vpop.permute.xlu1 %868  ;;  %v1249_v62 = vpop.permute.xlu0 %1248 }
 0x242   : > { %v1742_v60 = vsel %vm1717_vm5, %v1709_v51, %v1249_v62  ;;  %v1645_v12 = vsel %vm1618_vm2, %v1612_v13, %v869_v54  ;;  %v5046_v54 = vld [vmem:[#allocation50_spill] sm:$0xff] }
 0x244   : > { %v4422_v15 = vpop.f32.mrf.mxu0 }
 0x245   : > { %v2225_v27 = vmul.f32 %v4422_v15, %v4358_v16  ;;  %v1377_v10 = vpop.permute.xlu1 %1376  ;;  %v1251_v63 = vpop.permute.xlu0 %1250 }
 0x246   : > { %v4426_v53 = vpop.f32.mrf.mxu0  ;;  %v1775_v24 = vsel %vm1750_vm6, %v1742_v60, %v1377_v10  ;;  %v1743_v4 = vsel %vm1717_vm5, %v1710_v11, %v1251_v63  ;;  %v5045_v10 = vld [vmem:[#allocation25_spill] sm:$0xff] }
 0x247   : > { %v2224_v18 = vmul.f32 %v4358_v16, %v4426_v53  ;;  %2294 = vrot.lane.b32.xlu1 %v2225_v27, %s3179_s13  ;;  %v1580_v63 = vsel %vm1552_vm0, %v265_v39, %v5045_v10 }
 0x248   : > { %v1613_v38 = vsel %vm1585_vm1, %v1580_v63, %v5046_v54  ;;  %v269_v63 = vld [vmem:[%s3245_s30 + $0x170] sm:$0xff]  ;;  %v268_v54 = vld [vmem:[%s3245_s30 + $0x168] sm:$0xff] }
 0x249   : > { %2292 = vrot.lane.b32.xlu0 %v2224_v18, %s3179_s13  ;;  %v997_v28 = vpop.permute.xlu1 %996  ;;  %v871_v40 = vpop.permute.xlu0 %870 }
 0x24a   : > { %v1678_v34 = vsel %vm1651_vm3, %v1645_v12, %v997_v28  ;;  %v1646_v46 = vsel %vm1618_vm2, %v1613_v38, %v871_v40  ;;  %v2415_v38 = vlaneseq }
 0x24d   : > { %v1505_v7 = vpop.permute.xlu1 %1504  ;;  %v1379_v48 = vpop.permute.xlu0 %1378 }
 0x24e   : > { %v1808_v33 = vsel %vm1783_vm7, %v1775_v24, %v1505_v7  ;;  %v1776_v45 = vsel %vm1750_vm6, %v1743_v4, %v1379_v48 }
 0x24f   : > { %3072 = vmatprep.mubr.msk.f32.mxu1 %vm1825_vm8, %v1808_v33 }
 0x251   : > { %v1125_v61 = vpop.permute.xlu1 %1124  ;;  %v999_v37 = vpop.permute.xlu0 %998 }
 0x252   : > { %v1711_v35 = vsel %vm1684_vm4, %v1678_v34, %v1125_v61  ;;  %v1679_v26 = vsel %vm1651_vm3, %v1646_v46, %v999_v37  ;;  %v1581_v61 = vsel %vm1552_vm0, %v266_v22, %v5047_v9  ;;  %v5048_v37 = vld [vmem:[#allocation53_spill] sm:$0xff] }
 0x253   : > { %v1614_v23 = vsel %vm1585_vm1, %v1581_v61, %v5048_v37 }
 0x255   : > { %v1127_v2 = vpop.permute.xlu1 %1126  ;;  %v1507_v0 = vpop.permute.xlu0 %1506 }
 0x256   : > { %v1809_v42 = vsel %vm1783_vm7, %v1776_v45, %v1507_v0  ;;  %v1712_v25 = vsel %vm1684_vm4, %v1679_v26, %v1127_v2  ;;  %v2412_v26 = vld [vmem:[%s4924_s2 + $0x1] sm:$0x1] }
 0x257   : > { %3073 = vmatmul.mubr.msk.f32.gmra.mxu1 %vm1825_vm8, %v1809_v42  ;;  %v267_v42 = vld [vmem:[%s3245_s30 + $0x158] sm:$0xff] }
 0x258   : > { %v4456_v44 = vpop.f32.mrf.mxu0 }
 0x259   : > { %v2227_v32 = vmul.f32 %v4456_v44, %v4358_v16  ;;  %v873_v47 = vpop.permute.xlu1 %872  ;;  %v1253_v21 = vpop.permute.xlu0 %1252 }
 0x25a   : > { %v4460_v31 = vpop.f32.mrf.mxu0  ;;  %v1744_v43 = vsel %vm1717_vm5, %v1711_v35, %v1253_v21  ;;  %v1647_v11 = vsel %vm1618_vm2, %v1614_v23, %v873_v47  ;;  %v5050_v47 = vld [vmem:[#allocation52_spill] sm:$0xff] }
 0x25b   : > { %v2226_v3 = vmul.f32 %v4358_v16, %v4460_v31  ;;  %2298 = vrot.lane.b32.xlu1 %v2227_v32, %s3179_s13 }
 0x25d   : > { %2296 = vrot.lane.b32.xlu0 %v2226_v3, %s3179_s13  ;;  %v1381_v6 = vpop.permute.xlu1 %1380  ;;  %v1255_v52 = vpop.permute.xlu0 %1254 }
 0x25e   : > { %v1777_v58 = vsel %vm1750_vm6, %v1744_v43, %v1381_v6  ;;  %v1745_v56 = vsel %vm1717_vm5, %v1712_v25, %v1255_v52  ;;  %v5049_v52 = vld [vmem:[#allocation29_spill] sm:$0xff]  ;;  %v5051_v25 = vld [vmem:[#allocation32_spill] sm:$0xff] }
 0x25f   : > { %v1582_v29 = vsel %vm1552_vm0, %v267_v42, %v5049_v52 }
 0x260   : > { %v1615_v8 = vsel %vm1585_vm1, %v1582_v29, %v5050_v47 }
 0x261   : > { %v1001_v55 = vpop.permute.xlu1 %1000  ;;  %v875_v17 = vpop.permute.xlu0 %874 }
 0x262   : > { %v1680_v2 = vsel %vm1651_vm3, %v1647_v11, %v1001_v55  ;;  %v1648_v13 = vsel %vm1618_vm2, %v1615_v8, %v875_v17 }
 0x265   : > { %v1509_v5 = vpop.permute.xlu1 %1508  ;;  %v1383_v62 = vpop.permute.xlu0 %1382 }
 0x266   : > { %v1810_v27 = vsel %vm1783_vm7, %v1777_v58, %v1509_v5  ;;  %v1778_v14 = vsel %vm1750_vm6, %v1745_v56, %v1383_v62  ;;  %v1584_v56 = vsel %vm1552_vm0, %v269_v63, %v5051_v25 }
 0x267   : > { %3075 = vmatprep.mubr.msk.f32.mxu1 %vm1825_vm8, %v1810_v27 }
 0x269   : > { %v1129_v49 = vpop.permute.xlu1 %1128  ;;  %v1003_v18 = vpop.permute.xlu0 %1002 }
 0x26a   : > { %v1713_v0 = vsel %vm1684_vm4, %v1680_v2, %v1129_v49  ;;  %v1681_v35 = vsel %vm1651_vm3, %v1648_v13, %v1003_v18  ;;  %v2214_v18 = vld [vmem:[%s4924_s2] sm:$0x1] }
 0x26c   : > { %v4487_v28 = vpop.f32.mrf.mxu0 }
 0x26d   : > { %v2229_v51 = vmul.f32 %v4487_v28, %v4358_v16  ;;  %v1131_v60 = vpop.permute.xlu1 %1130  ;;  %v1511_v24 = vpop.permute.xlu0 %1510 }
 0x26e   : > { %v1811_v40 = vsel %vm1783_vm7, %v1778_v14, %v1511_v24  ;;  %v4493_v7 = vpop.f32.mrf.mxu0  ;;  %v1714_v43 = vsel %vm1684_vm4, %v1681_v35, %v1131_v60  ;;  %v5052_v14 = vld [vmem:[#allocation33_spill] sm:$0xff]  ;;  %v5053_v60 = vld [vmem:[#allocation54_spill] sm:$0xff] }
 0x26f   : > { %v2228_v48 = vmul.f32 %v4358_v16, %v4493_v7  ;;  %2302 = vrot.lane.b32.xlu1 %v2229_v51, %s3179_s13  ;;  %3076 = vmatmul.mubr.msk.f32.gmra.mxu1 %vm1825_vm8, %v1811_v40  ;;  %v1583_v51 = vsel %vm1552_vm0, %v268_v54, %v5052_v14  ;;  %v1617_v24 = vsel %vm1585_vm1, %v1584_v56, %v5053_v60  ;;  %v4551_v40 = vstv %s2148_s14 }
 0x270   : > { %v2215_v22 = vmul.f32 %v2214_v18, %v4551_v40  ;;  %v2151_v47 = vmul.f32 %v4353_v36, %v4551_v40  ;;  %v2150_v8 = vmul.f32 %v4551_v40, %v4361_v19  ;;  %v2153_v18 = vmul.f32 %v4391_v1, %v4551_v40 }
 0x271   : > { %2300 = vrot.lane.b32.xlu0 %v2228_v48, %s3179_s13  ;;  %v877_v33 = vpop.permute.xlu1 %876  ;;  %v1257_v50 = vpop.permute.xlu0 %1256  ;;  %v5054_v48 = vld [vmem:[#allocation55_spill] sm:$0xff]  ;;  %v2152_v25 = vmul.f32 %v4551_v40, %v4398_v41 }
 0x272   : > { %v1746_v32 = vsel %vm1717_vm5, %v1713_v0, %v1257_v50  ;;  %v1616_v50 = vsel %vm1585_vm1, %v1583_v51, %v5054_v48 }
 0x273   : > { %v1649_v9 = vsel %vm1618_vm2, %v1616_v50, %v877_v33 }
 0x275   : > { %v1385_v57 = vpop.permute.xlu1 %1384  ;;  %v1259_v59 = vpop.permute.xlu0 %1258 }
 0x276   : > { %v1779_v21 = vsel %vm1750_vm6, %v1746_v32, %v1385_v57  ;;  %v1747_v17 = vsel %vm1717_vm5, %v1714_v43, %v1259_v59  ;;  %v2413_v57 = vmul.f32 %v2412_v26, %v4358_v16  ;;  %v2416_v59 = vshrl.u32 %v2415_v38, 7 }
 0x278   : > { %v2417_v33 = vsub.s32 0, %v2416_v59 }
 0x279   : > { %v1005_v4 = vpop.permute.xlu1 %1004  ;;  %v879_v45 = vpop.permute.xlu0 %878 }
 0x27a   : > { %v1650_v61 = vsel %vm1618_vm2, %v1617_v24, %v879_v45  ;;  %v1682_v11 = vsel %vm1651_vm3, %v1649_v9, %v1005_v4 }
 0x27d   : > { %v1513_v3 = vpop.permute.xlu1 %1512  ;;  %v1387_v20 = vpop.permute.xlu0 %1386 }
 0x27e   : > { %v1812_v6 = vsel %vm1783_vm7, %v1779_v21, %v1513_v3  ;;  %v1780_v5 = vsel %vm1750_vm6, %v1747_v17, %v1387_v20  ;;  %v2414_v3 = vadd.f32 %v2413_v57, %v2215_v22 }
 0x27f   : > { %3078 = vmatprep.mubr.msk.f32.mxu1 %vm1825_vm8, %v1812_v6 }
 0x280   : > { %v4517_v30 = vpop.f32.mrf.mxu0 }
 0x281   : > { %v2231_v12 = vmul.f32 %v4517_v30, %v4358_v16  ;;  %v1133_v55 = vpop.permute.xlu1 %1132  ;;  %v1007_v34 = vpop.permute.xlu0 %1006 }
 0x282   : > { %v4523_v39 = vpop.f32.mrf.mxu0  ;;  %v1683_v2 = vsel %vm1651_vm3, %v1650_v61, %v1007_v34  ;;  %v1715_v0 = vsel %vm1684_vm4, %v1682_v11, %v1133_v55 }
 0x283   : > { %v2230_v58 = vmul.f32 %v4358_v16, %v4523_v39  ;;  %2306 = vrot.lane.b32.xlu1 %v2231_v12, %s3179_s13  ;;  %v4583_v12 = vrot.slane %v2414_v3, %v2417_v33 }
 0x285   : > { %2304 = vrot.lane.b32.xlu0 %v2230_v58, %s3179_s13  ;;  %v1135_v62 = vpop.permute.xlu1 %1134  ;;  %v1515_v27 = vpop.permute.xlu0 %1514 }
 0x286   : > { %v1813_v10 = vsel %vm1783_vm7, %v1780_v5, %v1515_v27  ;;  %v1716_v42 = vsel %vm1684_vm4, %v1683_v2, %v1135_v62 }
 0x287   : > { %3079 = vmatmul.mubr.msk.f32.gmra.mxu1 %vm1825_vm8, %v1813_v10 }
 0x289   : > { %v1263_v46 = vpop.permute.xlu1 %1262  ;;  %v1261_v49 = vpop.permute.xlu0 %1260 }
 0x28a   : > { %v1749_v32 = vsel %vm1717_vm5, %v1716_v42, %v1263_v46  ;;  %v1748_v21 = vsel %vm1717_vm5, %v1715_v0, %v1261_v49  ;;  %v2155_v42 = vmul.f32 %v4422_v15, %v4551_v40 }
 0x28d   : > { %v1391_v37 = vpop.permute.xlu1 %1390  ;;  %v1389_v23 = vpop.permute.xlu0 %1388 }
 0x28e   : > { %v1782_v45 = vsel %vm1750_vm6, %v1749_v32, %v1391_v37  ;;  %v1781_v20 = vsel %vm1750_vm6, %v1748_v21, %v1389_v23  ;;  %v2154_v21 = vmul.f32 %v4551_v40, %v4426_v53 }
 0x291   : > { %v1519_v6 = vpop.permute.xlu1 %1518  ;;  %v1517_v4 = vpop.permute.xlu0 %1516 }
 0x292   : > { %v1815_v52 = vsel %vm1783_vm7, %v1782_v45, %v1519_v6  ;;  %v1814_v29 = vsel %vm1783_vm7, %v1781_v20, %v1517_v4 }
 0x293   : > { %3081 = vmatprep.mubr.msk.f32.mxu1 %vm1825_vm8, %v1814_v29 }
 0x294   : > { %v4580_v13 = vpop.f32.mrf.mxu0  ;;  %3082 = vmatmul.mubr.msk.f32.gmra.mxu1 %vm1825_vm8, %v1815_v52 }
 0x295   : > { %v2233_v55 = vmul.f32 %v4580_v13, %v4358_v16  ;;  %v2287_v34 = vpop.permute.xlu1 %2286  ;;  %v2285_v35 = vpop.permute.xlu0 %2284 }
 0x296   : > { %v2381_v43 = vadd.f32 %v2287_v34, %v2151_v47  ;;  %v2380_v58 = vadd.f32 %v2285_v35, %v2150_v8  ;;  %v4587_v17 = vpop.f32.mrf.mxu0 }
 0x297   : > { %v2232_v36 = vmul.f32 %v4358_v16, %v4587_v17  ;;  %2310 = vrot.lane.b32.xlu1 %v2233_v55, %s3179_s13 }
 0x298   : > { %v2420_v19 = vadd.f32 %v4583_v12, %v2381_v43  ;;  %v2419_v5 = vadd.f32 %v4583_v12, %v2380_v58 }
 0x299   : > { %2308 = vrot.lane.b32.xlu0 %v2232_v36, %s3179_s13 }
 0x29a   : > { %2452 = vst.msk [vmem:[%s4592_s25 + $0x8] sm:$0xff] %vm1552_vm0, %v2420_v19  ;;  %v2484_v62 = vsel %vm1552_vm0, %v2420_v19, 0.0  ;;  %v2553_v27 = vmul.f32 %v2420_v19, %v2420_v19  ;;  %2451 = vst.msk [vmem:[%s4592_s25] sm:$0xff] %vm1552_vm0, %v2419_v5  ;;  %v2483_v10 = vsel %vm1552_vm0, %v2419_v5, 0.0  ;;  %v2552_v63 = vmul.f32 %v2419_v5, %v2419_v5 }
 0x29b   : > { %v2485_v54 = vadd.f32 %v2484_v62, %v2483_v10  ;;  %v2157_v5 = vmul.f32 %v4456_v44, %v4551_v40 }
 0x29c   : > { %v2585_v38 = vsel %vm1552_vm0, %v2553_v27, 0.0  ;;  %v2584_v46 = vsel %vm1552_vm0, %v2552_v63, 0.0  ;;  %v2156_v27 = vmul.f32 %v4551_v40, %v4460_v31 }
 0x29d   : > { %v2586_v49 = vadd.f32 %v2585_v38, %v2584_v46 }
 0x2a5   : > { %v2291_v26 = vpop.permute.xlu1 %2290 }
 0x2a6   : > { %v2383_v56 = vadd.f32 %v2291_v26, %v2153_v18 }
 0x2a7   : > { %v2289_v14 = vpop.permute.xlu0 %2288 }
 0x2a8   : > { %v2422_v51 = vadd.f32 %v4583_v12, %v2383_v56  ;;  %v2382_v60 = vadd.f32 %v2289_v14, %v2152_v25  ;;  %v4613_v24 = vpop.f32.mrf.mxu0 }
 0x2a9   : > { %v2235_v48 = vmul.f32 %v4613_v24, %v4358_v16 }
 0x2aa   : > { %2454 = vst.msk [vmem:[%s4592_s25 + $0x18] sm:$0xff] %vm1552_vm0, %v2422_v51  ;;  %v2421_v50 = vadd.f32 %v4583_v12, %v2382_v60  ;;  %v4620_v22 = vpop.f32.mrf.mxu0  ;;  %v2555_v41 = vmul.f32 %v2422_v51, %v2422_v51  ;;  %v2488_v61 = vsel %vm1552_vm0, %v2422_v51, 0.0 }
 0x2ab   : > { %v2234_v1 = vmul.f32 %v4358_v16, %v4620_v22  ;;  %2314 = vrot.lane.b32.xlu1 %v2235_v48, %s3179_s13 }
 0x2ac   : > { %2453 = vst.msk [vmem:[%s4592_s25 + $0x10] sm:$0xff] %vm1552_vm0, %v2421_v50  ;;  %v2486_v57 = vsel %vm1552_vm0, %v2421_v50, 0.0  ;;  %v2554_v59 = vmul.f32 %v2421_v50, %v2421_v50  ;;  %v2589_v2 = vsel %vm1552_vm0, %v2555_v41, 0.0 }
 0x2ad   : > { %v2487_v9 = vadd.f32 %v2486_v57, %v2485_v54  ;;  %2312 = vrot.lane.b32.xlu0 %v2234_v1, %s3179_s13  ;;  %v2159_v57 = vmul.f32 %v4487_v28, %v4551_v40 }
 0x2ae   : > { %v2587_v37 = vsel %vm1552_vm0, %v2554_v59, 0.0 }
 0x2af   : > { %v2588_v23 = vadd.f32 %v2587_v37, %v2586_v49  ;;  %v2489_v11 = vadd.f32 %v2488_v61, %v2487_v9  ;;  %v2158_v9 = vmul.f32 %v4551_v40, %v4493_v7 }
 0x2b1   : > { %v2590_v0 = vadd.f32 %v2589_v2, %v2588_v23 }
 0x2b9   : > { %v2295_v32 = vpop.permute.xlu1 %2294 }
 0x2ba   : > { %v2385_v3 = vadd.f32 %v2295_v32, %v2155_v42 }
 0x2bb   : > { %v2293_v33 = vpop.permute.xlu0 %2292 }
 0x2bc   : > { %v2424_v45 = vadd.f32 %v4583_v12, %v2385_v3  ;;  %v2384_v20 = vadd.f32 %v2293_v33, %v2154_v21  ;;  %v4637_v6 = vpop.f32.mrf.mxu1 }
 0x2bd   : > { %v2237_v4 = vmul.f32 %v4637_v6, %v4358_v16 }
 0x2be   : > { %2456 = vst.msk [vmem:[%s4592_s25 + $0x28] sm:$0xff] %vm1552_vm0, %v2424_v45  ;;  %v2423_v52 = vadd.f32 %v4583_v12, %v2384_v20  ;;  %v4644_v29 = vpop.f32.mrf.mxu1  ;;  %v2557_v53 = vmul.f32 %v2424_v45, %v2424_v45  ;;  %v2492_v34 = vsel %vm1552_vm0, %v2424_v45, 0.0 }
 0x2bf   : > { %v2236_v15 = vmul.f32 %v4358_v16, %v4644_v29  ;;  %2318 = vrot.lane.b32.xlu1 %v2237_v4, %s3179_s13 }
 0x2c0   : > { %2455 = vst.msk [vmem:[%s4592_s25 + $0x20] sm:$0xff] %vm1552_vm0, %v2423_v52  ;;  %v2490_v47 = vsel %vm1552_vm0, %v2423_v52, 0.0  ;;  %v2556_v8 = vmul.f32 %v2423_v52, %v2423_v52  ;;  %v2593_v36 = vsel %vm1552_vm0, %v2557_v53, 0.0 }
 0x2c1   : > { %v2491_v55 = vadd.f32 %v2490_v47, %v2489_v11  ;;  %2316 = vrot.lane.b32.xlu0 %v2236_v15, %s3179_s13  ;;  %v2161_v47 = vmul.f32 %v4517_v30, %v4551_v40 }
 0x2c2   : > { %v2591_v35 = vsel %vm1552_vm0, %v2556_v8, 0.0 }
 0x2c3   : > { %v2592_v43 = vadd.f32 %v2591_v35, %v2590_v0  ;;  %v2493_v58 = vadd.f32 %v2492_v34, %v2491_v55  ;;  %v2160_v55 = vmul.f32 %v4551_v40, %v4523_v39 }
 0x2c5   : > { %v2594_v19 = vadd.f32 %v2593_v36, %v2592_v43 }
 0x2cd   : > { %v2299_v62 = vpop.permute.xlu1 %2298 }
 0x2ce   : > { %v2387_v10 = vadd.f32 %v2299_v62, %v2157_v5 }
 0x2cf   : > { %v2297_v63 = vpop.permute.xlu0 %2296 }
 0x2d0   : > { %v2426_v54 = vadd.f32 %v4583_v12, %v2387_v10  ;;  %v2386_v38 = vadd.f32 %v2297_v63, %v2156_v27  ;;  %v4661_v46 = vpop.f32.mrf.mxu1 }
 0x2d1   : > { %v2239_v49 = vmul.f32 %v4661_v46, %v4358_v16 }
 0x2d2   : > { %2458 = vst.msk [vmem:[%s4592_s25 + $0x38] sm:$0xff] %vm1552_vm0, %v2426_v54  ;;  %v2425_v18 = vadd.f32 %v4583_v12, %v2386_v38  ;;  %v4668_v26 = vpop.f32.mrf.mxu1  ;;  %v2559_v31 = vmul.f32 %v2426_v54, %v2426_v54  ;;  %v2496_v51 = vsel %vm1552_vm0, %v2426_v54, 0.0 }
 0x2d3   : > { %v2238_v44 = vmul.f32 %v4358_v16, %v4668_v26  ;;  %2322 = vrot.lane.b32.xlu1 %v2239_v49, %s3179_s13 }
 0x2d4   : > { %2457 = vst.msk [vmem:[%s4592_s25 + $0x30] sm:$0xff] %vm1552_vm0, %v2425_v18  ;;  %v2494_v25 = vsel %vm1552_vm0, %v2425_v18, 0.0  ;;  %v2558_v56 = vmul.f32 %v2425_v18, %v2425_v18  ;;  %v2597_v1 = vsel %vm1552_vm0, %v2559_v31, 0.0 }
 0x2d5   : > { %v2495_v14 = vadd.f32 %v2494_v25, %v2493_v58  ;;  %2320 = vrot.lane.b32.xlu0 %v2238_v44, %s3179_s13  ;;  %v2163_v25 = vmul.f32 %v4580_v13, %v4551_v40 }
 0x2d6   : > { %v2595_v60 = vsel %vm1552_vm0, %v2558_v56, 0.0 }
 0x2d7   : > { %v2596_v48 = vadd.f32 %v2595_v60, %v2594_v19  ;;  %v2497_v50 = vadd.f32 %v2496_v51, %v2495_v14  ;;  %v2162_v14 = vmul.f32 %v4551_v40, %v4587_v17 }
 0x2d9   : > { %v2598_v41 = vadd.f32 %v2597_v1, %v2596_v48 }
 0x2e1   : > { %v2303_v59 = vpop.permute.xlu1 %2302 }
 0x2e2   : > { %v2389_v61 = vadd.f32 %v2303_v59, %v2159_v57 }
 0x2e3   : > { %v2301_v37 = vpop.permute.xlu0 %2300 }
 0x2e4   : > { %v2428_v23 = vadd.f32 %v4583_v12, %v2389_v61  ;;  %v2388_v11 = vadd.f32 %v2301_v37, %v2158_v9 }
 0x2e6   : > { %2460 = vst.msk [vmem:[%s4592_s25 + $0x48] sm:$0xff] %vm1552_vm0, %v2428_v23  ;;  %v2427_v2 = vadd.f32 %v4583_v12, %v2388_v11  ;;  %v2561_v42 = vmul.f32 %v2428_v23, %v2428_v23  ;;  %v2500_v33 = vsel %vm1552_vm0, %v2428_v23, 0.0 }
 0x2e7   : > { %v4688_v0 = vpop.f32.mrf.mxu1 }
 0x2e8   : > { %2459 = vst.msk [vmem:[%s4592_s25 + $0x40] sm:$0xff] %vm1552_vm0, %v2427_v2  ;;  %v2498_v28 = vsel %vm1552_vm0, %v2427_v2, 0.0  ;;  %v2560_v32 = vmul.f32 %v2427_v2, %v2427_v2  ;;  %v2241_v7 = vmul.f32 %v4688_v0, %v4358_v16  ;;  %v2601_v15 = vsel %vm1552_vm0, %v2561_v42, 0.0 }
 0x2e9   : > { %v2499_v21 = vadd.f32 %v2498_v28, %v2497_v50  ;;  %v4695_v3 = vpop.f32.mrf.mxu1 }
 0x2ea   : > { %v2599_v45 = vsel %vm1552_vm0, %v2560_v32, 0.0  ;;  %v2240_v20 = vmul.f32 %v4358_v16, %v4695_v3  ;;  %2326 = vrot.lane.b32.xlu1 %v2241_v7, %s3179_s13 }
 0x2eb   : > { %v2600_v4 = vadd.f32 %v2599_v45, %v2598_v41  ;;  %v2501_v52 = vadd.f32 %v2500_v33, %v2499_v21  ;;  %v2165_v21 = vmul.f32 %v4613_v24, %v4551_v40  ;;  %v2164_v33 = vmul.f32 %v4551_v40, %v4620_v22 }
 0x2ec   : > { %2324 = vrot.lane.b32.xlu0 %v2240_v20, %s3179_s13 }
 0x2ed   : > { %v2602_v53 = vadd.f32 %v2601_v15, %v2600_v4 }
 0x2f5   : > { %v2307_v8 = vpop.permute.xlu1 %2306 }
 0x2f6   : > { %v2391_v34 = vadd.f32 %v2307_v8, %v2161_v47 }
 0x2f7   : > { %v2305_v35 = vpop.permute.xlu0 %2304 }
 0x2f8   : > { %v2430_v43 = vadd.f32 %v4583_v12, %v2391_v34  ;;  %v2390_v58 = vadd.f32 %v2305_v35, %v2160_v55 }
 0x2fa   : > { %2462 = vst.msk [vmem:[%s4592_s25 + $0x58] sm:$0xff] %vm1552_vm0, %v2430_v43  ;;  %v2429_v36 = vadd.f32 %v4583_v12, %v2390_v58  ;;  %v2563_v19 = vmul.f32 %v2430_v43, %v2430_v43  ;;  %v2504_v27 = vsel %vm1552_vm0, %v2430_v43, 0.0 }
 0x2fc   : > { %2461 = vst.msk [vmem:[%s4592_s25 + $0x50] sm:$0xff] %vm1552_vm0, %v2429_v36  ;;  %v2502_v5 = vsel %vm1552_vm0, %v2429_v36, 0.0  ;;  %v2562_v62 = vmul.f32 %v2429_v36, %v2429_v36  ;;  %v2605_v38 = vsel %vm1552_vm0, %v2563_v19, 0.0  ;;  %v2167_v19 = vmul.f32 %v4637_v6, %v4551_v40 }
 0x2fd   : > { %v2503_v30 = vadd.f32 %v2502_v5, %v2501_v52 }
 0x2fe   : > { %v2603_v39 = vsel %vm1552_vm0, %v2562_v62, 0.0 }
 0x2ff   : > { %v2604_v10 = vadd.f32 %v2603_v39, %v2602_v53  ;;  %v4717_v63 = vpop.f32.mrf.mxu1  ;;  %v2505_v54 = vadd.f32 %v2504_v27, %v2503_v30  ;;  %v2166_v27 = vmul.f32 %v4551_v40, %v4644_v29 }
 0x300   : > { %v2243_v49 = vmul.f32 %v4717_v63, %v4358_v16 }
 0x301   : > { %v4722_v18 = vpop.f32.mrf.mxu1  ;;  %v2606_v44 = vadd.f32 %v2605_v38, %v2604_v10 }
 0x302   : > { %v2242_v31 = vmul.f32 %v4358_v16, %v4722_v18  ;;  %2330 = vrot.lane.b32.xlu1 %v2243_v49, %s3179_s13 }
 0x304   : > { %2328 = vrot.lane.b32.xlu0 %v2242_v31, %s3179_s13 }
 0x309   : > { %v2311_v56 = vpop.permute.xlu1 %2310 }
 0x30a   : > { %v2393_v51 = vadd.f32 %v2311_v56, %v2163_v25 }
 0x30b   : > { %v2309_v60 = vpop.permute.xlu0 %2308 }
 0x30c   : > { %v2432_v48 = vadd.f32 %v4583_v12, %v2393_v51  ;;  %v2392_v50 = vadd.f32 %v2309_v60, %v2162_v14 }
 0x30e   : > { %2464 = vst.msk [vmem:[%s4592_s25 + $0x68] sm:$0xff] %vm1552_vm0, %v2432_v48  ;;  %v2431_v1 = vadd.f32 %v4583_v12, %v2392_v50  ;;  %v2565_v41 = vmul.f32 %v2432_v48, %v2432_v48  ;;  %v2508_v9 = vsel %vm1552_vm0, %v2432_v48, 0.0 }
 0x310   : > { %2463 = vst.msk [vmem:[%s4592_s25 + $0x60] sm:$0xff] %vm1552_vm0, %v2431_v1  ;;  %v2506_v57 = vsel %vm1552_vm0, %v2431_v1, 0.0  ;;  %v2564_v59 = vmul.f32 %v2431_v1, %v2431_v1  ;;  %v2609_v23 = vsel %vm1552_vm0, %v2565_v41, 0.0  ;;  %v2169_v1 = vmul.f32 %v4661_v46, %v4551_v40 }
 0x311   : > { %v2507_v13 = vadd.f32 %v2506_v57, %v2505_v54  ;;  %v2168_v57 = vmul.f32 %v4551_v40, %v4668_v26 }
 0x312   : > { %v2607_v17 = vsel %vm1552_vm0, %v2564_v59, 0.0 }
 0x313   : > { %v2608_v61 = vadd.f32 %v2607_v17, %v2606_v44  ;;  %v2509_v37 = vadd.f32 %v2508_v9, %v2507_v13 }
 0x315   : > { %v2610_v11 = vadd.f32 %v2609_v23, %v2608_v61 }
 0x317   : > { %v4742_v2 = vpop.f32.mrf.mxu1 }
 0x318   : > { %v2245_v42 = vmul.f32 %v4742_v2, %v4358_v16 }
 0x319   : > { %v4746_v28 = vpop.f32.mrf.mxu1 }
 0x31a   : > { %v2244_v32 = vmul.f32 %v4358_v16, %v4746_v28  ;;  %2334 = vrot.lane.b32.xlu1 %v2245_v42, %s3179_s13 }
 0x31c   : > { %2332 = vrot.lane.b32.xlu0 %v2244_v32, %s3179_s13 }
 0x31d   : > { %v2315_v7 = vpop.permute.xlu1 %2314 }
 0x31e   : > { %v2395_v45 = vadd.f32 %v2315_v7, %v2165_v21 }
 0x31f   : > { %v2313_v20 = vpop.permute.xlu0 %2312 }
 0x320   : > { %v2434_v4 = vadd.f32 %v4583_v12, %v2395_v45  ;;  %v2394_v52 = vadd.f32 %v2313_v20, %v2164_v33 }
 0x322   : > { %2466 = vst.msk [vmem:[%s4592_s25 + $0x78] sm:$0xff] %vm1552_vm0, %v2434_v4  ;;  %v2433_v15 = vadd.f32 %v4583_v12, %v2394_v52  ;;  %v2567_v53 = vmul.f32 %v2434_v4, %v2434_v4  ;;  %v2512_v55 = vsel %vm1552_vm0, %v2434_v4, 0.0 }
 0x324   : > { %2465 = vst.msk [vmem:[%s4592_s25 + $0x70] sm:$0xff] %vm1552_vm0, %v2433_v15  ;;  %v2510_v24 = vsel %vm1552_vm0, %v2433_v15, 0.0  ;;  %v2566_v47 = vmul.f32 %v2433_v15, %v2433_v15  ;;  %v2613_v43 = vsel %vm1552_vm0, %v2567_v53, 0.0 }
 0x325   : > { %v2511_v8 = vadd.f32 %v2510_v24, %v2509_v37 }
 0x326   : > { %v2611_v22 = vsel %vm1552_vm0, %v2566_v47, 0.0 }
 0x327   : > { %v2612_v34 = vadd.f32 %v2611_v22, %v2610_v11  ;;  %v2513_v35 = vadd.f32 %v2512_v55, %v2511_v8  ;;  %v2171_v8 = vmul.f32 %v4688_v0, %v4551_v40  ;;  %v2170_v55 = vmul.f32 %v4551_v40, %v4695_v3 }
 0x329   : > { %v2614_v58 = vadd.f32 %v2613_v43, %v2612_v34 }
 0x32f   : > { %v4766_v36 = vpop.f32.mrf.mxu1 }
 0x330   : > { %v2247_v5 = vmul.f32 %v4766_v36, %v4358_v16 }
 0x331   : > { %v2319_v62 = vpop.permute.xlu1 %2318  ;;  %v4772_v30 = vpop.f32.mrf.mxu1 }
 0x332   : > { %v2397_v39 = vadd.f32 %v2319_v62, %v2167_v19  ;;  %v2246_v10 = vmul.f32 %v4358_v16, %v4772_v30  ;;  %2338 = vrot.lane.b32.xlu1 %v2247_v5, %s3179_s13 }
 0x333   : > { %v2317_v54 = vpop.permute.xlu0 %2316 }
 0x334   : > { %v2436_v38 = vadd.f32 %v4583_v12, %v2397_v39  ;;  %v2396_v49 = vadd.f32 %v2317_v54, %v2166_v27  ;;  %2336 = vrot.lane.b32.xlu0 %v2246_v10, %s3179_s13 }
 0x336   : > { %2468 = vst.msk [vmem:[%s4592_s25 + $0x88] sm:$0xff] %vm1552_vm0, %v2436_v38  ;;  %v2435_v6 = vadd.f32 %v4583_v12, %v2396_v49  ;;  %v2569_v44 = vmul.f32 %v2436_v38, %v2436_v38  ;;  %v2516_v56 = vsel %vm1552_vm0, %v2436_v38, 0.0  ;;  %v2173_v49 = vmul.f32 %v4717_v63, %v4551_v40 }
 0x338   : > { %2467 = vst.msk [vmem:[%s4592_s25 + $0x80] sm:$0xff] %vm1552_vm0, %v2435_v6  ;;  %v2514_v29 = vsel %vm1552_vm0, %v2435_v6, 0.0  ;;  %v2568_v31 = vmul.f32 %v2435_v6, %v2435_v6  ;;  %v2617_v48 = vsel %vm1552_vm0, %v2569_v44, 0.0  ;;  %v2172_v44 = vmul.f32 %v4551_v40, %v4722_v18 }
 0x339   : > { %v2515_v25 = vadd.f32 %v2514_v29, %v2513_v35 }
 0x33a   : > { %v2615_v14 = vsel %vm1552_vm0, %v2568_v31, 0.0 }
 0x33b   : > { %v2616_v51 = vadd.f32 %v2615_v14, %v2614_v58  ;;  %v2517_v60 = vadd.f32 %v2516_v56, %v2515_v25 }
 0x33d   : > { %v2618_v50 = vadd.f32 %v2617_v48, %v2616_v51 }
 0x345   : > { %v2323_v41 = vpop.permute.xlu1 %2322 }
 0x346   : > { %v2399_v59 = vadd.f32 %v2323_v41, %v2169_v1 }
 0x347   : > { %v2321_v13 = vpop.permute.xlu0 %2320  ;;  %v4794_v9 = vpop.f32.mrf.mxu1 }
 0x348   : > { %v2438_v17 = vadd.f32 %v4583_v12, %v2399_v59  ;;  %v2398_v61 = vadd.f32 %v2321_v13, %v2168_v57  ;;  %v2249_v37 = vmul.f32 %v4794_v9, %v4358_v16  ;;  %v2175_v13 = vmul.f32 %v4742_v2, %v4551_v40 }
 0x349   : > { %v4799_v23 = vpop.f32.mrf.mxu1 }
 0x34a   : > { %2470 = vst.msk [vmem:[%s4592_s25 + $0x98] sm:$0xff] %vm1552_vm0, %v2438_v17  ;;  %v2437_v46 = vadd.f32 %v4583_v12, %v2398_v61  ;;  %2342 = vrot.lane.b32.xlu1 %v2249_v37, %s3179_s13  ;;  %v2248_v26 = vmul.f32 %v4358_v16, %v4799_v23  ;;  %v2571_v11 = vmul.f32 %v2438_v17, %v2438_v17  ;;  %v2520_v7 = vsel %vm1552_vm0, %v2438_v17, 0.0 }
 0x34b   : > { %v2174_v61 = vmul.f32 %v4551_v40, %v4746_v28 }
 0x34c   : > { %2469 = vst.msk [vmem:[%s4592_s25 + $0x90] sm:$0xff] %vm1552_vm0, %v2437_v46  ;;  %v2518_v42 = vsel %vm1552_vm0, %v2437_v46, 0.0  ;;  %v2570_v32 = vmul.f32 %v2437_v46, %v2437_v46  ;;  %2340 = vrot.lane.b32.xlu0 %v2248_v26, %s3179_s13  ;;  %v2621_v4 = vsel %vm1552_vm0, %v2571_v11, 0.0 }
 0x34d   : > { %v2519_v21 = vadd.f32 %v2518_v42, %v2517_v60 }
 0x34e   : > { %v2619_v33 = vsel %vm1552_vm0, %v2570_v32, 0.0 }
 0x34f   : > { %v2620_v45 = vadd.f32 %v2619_v33, %v2618_v50  ;;  %v2521_v20 = vadd.f32 %v2520_v7, %v2519_v21 }
 0x351   : > { %v2622_v52 = vadd.f32 %v2621_v4, %v2620_v45 }
 0x354   : > { %v4814_v15 = vpop.f32.mrf.mxu1 }
 0x355   : > { %v2251_v53 = vmul.f32 %v4814_v15, %v4358_v16 }
 0x356   : > { %v4818_v24 = vpop.f32.mrf.mxu1 }
 0x357   : > { %v2250_v47 = vmul.f32 %v4358_v16, %v4818_v24  ;;  %2346 = vrot.lane.b32.xlu1 %v2251_v53, %s3179_s13  ;;  %v2177_v53 = vmul.f32 %v4766_v36, %v4551_v40 }
 0x359   : > { %2344 = vrot.lane.b32.xlu0 %v2250_v47, %s3179_s13 }
 0x35c   : > { %v2327_v22 = vpop.permute.xlu1 %2326 }
 0x35d   : > { %v2401_v34 = vadd.f32 %v2327_v22, %v2171_v8  ;;  %v2176_v8 = vmul.f32 %v4551_v40, %v4772_v30 }
 0x35e   : > { %v2325_v35 = vpop.permute.xlu0 %2324 }
 0x35f   : > { %v2400_v43 = vadd.f32 %v2325_v35, %v2170_v55  ;;  %v2440_v58 = vadd.f32 %v4583_v12, %v2401_v34 }
 0x361   : > { %v2439_v19 = vadd.f32 %v4583_v12, %v2400_v43  ;;  %2472 = vst.msk [vmem:[%s4592_s25 + $0xa8] sm:$0xff] %vm1552_vm0, %v2440_v58  ;;  %v2573_v16 = vmul.f32 %v2440_v58, %v2440_v58  ;;  %v2524_v3 = vsel %vm1552_vm0, %v2440_v58, 0.0 }
 0x363   : > { %2471 = vst.msk [vmem:[%s4592_s25 + $0xa0] sm:$0xff] %vm1552_vm0, %v2439_v19  ;;  %v2522_v5 = vsel %vm1552_vm0, %v2439_v19, 0.0  ;;  %v2572_v0 = vmul.f32 %v2439_v19, %v2439_v19  ;;  %v2625_v54 = vsel %vm1552_vm0, %v2573_v16, 0.0 }
 0x364   : > { %v2523_v62 = vadd.f32 %v2522_v5, %v2521_v20 }
 0x365   : > { %v2623_v27 = vsel %vm1552_vm0, %v2572_v0, 0.0 }
 0x366   : > { %v2624_v39 = vadd.f32 %v2623_v27, %v2622_v52  ;;  %v2525_v10 = vadd.f32 %v2524_v3, %v2523_v62 }
 0x368   : > { %v2626_v38 = vadd.f32 %v2625_v54, %v2624_v39  ;;  %v2179_v39 = vmul.f32 %v4794_v9, %v4551_v40 }
 0x374   : > { %v2331_v6 = vpop.permute.xlu1 %2330 }
 0x375   : > { %v2403_v29 = vadd.f32 %v2331_v6, %v2173_v49 }
 0x376   : > { %v2329_v31 = vpop.permute.xlu0 %2328 }
 0x377   : > { %v2442_v25 = vadd.f32 %v4583_v12, %v2403_v29  ;;  %v2402_v56 = vadd.f32 %v2329_v31, %v2172_v44 }
 0x379   : > { %2474 = vst.msk [vmem:[%s4592_s25 + $0xb8] sm:$0xff] %vm1552_vm0, %v2442_v25  ;;  %v2441_v14 = vadd.f32 %v4583_v12, %v2402_v56  ;;  %v2575_v51 = vmul.f32 %v2442_v25, %v2442_v25  ;;  %v2528_v50 = vsel %vm1552_vm0, %v2442_v25, 0.0 }
 0x37b   : > { %2473 = vst.msk [vmem:[%s4592_s25 + $0xb0] sm:$0xff] %vm1552_vm0, %v2441_v14  ;;  %v2526_v60 = vsel %vm1552_vm0, %v2441_v14, 0.0  ;;  %v2574_v63 = vmul.f32 %v2441_v14, %v2441_v14  ;;  %v2629_v57 = vsel %vm1552_vm0, %v2575_v51, 0.0 }
 0x37c   : > { %v2527_v48 = vadd.f32 %v2526_v60, %v2525_v10 }
 0x37d   : > { %v2627_v18 = vsel %vm1552_vm0, %v2574_v63, 0.0  ;;  %v2181_v63 = vmul.f32 %v4814_v15, %v4551_v40 }
 0x37e   : > { %v2628_v1 = vadd.f32 %v2627_v18, %v2626_v38  ;;  %v2529_v41 = vadd.f32 %v2528_v50, %v2527_v48  ;;  %v2178_v38 = vmul.f32 %v4551_v40, %v4799_v23 }
 0x380   : > { %v2630_v59 = vadd.f32 %v2629_v57, %v2628_v1  ;;  %v2180_v1 = vmul.f32 %v4551_v40, %v4818_v24 }
 0x38c   : > { %v2335_v17 = vpop.permute.xlu1 %2334 }
 0x38d   : > { %v2405_v37 = vadd.f32 %v2335_v17, %v2175_v13 }
 0x38e   : > { %v2333_v46 = vpop.permute.xlu0 %2332 }
 0x38f   : > { %v2444_v26 = vadd.f32 %v4583_v12, %v2405_v37  ;;  %v2404_v11 = vadd.f32 %v2333_v46, %v2174_v61 }
 0x391   : > { %2476 = vst.msk [vmem:[%s4592_s25 + $0xc8] sm:$0xff] %vm1552_vm0, %v2444_v26  ;;  %v2443_v42 = vadd.f32 %v4583_v12, %v2404_v11  ;;  %v2577_v32 = vmul.f32 %v2444_v26, %v2444_v26  ;;  %v2532_v33 = vsel %vm1552_vm0, %v2444_v26, 0.0 }
 0x393   : > { %2475 = vst.msk [vmem:[%s4592_s25 + $0xc0] sm:$0xff] %vm1552_vm0, %v2443_v42  ;;  %v2530_v21 = vsel %vm1552_vm0, %v2443_v42, 0.0  ;;  %v2576_v2 = vmul.f32 %v2443_v42, %v2443_v42  ;;  %v2633_v4 = vsel %vm1552_vm0, %v2577_v32, 0.0 }
 0x394   : > { %v2531_v7 = vadd.f32 %v2530_v21, %v2529_v41 }
 0x395   : > { %v2631_v28 = vsel %vm1552_vm0, %v2576_v2, 0.0 }
 0x396   : > { %v2632_v45 = vadd.f32 %v2631_v28, %v2630_v59  ;;  %v2533_v20 = vadd.f32 %v2532_v33, %v2531_v7 }
 0x398   : > { %v2634_v52 = vadd.f32 %v2633_v4, %v2632_v45 }
 0x3a4   : > { %v2339_v47 = vpop.permute.xlu1 %2338 }
 0x3a5   : > { %v2407_v55 = vadd.f32 %v2339_v47, %v2177_v53 }
 0x3a6   : > { %v2337_v22 = vpop.permute.xlu0 %2336 }
 0x3a7   : > { %v2446_v34 = vadd.f32 %v4583_v12, %v2407_v55  ;;  %v2406_v35 = vadd.f32 %v2337_v22, %v2176_v8 }
 0x3a9   : > { %2478 = vst.msk [vmem:[%s4592_s25 + $0xd8] sm:$0xff] %vm1552_vm0, %v2446_v34  ;;  %v2445_v43 = vadd.f32 %v4583_v12, %v2406_v35  ;;  %v2579_v58 = vmul.f32 %v2446_v34, %v2446_v34  ;;  %v2536_v5 = vsel %vm1552_vm0, %v2446_v34, 0.0 }
 0x3ab   : > { %2477 = vst.msk [vmem:[%s4592_s25 + $0xd0] sm:$0xff] %vm1552_vm0, %v2445_v43  ;;  %v2534_v19 = vsel %vm1552_vm0, %v2445_v43, 0.0  ;;  %v2578_v36 = vmul.f32 %v2445_v43, %v2445_v43  ;;  %v2637_v3 = vsel %vm1552_vm0, %v2579_v58, 0.0 }
 0x3ac   : > { %v2535_v16 = vadd.f32 %v2534_v19, %v2533_v20 }
 0x3ad   : > { %v2635_v30 = vsel %vm1552_vm0, %v2578_v36, 0.0 }
 0x3ae   : > { %v2636_v0 = vadd.f32 %v2635_v30, %v2634_v52  ;;  %v2537_v62 = vadd.f32 %v2536_v5, %v2535_v16 }
 0x3b0   : > { %v2638_v27 = vadd.f32 %v2637_v3, %v2636_v0 }
 0x3bc   : > { %v2343_v10 = vpop.permute.xlu1 %2342 }
 0x3bd   : > { %v2409_v54 = vadd.f32 %v2343_v10, %v2179_v39 }
 0x3be   : > { %v2341_v6 = vpop.permute.xlu0 %2340 }
 0x3bf   : > { %v2448_v49 = vadd.f32 %v4583_v12, %v2409_v54  ;;  %v2408_v44 = vadd.f32 %v2341_v6, %v2178_v38 }
 0x3c1   : > { %2480 = vst.msk [vmem:[%s4592_s25 + $0xe8] sm:$0xff] %vm1552_vm0, %v2448_v49  ;;  %v2447_v29 = vadd.f32 %v4583_v12, %v2408_v44  ;;  %v2581_v31 = vmul.f32 %v2448_v49, %v2448_v49  ;;  %v2540_v14 = vsel %vm1552_vm0, %v2448_v49, 0.0 }
 0x3c3   : > { %2479 = vst.msk [vmem:[%s4592_s25 + $0xe0] sm:$0xff] %vm1552_vm0, %v2447_v29  ;;  %v2538_v25 = vsel %vm1552_vm0, %v2447_v29, 0.0  ;;  %v2580_v9 = vmul.f32 %v2447_v29, %v2447_v29  ;;  %v2641_v48 = vsel %vm1552_vm0, %v2581_v31, 0.0 }
 0x3c4   : > { %v2539_v56 = vadd.f32 %v2538_v25, %v2537_v62 }
 0x3c5   : > { %v2639_v23 = vsel %vm1552_vm0, %v2580_v9, 0.0 }
 0x3c6   : > { %v2640_v51 = vadd.f32 %v2639_v23, %v2638_v27  ;;  %v2541_v60 = vadd.f32 %v2540_v14, %v2539_v56 }
 0x3c8   : > { %v2642_v18 = vadd.f32 %v2641_v48, %v2640_v51 }
 0x3c9   : > { %v2347_v50 = vpop.permute.xlu1 %2346 }
 0x3ca   : > { %v2411_v41 = vadd.f32 %v2347_v50, %v2181_v63 }
 0x3cb   : > { %v2345_v57 = vpop.permute.xlu0 %2344 }
 0x3cc   : > { %v2450_v59 = vadd.f32 %v4583_v12, %v2411_v41  ;;  %v2410_v13 = vadd.f32 %v2345_v57, %v2180_v1 }
 0x3ce   : > { %2482 = vst.msk [vmem:[%s4592_s25 + $0xf8] sm:$0xff] %vm1552_vm0, %v2450_v59  ;;  %v2449_v17 = vadd.f32 %v4583_v12, %v2410_v13  ;;  %v2583_v61 = vmul.f32 %v2450_v59, %v2450_v59  ;;  %v2544_v26 = vsel %vm1552_vm0, %v2450_v59, 0.0 }
 0x3d0   : > { %2481 = vst.msk [vmem:[%s4592_s25 + $0xf0] sm:$0xff] %vm1552_vm0, %v2449_v17  ;;  %v2542_v15 = vsel %vm1552_vm0, %v2449_v17, 0.0  ;;  %v2582_v37 = vmul.f32 %v2449_v17, %v2449_v17  ;;  %v2645_v42 = vsel %vm1552_vm0, %v2583_v61, 0.0 }
 0x3d1   : > { %v2543_v46 = vadd.f32 %v2542_v15, %v2541_v60 }
 0x3d2   : > { %v2643_v40 = vsel %vm1552_vm0, %v2582_v37, 0.0 }
 0x3d3   : > { %v2545_v24 = vadd.f32 %v2544_v26, %v2543_v46  ;;  %v2644_v11 = vadd.f32 %v2643_v40, %v2642_v18 }
 0x3d5   : > { %v2546_v32 = vrot.slane %v2545_v24, 4  ;;  %v2646_v21 = vadd.f32 %v2645_v42, %v2644_v11 }
 0x3d7   : > { %v2547_v2 = vadd.f32 %v2546_v32, %v2545_v24  ;;  %v2647_v7 = vrot.slane %v2646_v21, 4 }
 0x3d9   : > { %v2548_v12 = vrot.slane %v2547_v2, 2  ;;  %v2648_v33 = vadd.f32 %v2647_v7, %v2646_v21 }
 0x3db   : > { %v2549_v28 = vadd.f32 %v2548_v12, %v2547_v2  ;;  %v2649_v45 = vrot.slane %v2648_v33, 2 }
 0x3dd   : > { %v2550_v20 = vrot.slane %v2549_v28, 1  ;;  %v2650_v4 = vadd.f32 %v2649_v45, %v2648_v33 }
 0x3df   : > { %v2651_v52 = vrot.slane %v2650_v4, 1  ;;  %v2551_v53 = vadd.f32 %v2550_v20, %v2549_v28  ;;  %2658 = sbr.rel (%p5056_p2) target bundleno = 998 (0x3e6), region = 44 }
 0x3e1   : > { %v2652_v47 = vadd.f32 %v2651_v52, %v2650_v4 }
 0x3e3   : > { %v2654_v8 = vsel %vm2653_vm9, %v2551_v53, %v2652_v47 }
 0x3e4   : > { %vm2659_vm10 = vcmask 58368   ;;  %v3180_v55 = vmov 0.0  }
 0x3e5   : > { %2660 = vst.msk [vmem:[%s4927_s5] sm:$0x3] %vm2659_vm10, %v3180_v55 }
 0x3e6 PF: > { %vm2663_vm11 = vcmask 58368  }
 0x3ec   : > { %v2661_v22 = vld [vmem:[%s4927_s5] sm:$0x3] }
 0x3ed   : > { %v2662_v34 = vadd.f32 %v2661_v22, %v2654_v8 }
 0x3ef   : > { %2664 = vst.msk [vmem:[%s4927_s5] sm:$0x3] %vm2663_vm11, %v2662_v34 }
 0x3f0 PF: > { %s17_s18 = sadd.s32 1, %s3168_s18  }
 0x3f1   : > { %p14_p3 = scmp.ge.s32.totalorder %s17_s18, 4  }
 0x3f3   :  { %16 = sbr.rel (!%p14_p3) target bundleno = 1 (0x1), region = 85 }
 0x3f8   :  { %2693 = vsyncpa [#allocation3], 1 }
 0x3f9   :  { %2695 = vsyncpa [#allocation3 + $0x1], 1 }

</bundles_post_ra>
